<compile_context>
chip_gen: v7x
topology: tpu7x:2x2x1
jax: 0.10.0
libtpu: 0.0.40
codegen_flags: <defaults>
</compile_context>

<pallas_src>
import jax
import jax.numpy as jnp
from jax.experimental import pallas as pl
from jax.experimental.pallas import tpu as pltpu


# ----------------------------------------------------------------------------
# Kernel 1: single-layer LSTM, batch-major (N, T, H), tiled over T.
#   x block : (N, tt, H)  bf16 activations
#   wih/whh : (H, 4H)     bf16, gates stacked [i, f, o, g] along lanes (4H=128)
#   b       : (1, 4H)     f32  (b_ih + b_hh)
#   h_sc/c_sc carry the recurrent state (f32) across T-blocks.
# ----------------------------------------------------------------------------
def _lstm_kernel(x_ref, wih_ref, whh_ref, b_ref, out_ref, h_sc, c_sc):
    n, tt, h = x_ref.shape

    @pl.when(pl.program_id(0) == 0)
    def _():
        h_sc[...] = jnp.zeros_like(h_sc)
        c_sc[...] = jnp.zeros_like(c_sc)

    # Hoisted input projection: one (N*tt, H) @ (H, 4H) MXU matmul per block.
    x = x_ref[...].astype(jnp.bfloat16).reshape(n * tt, h)
    gx = (jnp.dot(x, wih_ref[...], preferred_element_type=jnp.float32)
          + b_ref[...]).reshape(n, tt, 4 * h)

    whh = whh_ref[...]
    h_t = h_sc[...]
    c_t = c_sc[...]

    # Fully unrolled recurrence (tt is small & static) -> scheduler sees across
    # timesteps; only h @ Whh (one fused 4-gate matmul) is on the serial path.
    for t in range(tt):
        gh = jnp.dot(h_t.astype(jnp.bfloat16), whh,
                     preferred_element_type=jnp.float32)
        gates = gx[:, t, :] + gh                      # (N, 4H), order [i, f, o, g]
        sig = jax.nn.sigmoid(gates[:, :3 * h])        # one EUP pass for i/f/o
        g_g = jnp.tanh(gates[:, 3 * h:])
        i_g = sig[:, 0 * h:1 * h]
        f_g = sig[:, 1 * h:2 * h]
        o_g = sig[:, 2 * h:3 * h]
        c_t = f_g * c_t + i_g * g_g
        h_t = o_g * jnp.tanh(c_t)
        out_ref[:, t, :] = h_t.astype(out_ref.dtype)

    h_sc[...] = h_t
    c_sc[...] = c_t


def lstm_encode(x_nth, wih, whh, b, *, tt=8):
    # x_nth: (N, T, H) -> (N, T, H) hidden states, batch-major throughout.
    n, t, h = x_nth.shape
    if t % tt != 0:
        tt = t
    grid = (t // tt,)
    # Cast activations/weights to bf16 once in the wrapper (halves kernel DMA
    # bytes and removes per-grid-step casts); bias stays f32 for the f32 adds.
    x_bf = x_nth.astype(jnp.bfloat16)
    wih_bf = wih.astype(jnp.bfloat16)
    whh_bf = whh.astype(jnp.bfloat16)
    return pl.pallas_call(
        _lstm_kernel,
        out_shape=jax.ShapeDtypeStruct((n, t, h), jnp.float32),
        grid_spec=pltpu.PrefetchScalarGridSpec(
            num_scalar_prefetch=0,
            grid=grid,
            in_specs=[pl.BlockSpec((n, tt, h), lambda i: (0, i, 0)),
                      pl.BlockSpec((h, 4 * h), lambda i: (0, 0)),
                      pl.BlockSpec((h, 4 * h), lambda i: (0, 0)),
                      pl.BlockSpec((1, 4 * h), lambda i: (0, 0))],
            out_specs=pl.BlockSpec((n, tt, h), lambda i: (0, i, 0)),
            scratch_shapes=[pltpu.VMEM((n, h), jnp.float32),
                            pltpu.VMEM((n, h), jnp.float32)]),
        compiler_params=pltpu.CompilerParams(
            dimension_semantics=("arbitrary",)),   # sequential recurrence over T
    )(x_bf, wih_bf, whh_bf, b)


# ----------------------------------------------------------------------------
# Kernel 2: batched attention + max-pool over sequence + rank Linear(2H -> 1).
#   c block: (Nb, Tc, H), q block: (Nb, Tq, H) -> y block (Nb, 1)
# ----------------------------------------------------------------------------
def _softmax_last(x):
    # Hand-rolled last-axis softmax; reciprocal goes to the EUP slot.
    m = jnp.max(x, axis=-1, keepdims=True)
    e = jnp.exp(x - m)
    return e * pl.reciprocal(jnp.sum(e, axis=-1, keepdims=True), approx=True)


def _attn_pool_rank_kernel(c_ref, q_ref, wr_ref, br_ref, y_ref):
    c = c_ref[...].astype(jnp.bfloat16)               # (Nb, Tc, H)
    q = q_ref[...].astype(jnp.bfloat16)               # (Nb, Tq, H)
    h = c.shape[-1]

    # a[n, t, s] = c[n, t, :] . q[n, s, :]
    a = jnp.einsum('bth,bsh->bts', c, q, preferred_element_type=jnp.float32)
    # context attends over question positions (torch softmax dim=2)
    p_c = _softmax_last(a)
    c_att = jnp.einsum('bts,bsh->bth', p_c.astype(jnp.bfloat16), q,
                       preferred_element_type=jnp.float32)      # (Nb, Tc, H)
    # question attends over context positions (torch softmax dim=1); recompute
    # the transposed score matrix on the MXU (slack) so the softmax stays a
    # lane-axis reduction.
    a_t = jnp.einsum('bsh,bth->bst', q, c, preferred_element_type=jnp.float32)
    p_q = _softmax_last(a_t)
    q_att = jnp.einsum('bst,bth->bsh', p_q.astype(jnp.bfloat16), c,
                       preferred_element_type=jnp.float32)      # (Nb, Tq, H)

    c_pool = jnp.max(c_att, axis=1)                   # (Nb, H)  torch max(dim=1)
    q_pool = jnp.max(q_att, axis=1)                   # (Nb, H)

    # rank_module: Linear(2H -> 1), fused epilogue (no extra launch / HBM trip).
    wr = wr_ref[...]                                  # (2H, 1) f32
    y_ref[...] = (jnp.dot(c_pool, wr[:h, :], preferred_element_type=jnp.float32)
                  + jnp.dot(q_pool, wr[h:, :], preferred_element_type=jnp.float32)
                  + br_ref[...])


def attention_pool_rank(c_seq, q_seq, w_rank, b_rank, *, nb=8):
    n, tc, h = c_seq.shape
    tq = q_seq.shape[1]
    if n % nb != 0:
        nb = n
    grid = (n // nb,)
    return pl.pallas_call(
        _attn_pool_rank_kernel,
        out_shape=jax.ShapeDtypeStruct((n, 1), jnp.float32),
        grid_spec=pltpu.PrefetchScalarGridSpec(
            num_scalar_prefetch=0,
            grid=grid,
            in_specs=[pl.BlockSpec((nb, tc, h), lambda i: (i, 0, 0)),
                      pl.BlockSpec((nb, tq, h), lambda i: (i, 0, 0)),
                      pl.BlockSpec((2 * h, 1), lambda i: (0, 0)),
                      pl.BlockSpec((1, 1), lambda i: (0, 0))],
            out_specs=pl.BlockSpec((nb, 1), lambda i: (i, 0))),
        compiler_params=pltpu.CompilerParams(
            dimension_semantics=("parallel",)),       # batch-parallel (megacore)
    )(c_seq, q_seq, w_rank, b_rank)


# ----------------------------------------------------------------------------
# Full forward (glue in plain JAX, hot paths in the kernels above)
# ----------------------------------------------------------------------------
@jax.jit
def qa_forward(params, context_ids, question_ids, labels):
    batch, option, tc = context_ids.shape
    tq = question_ids.shape[2]
    n = batch * option
    emb = params["emb"]

    # Embedding lookup: XLA gather (per-row Pallas gather was overhead-bound).
    ctx_emb = jnp.take(emb, context_ids.reshape(n, tc), axis=0)    # (N, Tc, H)
    qst_emb = jnp.take(emb, question_ids.reshape(n, tq), axis=0)   # (N, Tq, H)

    ctx_seq = lstm_encode(ctx_emb, params["c_wih"], params["c_whh"], params["c_b"])
    qst_seq = lstm_encode(qst_emb, params["q_wih"], params["q_whh"], params["q_b"])

    # attention + max-pool + rank_module fused into one kernel -> (N, 1)
    y = attention_pool_rank(ctx_seq, qst_seq, params["w_rank"], params["b_rank"])
    y = y.reshape(batch, option)                                   # (B, 4)

    # multi_module Linear(4 -> 16) + CrossEntropyLoss: tiny, left in plain JAX
    # (two dedicated pallas_calls here would be pure launch overhead).
    logits = y @ params["w_multi"] + params["b_multi"]             # (B, 16)
    logp = jax.nn.log_softmax(logits, axis=-1)
    nll = -jnp.take_along_axis(logp, labels[:, None], axis=1)[:, 0]
    loss = jnp.mean(nll)

    # single_label_top1_accuracy (metric glue)
    acc = jnp.sum(jnp.argmax(logits, axis=-1) == labels)
    return {"loss": loss, "logits": logits, "acc_result": acc}


def init_params(key, vocab, hidden):
    ks = jax.random.split(key, 8)
    s = 0.1
    return {
        "emb": jax.random.normal(ks[0], (vocab, hidden), jnp.float32),
        # LSTM weights concatenated along lanes as [i, f, o, g] -> (H, 4H);
        # bias is b_ih + b_hh summed -> (1, 4H).
        "c_wih": jax.random.normal(ks[1], (hidden, 4 * hidden), jnp.float32) * s,
        "c_whh": jax.random.normal(ks[2], (hidden, 4 * hidden), jnp.float32) * s,
        "c_b": jnp.zeros((1, 4 * hidden), jnp.float32),
        "q_wih": jax.random.normal(ks[3], (hidden, 4 * hidden), jnp.float32) * s,
        "q_whh": jax.random.normal(ks[4], (hidden, 4 * hidden), jnp.float32) * s,
        "q_b": jnp.zeros((1, 4 * hidden), jnp.float32),
        "w_rank": jax.random.normal(ks[5], (2 * hidden, 1), jnp.float32) * s,
        "b_rank": jnp.zeros((1, 1), jnp.float32),
        "w_multi": jax.random.normal(ks[6], (4, 16), jnp.float32) * s,
        "b_multi": jnp.zeros((1, 16), jnp.float32),
    }


if __name__ == "__main__":
    VOCAB, HIDDEN = 100, 32
    BATCH, OPTION, T_CTX, T_QST = 2, 4, 16, 8    # option fixed to 4 by Linear(4, 16)

    key = jax.random.PRNGKey(0)
    k_p, k_c, k_q, k_l = jax.random.split(key, 4)
    params = init_params(k_p, VOCAB, HIDDEN)

    context = jax.random.randint(k_c, (BATCH, OPTION, T_CTX), 0, VOCAB, jnp.int32)
    question = jax.random.randint(k_q, (BATCH, OPTION, T_QST), 0, VOCAB, jnp.int32)
    labels = jax.random.randint(k_l, (BATCH,), 0, 16, jnp.int32)

    out = qa_forward(params, context, question, labels)
    jax.block_until_ready(out)
    assert out["logits"].shape == (BATCH, 16)
    assert jnp.isfinite(out["loss"]).item()
    print("KERNEL_OK")
</pallas_src>

<mosaic_0001>
module attributes {stable_mosaic.version = 11 : i64} {
  func.func @_lstm_kernel(%arg0: i32, %arg1: memref<8x8x32xbf16, #tpu.memory_space<vmem>>, %arg2: memref<32x128xbf16, #tpu.memory_space<vmem>>, %arg3: memref<32x128xbf16, #tpu.memory_space<vmem>>, %arg4: memref<1x128xf32, #tpu.memory_space<vmem>>, %arg5: memref<8x8x32xf32, #tpu.memory_space<vmem>>, %arg6: memref<8x32xf32, #tpu.memory_space<vmem>>, %arg7: memref<8x32xf32, #tpu.memory_space<vmem>>) attributes {dimension_semantics = [#tpu.dimension_semantics<arbitrary>], iteration_bounds = array<i64: 2>, scalar_prefetch = 0 : i64, scratch_operands = 2 : i64, tpu.core_type = #tpu.core_type<tc>, window_params = [{transform_indices = @transform_0, window_bounds = array<i64: 8, 8, 32>}, {pipeline_mode = #tpu.pipeline_mode<synchronous>, transform_indices = @transform_1, window_bounds = array<i64: 32, 128>}, {pipeline_mode = #tpu.pipeline_mode<synchronous>, transform_indices = @transform_2, window_bounds = array<i64: 32, 128>}, {pipeline_mode = #tpu.pipeline_mode<synchronous>, transform_indices = @transform_3, window_bounds = array<i64: 1, 128>}, {transform_indices = @transform_4, window_bounds = array<i64: 8, 8, 32>}]} {
    %c0_i32 = arith.constant 0 : i32
    %0 = arith.cmpi eq, %arg0, %c0_i32 : i32
    %1 = arith.extui %0 : i1 to i32
    %c0_i32_0 = arith.constant 0 : i32
    %2 = arith.cmpi ne, %1, %c0_i32_0 : i32
    scf.if %2 {
      %cst_50 = arith.constant 0.000000e+00 : f32
      %208 = vector.broadcast %cst_50 : f32 to vector<8x32xf32>
      %c0_51 = arith.constant 0 : index
      %c0_52 = arith.constant 0 : index
      %209 = vector.load %arg6[%c0_51, %c0_52] : memref<8x32xf32, #tpu.memory_space<vmem>>, vector<8x32xf32>
      tpu.vector_store %arg6[%c0_51, %c0_52], %208 {strides = array<i32>} : memref<8x32xf32, #tpu.memory_space<vmem>>, vector<8x32xf32>,
      %cst_53 = arith.constant 0.000000e+00 : f32
      %210 = vector.broadcast %cst_53 : f32 to vector<8x32xf32>
      %c0_54 = arith.constant 0 : index
      %c0_55 = arith.constant 0 : index
      %211 = vector.load %arg7[%c0_54, %c0_55] : memref<8x32xf32, #tpu.memory_space<vmem>>, vector<8x32xf32>
      tpu.vector_store %arg7[%c0_54, %c0_55], %210 {strides = array<i32>} : memref<8x32xf32, #tpu.memory_space<vmem>>, vector<8x32xf32>,
    } else {
    }
    %c0 = arith.constant 0 : index
    %c0_1 = arith.constant 0 : index
    %c0_2 = arith.constant 0 : index
    %3 = vector.load %arg1[%c0, %c0_1, %c0_2] : memref<8x8x32xbf16, #tpu.memory_space<vmem>>, vector<8x8x32xbf16>
    %4 = vector.shape_cast %3 : vector<8x8x32xbf16> to vector<64x32xbf16>
    %c0_3 = arith.constant 0 : index
    %c0_4 = arith.constant 0 : index
    %5 = vector.load %arg2[%c0_3, %c0_4] : memref<32x128xbf16, #tpu.memory_space<vmem>>, vector<32x128xbf16>
    %cst = arith.constant dense<0.000000e+00> : vector<64x128xf32>
    %6 = tpu.matmul %4, %5, %cst {dimension_numbers = #tpu.dot_dimension_numbers<[1], [0], [0], [1], [0, 0, 1, 1], [], []>} : vector<64x32xbf16>, vector<32x128xbf16>, vector<64x128xf32> -> vector<64x128xf32>
    %c0_5 = arith.constant 0 : index
    %c0_6 = arith.constant 0 : index
    %7 = vector.load %arg4[%c0_5, %c0_6] : memref<1x128xf32, #tpu.memory_space<vmem>>, vector<1x128xf32>
    %8 = vector.broadcast %7 : vector<1x128xf32> to vector<64x128xf32>
    %9 = arith.addf %6, %8 : vector<64x128xf32>
    %10 = vector.shape_cast %9 : vector<64x128xf32> to vector<8x8x128xf32>
    %c0_7 = arith.constant 0 : index
    %c0_8 = arith.constant 0 : index
    %11 = vector.load %arg3[%c0_7, %c0_8] : memref<32x128xbf16, #tpu.memory_space<vmem>>, vector<32x128xbf16>
    %c0_9 = arith.constant 0 : index
    %c0_10 = arith.constant 0 : index
    %12 = vector.load %arg6[%c0_9, %c0_10] : memref<8x32xf32, #tpu.memory_space<vmem>>, vector<8x32xf32>
    %c0_11 = arith.constant 0 : index
    %c0_12 = arith.constant 0 : index
    %13 = vector.load %arg7[%c0_11, %c0_12] : memref<8x32xf32, #tpu.memory_space<vmem>>, vector<8x32xf32>
    %14 = arith.truncf %12 : vector<8x32xf32> to vector<8x32xbf16>
    %cst_13 = arith.constant dense<0.000000e+00> : vector<8x128xf32>
    %15 = tpu.matmul %14, %11, %cst_13 {dimension_numbers = #tpu.dot_dimension_numbers<[1], [0], [0], [1], [0, 0, 1, 1], [], []>} : vector<8x32xbf16>, vector<32x128xbf16>, vector<8x128xf32> -> vector<8x128xf32>
    %16 = vector.extract_strided_slice %10 {offsets = [0, 0, 0], sizes = [8, 1, 128], strides = [1, 1, 1]} : vector<8x8x128xf32> to vector<8x1x128xf32>
    %17 = vector.shape_cast %16 : vector<8x1x128xf32> to vector<8x128xf32>
    %18 = arith.addf %17, %15 : vector<8x128xf32>
    %19 = vector.extract_strided_slice %18 {offsets = [0, 0], sizes = [8, 96], strides = [1, 1]} : vector<8x128xf32> to vector<8x96xf32>
    %20 = arith.negf %19 : vector<8x96xf32>
    %21 = math.exp %20 : vector<8x96xf32>
    %cst_14 = arith.constant 1.000000e+00 : f32
    %22 = vector.broadcast %cst_14 : f32 to vector<8x96xf32>
    %23 = arith.addf %22, %21 : vector<8x96xf32>
    %24 = arith.divf %22, %23 : vector<8x96xf32>
    %25 = vector.extract_strided_slice %18 {offsets = [0, 96], sizes = [8, 32], strides = [1, 1]} : vector<8x128xf32> to vector<8x32xf32>
    %26 = math.tanh %25 : vector<8x32xf32>
    %27 = vector.extract_strided_slice %24 {offsets = [0, 0], sizes = [8, 32], strides = [1, 1]} : vector<8x96xf32> to vector<8x32xf32>
    %28 = vector.extract_strided_slice %24 {offsets = [0, 32], sizes = [8, 32], strides = [1, 1]} : vector<8x96xf32> to vector<8x32xf32>
    %29 = vector.extract_strided_slice %24 {offsets = [0, 64], sizes = [8, 32], strides = [1, 1]} : vector<8x96xf32> to vector<8x32xf32>
    %30 = arith.mulf %28, %13 : vector<8x32xf32>
    %31 = arith.mulf %27, %26 : vector<8x32xf32>
    %32 = arith.addf %30, %31 : vector<8x32xf32>
    %33 = math.tanh %32 : vector<8x32xf32>
    %34 = arith.mulf %29, %33 : vector<8x32xf32>
    %c0_15 = arith.constant 0 : index
    %c0_16 = arith.constant 0 : index
    %c0_17 = arith.constant 0 : index
    %35 = vector.load %arg5[%c0_15, %c0_16, %c0_17] : memref<8x8x32xf32, #tpu.memory_space<vmem>>, vector<8x1x32xf32>
    %36 = vector.shape_cast %35 : vector<8x1x32xf32> to vector<8x32xf32>
    %37 = vector.shape_cast %34 : vector<8x32xf32> to vector<8x1x32xf32>
    tpu.vector_store %arg5[%c0_15, %c0_16, %c0_17], %37 {strides = array<i32>} : memref<8x8x32xf32, #tpu.memory_space<vmem>>, vector<8x1x32xf32>,
    %38 = arith.truncf %34 : vector<8x32xf32> to vector<8x32xbf16>
    %cst_18 = arith.constant dense<0.000000e+00> : vector<8x128xf32>
    %39 = tpu.matmul %38, %11, %cst_18 {dimension_numbers = #tpu.dot_dimension_numbers<[1], [0], [0], [1], [0, 0, 1, 1], [], []>} : vector<8x32xbf16>, vector<32x128xbf16>, vector<8x128xf32> -> vector<8x128xf32>
    %40 = vector.extract_strided_slice %10 {offsets = [0, 1, 0], sizes = [8, 1, 128], strides = [1, 1, 1]} : vector<8x8x128xf32> to vector<8x1x128xf32>
    %41 = vector.shape_cast %40 : vector<8x1x128xf32> to vector<8x128xf32>
    %42 = arith.addf %41, %39 : vector<8x128xf32>
    %43 = vector.extract_strided_slice %42 {offsets = [0, 0], sizes = [8, 96], strides = [1, 1]} : vector<8x128xf32> to vector<8x96xf32>
    %44 = arith.negf %43 : vector<8x96xf32>
    %45 = math.exp %44 : vector<8x96xf32>
    %cst_19 = arith.constant 1.000000e+00 : f32
    %46 = vector.broadcast %cst_19 : f32 to vector<8x96xf32>
    %47 = arith.addf %46, %45 : vector<8x96xf32>
    %48 = arith.divf %46, %47 : vector<8x96xf32>
    %49 = vector.extract_strided_slice %42 {offsets = [0, 96], sizes = [8, 32], strides = [1, 1]} : vector<8x128xf32> to vector<8x32xf32>
    %50 = math.tanh %49 : vector<8x32xf32>
    %51 = vector.extract_strided_slice %48 {offsets = [0, 0], sizes = [8, 32], strides = [1, 1]} : vector<8x96xf32> to vector<8x32xf32>
    %52 = vector.extract_strided_slice %48 {offsets = [0, 32], sizes = [8, 32], strides = [1, 1]} : vector<8x96xf32> to vector<8x32xf32>
    %53 = vector.extract_strided_slice %48 {offsets = [0, 64], sizes = [8, 32], strides = [1, 1]} : vector<8x96xf32> to vector<8x32xf32>
    %54 = arith.mulf %52, %32 : vector<8x32xf32>
    %55 = arith.mulf %51, %50 : vector<8x32xf32>
    %56 = arith.addf %54, %55 : vector<8x32xf32>
    %57 = math.tanh %56 : vector<8x32xf32>
    %58 = arith.mulf %53, %57 : vector<8x32xf32>
    %c0_20 = arith.constant 0 : index
    %c1 = arith.constant 1 : index
    %c0_21 = arith.constant 0 : index
    %59 = vector.load %arg5[%c0_20, %c1, %c0_21] : memref<8x8x32xf32, #tpu.memory_space<vmem>>, vector<8x1x32xf32>
    %60 = vector.shape_cast %59 : vector<8x1x32xf32> to vector<8x32xf32>
    %61 = vector.shape_cast %58 : vector<8x32xf32> to vector<8x1x32xf32>
    tpu.vector_store %arg5[%c0_20, %c1, %c0_21], %61 {strides = array<i32>} : memref<8x8x32xf32, #tpu.memory_space<vmem>>, vector<8x1x32xf32>,
    %62 = arith.truncf %58 : vector<8x32xf32> to vector<8x32xbf16>
    %cst_22 = arith.constant dense<0.000000e+00> : vector<8x128xf32>
    %63 = tpu.matmul %62, %11, %cst_22 {dimension_numbers = #tpu.dot_dimension_numbers<[1], [0], [0], [1], [0, 0, 1, 1], [], []>} : vector<8x32xbf16>, vector<32x128xbf16>, vector<8x128xf32> -> vector<8x128xf32>
    %64 = vector.extract_strided_slice %10 {offsets = [0, 2, 0], sizes = [8, 1, 128], strides = [1, 1, 1]} : vector<8x8x128xf32> to vector<8x1x128xf32>
    %65 = vector.shape_cast %64 : vector<8x1x128xf32> to vector<8x128xf32>
    %66 = arith.addf %65, %63 : vector<8x128xf32>
    %67 = vector.extract_strided_slice %66 {offsets = [0, 0], sizes = [8, 96], strides = [1, 1]} : vector<8x128xf32> to vector<8x96xf32>
    %68 = arith.negf %67 : vector<8x96xf32>
    %69 = math.exp %68 : vector<8x96xf32>
    %cst_23 = arith.constant 1.000000e+00 : f32
    %70 = vector.broadcast %cst_23 : f32 to vector<8x96xf32>
    %71 = arith.addf %70, %69 : vector<8x96xf32>
    %72 = arith.divf %70, %71 : vector<8x96xf32>
    %73 = vector.extract_strided_slice %66 {offsets = [0, 96], sizes = [8, 32], strides = [1, 1]} : vector<8x128xf32> to vector<8x32xf32>
    %74 = math.tanh %73 : vector<8x32xf32>
    %75 = vector.extract_strided_slice %72 {offsets = [0, 0], sizes = [8, 32], strides = [1, 1]} : vector<8x96xf32> to vector<8x32xf32>
    %76 = vector.extract_strided_slice %72 {offsets = [0, 32], sizes = [8, 32], strides = [1, 1]} : vector<8x96xf32> to vector<8x32xf32>
    %77 = vector.extract_strided_slice %72 {offsets = [0, 64], sizes = [8, 32], strides = [1, 1]} : vector<8x96xf32> to vector<8x32xf32>
    %78 = arith.mulf %76, %56 : vector<8x32xf32>
    %79 = arith.mulf %75, %74 : vector<8x32xf32>
    %80 = arith.addf %78, %79 : vector<8x32xf32>
    %81 = math.tanh %80 : vector<8x32xf32>
    %82 = arith.mulf %77, %81 : vector<8x32xf32>
    %c0_24 = arith.constant 0 : index
    %c2 = arith.constant 2 : index
    %c0_25 = arith.constant 0 : index
    %83 = vector.load %arg5[%c0_24, %c2, %c0_25] : memref<8x8x32xf32, #tpu.memory_space<vmem>>, vector<8x1x32xf32>
    %84 = vector.shape_cast %83 : vector<8x1x32xf32> to vector<8x32xf32>
    %85 = vector.shape_cast %82 : vector<8x32xf32> to vector<8x1x32xf32>
    tpu.vector_store %arg5[%c0_24, %c2, %c0_25], %85 {strides = array<i32>} : memref<8x8x32xf32, #tpu.memory_space<vmem>>, vector<8x1x32xf32>,
    %86 = arith.truncf %82 : vector<8x32xf32> to vector<8x32xbf16>
    %cst_26 = arith.constant dense<0.000000e+00> : vector<8x128xf32>
    %87 = tpu.matmul %86, %11, %cst_26 {dimension_numbers = #tpu.dot_dimension_numbers<[1], [0], [0], [1], [0, 0, 1, 1], [], []>} : vector<8x32xbf16>, vector<32x128xbf16>, vector<8x128xf32> -> vector<8x128xf32>
    %88 = vector.extract_strided_slice %10 {offsets = [0, 3, 0], sizes = [8, 1, 128], strides = [1, 1, 1]} : vector<8x8x128xf32> to vector<8x1x128xf32>
    %89 = vector.shape_cast %88 : vector<8x1x128xf32> to vector<8x128xf32>
    %90 = arith.addf %89, %87 : vector<8x128xf32>
    %91 = vector.extract_strided_slice %90 {offsets = [0, 0], sizes = [8, 96], strides = [1, 1]} : vector<8x128xf32> to vector<8x96xf32>
    %92 = arith.negf %91 : vector<8x96xf32>
    %93 = math.exp %92 : vector<8x96xf32>
    %cst_27 = arith.constant 1.000000e+00 : f32
    %94 = vector.broadcast %cst_27 : f32 to vector<8x96xf32>
    %95 = arith.addf %94, %93 : vector<8x96xf32>
    %96 = arith.divf %94, %95 : vector<8x96xf32>
    %97 = vector.extract_strided_slice %90 {offsets = [0, 96], sizes = [8, 32], strides = [1, 1]} : vector<8x128xf32> to vector<8x32xf32>
    %98 = math.tanh %97 : vector<8x32xf32>
    %99 = vector.extract_strided_slice %96 {offsets = [0, 0], sizes = [8, 32], strides = [1, 1]} : vector<8x96xf32> to vector<8x32xf32>
    %100 = vector.extract_strided_slice %96 {offsets = [0, 32], sizes = [8, 32], strides = [1, 1]} : vector<8x96xf32> to vector<8x32xf32>
    %101 = vector.extract_strided_slice %96 {offsets = [0, 64], sizes = [8, 32], strides = [1, 1]} : vector<8x96xf32> to vector<8x32xf32>
    %102 = arith.mulf %100, %80 : vector<8x32xf32>
    %103 = arith.mulf %99, %98 : vector<8x32xf32>
    %104 = arith.addf %102, %103 : vector<8x32xf32>
    %105 = math.tanh %104 : vector<8x32xf32>
    %106 = arith.mulf %101, %105 : vector<8x32xf32>
    %c0_28 = arith.constant 0 : index
    %c3 = arith.constant 3 : index
    %c0_29 = arith.constant 0 : index
    %107 = vector.load %arg5[%c0_28, %c3, %c0_29] : memref<8x8x32xf32, #tpu.memory_space<vmem>>, vector<8x1x32xf32>
    %108 = vector.shape_cast %107 : vector<8x1x32xf32> to vector<8x32xf32>
    %109 = vector.shape_cast %106 : vector<8x32xf32> to vector<8x1x32xf32>
    tpu.vector_store %arg5[%c0_28, %c3, %c0_29], %109 {strides = array<i32>} : memref<8x8x32xf32, #tpu.memory_space<vmem>>, vector<8x1x32xf32>,
    %110 = arith.truncf %106 : vector<8x32xf32> to vector<8x32xbf16>
    %cst_30 = arith.constant dense<0.000000e+00> : vector<8x128xf32>
    %111 = tpu.matmul %110, %11, %cst_30 {dimension_numbers = #tpu.dot_dimension_numbers<[1], [0], [0], [1], [0, 0, 1, 1], [], []>} : vector<8x32xbf16>, vector<32x128xbf16>, vector<8x128xf32> -> vector<8x128xf32>
    %112 = vector.extract_strided_slice %10 {offsets = [0, 4, 0], sizes = [8, 1, 128], strides = [1, 1, 1]} : vector<8x8x128xf32> to vector<8x1x128xf32>
    %113 = vector.shape_cast %112 : vector<8x1x128xf32> to vector<8x128xf32>
    %114 = arith.addf %113, %111 : vector<8x128xf32>
    %115 = vector.extract_strided_slice %114 {offsets = [0, 0], sizes = [8, 96], strides = [1, 1]} : vector<8x128xf32> to vector<8x96xf32>
    %116 = arith.negf %115 : vector<8x96xf32>
    %117 = math.exp %116 : vector<8x96xf32>
    %cst_31 = arith.constant 1.000000e+00 : f32
    %118 = vector.broadcast %cst_31 : f32 to vector<8x96xf32>
    %119 = arith.addf %118, %117 : vector<8x96xf32>
    %120 = arith.divf %118, %119 : vector<8x96xf32>
    %121 = vector.extract_strided_slice %114 {offsets = [0, 96], sizes = [8, 32], strides = [1, 1]} : vector<8x128xf32> to vector<8x32xf32>
    %122 = math.tanh %121 : vector<8x32xf32>
    %123 = vector.extract_strided_slice %120 {offsets = [0, 0], sizes = [8, 32], strides = [1, 1]} : vector<8x96xf32> to vector<8x32xf32>
    %124 = vector.extract_strided_slice %120 {offsets = [0, 32], sizes = [8, 32], strides = [1, 1]} : vector<8x96xf32> to vector<8x32xf32>
    %125 = vector.extract_strided_slice %120 {offsets = [0, 64], sizes = [8, 32], strides = [1, 1]} : vector<8x96xf32> to vector<8x32xf32>
    %126 = arith.mulf %124, %104 : vector<8x32xf32>
    %127 = arith.mulf %123, %122 : vector<8x32xf32>
    %128 = arith.addf %126, %127 : vector<8x32xf32>
    %129 = math.tanh %128 : vector<8x32xf32>
    %130 = arith.mulf %125, %129 : vector<8x32xf32>
    %c0_32 = arith.constant 0 : index
    %c4 = arith.constant 4 : index
    %c0_33 = arith.constant 0 : index
    %131 = vector.load %arg5[%c0_32, %c4, %c0_33] : memref<8x8x32xf32, #tpu.memory_space<vmem>>, vector<8x1x32xf32>
    %132 = vector.shape_cast %131 : vector<8x1x32xf32> to vector<8x32xf32>
    %133 = vector.shape_cast %130 : vector<8x32xf32> to vector<8x1x32xf32>
    tpu.vector_store %arg5[%c0_32, %c4, %c0_33], %133 {strides = array<i32>} : memref<8x8x32xf32, #tpu.memory_space<vmem>>, vector<8x1x32xf32>,
    %134 = arith.truncf %130 : vector<8x32xf32> to vector<8x32xbf16>
    %cst_34 = arith.constant dense<0.000000e+00> : vector<8x128xf32>
    %135 = tpu.matmul %134, %11, %cst_34 {dimension_numbers = #tpu.dot_dimension_numbers<[1], [0], [0], [1], [0, 0, 1, 1], [], []>} : vector<8x32xbf16>, vector<32x128xbf16>, vector<8x128xf32> -> vector<8x128xf32>
    %136 = vector.extract_strided_slice %10 {offsets = [0, 5, 0], sizes = [8, 1, 128], strides = [1, 1, 1]} : vector<8x8x128xf32> to vector<8x1x128xf32>
    %137 = vector.shape_cast %136 : vector<8x1x128xf32> to vector<8x128xf32>
    %138 = arith.addf %137, %135 : vector<8x128xf32>
    %139 = vector.extract_strided_slice %138 {offsets = [0, 0], sizes = [8, 96], strides = [1, 1]} : vector<8x128xf32> to vector<8x96xf32>
    %140 = arith.negf %139 : vector<8x96xf32>
    %141 = math.exp %140 : vector<8x96xf32>
    %cst_35 = arith.constant 1.000000e+00 : f32
    %142 = vector.broadcast %cst_35 : f32 to vector<8x96xf32>
    %143 = arith.addf %142, %141 : vector<8x96xf32>
    %144 = arith.divf %142, %143 : vector<8x96xf32>
    %145 = vector.extract_strided_slice %138 {offsets = [0, 96], sizes = [8, 32], strides = [1, 1]} : vector<8x128xf32> to vector<8x32xf32>
    %146 = math.tanh %145 : vector<8x32xf32>
    %147 = vector.extract_strided_slice %144 {offsets = [0, 0], sizes = [8, 32], strides = [1, 1]} : vector<8x96xf32> to vector<8x32xf32>
    %148 = vector.extract_strided_slice %144 {offsets = [0, 32], sizes = [8, 32], strides = [1, 1]} : vector<8x96xf32> to vector<8x32xf32>
    %149 = vector.extract_strided_slice %144 {offsets = [0, 64], sizes = [8, 32], strides = [1, 1]} : vector<8x96xf32> to vector<8x32xf32>
    %150 = arith.mulf %148, %128 : vector<8x32xf32>
    %151 = arith.mulf %147, %146 : vector<8x32xf32>
    %152 = arith.addf %150, %151 : vector<8x32xf32>
    %153 = math.tanh %152 : vector<8x32xf32>
    %154 = arith.mulf %149, %153 : vector<8x32xf32>
    %c0_36 = arith.constant 0 : index
    %c5 = arith.constant 5 : index
    %c0_37 = arith.constant 0 : index
    %155 = vector.load %arg5[%c0_36, %c5, %c0_37] : memref<8x8x32xf32, #tpu.memory_space<vmem>>, vector<8x1x32xf32>
    %156 = vector.shape_cast %155 : vector<8x1x32xf32> to vector<8x32xf32>
    %157 = vector.shape_cast %154 : vector<8x32xf32> to vector<8x1x32xf32>
    tpu.vector_store %arg5[%c0_36, %c5, %c0_37], %157 {strides = array<i32>} : memref<8x8x32xf32, #tpu.memory_space<vmem>>, vector<8x1x32xf32>,
    %158 = arith.truncf %154 : vector<8x32xf32> to vector<8x32xbf16>
    %cst_38 = arith.constant dense<0.000000e+00> : vector<8x128xf32>
    %159 = tpu.matmul %158, %11, %cst_38 {dimension_numbers = #tpu.dot_dimension_numbers<[1], [0], [0], [1], [0, 0, 1, 1], [], []>} : vector<8x32xbf16>, vector<32x128xbf16>, vector<8x128xf32> -> vector<8x128xf32>
    %160 = vector.extract_strided_slice %10 {offsets = [0, 6, 0], sizes = [8, 1, 128], strides = [1, 1, 1]} : vector<8x8x128xf32> to vector<8x1x128xf32>
    %161 = vector.shape_cast %160 : vector<8x1x128xf32> to vector<8x128xf32>
    %162 = arith.addf %161, %159 : vector<8x128xf32>
    %163 = vector.extract_strided_slice %162 {offsets = [0, 0], sizes = [8, 96], strides = [1, 1]} : vector<8x128xf32> to vector<8x96xf32>
    %164 = arith.negf %163 : vector<8x96xf32>
    %165 = math.exp %164 : vector<8x96xf32>
    %cst_39 = arith.constant 1.000000e+00 : f32
    %166 = vector.broadcast %cst_39 : f32 to vector<8x96xf32>
    %167 = arith.addf %166, %165 : vector<8x96xf32>
    %168 = arith.divf %166, %167 : vector<8x96xf32>
    %169 = vector.extract_strided_slice %162 {offsets = [0, 96], sizes = [8, 32], strides = [1, 1]} : vector<8x128xf32> to vector<8x32xf32>
    %170 = math.tanh %169 : vector<8x32xf32>
    %171 = vector.extract_strided_slice %168 {offsets = [0, 0], sizes = [8, 32], strides = [1, 1]} : vector<8x96xf32> to vector<8x32xf32>
    %172 = vector.extract_strided_slice %168 {offsets = [0, 32], sizes = [8, 32], strides = [1, 1]} : vector<8x96xf32> to vector<8x32xf32>
    %173 = vector.extract_strided_slice %168 {offsets = [0, 64], sizes = [8, 32], strides = [1, 1]} : vector<8x96xf32> to vector<8x32xf32>
    %174 = arith.mulf %172, %152 : vector<8x32xf32>
    %175 = arith.mulf %171, %170 : vector<8x32xf32>
    %176 = arith.addf %174, %175 : vector<8x32xf32>
    %177 = math.tanh %176 : vector<8x32xf32>
    %178 = arith.mulf %173, %177 : vector<8x32xf32>
    %c0_40 = arith.constant 0 : index
    %c6 = arith.constant 6 : index
    %c0_41 = arith.constant 0 : index
    %179 = vector.load %arg5[%c0_40, %c6, %c0_41] : memref<8x8x32xf32, #tpu.memory_space<vmem>>, vector<8x1x32xf32>
    %180 = vector.shape_cast %179 : vector<8x1x32xf32> to vector<8x32xf32>
    %181 = vector.shape_cast %178 : vector<8x32xf32> to vector<8x1x32xf32>
    tpu.vector_store %arg5[%c0_40, %c6, %c0_41], %181 {strides = array<i32>} : memref<8x8x32xf32, #tpu.memory_space<vmem>>, vector<8x1x32xf32>,
    %182 = arith.truncf %178 : vector<8x32xf32> to vector<8x32xbf16>
    %cst_42 = arith.constant dense<0.000000e+00> : vector<8x128xf32>
    %183 = tpu.matmul %182, %11, %cst_42 {dimension_numbers = #tpu.dot_dimension_numbers<[1], [0], [0], [1], [0, 0, 1, 1], [], []>} : vector<8x32xbf16>, vector<32x128xbf16>, vector<8x128xf32> -> vector<8x128xf32>
    %184 = vector.extract_strided_slice %10 {offsets = [0, 7, 0], sizes = [8, 1, 128], strides = [1, 1, 1]} : vector<8x8x128xf32> to vector<8x1x128xf32>
    %185 = vector.shape_cast %184 : vector<8x1x128xf32> to vector<8x128xf32>
    %186 = arith.addf %185, %183 : vector<8x128xf32>
    %187 = vector.extract_strided_slice %186 {offsets = [0, 0], sizes = [8, 96], strides = [1, 1]} : vector<8x128xf32> to vector<8x96xf32>
    %188 = arith.negf %187 : vector<8x96xf32>
    %189 = math.exp %188 : vector<8x96xf32>
    %cst_43 = arith.constant 1.000000e+00 : f32
    %190 = vector.broadcast %cst_43 : f32 to vector<8x96xf32>
    %191 = arith.addf %190, %189 : vector<8x96xf32>
    %192 = arith.divf %190, %191 : vector<8x96xf32>
    %193 = vector.extract_strided_slice %186 {offsets = [0, 96], sizes = [8, 32], strides = [1, 1]} : vector<8x128xf32> to vector<8x32xf32>
    %194 = math.tanh %193 : vector<8x32xf32>
    %195 = vector.extract_strided_slice %192 {offsets = [0, 0], sizes = [8, 32], strides = [1, 1]} : vector<8x96xf32> to vector<8x32xf32>
    %196 = vector.extract_strided_slice %192 {offsets = [0, 32], sizes = [8, 32], strides = [1, 1]} : vector<8x96xf32> to vector<8x32xf32>
    %197 = vector.extract_strided_slice %192 {offsets = [0, 64], sizes = [8, 32], strides = [1, 1]} : vector<8x96xf32> to vector<8x32xf32>
    %198 = arith.mulf %196, %176 : vector<8x32xf32>
    %199 = arith.mulf %195, %194 : vector<8x32xf32>
    %200 = arith.addf %198, %199 : vector<8x32xf32>
    %201 = math.tanh %200 : vector<8x32xf32>
    %202 = arith.mulf %197, %201 : vector<8x32xf32>
    %c0_44 = arith.constant 0 : index
    %c7 = arith.constant 7 : index
    %c0_45 = arith.constant 0 : index
    %203 = vector.load %arg5[%c0_44, %c7, %c0_45] : memref<8x8x32xf32, #tpu.memory_space<vmem>>, vector<8x1x32xf32>
    %204 = vector.shape_cast %203 : vector<8x1x32xf32> to vector<8x32xf32>
    %205 = vector.shape_cast %202 : vector<8x32xf32> to vector<8x1x32xf32>
    tpu.vector_store %arg5[%c0_44, %c7, %c0_45], %205 {strides = array<i32>} : memref<8x8x32xf32, #tpu.memory_space<vmem>>, vector<8x1x32xf32>,
    %c0_46 = arith.constant 0 : index
    %c0_47 = arith.constant 0 : index
    %206 = vector.load %arg6[%c0_46, %c0_47] : memref<8x32xf32, #tpu.memory_space<vmem>>, vector<8x32xf32>
    tpu.vector_store %arg6[%c0_46, %c0_47], %202 {strides = array<i32>} : memref<8x32xf32, #tpu.memory_space<vmem>>, vector<8x32xf32>,
    %c0_48 = arith.constant 0 : index
    %c0_49 = arith.constant 0 : index
    %207 = vector.load %arg7[%c0_48, %c0_49] : memref<8x32xf32, #tpu.memory_space<vmem>>, vector<8x32xf32>
    tpu.vector_store %arg7[%c0_48, %c0_49], %200 {strides = array<i32>} : memref<8x32xf32, #tpu.memory_space<vmem>>, vector<8x32xf32>,
    return
  }
  func.func @transform_0(%arg0: i32) -> (i32, i32, i32) {
    %c0_i32 = arith.constant 0 : i32
    %c0_i32_0 = arith.constant 0 : i32
    %c0_i32_1 = arith.constant 0 : i32
    return %c0_i32, %arg0, %c0_i32_0 : i32, i32, i32
  }
  func.func @transform_1(%arg0: i32) -> (i32, i32) {
    %c0_i32 = arith.constant 0 : i32
    %c0_i32_0 = arith.constant 0 : i32
    %c0_i32_1 = arith.constant 0 : i32
    return %c0_i32, %c0_i32_0 : i32, i32
  }
  func.func @transform_2(%arg0: i32) -> (i32, i32) {
    %c0_i32 = arith.constant 0 : i32
    %c0_i32_0 = arith.constant 0 : i32
    %c0_i32_1 = arith.constant 0 : i32
    return %c0_i32, %c0_i32_0 : i32, i32
  }
  func.func @transform_3(%arg0: i32) -> (i32, i32) {
    %c0_i32 = arith.constant 0 : i32
    %c0_i32_0 = arith.constant 0 : i32
    %c0_i32_1 = arith.constant 0 : i32
    return %c0_i32, %c0_i32_0 : i32, i32
  }
  func.func @transform_4(%arg0: i32) -> (i32, i32, i32) {
    %c0_i32 = arith.constant 0 : i32
    %c0_i32_0 = arith.constant 0 : i32
    %c0_i32_1 = arith.constant 0 : i32
    return %c0_i32, %arg0, %c0_i32_0 : i32, i32, i32
  }
}

module attributes {stable_mosaic.version = 11 : i64} {
  func.func @_attn_pool_rank_kernel(%arg0: i32, %arg1: memref<8x16x32xf32, #tpu.memory_space<vmem>>, %arg2: memref<8x8x32xf32, #tpu.memory_space<vmem>>, %arg3: memref<64x1xf32, #tpu.memory_space<vmem>>, %arg4: memref<1x1xf32, #tpu.memory_space<vmem>>, %arg5: memref<8x1xf32, #tpu.memory_space<vmem>>) attributes {dimension_semantics = [#tpu.dimension_semantics<parallel>], iteration_bounds = array<i64: 1>, scalar_prefetch = 0 : i64, scratch_operands = 0 : i64, tpu.core_type = #tpu.core_type<tc>, window_params = [{transform_indices = @transform_0, window_bounds = array<i64: 8, 16, 32>}, {transform_indices = @transform_1, window_bounds = array<i64: 8, 8, 32>}, {pipeline_mode = #tpu.pipeline_mode<synchronous>, transform_indices = @transform_2, window_bounds = array<i64: 64, 1>}, {pipeline_mode = #tpu.pipeline_mode<synchronous>, transform_indices = @transform_3, window_bounds = array<i64: 1, 1>}, {transform_indices = @transform_4, window_bounds = array<i64: 8, 1>}]} {
    %c0 = arith.constant 0 : index
    %c0_0 = arith.constant 0 : index
    %c0_1 = arith.constant 0 : index
    %0 = vector.load %arg1[%c0, %c0_0, %c0_1] : memref<8x16x32xf32, #tpu.memory_space<vmem>>, vector<8x16x32xf32>
    %1 = arith.truncf %0 : vector<8x16x32xf32> to vector<8x16x32xbf16>
    %c0_2 = arith.constant 0 : index
    %c0_3 = arith.constant 0 : index
    %c0_4 = arith.constant 0 : index
    %2 = vector.load %arg2[%c0_2, %c0_3, %c0_4] : memref<8x8x32xf32, #tpu.memory_space<vmem>>, vector<8x8x32xf32>
    %3 = arith.truncf %2 : vector<8x8x32xf32> to vector<8x8x32xbf16>
    "tpu.trace_start"() <{level = 10 : i32, message = "bth,bsh->bts"}> : () -> ()
    %cst = arith.constant dense<0.000000e+00> : vector<8x16x8xf32>
    %4 = tpu.matmul %1, %3, %cst {dimension_numbers = #tpu.dot_dimension_numbers<[2], [2], [1], [1], [0, 0, 0, 1, 1, 1], [0], [0]>} : vector<8x16x32xbf16>, vector<8x8x32xbf16>, vector<8x16x8xf32> -> vector<8x16x8xf32>
    "tpu.trace_stop"() : () -> ()
    %cst_5 = arith.constant dense<0xFF800000> : vector<8x16xf32>
    %5 = vector.multi_reduction <maximumf>, %4, %cst_5 [2] : vector<8x16x8xf32> to vector<8x16xf32>
    %6 = vector.shape_cast %5 : vector<8x16xf32> to vector<8x16x1xf32>
    %7 = vector.broadcast %6 : vector<8x16x1xf32> to vector<8x16x8xf32>
    %8 = arith.subf %4, %7 : vector<8x16x8xf32>
    %9 = math.exp %8 : vector<8x16x8xf32>
    %cst_6 = arith.constant dense<0.000000e+00> : vector<8x16xf32>
    %10 = vector.multi_reduction <add>, %9, %cst_6 [2] : vector<8x16x8xf32> to vector<8x16xf32>
    %11 = vector.shape_cast %10 : vector<8x16xf32> to vector<8x16x1xf32>
    %12 = tpu.reciprocal %11 {approx = true} : vector<8x16x1xf32> -> vector<8x16x1xf32>
    %13 = vector.broadcast %12 : vector<8x16x1xf32> to vector<8x16x8xf32>
    %14 = arith.mulf %9, %13 : vector<8x16x8xf32>
    %15 = arith.truncf %14 : vector<8x16x8xf32> to vector<8x16x8xbf16>
    "tpu.trace_start"() <{level = 10 : i32, message = "bts,bsh->bth"}> : () -> ()
    %cst_7 = arith.constant dense<0.000000e+00> : vector<8x16x32xf32>
    %16 = tpu.matmul %15, %3, %cst_7 {dimension_numbers = #tpu.dot_dimension_numbers<[2], [1], [1], [2], [0, 0, 0, 1, 1, 2], [0], [0]>} : vector<8x16x8xbf16>, vector<8x8x32xbf16>, vector<8x16x32xf32> -> vector<8x16x32xf32>
    "tpu.trace_stop"() : () -> ()
    "tpu.trace_start"() <{level = 10 : i32, message = "bsh,bth->bst"}> : () -> ()
    %cst_8 = arith.constant dense<0.000000e+00> : vector<8x8x16xf32>
    %17 = tpu.matmul %3, %1, %cst_8 {dimension_numbers = #tpu.dot_dimension_numbers<[2], [2], [1], [1], [0, 0, 0, 1, 1, 1], [0], [0]>} : vector<8x8x32xbf16>, vector<8x16x32xbf16>, vector<8x8x16xf32> -> vector<8x8x16xf32>
    "tpu.trace_stop"() : () -> ()
    %cst_9 = arith.constant dense<0xFF800000> : vector<8x8xf32>
    %18 = vector.multi_reduction <maximumf>, %17, %cst_9 [2] : vector<8x8x16xf32> to vector<8x8xf32>
    %19 = vector.shape_cast %18 : vector<8x8xf32> to vector<8x8x1xf32>
    %20 = vector.broadcast %19 : vector<8x8x1xf32> to vector<8x8x16xf32>
    %21 = arith.subf %17, %20 : vector<8x8x16xf32>
    %22 = math.exp %21 : vector<8x8x16xf32>
    %cst_10 = arith.constant dense<0.000000e+00> : vector<8x8xf32>
    %23 = vector.multi_reduction <add>, %22, %cst_10 [2] : vector<8x8x16xf32> to vector<8x8xf32>
    %24 = vector.shape_cast %23 : vector<8x8xf32> to vector<8x8x1xf32>
    %25 = tpu.reciprocal %24 {approx = true} : vector<8x8x1xf32> -> vector<8x8x1xf32>
    %26 = vector.broadcast %25 : vector<8x8x1xf32> to vector<8x8x16xf32>
    %27 = arith.mulf %22, %26 : vector<8x8x16xf32>
    %28 = arith.truncf %27 : vector<8x8x16xf32> to vector<8x8x16xbf16>
    "tpu.trace_start"() <{level = 10 : i32, message = "bst,bth->bsh"}> : () -> ()
    %cst_11 = arith.constant dense<0.000000e+00> : vector<8x8x32xf32>
    %29 = tpu.matmul %28, %1, %cst_11 {dimension_numbers = #tpu.dot_dimension_numbers<[2], [1], [1], [2], [0, 0, 0, 1, 1, 2], [0], [0]>} : vector<8x8x16xbf16>, vector<8x16x32xbf16>, vector<8x8x32xf32> -> vector<8x8x32xf32>
    "tpu.trace_stop"() : () -> ()
    %cst_12 = arith.constant dense<0xFF800000> : vector<8x32xf32>
    %30 = vector.multi_reduction <maximumf>, %16, %cst_12 [1] : vector<8x16x32xf32> to vector<8x32xf32>
    %cst_13 = arith.constant dense<0xFF800000> : vector<8x32xf32>
    %31 = vector.multi_reduction <maximumf>, %29, %cst_13 [1] : vector<8x8x32xf32> to vector<8x32xf32>
    %c0_14 = arith.constant 0 : index
    %c0_15 = arith.constant 0 : index
    %32 = vector.load %arg3[%c0_14, %c0_15] : memref<64x1xf32, #tpu.memory_space<vmem>>, vector<64x1xf32>
    %33 = vector.extract_strided_slice %32 {offsets = [0, 0], sizes = [32, 1], strides = [1, 1]} : vector<64x1xf32> to vector<32x1xf32>
    %cst_16 = arith.constant dense<0.000000e+00> : vector<8x1xf32>
    %34 = tpu.matmul %30, %33, %cst_16 {dimension_numbers = #tpu.dot_dimension_numbers<[1], [0], [0], [1], [0, 0, 1, 1], [], []>} : vector<8x32xf32>, vector<32x1xf32>, vector<8x1xf32> -> vector<8x1xf32>
    %35 = vector.extract_strided_slice %32 {offsets = [32, 0], sizes = [32, 1], strides = [1, 1]} : vector<64x1xf32> to vector<32x1xf32>
    %cst_17 = arith.constant dense<0.000000e+00> : vector<8x1xf32>
    %36 = tpu.matmul %31, %35, %cst_17 {dimension_numbers = #tpu.dot_dimension_numbers<[1], [0], [0], [1], [0, 0, 1, 1], [], []>} : vector<8x32xf32>, vector<32x1xf32>, vector<8x1xf32> -> vector<8x1xf32>
    %37 = arith.addf %34, %36 : vector<8x1xf32>
    %c0_18 = arith.constant 0 : index
    %c0_19 = arith.constant 0 : index
    %38 = vector.load %arg4[%c0_18, %c0_19] : memref<1x1xf32, #tpu.memory_space<vmem>>, vector<1x1xf32>
    %39 = vector.broadcast %38 : vector<1x1xf32> to vector<8x1xf32>
    %40 = arith.addf %37, %39 : vector<8x1xf32>
    %c0_20 = arith.constant 0 : index
    %c0_21 = arith.constant 0 : index
    %41 = vector.load %arg5[%c0_20, %c0_21] : memref<8x1xf32, #tpu.memory_space<vmem>>, vector<8x1xf32>
    tpu.vector_store %arg5[%c0_20, %c0_21], %40 {strides = array<i32>} : memref<8x1xf32, #tpu.memory_space<vmem>>, vector<8x1xf32>,
    return
  }
  func.func @transform_0(%arg0: i32) -> (i32, i32, i32) {
    %c0_i32 = arith.constant 0 : i32
    %c0_i32_0 = arith.constant 0 : i32
    %c0_i32_1 = arith.constant 0 : i32
    return %arg0, %c0_i32, %c0_i32_0 : i32, i32, i32
  }
  func.func @transform_1(%arg0: i32) -> (i32, i32, i32) {
    %c0_i32 = arith.constant 0 : i32
    %c0_i32_0 = arith.constant 0 : i32
    %c0_i32_1 = arith.constant 0 : i32
    return %arg0, %c0_i32, %c0_i32_0 : i32, i32, i32
  }
  func.func @transform_2(%arg0: i32) -> (i32, i32) {
    %c0_i32 = arith.constant 0 : i32
    %c0_i32_0 = arith.constant 0 : i32
    %c0_i32_1 = arith.constant 0 : i32
    return %c0_i32, %c0_i32_0 : i32, i32
  }
  func.func @transform_3(%arg0: i32) -> (i32, i32) {
    %c0_i32 = arith.constant 0 : i32
    %c0_i32_0 = arith.constant 0 : i32
    %c0_i32_1 = arith.constant 0 : i32
    return %c0_i32, %c0_i32_0 : i32, i32
  }
  func.func @transform_4(%arg0: i32) -> (i32, i32) {
    %c0_i32 = arith.constant 0 : i32
    %c0_i32_0 = arith.constant 0 : i32
    return %arg0, %c0_i32 : i32, i32
  }
}

module attributes {stable_mosaic.version = 11 : i64} {
  func.func @_lstm_kernel(%arg0: i32, %arg1: memref<8x8x32xbf16, #tpu.memory_space<vmem>>, %arg2: memref<32x128xbf16, #tpu.memory_space<vmem>>, %arg3: memref<32x128xbf16, #tpu.memory_space<vmem>>, %arg4: memref<1x128xf32, #tpu.memory_space<vmem>>, %arg5: memref<8x8x32xf32, #tpu.memory_space<vmem>>, %arg6: memref<8x32xf32, #tpu.memory_space<vmem>>, %arg7: memref<8x32xf32, #tpu.memory_space<vmem>>) attributes {dimension_semantics = [#tpu.dimension_semantics<arbitrary>], iteration_bounds = array<i64: 1>, scalar_prefetch = 0 : i64, scratch_operands = 2 : i64, tpu.core_type = #tpu.core_type<tc>, window_params = [{transform_indices = @transform_0, window_bounds = array<i64: 8, 8, 32>}, {pipeline_mode = #tpu.pipeline_mode<synchronous>, transform_indices = @transform_1, window_bounds = array<i64: 32, 128>}, {pipeline_mode = #tpu.pipeline_mode<synchronous>, transform_indices = @transform_2, window_bounds = array<i64: 32, 128>}, {pipeline_mode = #tpu.pipeline_mode<synchronous>, transform_indices = @transform_3, window_bounds = array<i64: 1, 128>}, {transform_indices = @transform_4, window_bounds = array<i64: 8, 8, 32>}]} {
    %c0_i32 = arith.constant 0 : i32
    %0 = arith.cmpi eq, %arg0, %c0_i32 : i32
    %1 = arith.extui %0 : i1 to i32
    %c0_i32_0 = arith.constant 0 : i32
    %2 = arith.cmpi ne, %1, %c0_i32_0 : i32
    scf.if %2 {
      %cst_50 = arith.constant 0.000000e+00 : f32
      %208 = vector.broadcast %cst_50 : f32 to vector<8x32xf32>
      %c0_51 = arith.constant 0 : index
      %c0_52 = arith.constant 0 : index
      %209 = vector.load %arg6[%c0_51, %c0_52] : memref<8x32xf32, #tpu.memory_space<vmem>>, vector<8x32xf32>
      tpu.vector_store %arg6[%c0_51, %c0_52], %208 {strides = array<i32>} : memref<8x32xf32, #tpu.memory_space<vmem>>, vector<8x32xf32>,
      %cst_53 = arith.constant 0.000000e+00 : f32
      %210 = vector.broadcast %cst_53 : f32 to vector<8x32xf32>
      %c0_54 = arith.constant 0 : index
      %c0_55 = arith.constant 0 : index
      %211 = vector.load %arg7[%c0_54, %c0_55] : memref<8x32xf32, #tpu.memory_space<vmem>>, vector<8x32xf32>
      tpu.vector_store %arg7[%c0_54, %c0_55], %210 {strides = array<i32>} : memref<8x32xf32, #tpu.memory_space<vmem>>, vector<8x32xf32>,
    } else {
    }
    %c0 = arith.constant 0 : index
    %c0_1 = arith.constant 0 : index
    %c0_2 = arith.constant 0 : index
    %3 = vector.load %arg1[%c0, %c0_1, %c0_2] : memref<8x8x32xbf16, #tpu.memory_space<vmem>>, vector<8x8x32xbf16>
    %4 = vector.shape_cast %3 : vector<8x8x32xbf16> to vector<64x32xbf16>
    %c0_3 = arith.constant 0 : index
    %c0_4 = arith.constant 0 : index
    %5 = vector.load %arg2[%c0_3, %c0_4] : memref<32x128xbf16, #tpu.memory_space<vmem>>, vector<32x128xbf16>
    %cst = arith.constant dense<0.000000e+00> : vector<64x128xf32>
    %6 = tpu.matmul %4, %5, %cst {dimension_numbers = #tpu.dot_dimension_numbers<[1], [0], [0], [1], [0, 0, 1, 1], [], []>} : vector<64x32xbf16>, vector<32x128xbf16>, vector<64x128xf32> -> vector<64x128xf32>
    %c0_5 = arith.constant 0 : index
    %c0_6 = arith.constant 0 : index
    %7 = vector.load %arg4[%c0_5, %c0_6] : memref<1x128xf32, #tpu.memory_space<vmem>>, vector<1x128xf32>
    %8 = vector.broadcast %7 : vector<1x128xf32> to vector<64x128xf32>
    %9 = arith.addf %6, %8 : vector<64x128xf32>
    %10 = vector.shape_cast %9 : vector<64x128xf32> to vector<8x8x128xf32>
    %c0_7 = arith.constant 0 : index
    %c0_8 = arith.constant 0 : index
    %11 = vector.load %arg3[%c0_7, %c0_8] : memref<32x128xbf16, #tpu.memory_space<vmem>>, vector<32x128xbf16>
    %c0_9 = arith.constant 0 : index
    %c0_10 = arith.constant 0 : index
    %12 = vector.load %arg6[%c0_9, %c0_10] : memref<8x32xf32, #tpu.memory_space<vmem>>, vector<8x32xf32>
    %c0_11 = arith.constant 0 : index
    %c0_12 = arith.constant 0 : index
    %13 = vector.load %arg7[%c0_11, %c0_12] : memref<8x32xf32, #tpu.memory_space<vmem>>, vector<8x32xf32>
    %14 = arith.truncf %12 : vector<8x32xf32> to vector<8x32xbf16>
    %cst_13 = arith.constant dense<0.000000e+00> : vector<8x128xf32>
    %15 = tpu.matmul %14, %11, %cst_13 {dimension_numbers = #tpu.dot_dimension_numbers<[1], [0], [0], [1], [0, 0, 1, 1], [], []>} : vector<8x32xbf16>, vector<32x128xbf16>, vector<8x128xf32> -> vector<8x128xf32>
    %16 = vector.extract_strided_slice %10 {offsets = [0, 0, 0], sizes = [8, 1, 128], strides = [1, 1, 1]} : vector<8x8x128xf32> to vector<8x1x128xf32>
    %17 = vector.shape_cast %16 : vector<8x1x128xf32> to vector<8x128xf32>
    %18 = arith.addf %17, %15 : vector<8x128xf32>
    %19 = vector.extract_strided_slice %18 {offsets = [0, 0], sizes = [8, 96], strides = [1, 1]} : vector<8x128xf32> to vector<8x96xf32>
    %20 = arith.negf %19 : vector<8x96xf32>
    %21 = math.exp %20 : vector<8x96xf32>
    %cst_14 = arith.constant 1.000000e+00 : f32
    %22 = vector.broadcast %cst_14 : f32 to vector<8x96xf32>
    %23 = arith.addf %22, %21 : vector<8x96xf32>
    %24 = arith.divf %22, %23 : vector<8x96xf32>
    %25 = vector.extract_strided_slice %18 {offsets = [0, 96], sizes = [8, 32], strides = [1, 1]} : vector<8x128xf32> to vector<8x32xf32>
    %26 = math.tanh %25 : vector<8x32xf32>
    %27 = vector.extract_strided_slice %24 {offsets = [0, 0], sizes = [8, 32], strides = [1, 1]} : vector<8x96xf32> to vector<8x32xf32>
    %28 = vector.extract_strided_slice %24 {offsets = [0, 32], sizes = [8, 32], strides = [1, 1]} : vector<8x96xf32> to vector<8x32xf32>
    %29 = vector.extract_strided_slice %24 {offsets = [0, 64], sizes = [8, 32], strides = [1, 1]} : vector<8x96xf32> to vector<8x32xf32>
    %30 = arith.mulf %28, %13 : vector<8x32xf32>
    %31 = arith.mulf %27, %26 : vector<8x32xf32>
    %32 = arith.addf %30, %31 : vector<8x32xf32>
    %33 = math.tanh %32 : vector<8x32xf32>
    %34 = arith.mulf %29, %33 : vector<8x32xf32>
    %c0_15 = arith.constant 0 : index
    %c0_16 = arith.constant 0 : index
    %c0_17 = arith.constant 0 : index
    %35 = vector.load %arg5[%c0_15, %c0_16, %c0_17] : memref<8x8x32xf32, #tpu.memory_space<vmem>>, vector<8x1x32xf32>
    %36 = vector.shape_cast %35 : vector<8x1x32xf32> to vector<8x32xf32>
    %37 = vector.shape_cast %34 : vector<8x32xf32> to vector<8x1x32xf32>
    tpu.vector_store %arg5[%c0_15, %c0_16, %c0_17], %37 {strides = array<i32>} : memref<8x8x32xf32, #tpu.memory_space<vmem>>, vector<8x1x32xf32>,
    %38 = arith.truncf %34 : vector<8x32xf32> to vector<8x32xbf16>
    %cst_18 = arith.constant dense<0.000000e+00> : vector<8x128xf32>
    %39 = tpu.matmul %38, %11, %cst_18 {dimension_numbers = #tpu.dot_dimension_numbers<[1], [0], [0], [1], [0, 0, 1, 1], [], []>} : vector<8x32xbf16>, vector<32x128xbf16>, vector<8x128xf32> -> vector<8x128xf32>
    %40 = vector.extract_strided_slice %10 {offsets = [0, 1, 0], sizes = [8, 1, 128], strides = [1, 1, 1]} : vector<8x8x128xf32> to vector<8x1x128xf32>
    %41 = vector.shape_cast %40 : vector<8x1x128xf32> to vector<8x128xf32>
    %42 = arith.addf %41, %39 : vector<8x128xf32>
    %43 = vector.extract_strided_slice %42 {offsets = [0, 0], sizes = [8, 96], strides = [1, 1]} : vector<8x128xf32> to vector<8x96xf32>
    %44 = arith.negf %43 : vector<8x96xf32>
    %45 = math.exp %44 : vector<8x96xf32>
    %cst_19 = arith.constant 1.000000e+00 : f32
    %46 = vector.broadcast %cst_19 : f32 to vector<8x96xf32>
    %47 = arith.addf %46, %45 : vector<8x96xf32>
    %48 = arith.divf %46, %47 : vector<8x96xf32>
    %49 = vector.extract_strided_slice %42 {offsets = [0, 96], sizes = [8, 32], strides = [1, 1]} : vector<8x128xf32> to vector<8x32xf32>
    %50 = math.tanh %49 : vector<8x32xf32>
    %51 = vector.extract_strided_slice %48 {offsets = [0, 0], sizes = [8, 32], strides = [1, 1]} : vector<8x96xf32> to vector<8x32xf32>
    %52 = vector.extract_strided_slice %48 {offsets = [0, 32], sizes = [8, 32], strides = [1, 1]} : vector<8x96xf32> to vector<8x32xf32>
    %53 = vector.extract_strided_slice %48 {offsets = [0, 64], sizes = [8, 32], strides = [1, 1]} : vector<8x96xf32> to vector<8x32xf32>
    %54 = arith.mulf %52, %32 : vector<8x32xf32>
    %55 = arith.mulf %51, %50 : vector<8x32xf32>
    %56 = arith.addf %54, %55 : vector<8x32xf32>
    %57 = math.tanh %56 : vector<8x32xf32>
    %58 = arith.mulf %53, %57 : vector<8x32xf32>
    %c0_20 = arith.constant 0 : index
    %c1 = arith.constant 1 : index
    %c0_21 = arith.constant 0 : index
    %59 = vector.load %arg5[%c0_20, %c1, %c0_21] : memref<8x8x32xf32, #tpu.memory_space<vmem>>, vector<8x1x32xf32>
    %60 = vector.shape_cast %59 : vector<8x1x32xf32> to vector<8x32xf32>
    %61 = vector.shape_cast %58 : vector<8x32xf32> to vector<8x1x32xf32>
    tpu.vector_store %arg5[%c0_20, %c1, %c0_21], %61 {strides = array<i32>} : memref<8x8x32xf32, #tpu.memory_space<vmem>>, vector<8x1x32xf32>,
    %62 = arith.truncf %58 : vector<8x32xf32> to vector<8x32xbf16>
    %cst_22 = arith.constant dense<0.000000e+00> : vector<8x128xf32>
    %63 = tpu.matmul %62, %11, %cst_22 {dimension_numbers = #tpu.dot_dimension_numbers<[1], [0], [0], [1], [0, 0, 1, 1], [], []>} : vector<8x32xbf16>, vector<32x128xbf16>, vector<8x128xf32> -> vector<8x128xf32>
    %64 = vector.extract_strided_slice %10 {offsets = [0, 2, 0], sizes = [8, 1, 128], strides = [1, 1, 1]} : vector<8x8x128xf32> to vector<8x1x128xf32>
    %65 = vector.shape_cast %64 : vector<8x1x128xf32> to vector<8x128xf32>
    %66 = arith.addf %65, %63 : vector<8x128xf32>
    %67 = vector.extract_strided_slice %66 {offsets = [0, 0], sizes = [8, 96], strides = [1, 1]} : vector<8x128xf32> to vector<8x96xf32>
    %68 = arith.negf %67 : vector<8x96xf32>
    %69 = math.exp %68 : vector<8x96xf32>
    %cst_23 = arith.constant 1.000000e+00 : f32
    %70 = vector.broadcast %cst_23 : f32 to vector<8x96xf32>
    %71 = arith.addf %70, %69 : vector<8x96xf32>
    %72 = arith.divf %70, %71 : vector<8x96xf32>
    %73 = vector.extract_strided_slice %66 {offsets = [0, 96], sizes = [8, 32], strides = [1, 1]} : vector<8x128xf32> to vector<8x32xf32>
    %74 = math.tanh %73 : vector<8x32xf32>
    %75 = vector.extract_strided_slice %72 {offsets = [0, 0], sizes = [8, 32], strides = [1, 1]} : vector<8x96xf32> to vector<8x32xf32>
    %76 = vector.extract_strided_slice %72 {offsets = [0, 32], sizes = [8, 32], strides = [1, 1]} : vector<8x96xf32> to vector<8x32xf32>
    %77 = vector.extract_strided_slice %72 {offsets = [0, 64], sizes = [8, 32], strides = [1, 1]} : vector<8x96xf32> to vector<8x32xf32>
    %78 = arith.mulf %76, %56 : vector<8x32xf32>
    %79 = arith.mulf %75, %74 : vector<8x32xf32>
    %80 = arith.addf %78, %79 : vector<8x32xf32>
    %81 = math.tanh %80 : vector<8x32xf32>
    %82 = arith.mulf %77, %81 : vector<8x32xf32>
    %c0_24 = arith.constant 0 : index
    %c2 = arith.constant 2 : index
    %c0_25 = arith.constant 0 : index
    %83 = vector.load %arg5[%c0_24, %c2, %c0_25] : memref<8x8x32xf32, #tpu.memory_space<vmem>>, vector<8x1x32xf32>
    %84 = vector.shape_cast %83 : vector<8x1x32xf32> to vector<8x32xf32>
    %85 = vector.shape_cast %82 : vector<8x32xf32> to vector<8x1x32xf32>
    tpu.vector_store %arg5[%c0_24, %c2, %c0_25], %85 {strides = array<i32>} : memref<8x8x32xf32, #tpu.memory_space<vmem>>, vector<8x1x32xf32>,
    %86 = arith.truncf %82 : vector<8x32xf32> to vector<8x32xbf16>
    %cst_26 = arith.constant dense<0.000000e+00> : vector<8x128xf32>
    %87 = tpu.matmul %86, %11, %cst_26 {dimension_numbers = #tpu.dot_dimension_numbers<[1], [0], [0], [1], [0, 0, 1, 1], [], []>} : vector<8x32xbf16>, vector<32x128xbf16>, vector<8x128xf32> -> vector<8x128xf32>
    %88 = vector.extract_strided_slice %10 {offsets = [0, 3, 0], sizes = [8, 1, 128], strides = [1, 1, 1]} : vector<8x8x128xf32> to vector<8x1x128xf32>
    %89 = vector.shape_cast %88 : vector<8x1x128xf32> to vector<8x128xf32>
    %90 = arith.addf %89, %87 : vector<8x128xf32>
    %91 = vector.extract_strided_slice %90 {offsets = [0, 0], sizes = [8, 96], strides = [1, 1]} : vector<8x128xf32> to vector<8x96xf32>
    %92 = arith.negf %91 : vector<8x96xf32>
    %93 = math.exp %92 : vector<8x96xf32>
    %cst_27 = arith.constant 1.000000e+00 : f32
    %94 = vector.broadcast %cst_27 : f32 to vector<8x96xf32>
    %95 = arith.addf %94, %93 : vector<8x96xf32>
    %96 = arith.divf %94, %95 : vector<8x96xf32>
    %97 = vector.extract_strided_slice %90 {offsets = [0, 96], sizes = [8, 32], strides = [1, 1]} : vector<8x128xf32> to vector<8x32xf32>
    %98 = math.tanh %97 : vector<8x32xf32>
    %99 = vector.extract_strided_slice %96 {offsets = [0, 0], sizes = [8, 32], strides = [1, 1]} : vector<8x96xf32> to vector<8x32xf32>
    %100 = vector.extract_strided_slice %96 {offsets = [0, 32], sizes = [8, 32], strides = [1, 1]} : vector<8x96xf32> to vector<8x32xf32>
    %101 = vector.extract_strided_slice %96 {offsets = [0, 64], sizes = [8, 32], strides = [1, 1]} : vector<8x96xf32> to vector<8x32xf32>
    %102 = arith.mulf %100, %80 : vector<8x32xf32>
    %103 = arith.mulf %99, %98 : vector<8x32xf32>
    %104 = arith.addf %102, %103 : vector<8x32xf32>
    %105 = math.tanh %104 : vector<8x32xf32>
    %106 = arith.mulf %101, %105 : vector<8x32xf32>
    %c0_28 = arith.constant 0 : index
    %c3 = arith.constant 3 : index
    %c0_29 = arith.constant 0 : index
    %107 = vector.load %arg5[%c0_28, %c3, %c0_29] : memref<8x8x32xf32, #tpu.memory_space<vmem>>, vector<8x1x32xf32>
    %108 = vector.shape_cast %107 : vector<8x1x32xf32> to vector<8x32xf32>
    %109 = vector.shape_cast %106 : vector<8x32xf32> to vector<8x1x32xf32>
    tpu.vector_store %arg5[%c0_28, %c3, %c0_29], %109 {strides = array<i32>} : memref<8x8x32xf32, #tpu.memory_space<vmem>>, vector<8x1x32xf32>,
    %110 = arith.truncf %106 : vector<8x32xf32> to vector<8x32xbf16>
    %cst_30 = arith.constant dense<0.000000e+00> : vector<8x128xf32>
    %111 = tpu.matmul %110, %11, %cst_30 {dimension_numbers = #tpu.dot_dimension_numbers<[1], [0], [0], [1], [0, 0, 1, 1], [], []>} : vector<8x32xbf16>, vector<32x128xbf16>, vector<8x128xf32> -> vector<8x128xf32>
    %112 = vector.extract_strided_slice %10 {offsets = [0, 4, 0], sizes = [8, 1, 128], strides = [1, 1, 1]} : vector<8x8x128xf32> to vector<8x1x128xf32>
    %113 = vector.shape_cast %112 : vector<8x1x128xf32> to vector<8x128xf32>
    %114 = arith.addf %113, %111 : vector<8x128xf32>
    %115 = vector.extract_strided_slice %114 {offsets = [0, 0], sizes = [8, 96], strides = [1, 1]} : vector<8x128xf32> to vector<8x96xf32>
    %116 = arith.negf %115 : vector<8x96xf32>
    %117 = math.exp %116 : vector<8x96xf32>
    %cst_31 = arith.constant 1.000000e+00 : f32
    %118 = vector.broadcast %cst_31 : f32 to vector<8x96xf32>
    %119 = arith.addf %118, %117 : vector<8x96xf32>
    %120 = arith.divf %118, %119 : vector<8x96xf32>
    %121 = vector.extract_strided_slice %114 {offsets = [0, 96], sizes = [8, 32], strides = [1, 1]} : vector<8x128xf32> to vector<8x32xf32>
    %122 = math.tanh %121 : vector<8x32xf32>
    %123 = vector.extract_strided_slice %120 {offsets = [0, 0], sizes = [8, 32], strides = [1, 1]} : vector<8x96xf32> to vector<8x32xf32>
    %124 = vector.extract_strided_slice %120 {offsets = [0, 32], sizes = [8, 32], strides = [1, 1]} : vector<8x96xf32> to vector<8x32xf32>
    %125 = vector.extract_strided_slice %120 {offsets = [0, 64], sizes = [8, 32], strides = [1, 1]} : vector<8x96xf32> to vector<8x32xf32>
    %126 = arith.mulf %124, %104 : vector<8x32xf32>
    %127 = arith.mulf %123, %122 : vector<8x32xf32>
    %128 = arith.addf %126, %127 : vector<8x32xf32>
    %129 = math.tanh %128 : vector<8x32xf32>
    %130 = arith.mulf %125, %129 : vector<8x32xf32>
    %c0_32 = arith.constant 0 : index
    %c4 = arith.constant 4 : index
    %c0_33 = arith.constant 0 : index
    %131 = vector.load %arg5[%c0_32, %c4, %c0_33] : memref<8x8x32xf32, #tpu.memory_space<vmem>>, vector<8x1x32xf32>
    %132 = vector.shape_cast %131 : vector<8x1x32xf32> to vector<8x32xf32>
    %133 = vector.shape_cast %130 : vector<8x32xf32> to vector<8x1x32xf32>
    tpu.vector_store %arg5[%c0_32, %c4, %c0_33], %133 {strides = array<i32>} : memref<8x8x32xf32, #tpu.memory_space<vmem>>, vector<8x1x32xf32>,
    %134 = arith.truncf %130 : vector<8x32xf32> to vector<8x32xbf16>
    %cst_34 = arith.constant dense<0.000000e+00> : vector<8x128xf32>
    %135 = tpu.matmul %134, %11, %cst_34 {dimension_numbers = #tpu.dot_dimension_numbers<[1], [0], [0], [1], [0, 0, 1, 1], [], []>} : vector<8x32xbf16>, vector<32x128xbf16>, vector<8x128xf32> -> vector<8x128xf32>
    %136 = vector.extract_strided_slice %10 {offsets = [0, 5, 0], sizes = [8, 1, 128], strides = [1, 1, 1]} : vector<8x8x128xf32> to vector<8x1x128xf32>
    %137 = vector.shape_cast %136 : vector<8x1x128xf32> to vector<8x128xf32>
    %138 = arith.addf %137, %135 : vector<8x128xf32>
    %139 = vector.extract_strided_slice %138 {offsets = [0, 0], sizes = [8, 96], strides = [1, 1]} : vector<8x128xf32> to vector<8x96xf32>
    %140 = arith.negf %139 : vector<8x96xf32>
    %141 = math.exp %140 : vector<8x96xf32>
    %cst_35 = arith.constant 1.000000e+00 : f32
    %142 = vector.broadcast %cst_35 : f32 to vector<8x96xf32>
    %143 = arith.addf %142, %141 : vector<8x96xf32>
    %144 = arith.divf %142, %143 : vector<8x96xf32>
    %145 = vector.extract_strided_slice %138 {offsets = [0, 96], sizes = [8, 32], strides = [1, 1]} : vector<8x128xf32> to vector<8x32xf32>
    %146 = math.tanh %145 : vector<8x32xf32>
    %147 = vector.extract_strided_slice %144 {offsets = [0, 0], sizes = [8, 32], strides = [1, 1]} : vector<8x96xf32> to vector<8x32xf32>
    %148 = vector.extract_strided_slice %144 {offsets = [0, 32], sizes = [8, 32], strides = [1, 1]} : vector<8x96xf32> to vector<8x32xf32>
    %149 = vector.extract_strided_slice %144 {offsets = [0, 64], sizes = [8, 32], strides = [1, 1]} : vector<8x96xf32> to vector<8x32xf32>
    %150 = arith.mulf %148, %128 : vector<8x32xf32>
    %151 = arith.mulf %147, %146 : vector<8x32xf32>
    %152 = arith.addf %150, %151 : vector<8x32xf32>
    %153 = math.tanh %152 : vector<8x32xf32>
    %154 = arith.mulf %149, %153 : vector<8x32xf32>
    %c0_36 = arith.constant 0 : index
    %c5 = arith.constant 5 : index
    %c0_37 = arith.constant 0 : index
    %155 = vector.load %arg5[%c0_36, %c5, %c0_37] : memref<8x8x32xf32, #tpu.memory_space<vmem>>, vector<8x1x32xf32>
    %156 = vector.shape_cast %155 : vector<8x1x32xf32> to vector<8x32xf32>
    %157 = vector.shape_cast %154 : vector<8x32xf32> to vector<8x1x32xf32>
    tpu.vector_store %arg5[%c0_36, %c5, %c0_37], %157 {strides = array<i32>} : memref<8x8x32xf32, #tpu.memory_space<vmem>>, vector<8x1x32xf32>,
    %158 = arith.truncf %154 : vector<8x32xf32> to vector<8x32xbf16>
    %cst_38 = arith.constant dense<0.000000e+00> : vector<8x128xf32>
    %159 = tpu.matmul %158, %11, %cst_38 {dimension_numbers = #tpu.dot_dimension_numbers<[1], [0], [0], [1], [0, 0, 1, 1], [], []>} : vector<8x32xbf16>, vector<32x128xbf16>, vector<8x128xf32> -> vector<8x128xf32>
    %160 = vector.extract_strided_slice %10 {offsets = [0, 6, 0], sizes = [8, 1, 128], strides = [1, 1, 1]} : vector<8x8x128xf32> to vector<8x1x128xf32>
    %161 = vector.shape_cast %160 : vector<8x1x128xf32> to vector<8x128xf32>
    %162 = arith.addf %161, %159 : vector<8x128xf32>
    %163 = vector.extract_strided_slice %162 {offsets = [0, 0], sizes = [8, 96], strides = [1, 1]} : vector<8x128xf32> to vector<8x96xf32>
    %164 = arith.negf %163 : vector<8x96xf32>
    %165 = math.exp %164 : vector<8x96xf32>
    %cst_39 = arith.constant 1.000000e+00 : f32
    %166 = vector.broadcast %cst_39 : f32 to vector<8x96xf32>
    %167 = arith.addf %166, %165 : vector<8x96xf32>
    %168 = arith.divf %166, %167 : vector<8x96xf32>
    %169 = vector.extract_strided_slice %162 {offsets = [0, 96], sizes = [8, 32], strides = [1, 1]} : vector<8x128xf32> to vector<8x32xf32>
    %170 = math.tanh %169 : vector<8x32xf32>
    %171 = vector.extract_strided_slice %168 {offsets = [0, 0], sizes = [8, 32], strides = [1, 1]} : vector<8x96xf32> to vector<8x32xf32>
    %172 = vector.extract_strided_slice %168 {offsets = [0, 32], sizes = [8, 32], strides = [1, 1]} : vector<8x96xf32> to vector<8x32xf32>
    %173 = vector.extract_strided_slice %168 {offsets = [0, 64], sizes = [8, 32], strides = [1, 1]} : vector<8x96xf32> to vector<8x32xf32>
    %174 = arith.mulf %172, %152 : vector<8x32xf32>
    %175 = arith.mulf %171, %170 : vector<8x32xf32>
    %176 = arith.addf %174, %175 : vector<8x32xf32>
    %177 = math.tanh %176 : vector<8x32xf32>
    %178 = arith.mulf %173, %177 : vector<8x32xf32>
    %c0_40 = arith.constant 0 : index
    %c6 = arith.constant 6 : index
    %c0_41 = arith.constant 0 : index
    %179 = vector.load %arg5[%c0_40, %c6, %c0_41] : memref<8x8x32xf32, #tpu.memory_space<vmem>>, vector<8x1x32xf32>
    %180 = vector.shape_cast %179 : vector<8x1x32xf32> to vector<8x32xf32>
    %181 = vector.shape_cast %178 : vector<8x32xf32> to vector<8x1x32xf32>
    tpu.vector_store %arg5[%c0_40, %c6, %c0_41], %181 {strides = array<i32>} : memref<8x8x32xf32, #tpu.memory_space<vmem>>, vector<8x1x32xf32>,
    %182 = arith.truncf %178 : vector<8x32xf32> to vector<8x32xbf16>
    %cst_42 = arith.constant dense<0.000000e+00> : vector<8x128xf32>
    %183 = tpu.matmul %182, %11, %cst_42 {dimension_numbers = #tpu.dot_dimension_numbers<[1], [0], [0], [1], [0, 0, 1, 1], [], []>} : vector<8x32xbf16>, vector<32x128xbf16>, vector<8x128xf32> -> vector<8x128xf32>
    %184 = vector.extract_strided_slice %10 {offsets = [0, 7, 0], sizes = [8, 1, 128], strides = [1, 1, 1]} : vector<8x8x128xf32> to vector<8x1x128xf32>
    %185 = vector.shape_cast %184 : vector<8x1x128xf32> to vector<8x128xf32>
    %186 = arith.addf %185, %183 : vector<8x128xf32>
    %187 = vector.extract_strided_slice %186 {offsets = [0, 0], sizes = [8, 96], strides = [1, 1]} : vector<8x128xf32> to vector<8x96xf32>
    %188 = arith.negf %187 : vector<8x96xf32>
    %189 = math.exp %188 : vector<8x96xf32>
    %cst_43 = arith.constant 1.000000e+00 : f32
    %190 = vector.broadcast %cst_43 : f32 to vector<8x96xf32>
    %191 = arith.addf %190, %189 : vector<8x96xf32>
    %192 = arith.divf %190, %191 : vector<8x96xf32>
    %193 = vector.extract_strided_slice %186 {offsets = [0, 96], sizes = [8, 32], strides = [1, 1]} : vector<8x128xf32> to vector<8x32xf32>
    %194 = math.tanh %193 : vector<8x32xf32>
    %195 = vector.extract_strided_slice %192 {offsets = [0, 0], sizes = [8, 32], strides = [1, 1]} : vector<8x96xf32> to vector<8x32xf32>
    %196 = vector.extract_strided_slice %192 {offsets = [0, 32], sizes = [8, 32], strides = [1, 1]} : vector<8x96xf32> to vector<8x32xf32>
    %197 = vector.extract_strided_slice %192 {offsets = [0, 64], sizes = [8, 32], strides = [1, 1]} : vector<8x96xf32> to vector<8x32xf32>
    %198 = arith.mulf %196, %176 : vector<8x32xf32>
    %199 = arith.mulf %195, %194 : vector<8x32xf32>
    %200 = arith.addf %198, %199 : vector<8x32xf32>
    %201 = math.tanh %200 : vector<8x32xf32>
    %202 = arith.mulf %197, %201 : vector<8x32xf32>
    %c0_44 = arith.constant 0 : index
    %c7 = arith.constant 7 : index
    %c0_45 = arith.constant 0 : index
    %203 = vector.load %arg5[%c0_44, %c7, %c0_45] : memref<8x8x32xf32, #tpu.memory_space<vmem>>, vector<8x1x32xf32>
    %204 = vector.shape_cast %203 : vector<8x1x32xf32> to vector<8x32xf32>
    %205 = vector.shape_cast %202 : vector<8x32xf32> to vector<8x1x32xf32>
    tpu.vector_store %arg5[%c0_44, %c7, %c0_45], %205 {strides = array<i32>} : memref<8x8x32xf32, #tpu.memory_space<vmem>>, vector<8x1x32xf32>,
    %c0_46 = arith.constant 0 : index
    %c0_47 = arith.constant 0 : index
    %206 = vector.load %arg6[%c0_46, %c0_47] : memref<8x32xf32, #tpu.memory_space<vmem>>, vector<8x32xf32>
    tpu.vector_store %arg6[%c0_46, %c0_47], %202 {strides = array<i32>} : memref<8x32xf32, #tpu.memory_space<vmem>>, vector<8x32xf32>,
    %c0_48 = arith.constant 0 : index
    %c0_49 = arith.constant 0 : index
    %207 = vector.load %arg7[%c0_48, %c0_49] : memref<8x32xf32, #tpu.memory_space<vmem>>, vector<8x32xf32>
    tpu.vector_store %arg7[%c0_48, %c0_49], %200 {strides = array<i32>} : memref<8x32xf32, #tpu.memory_space<vmem>>, vector<8x32xf32>,
    return
  }
  func.func @transform_0(%arg0: i32) -> (i32, i32, i32) {
    %c0_i32 = arith.constant 0 : i32
    %c0_i32_0 = arith.constant 0 : i32
    %c0_i32_1 = arith.constant 0 : i32
    return %c0_i32, %arg0, %c0_i32_0 : i32, i32, i32
  }
  func.func @transform_1(%arg0: i32) -> (i32, i32) {
    %c0_i32 = arith.constant 0 : i32
    %c0_i32_0 = arith.constant 0 : i32
    %c0_i32_1 = arith.constant 0 : i32
    return %c0_i32, %c0_i32_0 : i32, i32
  }
  func.func @transform_2(%arg0: i32) -> (i32, i32) {
    %c0_i32 = arith.constant 0 : i32
    %c0_i32_0 = arith.constant 0 : i32
    %c0_i32_1 = arith.constant 0 : i32
    return %c0_i32, %c0_i32_0 : i32, i32
  }
  func.func @transform_3(%arg0: i32) -> (i32, i32) {
    %c0_i32 = arith.constant 0 : i32
    %c0_i32_0 = arith.constant 0 : i32
    %c0_i32_1 = arith.constant 0 : i32
    return %c0_i32, %c0_i32_0 : i32, i32
  }
  func.func @transform_4(%arg0: i32) -> (i32, i32, i32) {
    %c0_i32 = arith.constant 0 : i32
    %c0_i32_0 = arith.constant 0 : i32
    %c0_i32_1 = arith.constant 0 : i32
    return %c0_i32, %arg0, %c0_i32_0 : i32, i32, i32
  }
}

</mosaic_0001>

<bundles_post_ra>
// kernel: qa_forward.5
= control target key start
LH: loop header
LB: loop body
LE: loop exit
PB: predicated region body
PF: predicated region fallthrough
CT: control target
= control target key end

     0   :  { %v2517_v0 = vmov 0.0   ;;  %vm60_vm0 = vcmask 261120   ;;  %vm2518_vm1 = vmmov 0   ;;  %vm437_vm2 = vcmask 64512   ;;  %s3114_s1 = inlined_call_operand.vmem [shape: f32[8,8,32], index: 1, kind: input, shape index: {}]   ;;  %s3115_s0 = inlined_call_operand.vmem [shape: f32[8,16,32], index: 0, kind: input, shape index: {}]   ;;  %s3116_s2 = inlined_call_operand.vmem [shape: f32[64,1], index: 2, kind: input, shape index: {}]   ;;  %s3117_s3 = inlined_call_operand.<no memory space> [shape: f32[1,1], index: 3, kind: input, shape index: {}]   ;;  %s3118_s4 = inlined_call_operand.vmem [shape: f32[8,1], index: 4, kind: output, shape index: {}]  }
   0x1   :  { %2192 = vmatprep.subr.bf16.mxu0 %v2517_v0  ;;  %2198 = vmatprep.subr.bf16.mxu1 %v2517_v0  ;;  %v44_v1 = vld [vmem:[%s3114_s1] sm:$0xff]  ;;  %v45_v2 = vld [vmem:[%s3114_s1 + $0x8] sm:$0xff]  ;;  %v46_v5 = vld [vmem:[%s3114_s1 + $0x10] sm:$0xff]  ;;  %vm625_vm3 = vcmask 1043456   ;;  %vm1896_vm4 = vcmask 1041409   ;;  %vm1898_vm5 = vcmask 1042434  }
   0x2   :  { %v2553_v3 = vpack.c.bf16 %v44_v1, %v44_v1  ;;  %v2555_v4 = vpack.c.bf16 %v45_v2, %v45_v2  ;;  %2194 = vmatprep.mubr.msk.bf16.mxu0 %vm2518_vm1, %v2517_v0  ;;  %2200 = vmatprep.mubr.msk.bf16.mxu1 %vm2518_vm1, %v2517_v0  ;;  %v47_v6 = vld [vmem:[%s3114_s1 + $0x18] sm:$0xff]  ;;  %v20_v9 = vld [vmem:[%s3115_s0] sm:$0xff]  ;;  %v21_v10 = vld [vmem:[%s3115_s0 + $0x8] sm:$0xff]  ;;  %v2584_v13 = vpack.c.bf16 %v46_v5, %v46_v5  ;;  %vm1900_vm6 = vcmask 1043459  }
   0x3   :  { %v22_v11 = vld [vmem:[%s3115_s0 + $0x10] sm:$0xff]  ;;  %v23_v12 = vld [vmem:[%s3115_s0 + $0x18] sm:$0xff]  ;;  %v2587_v14 = vpack.c.bf16 %v47_v6, %v47_v6  ;;  %v2589_v15 = vpack.c.bf16 %v21_v10, %v20_v9  ;;  %v48_v19 = vld [vmem:[%s3114_s1 + $0x20] sm:$0xff]  ;;  %vm1902_vm7 = vcmask 1044484   ;;  %vm1311_vm8 = vcmask 130048  }
   0x4   :  { %v65_v7 = vsel %vm60_vm0, %v2553_v3, 0  ;;  %v112_v8 = vsel %vm60_vm0, %v2555_v4, 0  ;;  %v2591_v16 = vpack.c.bf16 %v23_v12, %v22_v11  ;;  %v159_v17 = vsel %vm60_vm0, %v2584_v13, 0  ;;  %v49_v20 = vld [vmem:[%s3114_s1 + $0x28] sm:$0xff]  ;;  %v24_v21 = vld [vmem:[%s3115_s0 + $0x20] sm:$0xff]  ;;  %v26_v23 = vld [vmem:[%s3115_s0 + $0x30] sm:$0xff] }
   0x5   :  { %2193 = vmatpush3.bf16.xpose.msra.mxu0 %v65_v7  ;;  %2199 = vmatpush3.bf16.xpose.msra.mxu1 %v112_v8  ;;  %v206_v18 = vsel %vm60_vm0, %v2587_v14, 0  ;;  %v25_v22 = vld [vmem:[%s3115_s0 + $0x28] sm:$0xff]  ;;  %v27_v24 = vld [vmem:[%s3115_s0 + $0x38] sm:$0xff]  ;;  %v2622_v25 = vpack.c.bf16 %v48_v19, %v48_v19  ;;  %v2624_v26 = vpack.c.bf16 %v49_v20, %v49_v20  ;;  %v50_v31 = vld [vmem:[%s3114_s1 + $0x30] sm:$0xff]  ;;  %vm1904_vm9 = vcmask 1045509  }
   0x6   :  { %2204 = vmatprep.subr.bf16.mxu0 %v2517_v0  ;;  %2210 = vmatprep.subr.bf16.mxu1 %v2517_v0  ;;  %v2629_v27 = vpack.c.bf16 %v25_v22, %v24_v21  ;;  %v2631_v28 = vpack.c.bf16 %v27_v24, %v26_v23  ;;  %v51_v32 = vld [vmem:[%s3114_s1 + $0x38] sm:$0xff]  ;;  %v28_v33 = vld [vmem:[%s3115_s0 + $0x40] sm:$0xff]  ;;  %v29_v34 = vld [vmem:[%s3115_s0 + $0x48] sm:$0xff]  ;;  %v2662_v37 = vpack.c.bf16 %v50_v31, %v50_v31  ;;  %vm1906_vm10 = vcmask 1046534  }
   0x7   :  { %v253_v29 = vsel %vm60_vm0, %v2622_v25, 0  ;;  %v300_v30 = vsel %vm60_vm0, %v2624_v26, 0  ;;  %v30_v35 = vld [vmem:[%s3115_s0 + $0x50] sm:$0xff]  ;;  %v31_v36 = vld [vmem:[%s3115_s0 + $0x58] sm:$0xff]  ;;  %v2664_v38 = vpack.c.bf16 %v51_v32, %v51_v32  ;;  %v2669_v39 = vpack.c.bf16 %v29_v34, %v28_v33  ;;  %v32_v43 = vld [vmem:[%s3115_s0 + $0x60] sm:$0xff] }
   0x8   :  { %v2671_v40 = vpack.c.bf16 %v31_v36, %v30_v35  ;;  %v347_v41 = vsel %vm60_vm0, %v2662_v37, 0  ;;  %v33_v44 = vld [vmem:[%s3115_s0 + $0x68] sm:$0xff]  ;;  %v34_v45 = vld [vmem:[%s3115_s0 + $0x70] sm:$0xff]  ;;  %v35_v46 = vld [vmem:[%s3115_s0 + $0x78] sm:$0xff]  ;;  %vm1908_vm11 = vcmask 1047559   ;;  %vm2077_vm12 = vcmask 7168  }
   0x9   :  { %v394_v42 = vsel %vm60_vm0, %v2664_v38, 0  ;;  %v2699_v47 = vpack.c.bf16 %v33_v44, %v32_v43  ;;  %v2701_v48 = vpack.c.bf16 %v35_v46, %v34_v45 }
   0xc   :  { %2195 = vmatmul.mubr.msk.bf16.vlgmr.msra.gmra.mrb[0].mxu0 %vm60_vm0, %v2589_v15  ;;  %2201 = vmatmul.mubr.msk.bf16.vlgmr.msra.gmra.mrb[0].mxu1 %vm60_vm0, %v2591_v16 }
   0xd   :  { %2205 = vmatpush3.bf16.xpose.msra.mxu0 %v159_v17  ;;  %2211 = vmatpush3.bf16.xpose.msra.mxu1 %v206_v18 }
   0xe   :  { %2206 = vmatprep.mubr.msk.bf16.mxu0 %vm2518_vm1, %v2517_v0  ;;  %2216 = vmatprep.subr.bf16.mxu0 %v2517_v0 }
   0xf   :  { %2212 = vmatprep.mubr.msk.bf16.mxu1 %vm2518_vm1, %v2517_v0  ;;  %2222 = vmatprep.subr.bf16.mxu1 %v2517_v0 }
  0x14   :  { %2207 = vmatmul.mubr.msk.bf16.vlgmr.msra.gmra.mrb[4].mxu0 %vm60_vm0, %v2629_v27  ;;  %2213 = vmatmul.mubr.msk.bf16.vlgmr.msra.gmra.mrb[4].mxu1 %vm60_vm0, %v2631_v28 }
  0x15   :  { %2217 = vmatpush3.bf16.xpose.msra.mxu0 %v253_v29  ;;  %2223 = vmatpush3.bf16.xpose.msra.mxu1 %v300_v30 }
  0x16   :  { %2218 = vmatprep.mubr.msk.bf16.mxu0 %vm2518_vm1, %v2517_v0  ;;  %2228 = vmatprep.subr.bf16.mxu0 %v2517_v0 }
  0x17   :  { %2224 = vmatprep.mubr.msk.bf16.mxu1 %vm2518_vm1, %v2517_v0  ;;  %2234 = vmatprep.subr.bf16.mxu1 %v2517_v0 }
  0x1c   :  { %2219 = vmatmul.mubr.msk.bf16.vlgmr.msra.gmra.mrb[8].mxu0 %vm60_vm0, %v2669_v39  ;;  %2225 = vmatmul.mubr.msk.bf16.vlgmr.msra.gmra.mrb[8].mxu1 %vm60_vm0, %v2671_v40 }
  0x1d   :  { %2229 = vmatpush3.bf16.xpose.msra.mxu0 %v347_v41  ;;  %2235 = vmatpush3.bf16.xpose.msra.mxu1 %v394_v42 }
  0x1e   :  { %2230 = vmatprep.mubr.msk.bf16.mxu0 %vm2518_vm1, %v2517_v0  ;;  %2236 = vmatprep.mubr.msk.bf16.mxu1 %vm2518_vm1, %v2517_v0 }
  0x1f   :  { %2240 = vmatprep.subr.bf16.mxu0 %v2517_v0  ;;  %2246 = vmatprep.subr.bf16.mxu1 %v2517_v0 }
  0x24   :  { %2231 = vmatmul.mubr.msk.bf16.vlgmr.msra.gmra.mrb[12].mxu0 %vm60_vm0, %v2699_v47  ;;  %2237 = vmatmul.mubr.msk.bf16.vlgmr.msra.gmra.mrb[12].mxu1 %vm60_vm0, %v2701_v48 }
  0x25   :  { %2242 = vmatprep.mubr.msk.bf16.mxu0 %vm2518_vm1, %v2517_v0  ;;  %2248 = vmatprep.mubr.msk.bf16.mxu1 %vm2518_vm1, %v2517_v0 }
  0xdf   :  { %v2711_v49 = vpop.f32.mrb[0].mxu0  ;;  %v2713_v50 = vpop.f32.mrb[0].mxu1 }
  0xe0   :  { %v2196_v51 = vpop.f32.mrb[1].mxu0  ;;  %v444_v52 = vsel %vm437_vm2, %v2713_v50, -inf  ;;  %v2202_v53 = vpop.f32.mrb[1].mxu1  ;;  %v438_v54 = vsel %vm437_vm2, %v2711_v49, -inf }
  0xe1   :  { %445 = vmax.xlane.f32.xlu1 %v444_v52  ;;  %439 = vmax.xlane.f32.xlu0 %v438_v54  ;;  %v2719_v55 = vpop.f32.mrb[2].mxu0  ;;  %v2721_v56 = vpop.f32.mrb[2].mxu1 }
  0xe2   :  { %v2197_v57 = vpop.f32.mrb[3].mxu0  ;;  %v2203_v58 = vpop.f32.mrb[3].mxu1  ;;  %v447_v59 = vsel %vm437_vm2, %v2721_v56, -inf  ;;  %v441_v60 = vsel %vm437_vm2, %v2719_v55, -inf }
  0xe5   :  { %448 = vmax.xlane.f32.xlu1 %v447_v59  ;;  %442 = vmax.xlane.f32.xlu0 %v441_v60 }
  0xe7   :  { %v2727_v61 = vpop.f32.mrb[4].mxu0  ;;  %v2729_v62 = vpop.f32.mrb[4].mxu1 }
  0xe8   :  { %v2208_v63 = vpop.f32.mrb[5].mxu0  ;;  %v450_v1 = vsel %vm437_vm2, %v2727_v61, -inf  ;;  %v2214_v2 = vpop.f32.mrb[5].mxu1  ;;  %v456_v10 = vsel %vm437_vm2, %v2729_v62, -inf }
  0xe9   :  { %451 = vmax.xlane.f32.xlu0 %v450_v1  ;;  %v2733_v5 = vpop.f32.mrb[6].mxu0  ;;  %v2735_v6 = vpop.f32.mrb[6].mxu1 }
  0xea   :  { %v2209_v7 = vpop.f32.mrb[7].mxu0  ;;  %v453_v8 = vsel %vm437_vm2, %v2733_v5, -inf  ;;  %v2215_v9 = vpop.f32.mrb[7].mxu1  ;;  %v459_v11 = vsel %vm437_vm2, %v2735_v6, -inf }
  0xeb   :  { %454 = vmax.xlane.f32.xlu1 %v453_v8 }
  0xed   :  { %457 = vmax.xlane.f32.xlu0 %v456_v10 }
  0xef   :  { %460 = vmax.xlane.f32.xlu1 %v459_v11  ;;  %v2743_v12 = vpop.f32.mrb[8].mxu0  ;;  %v2745_v17 = vpop.f32.mrb[8].mxu1 }
  0xf0   :  { %v2220_v18 = vpop.f32.mrb[9].mxu0  ;;  %v462_v19 = vsel %vm437_vm2, %v2743_v12, -inf  ;;  %v2226_v20 = vpop.f32.mrb[9].mxu1  ;;  %v468_v30 = vsel %vm437_vm2, %v2745_v17, -inf }
  0xf1   :  { %463 = vmax.xlane.f32.xlu0 %v462_v19  ;;  %v2749_v21 = vpop.f32.mrb[10].mxu0  ;;  %v2751_v22 = vpop.f32.mrb[10].mxu1 }
  0xf2   :  { %v2221_v23 = vpop.f32.mrb[11].mxu0  ;;  %v465_v24 = vsel %vm437_vm2, %v2749_v21, -inf  ;;  %v2227_v29 = vpop.f32.mrb[11].mxu1  ;;  %v471_v31 = vsel %vm437_vm2, %v2751_v22, -inf }
  0xf3   :  { %466 = vmax.xlane.f32.xlu1 %v465_v24 }
  0xf5   :  { %469 = vmax.xlane.f32.xlu0 %v468_v30 }
  0xf7   :  { %472 = vmax.xlane.f32.xlu1 %v471_v31  ;;  %v2759_v32 = vpop.f32.mrb[12].mxu0  ;;  %v2761_v33 = vpop.f32.mrb[12].mxu1 }
  0xf8   :  { %v2232_v34 = vpop.f32.mrb[13].mxu0  ;;  %v474_v35 = vsel %vm437_vm2, %v2759_v32, -inf  ;;  %v2238_v36 = vpop.f32.mrb[13].mxu1  ;;  %v480_v45 = vsel %vm437_vm2, %v2761_v33, -inf }
  0xf9   :  { %475 = vmax.xlane.f32.xlu0 %v474_v35  ;;  %v2765_v41 = vpop.f32.mrb[14].mxu0  ;;  %v2767_v42 = vpop.f32.mrb[14].mxu1 }
  0xfa   :  { %v2233_v43 = vpop.f32.mrb[15].mxu0  ;;  %v477_v44 = vsel %vm437_vm2, %v2765_v41, -inf  ;;  %v2239_v46 = vpop.f32.mrb[15].mxu1  ;;  %v483_v51 = vsel %vm437_vm2, %v2767_v42, -inf }
  0xfb   :  { %478 = vmax.xlane.f32.xlu1 %v477_v44 }
  0xfd   :  { %481 = vmax.xlane.f32.xlu0 %v480_v45 }
  0xff   :  { %484 = vmax.xlane.f32.xlu1 %v483_v51 }
 0x16e   :  { %v446_v52 = vpop.xlane.xlu1 %445  ;;  %v440_v53 = vpop.xlane.xlu0 %439 }
 0x16f   :  { %v488_v54 = vsub.f32 %v2713_v50, %v446_v52  ;;  %v486_v57 = vsub.f32 %v2711_v49, %v440_v53 }
 0x171   :  { %v506_v58 = vmul.f32 1.442695, %v488_v54  ;;  %v502_v59 = vmul.f32 1.442695, %v486_v57 }
 0x172   :  { %v449_v60 = vpop.xlane.xlu1 %448  ;;  %v443_v63 = vpop.xlane.xlu0 %442 }
 0x173   :  { %v489_v1 = vsub.f32 %v2721_v56, %v449_v60  ;;  %v487_v2 = vsub.f32 %v2719_v55, %v443_v63  ;;  %2421 = vpow2.f32 %v502_v59 }
 0x174   :  { %2423 = vpow2.f32 %v506_v58 }
 0x175   :  { %v504_v7 = vmul.f32 1.442695, %v487_v2  ;;  %v508_v8 = vmul.f32 1.442695, %v489_v1 }
 0x176   :  { %v452_v9 = vpop.xlane.xlu0 %451 }
 0x177   :  { %v490_v10 = vsub.f32 %v2727_v61, %v452_v9  ;;  %2425 = vpow2.f32 %v504_v7 }
 0x178   :  { %v455_v11 = vpop.xlane.xlu1 %454  ;;  %2427 = vpow2.f32 %v508_v8 }
 0x179   :  { %v510_v50 = vmul.f32 1.442695, %v490_v10  ;;  %v491_v49 = vsub.f32 %v2733_v5, %v455_v11 }
 0x17a   :  { %v458_v18 = vpop.xlane.xlu0 %457 }
 0x17b   :  { %2429 = vpow2.f32 %v510_v50  ;;  %v512_v19 = vmul.f32 1.442695, %v491_v49  ;;  %v492_v56 = vsub.f32 %v2729_v62, %v458_v18 }
 0x17c   :  { %v461_v20 = vpop.xlane.xlu1 %460 }
 0x17d   :  { %v514_v55 = vmul.f32 1.442695, %v492_v56  ;;  %v493_v23 = vsub.f32 %v2735_v6, %v461_v20  ;;  %v2783_v24 = vpop.eup %2421  ;;  %2431 = vpow2.f32 %v512_v19 }
 0x17e   :  { %v464_v29 = vpop.xlane.xlu0 %463  ;;  %v2785_v61 = vpop.eup %2423  ;;  %v534_v31 = vsel %vm437_vm2, %v2783_v24, 0.0 }
 0x17f   :  { %2433 = vpow2.f32 %v514_v55  ;;  %v516_v30 = vmul.f32 1.442695, %v493_v23  ;;  %v494_v5 = vsub.f32 %v2743_v12, %v464_v29  ;;  %535 = vadd.xlane.f32.xlu0 %v534_v31  ;;  %v540_v43 = vsel %vm437_vm2, %v2785_v61, 0.0 }
 0x180   :  { %v467_v34 = vpop.xlane.xlu1 %466 }
 0x181   :  { %v518_v62 = vmul.f32 1.442695, %v494_v5  ;;  %v495_v35 = vsub.f32 %v2749_v21, %v467_v34  ;;  %v2791_v36 = vpop.eup %2425  ;;  %2435 = vpow2.f32 %v516_v30 }
 0x182   :  { %v470_v6 = vpop.xlane.xlu0 %469  ;;  %v537_v12 = vsel %vm437_vm2, %v2791_v36, 0.0  ;;  %v2798_v46 = vpop.eup %2427 }
 0x183   :  { %2437 = vpow2.f32 %v518_v62  ;;  %v520_v44 = vmul.f32 1.442695, %v495_v35  ;;  %v496_v45 = vsub.f32 %v2745_v17, %v470_v6  ;;  %541 = vadd.xlane.f32.xlu0 %v540_v43  ;;  %538 = vadd.xlane.f32.xlu1 %v537_v12  ;;  %v543_v59 = vsel %vm437_vm2, %v2798_v46, 0.0 }
 0x184   :  { %v473_v51 = vpop.xlane.xlu1 %472  ;;  %v672_v12 = vsel %vm625_vm3, %v2555_v4, 0 }
 0x185   :  { %v2800_v21 = vpop.eup %2429  ;;  %v522_v52 = vmul.f32 1.442695, %v496_v45  ;;  %v497_v53 = vsub.f32 %v2751_v22, %v473_v51  ;;  %2439 = vpow2.f32 %v520_v44  ;;  %v626_v44 = vsel %vm625_vm3, %v2553_v3, 0  ;;  %2247 = vmatpush3.bf16.msra.mxu1 %v672_v12 }
 0x186   :  { %v476_v54 = vpop.xlane.xlu0 %475  ;;  %v546_v57 = vsel %vm437_vm2, %v2800_v21, 0.0  ;;  %2241 = vmatpush3.bf16.msra.mxu0 %v626_v44  ;;  %2258 = vmatprep.subr.bf16.mxu1 %v2517_v0 }
 0x187   :  { %2441 = vpow2.f32 %v522_v52  ;;  %v524_v17 = vmul.f32 1.442695, %v497_v53  ;;  %v498_v58 = vsub.f32 %v2759_v32, %v476_v54  ;;  %v2808_v60 = vpop.eup %2431  ;;  %547 = vadd.xlane.f32.xlu0 %v546_v57  ;;  %544 = vadd.xlane.f32.xlu1 %v543_v59 }
 0x188   :  { %v479_v63 = vpop.xlane.xlu1 %478  ;;  %v549_v10 = vsel %vm437_vm2, %v2808_v60, 0.0  ;;  %2252 = vmatprep.subr.bf16.mxu0 %v2517_v0 }
 0x189   :  { %v2810_v1 = vpop.eup %2433  ;;  %v526_v22 = vmul.f32 1.442695, %v498_v58  ;;  %v499_v2 = vsub.f32 %v2765_v41, %v479_v63  ;;  %2443 = vpow2.f32 %v524_v17 }
 0x18a   :  { %v482_v7 = vpop.xlane.xlu0 %481  ;;  %v552_v8 = vsel %vm437_vm2, %v2810_v1, 0.0 }
 0x18b   :  { %2445 = vpow2.f32 %v526_v22  ;;  %v528_v32 = vmul.f32 1.442695, %v499_v2  ;;  %v500_v9 = vsub.f32 %v2761_v33, %v482_v7  ;;  %v2818_v11 = vpop.eup %2435  ;;  %553 = vadd.xlane.f32.xlu0 %v552_v8  ;;  %550 = vadd.xlane.f32.xlu1 %v549_v10  ;;  %v718_v10 = vsel %vm625_vm3, %v2584_v13, 0 }
 0x18c   :  { %v485_v50 = vpop.xlane.xlu1 %484  ;;  %v555_v33 = vsel %vm437_vm2, %v2818_v11, 0.0 }
 0x18d   :  { %v2820_v49 = vpop.eup %2437  ;;  %v530_v41 = vmul.f32 1.442695, %v500_v9  ;;  %v501_v18 = vsub.f32 %v2767_v42, %v485_v50  ;;  %2447 = vpow2.f32 %v528_v32 }
 0x18e   :  { %v558_v19 = vsel %vm437_vm2, %v2820_v49, 0.0 }
 0x18f   :  { %2449 = vpow2.f32 %v530_v41  ;;  %v532_v56 = vmul.f32 1.442695, %v501_v18  ;;  %v2827_v20 = vpop.eup %2439  ;;  %559 = vadd.xlane.f32.xlu0 %v558_v19  ;;  %556 = vadd.xlane.f32.xlu1 %v555_v33 }
 0x190   :  { %v561_v42 = vsel %vm437_vm2, %v2827_v20, 0.0 }
 0x191   :  { %v2829_v55 = vpop.eup %2441  ;;  %2451 = vpow2.f32 %v532_v56 }
 0x192   :  { %v564_v23 = vsel %vm437_vm2, %v2829_v55, 0.0 }
 0x193   :  { %v2835_v29 = vpop.eup %2443  ;;  %565 = vadd.xlane.f32.xlu0 %v564_v23  ;;  %562 = vadd.xlane.f32.xlu1 %v561_v42 }
 0x194   :  { %v567_v31 = vsel %vm437_vm2, %v2835_v29, 0.0 }
 0x195   :  { %v2837_v30 = vpop.eup %2445 }
 0x196   :  { %v570_v5 = vsel %vm437_vm2, %v2837_v30, 0.0 }
 0x197   :  { %v2843_v34 = vpop.eup %2447  ;;  %571 = vadd.xlane.f32.xlu0 %v570_v5  ;;  %568 = vadd.xlane.f32.xlu1 %v567_v31 }
 0x198   :  { %v573_v6 = vsel %vm437_vm2, %v2843_v34, 0.0 }
 0x199   :  { %v2845_v62 = vpop.eup %2449 }
 0x19a   :  { %v576_v35 = vsel %vm437_vm2, %v2845_v62, 0.0 }
 0x19b   :  { %v2851_v43 = vpop.eup %2451  ;;  %577 = vadd.xlane.f32.xlu0 %v576_v35  ;;  %574 = vadd.xlane.f32.xlu1 %v573_v6  ;;  %v810_v6 = vsel %vm625_vm3, %v2622_v25, 0 }
 0x19c   :  { %v579_v45 = vsel %vm437_vm2, %v2851_v43, 0.0 }
 0x19f   :  { %580 = vadd.xlane.f32.xlu1 %v579_v45 }
 0x20c   :  { %v536_v51 = vpop.xlane.xlu0 %535 }
 0x20d   :  { %2453 = vrcp.f32 %v536_v51 }
 0x210   :  { %v542_v52 = vpop.xlane.xlu0 %541  ;;  %v539_v53 = vpop.xlane.xlu1 %538 }
 0x211   :  { %2455 = vrcp.f32 %v539_v53  ;;  %v856_v53 = vsel %vm625_vm3, %v2624_v26, 0 }
 0x212   :  { %2457 = vrcp.f32 %v542_v52 }
 0x214   :  { %v548_v54 = vpop.xlane.xlu0 %547  ;;  %v545_v57 = vpop.xlane.xlu1 %544 }
 0x215   :  { %2459 = vrcp.f32 %v545_v57 }
 0x216   :  { %2461 = vrcp.f32 %v548_v54 }
 0x217   :  { %v2454_v59 = vpop.eup %2453 }
 0x218   :  { %v554_v17 = vpop.xlane.xlu0 %553  ;;  %v551_v58 = vpop.xlane.xlu1 %550  ;;  %v598_v7 = vmul.f32 %v2454_v59, %v2783_v24  ;;  %v902_v59 = vsel %vm625_vm3, %v2662_v37, 0 }
 0x219   :  { %2463 = vrcp.f32 %v551_v58 }
 0x21a   :  { %2465 = vrcp.f32 %v554_v17 }
 0x21b   :  { %v2456_v63 = vpop.eup %2455 }
 0x21c   :  { %v560_v22 = vpop.xlane.xlu0 %559  ;;  %v557_v2 = vpop.xlane.xlu1 %556  ;;  %v599_v8 = vmul.f32 %v2456_v63, %v2791_v36  ;;  %v764_v36 = vsel %vm625_vm3, %v2587_v14, 0 }
 0x21d   :  { %v2458_v32 = vpop.eup %2457  ;;  %2467 = vrcp.f32 %v557_v2 }
 0x21e   :  { %v614_v9 = vpack.c.bf16 %v599_v8, %v598_v7  ;;  %2469 = vrcp.f32 %v560_v22  ;;  %v600_v19 = vmul.f32 %v2458_v32, %v2785_v61  ;;  %v948_v7 = vsel %vm625_vm3, %v2664_v38, 0 }
 0x21f   :  { %v2460_v50 = vpop.eup %2459 }
 0x220   :  { %v566_v41 = vpop.xlane.xlu0 %565  ;;  %v563_v18 = vpop.xlane.xlu1 %562  ;;  %v601_v56 = vmul.f32 %v2460_v50, %v2798_v46  ;;  %2243 = vmatmul.mubr.msk.bf16.vlgmr.msra.gmra.mrb[16].mxu0 %vm437_vm2, %v614_v9 }
 0x221   :  { %v2462_v33 = vpop.eup %2461  ;;  %2471 = vrcp.f32 %v563_v18  ;;  %2253 = vmatpush3.bf16.msra.mxu0 %v718_v10  ;;  %2254 = vmatprep.mubr.msk.bf16.mxu0 %vm2518_vm1, %v2517_v0  ;;  %v62_v18 = vsel %vm60_vm0, %v2589_v15, 0 }
 0x222   :  { %v615_v24 = vpack.c.bf16 %v601_v56, %v600_v19  ;;  %2264 = vmatprep.subr.bf16.mxu0 %v2517_v0  ;;  %2473 = vrcp.f32 %v566_v41  ;;  %v602_v46 = vmul.f32 %v2462_v33, %v2800_v21  ;;  %v250_v19 = vsel %vm60_vm0, %v2669_v39, 0 }
 0x223   :  { %v2464_v23 = vpop.eup %2463 }
 0x224   :  { %v572_v42 = vpop.xlane.xlu0 %571  ;;  %v569_v61 = vpop.xlane.xlu1 %568  ;;  %v603_v5 = vmul.f32 %v2464_v23, %v2808_v60  ;;  %2249 = vmatmul.mubr.msk.bf16.vlgmr.msra.gmra.mrb[16].mxu1 %vm437_vm2, %v615_v24 }
 0x225   :  { %v2466_v31 = vpop.eup %2465  ;;  %2475 = vrcp.f32 %v569_v61  ;;  %2259 = vmatpush3.bf16.msra.mxu1 %v764_v36  ;;  %2260 = vmatprep.mubr.msk.bf16.mxu1 %vm2518_vm1, %v2517_v0 }
 0x226   :  { %v616_v35 = vpack.c.bf16 %v603_v5, %v602_v46  ;;  %2270 = vmatprep.subr.bf16.mxu1 %v2517_v0  ;;  %2477 = vrcp.f32 %v572_v42  ;;  %v604_v60 = vmul.f32 %v2466_v31, %v2810_v1 }
 0x227   :  { %v2468_v44 = vpop.eup %2467 }
 0x228   :  { %v578_v45 = vpop.xlane.xlu0 %577  ;;  %v575_v21 = vpop.xlane.xlu1 %574  ;;  %v605_v12 = vmul.f32 %v2468_v44, %v2818_v11  ;;  %2255 = vmatmul.mubr.msk.bf16.vlgmr.msra.gmra.mrb[20].mxu0 %vm437_vm2, %v616_v35 }
 0x229   :  { %v2470_v51 = vpop.eup %2469  ;;  %2479 = vrcp.f32 %v575_v21  ;;  %2265 = vmatpush3.bf16.msra.mxu0 %v810_v6  ;;  %2266 = vmatprep.mubr.msk.bf16.mxu0 %vm2518_vm1, %v2517_v0 }
 0x22a   :  { %2481 = vrcp.f32 %v578_v45  ;;  %v617_v52 = vpack.c.bf16 %v605_v12, %v604_v60  ;;  %2276 = vmatprep.subr.bf16.mxu0 %v2517_v0  ;;  %v606_v1 = vmul.f32 %v2470_v51, %v2820_v49 }
 0x22b   :  { %v2472_v54 = vpop.eup %2471 }
 0x22c   :  { %v581_v57 = vpop.xlane.xlu1 %580  ;;  %v607_v11 = vmul.f32 %v2472_v54, %v2827_v20  ;;  %2261 = vmatmul.mubr.msk.bf16.vlgmr.msra.gmra.mrb[20].mxu1 %vm437_vm2, %v617_v52  ;;  %v2474_v17 = vpop.eup %2473 }
 0x22d   :  { %2483 = vrcp.f32 %v581_v57  ;;  %2271 = vmatpush3.bf16.msra.mxu1 %v856_v53  ;;  %2272 = vmatprep.mubr.msk.bf16.mxu1 %vm2518_vm1, %v2517_v0  ;;  %v608_v22 = vmul.f32 %v2474_v17, %v2829_v55 }
 0x22e   :  { %v618_v58 = vpack.c.bf16 %v607_v11, %v606_v1  ;;  %2282 = vmatprep.subr.bf16.mxu1 %v2517_v0 }
 0x22f   :  { %v2476_v63 = vpop.eup %2475 }
 0x230   :  { %v609_v49 = vmul.f32 %v2476_v63, %v2835_v29  ;;  %2267 = vmatmul.mubr.msk.bf16.vlgmr.msra.gmra.mrb[24].mxu0 %vm437_vm2, %v618_v58  ;;  %v2478_v20 = vpop.eup %2477 }
 0x231   :  { %2277 = vmatpush3.bf16.msra.mxu0 %v902_v59  ;;  %2278 = vmatprep.mubr.msk.bf16.mxu0 %vm2518_vm1, %v2517_v0  ;;  %v610_v9 = vmul.f32 %v2478_v20, %v2837_v30 }
 0x232   :  { %v619_v2 = vpack.c.bf16 %v609_v49, %v608_v22  ;;  %2288 = vmatprep.subr.bf16.mxu0 %v2517_v0 }
 0x233   :  { %v2480_v8 = vpop.eup %2479 }
 0x234   :  { %v2482_v32 = vpop.eup %2481  ;;  %v611_v55 = vmul.f32 %v2480_v8, %v2843_v34  ;;  %2273 = vmatmul.mubr.msk.bf16.vlgmr.msra.gmra.mrb[24].mxu1 %vm437_vm2, %v619_v2  ;;  %v109_v34 = vsel %vm60_vm0, %v2591_v16, 0 }
 0x235   :  { %2283 = vmatpush3.bf16.msra.mxu1 %v948_v7  ;;  %2284 = vmatprep.mubr.msk.bf16.mxu1 %vm2518_vm1, %v2517_v0  ;;  %v612_v50 = vmul.f32 %v2482_v32, %v2845_v62  ;;  %v156_v62 = vsel %vm60_vm0, %v2629_v27, 0 }
 0x236   :  { %v620_v10 = vpack.c.bf16 %v611_v55, %v610_v9  ;;  %2294 = vmatprep.subr.bf16.mxu1 %v2517_v0 }
 0x237   :  { %v2484_v29 = vpop.eup %2483 }
 0x238   :  { %v613_v41 = vmul.f32 %v2484_v29, %v2851_v43  ;;  %2279 = vmatmul.mubr.msk.bf16.vlgmr.msra.gmra.mrb[28].mxu0 %vm437_vm2, %v620_v10  ;;  %v203_v43 = vsel %vm60_vm0, %v2631_v28, 0 }
 0x239   :  { %2290 = vmatprep.mubr.msk.bf16.mxu0 %vm2518_vm1, %v2517_v0 }
 0x23a   :  { %v621_v30 = vpack.c.bf16 %v613_v41, %v612_v50  ;;  %2289 = vmatpush3.bf16.xpose.msra.mxu0 %v62_v18 }
 0x23b   :  { %2300 = vmatprep.subr.bf16.mxu0 %v2517_v0 }
 0x23c   :  { %2285 = vmatmul.mubr.msk.bf16.vlgmr.msra.gmra.mrb[28].mxu1 %vm437_vm2, %v621_v30 }
 0x23d   :  { %2296 = vmatprep.mubr.msk.bf16.mxu1 %vm2518_vm1, %v2517_v0 }
 0x23e   :  { %2295 = vmatpush3.bf16.xpose.msra.mxu1 %v109_v34 }
 0x23f   :  { %2306 = vmatprep.subr.bf16.mxu1 %v2517_v0 }
 0x241   :  { %2291 = vmatmul.mubr.msk.bf16.vlgmr.msra.gmra.mrb[32].mxu0 %vm60_vm0, %v2553_v3  ;;  %v297_v3 = vsel %vm60_vm0, %v2671_v40, 0 }
 0x242   :  { %2301 = vmatpush3.bf16.xpose.msra.mxu0 %v156_v62  ;;  %2302 = vmatprep.mubr.msk.bf16.mxu0 %vm2518_vm1, %v2517_v0 }
 0x243   :  { %2312 = vmatprep.subr.bf16.mxu0 %v2517_v0 }
 0x245   :  { %2297 = vmatmul.mubr.msk.bf16.vlgmr.msra.gmra.mrb[32].mxu1 %vm60_vm0, %v2555_v4  ;;  %v344_v4 = vsel %vm60_vm0, %v2699_v47, 0 }
 0x246   :  { %2307 = vmatpush3.bf16.xpose.msra.mxu1 %v203_v43  ;;  %2308 = vmatprep.mubr.msk.bf16.mxu1 %vm2518_vm1, %v2517_v0 }
 0x247   :  { %2318 = vmatprep.subr.bf16.mxu1 %v2517_v0 }
 0x249   :  { %2303 = vmatmul.mubr.msk.bf16.vlgmr.msra.gmra.mrb[36].mxu0 %vm60_vm0, %v2584_v13  ;;  %v391_v13 = vsel %vm60_vm0, %v2701_v48, 0 }
 0x24a   :  { %2313 = vmatpush3.bf16.xpose.msra.mxu0 %v250_v19  ;;  %2314 = vmatprep.mubr.msk.bf16.mxu0 %vm2518_vm1, %v2517_v0 }
 0x24b   :  { %2324 = vmatprep.subr.bf16.mxu0 %v2517_v0 }
 0x24d   :  { %2309 = vmatmul.mubr.msk.bf16.vlgmr.msra.gmra.mrb[36].mxu1 %vm60_vm0, %v2587_v14 }
 0x24e   :  { %2319 = vmatpush3.bf16.xpose.msra.mxu1 %v297_v3  ;;  %2320 = vmatprep.mubr.msk.bf16.mxu1 %vm2518_vm1, %v2517_v0 }
 0x24f   :  { %2330 = vmatprep.subr.bf16.mxu1 %v2517_v0 }
 0x251   :  { %2315 = vmatmul.mubr.msk.bf16.vlgmr.msra.gmra.mrb[40].mxu0 %vm60_vm0, %v2622_v25 }
 0x252   :  { %2325 = vmatpush3.bf16.xpose.msra.mxu0 %v344_v4  ;;  %2326 = vmatprep.mubr.msk.bf16.mxu0 %vm2518_vm1, %v2517_v0 }
 0x253   :  { %2336 = vmatprep.subr.bf16.mxu0 %v2517_v0 }
 0x255   :  { %2321 = vmatmul.mubr.msk.bf16.vlgmr.msra.gmra.mrb[40].mxu1 %vm60_vm0, %v2624_v26 }
 0x256   :  { %2331 = vmatpush3.bf16.xpose.msra.mxu1 %v391_v13  ;;  %2332 = vmatprep.mubr.msk.bf16.mxu1 %vm2518_vm1, %v2517_v0 }
 0x257   :  { %2342 = vmatprep.subr.bf16.mxu1 %v2517_v0 }
 0x259   :  { %2327 = vmatmul.mubr.msk.bf16.vlgmr.msra.gmra.mrb[44].mxu0 %vm60_vm0, %v2662_v37 }
 0x25a   :  { %2337 = vmatpush3.bf16.msra.mxu0 %v2589_v15  ;;  %2338 = vmatprep.mubr.msk.bf16.mxu0 %vm2518_vm1, %v2517_v0 }
 0x25b   :  { %2348 = vmatprep.subr.bf16.mxu0 %v2517_v0 }
 0x25d   :  { %2333 = vmatmul.mubr.msk.bf16.vlgmr.msra.gmra.mrb[44].mxu1 %vm60_vm0, %v2664_v38 }
 0x25e   :  { %2343 = vmatpush3.bf16.msra.mxu1 %v2591_v16  ;;  %2344 = vmatprep.mubr.msk.bf16.mxu1 %vm2518_vm1, %v2517_v0 }
 0x25f   :  { %2354 = vmatprep.subr.bf16.mxu1 %v2517_v0 }
 0x2f3   :  { %v662_v14 = vpop.f32.mrb[16].mxu0 }
 0x2f4   :  { %v2244_v25 = vpop.f32.mrb[17].mxu0  ;;  %v1752_v15 = vsel %vm60_vm0, %v662_v14, -inf }
 0x2f5   :  { %v665_v26 = vpop.f32.mrb[18].mxu0 }
 0x2f6   :  { %v1753_v37 = vsel %vm60_vm0, %v665_v26, -inf  ;;  %v2245_v56 = vpop.f32.mrb[19].mxu0 }
 0x2f7   :  { %v1754_v33 = vmax.f32 %v1752_v15, %v1753_v37  ;;  %v708_v24 = vpop.f32.mrb[16].mxu1 }
 0x2f8   :  { %v2250_v36 = vpop.f32.mrb[17].mxu1  ;;  %v1761_v16 = vsel %vm60_vm0, %v708_v24, -inf }
 0x2f9   :  { %v1755_v23 = vrot.slane %v1754_v33, 4  ;;  %v711_v38 = vpop.f32.mrb[18].mxu1 }
 0x2fa   :  { %v1762_v42 = vsel %vm60_vm0, %v711_v38, -inf  ;;  %v2251_v61 = vpop.f32.mrb[19].mxu1 }
 0x2fb   :  { %v1756_v46 = vmax.f32 %v1754_v33, %v1755_v23  ;;  %v1763_v5 = vmax.f32 %v1761_v16, %v1762_v42  ;;  %v754_v31 = vpop.f32.mrb[20].mxu0 }
 0x2fc   :  { %v2256_v35 = vpop.f32.mrb[21].mxu0  ;;  %v1770_v21 = vsel %vm60_vm0, %v754_v31, -inf }
 0x2fd   :  { %v1757_v6 = vrot.slane %v1756_v46, 2  ;;  %v1764_v44 = vrot.slane %v1763_v5, 4  ;;  %v757_v45 = vpop.f32.mrb[22].mxu0 }
 0x2fe   :  { %v1771_v60 = vsel %vm60_vm0, %v757_v45, -inf  ;;  %v2257_v12 = vpop.f32.mrb[23].mxu0 }
 0x2ff   :  { %v1758_v51 = vmax.f32 %v1756_v46, %v1757_v6  ;;  %v1765_v52 = vmax.f32 %v1763_v5, %v1764_v44  ;;  %v1772_v53 = vmax.f32 %v1770_v21, %v1771_v60  ;;  %v800_v54 = vpop.f32.mrb[20].mxu1 }
 0x300   :  { %v2262_v57 = vpop.f32.mrb[21].mxu1  ;;  %v1779_v59 = vsel %vm60_vm0, %v800_v54, -inf }
 0x301   :  { %v1766_v1 = vrot.slane %v1765_v52, 2  ;;  %v1773_v11 = vrot.slane %v1772_v53, 4  ;;  %v803_v17 = vpop.f32.mrb[22].mxu1  ;;  %v1759_v58 = vrot.slane %v1758_v51, 1 }
 0x302   :  { %v1780_v63 = vsel %vm60_vm0, %v803_v17, -inf  ;;  %v2263_v22 = vpop.f32.mrb[23].mxu1 }
 0x303   :  { %v1767_v49 = vmax.f32 %v1765_v52, %v1766_v1  ;;  %v1774_v20 = vmax.f32 %v1772_v53, %v1773_v11  ;;  %v1781_v2 = vmax.f32 %v1779_v59, %v1780_v63  ;;  %v846_v7 = vpop.f32.mrb[24].mxu0  ;;  %v1760_v10 = vmax.f32 %v1758_v51, %v1759_v58 }
 0x304   :  { %v2268_v8 = vpop.f32.mrb[25].mxu0  ;;  %v1788_v50 = vsel %vm60_vm0, %v846_v7, -inf }
 0x305   :  { %v1768_v32 = vrot.slane %v1767_v49, 1  ;;  %v1775_v9 = vrot.slane %v1774_v20, 2  ;;  %v1782_v55 = vrot.slane %v1781_v2, 4  ;;  %v849_v29 = vpop.f32.mrb[26].mxu0 }
 0x306   :  { %v1789_v41 = vsel %vm60_vm0, %v849_v29, -inf  ;;  %v2269_v18 = vpop.f32.mrb[27].mxu0 }
 0x307   :  { %v1769_v30 = vmax.f32 %v1767_v49, %v1768_v32  ;;  %v1776_v34 = vmax.f32 %v1774_v20, %v1775_v9  ;;  %v1783_v62 = vmax.f32 %v1781_v2, %v1782_v55  ;;  %v1790_v43 = vmax.f32 %v1788_v50, %v1789_v41  ;;  %v892_v19 = vpop.f32.mrb[24].mxu1 }
 0x308   :  { %v2274_v3 = vpop.f32.mrb[25].mxu1  ;;  %v1797_v15 = vsel %vm60_vm0, %v892_v19, -inf }
 0x309   :  { %v1990_v4 = vsel %vm1896_vm4, %v1769_v30, %v1760_v10  ;;  %v1777_v13 = vrot.slane %v1776_v34, 1  ;;  %v1784_v14 = vrot.slane %v1783_v62, 2  ;;  %v1791_v25 = vrot.slane %v1790_v43, 4  ;;  %v895_v26 = vpop.f32.mrb[26].mxu1 }
 0x30a   :  { %v1798_v37 = vsel %vm60_vm0, %v895_v26, -inf  ;;  %v2275_v56 = vpop.f32.mrb[27].mxu1 }
 0x30b   :  { %v1778_v33 = vmax.f32 %v1776_v34, %v1777_v13  ;;  %v1785_v24 = vmax.f32 %v1783_v62, %v1784_v14  ;;  %v1792_v36 = vmax.f32 %v1790_v43, %v1791_v25  ;;  %v1799_v23 = vmax.f32 %v1797_v15, %v1798_v37  ;;  %v938_v38 = vpop.f32.mrb[28].mxu0 }
 0x30c   :  { %v2280_v16 = vpop.f32.mrb[29].mxu0  ;;  %v1806_v35 = vsel %vm60_vm0, %v938_v38, -inf }
 0x30d   :  { %v1991_v42 = vsel %vm1898_vm5, %v1778_v33, %v1990_v4  ;;  %v1786_v61 = vrot.slane %v1785_v24, 1  ;;  %v1793_v46 = vrot.slane %v1792_v36, 2  ;;  %v1800_v5 = vrot.slane %v1799_v23, 4  ;;  %v941_v31 = vpop.f32.mrb[30].mxu0 }
 0x30e   :  { %v1807_v6 = vsel %vm60_vm0, %v941_v31, -inf  ;;  %v2281_v44 = vpop.f32.mrb[31].mxu0 }
 0x30f   :  { %v1787_v45 = vmax.f32 %v1785_v24, %v1786_v61  ;;  %v1794_v21 = vmax.f32 %v1792_v36, %v1793_v46  ;;  %v1801_v60 = vmax.f32 %v1799_v23, %v1800_v5  ;;  %v1808_v12 = vmax.f32 %v1806_v35, %v1807_v6  ;;  %v984_v51 = vpop.f32.mrb[28].mxu1 }
 0x310   :  { %v2286_v52 = vpop.f32.mrb[29].mxu1  ;;  %v1815_v17 = vsel %vm60_vm0, %v984_v51, -inf }
 0x311   :  { %v1992_v53 = vsel %vm1900_vm6, %v1787_v45, %v1991_v42  ;;  %v1795_v54 = vrot.slane %v1794_v21, 1  ;;  %v1802_v57 = vrot.slane %v1801_v60, 2  ;;  %v1809_v1 = vrot.slane %v1808_v12, 4  ;;  %v987_v11 = vpop.f32.mrb[30].mxu1 }
 0x312   :  { %v1816_v58 = vsel %vm60_vm0, %v987_v11, -inf  ;;  %v2287_v59 = vpop.f32.mrb[31].mxu1 }
 0x313   :  { %v1796_v63 = vmax.f32 %v1794_v21, %v1795_v54  ;;  %v1803_v22 = vmax.f32 %v1801_v60, %v1802_v57  ;;  %v1810_v49 = vmax.f32 %v1808_v12, %v1809_v1  ;;  %v1817_v20 = vmax.f32 %v1815_v17, %v1816_v58 }
 0x314   :  { %v2998_v2 = vpop.f32.mrb[32].mxu0 }
 0x315   :  { %v1993_v7 = vsel %vm1902_vm7, %v1796_v63, %v1992_v53  ;;  %v1804_v8 = vrot.slane %v1803_v22, 1  ;;  %v1811_v32 = vrot.slane %v1810_v49, 2  ;;  %v1818_v9 = vrot.slane %v1817_v20, 4  ;;  %v2292_v55 = vpop.f32.mrb[33].mxu0 }
 0x316   :  { %v1312_v29 = vsel %vm1311_vm8, %v2998_v2, -inf  ;;  %v1028_v10 = vpop.f32.mrb[34].mxu0 }
 0x317   :  { %v1805_v50 = vmax.f32 %v1803_v22, %v1804_v8  ;;  %v1812_v41 = vmax.f32 %v1810_v49, %v1811_v32  ;;  %v1819_v18 = vmax.f32 %v1817_v20, %v1818_v9  ;;  %1313 = vmax.xlane.f32.xlu0 %v1312_v29  ;;  %v2293_v30 = vpop.f32.mrb[35].mxu0 }
 0x318   :  { %v1065_v34 = vpop.f32.mrb[32].mxu1 }
 0x319   :  { %v1813_v62 = vrot.slane %v1812_v41, 1  ;;  %v1820_v43 = vrot.slane %v1819_v18, 2  ;;  %v2298_v19 = vpop.f32.mrb[33].mxu1  ;;  %v1315_v3 = vsel %vm1311_vm8, %v1065_v34, -inf  ;;  %v1994_v4 = vsel %vm1904_vm9, %v1805_v50, %v1993_v7 }
 0x31a   :  { %1316 = vmax.xlane.f32.xlu1 %v1315_v3  ;;  %v1068_v13 = vpop.f32.mrb[34].mxu1 }
 0x31b   :  { %v1814_v14 = vmax.f32 %v1812_v41, %v1813_v62  ;;  %v1821_v25 = vmax.f32 %v1819_v18, %v1820_v43  ;;  %v2299_v26 = vpop.f32.mrb[35].mxu1 }
 0x31c   :  { %v1105_v15 = vpop.f32.mrb[36].mxu0 }
 0x31d   :  { %v1822_v37 = vrot.slane %v1821_v25, 1  ;;  %v1318_v56 = vsel %vm1311_vm8, %v1105_v15, -inf  ;;  %v2304_v33 = vpop.f32.mrb[37].mxu0  ;;  %v1995_v24 = vsel %vm1906_vm10, %v1814_v14, %v1994_v4 }
 0x31e   :  { %1319 = vmax.xlane.f32.xlu0 %v1318_v56  ;;  %v1108_v36 = vpop.f32.mrb[38].mxu0 }
 0x31f   :  { %v1823_v23 = vmax.f32 %v1821_v25, %v1822_v37  ;;  %v2305_v38 = vpop.f32.mrb[39].mxu0 }
 0x320   :  { %v1145_v16 = vpop.f32.mrb[36].mxu1 }
 0x321   :  { %v2310_v42 = vpop.f32.mrb[37].mxu1  ;;  %v1321_v61 = vsel %vm1311_vm8, %v1145_v16, -inf  ;;  %v3009_v46 = vsel %vm1908_vm11, %v1823_v23, %v1995_v24 }
 0x322   :  { %1322 = vmax.xlane.f32.xlu1 %v1321_v61  ;;  %v1148_v5 = vpop.f32.mrb[38].mxu1 }
 0x323   :  { %v2311_v31 = vpop.f32.mrb[39].mxu1 }
 0x324   :  { %v1185_v35 = vpop.f32.mrb[40].mxu0 }
 0x325   :  { %v1324_v6 = vsel %vm1311_vm8, %v1185_v35, -inf  ;;  %v2316_v44 = vpop.f32.mrb[41].mxu0 }
 0x326   :  { %1325 = vmax.xlane.f32.xlu0 %v1324_v6  ;;  %v1188_v45 = vpop.f32.mrb[42].mxu0 }
 0x327   :  { %v2317_v21 = vpop.f32.mrb[43].mxu0 }
 0x328   :  { %v1225_v60 = vpop.f32.mrb[40].mxu1 }
 0x329   :  { %v2322_v12 = vpop.f32.mrb[41].mxu1  ;;  %v1327_v51 = vsel %vm1311_vm8, %v1225_v60, -inf }
 0x32a   :  { %1328 = vmax.xlane.f32.xlu1 %v1327_v51  ;;  %v1228_v52 = vpop.f32.mrb[42].mxu1 }
 0x32b   :  { %v2323_v53 = vpop.f32.mrb[43].mxu1 }
 0x32c   :  { %v1265_v54 = vpop.f32.mrb[44].mxu0 }
 0x32d   :  { %v1330_v57 = vsel %vm1311_vm8, %v1265_v54, -inf  ;;  %v2328_v1 = vpop.f32.mrb[45].mxu0 }
 0x32e   :  { %1331 = vmax.xlane.f32.xlu0 %v1330_v57  ;;  %v1268_v11 = vpop.f32.mrb[46].mxu0 }
 0x32f   :  { %v2329_v17 = vpop.f32.mrb[47].mxu0 }
 0x330   :  { %v1305_v58 = vpop.f32.mrb[44].mxu1 }
 0x331   :  { %v2334_v59 = vpop.f32.mrb[45].mxu1  ;;  %v1333_v63 = vsel %vm1311_vm8, %v1305_v58, -inf }
 0x332   :  { %1334 = vmax.xlane.f32.xlu1 %v1333_v63  ;;  %v1308_v22 = vpop.f32.mrb[46].mxu1 }
 0x333   :  { %v2335_v49 = vpop.f32.mrb[47].mxu1 }
 0x3a4   :  { %v1314_v20 = vpop.xlane.xlu0 %1313 }
 0x3a5   :  { %v1336_v7 = vsub.f32 %v2998_v2, %v1314_v20 }
 0x3a7   :  { %v1344_v8 = vmul.f32 1.442695, %v1336_v7  ;;  %v1317_v32 = vpop.xlane.xlu1 %1316 }
 0x3a8   :  { %v1337_v9 = vsub.f32 %v1065_v34, %v1317_v32 }
 0x3a9   :  { %2485 = vpow2.f32 %v1344_v8 }
 0x3aa   :  { %v1346_v55 = vmul.f32 1.442695, %v1337_v9 }
 0x3ab   :  { %v1320_v29 = vpop.xlane.xlu0 %1319 }
 0x3ac   :  { %2487 = vpow2.f32 %v1346_v55  ;;  %v1338_v10 = vsub.f32 %v1105_v15, %v1320_v29 }
 0x3ae   :  { %v1348_v50 = vmul.f32 1.442695, %v1338_v10 }
 0x3af   :  { %v1323_v41 = vpop.xlane.xlu1 %1322 }
 0x3b0   :  { %2489 = vpow2.f32 %v1348_v50  ;;  %v1339_v18 = vsub.f32 %v1145_v16, %v1323_v41  ;;  %v2519_v50 = vmov 0.0|0.0  }
 0x3b2   :  { %v1350_v30 = vmul.f32 1.442695, %v1339_v18  ;;  %v1881_v18 = vld [vmem:[%s3116_s2 + $0x8] sm:$0xff] }
 0x3b3   :  { %v2486_v62 = vpop.eup %2485  ;;  %v1326_v43 = vpop.xlane.xlu0 %1325 }
 0x3b4   :  { %2491 = vpow2.f32 %v1350_v30  ;;  %v1340_v19 = vsub.f32 %v1185_v35, %v1326_v43  ;;  %v1360_v3 = vsel %vm1311_vm8, %v2486_v62, 0.0 }
 0x3b5   :  { %1361 = vadd.xlane.f32.xlu0 %v1360_v3  ;;  %v1883_v3 = vld [vmem:[%s3116_s2 + $0x18] sm:$0xff] }
 0x3b6   :  { %v2488_v2 = vpop.eup %2487  ;;  %v1352_v4 = vmul.f32 1.442695, %v1340_v19  ;;  %v1882_v19 = vld [vmem:[%s3116_s2 + $0x10] sm:$0xff] }
 0x3b7   :  { %v1329_v34 = vpop.xlane.xlu1 %1328  ;;  %v1363_v13 = vsel %vm1311_vm8, %v2488_v2, 0.0 }
 0x3b8   :  { %2493 = vpow2.f32 %v1352_v4  ;;  %v1341_v14 = vsub.f32 %v1225_v60, %v1329_v34  ;;  %1364 = vadd.xlane.f32.xlu1 %v1363_v13  ;;  %v1884_v4 = vld [vmem:[%s3116_s2 + $0x20] sm:$0xff]  ;;  %v1885_v34 = vld [vmem:[%s3116_s2 + $0x28] sm:$0xff] }
 0x3b9   :  { %v2407_v13 = vpack.c.bf16 %v1885_v34, %v1884_v4 }
 0x3ba   :  { %v2490_v25 = vpop.eup %2489  ;;  %v1354_v26 = vmul.f32 1.442695, %v1341_v14  ;;  %v1887_v14 = vld [vmem:[%s3116_s2 + $0x38] sm:$0xff] }
 0x3bb   :  { %v1332_v15 = vpop.xlane.xlu0 %1331  ;;  %v1366_v37 = vsel %vm1311_vm8, %v2490_v25, 0.0 }
 0x3bc   :  { %2495 = vpow2.f32 %v1354_v26  ;;  %v1342_v56 = vsub.f32 %v1265_v54, %v1332_v15  ;;  %1367 = vadd.xlane.f32.xlu0 %v1366_v37 }
 0x3be   :  { %v2492_v33 = vpop.eup %2491  ;;  %v1356_v24 = vmul.f32 1.442695, %v1342_v56 }
 0x3bf   :  { %v1335_v36 = vpop.xlane.xlu1 %1334  ;;  %v1369_v23 = vsel %vm1311_vm8, %v2492_v33, 0.0 }
 0x3c0   :  { %2497 = vpow2.f32 %v1356_v24  ;;  %v1343_v38 = vsub.f32 %v1305_v58, %v1335_v36  ;;  %1370 = vadd.xlane.f32.xlu1 %v1369_v23 }
 0x3c2   :  { %v2494_v16 = vpop.eup %2493  ;;  %v1358_v42 = vmul.f32 1.442695, %v1343_v38 }
 0x3c3   :  { %v1372_v61 = vsel %vm1311_vm8, %v2494_v16, 0.0 }
 0x3c4   :  { %2499 = vpow2.f32 %v1358_v42  ;;  %1373 = vadd.xlane.f32.xlu0 %v1372_v61 }
 0x3c6   :  { %v2496_v5 = vpop.eup %2495 }
 0x3c7   :  { %v1375_v31 = vsel %vm1311_vm8, %v2496_v5, 0.0 }
 0x3c8   :  { %1376 = vadd.xlane.f32.xlu1 %v1375_v31 }
 0x3ca   :  { %v3022_v35 = vpop.eup %2497 }
 0x3cb   :  { %v1378_v6 = vsel %vm1311_vm8, %v3022_v35, 0.0 }
 0x3cc   :  { %1379 = vadd.xlane.f32.xlu0 %v1378_v6 }
 0x3ce   :  { %v3026_v44 = vpop.eup %2499 }
 0x3cf   :  { %v1381_v45 = vsel %vm1311_vm8, %v3026_v44, 0.0 }
 0x3d0   :  { %1382 = vadd.xlane.f32.xlu1 %v1381_v45 }
 0x442   :  { %v1362_v21 = vpop.xlane.xlu0 %1361 }
 0x443   :  { %2501 = vrcp.f32 %v1362_v21 }
 0x445   :  { %v1365_v60 = vpop.xlane.xlu1 %1364 }
 0x446   :  { %2503 = vrcp.f32 %v1365_v60 }
 0x449   :  { %v1368_v12 = vpop.xlane.xlu0 %1367 }
 0x44a   :  { %2505 = vrcp.f32 %v1368_v12 }
 0x44d   :  { %v2502_v51 = vpop.eup %2501  ;;  %v1371_v52 = vpop.xlane.xlu1 %1370 }
 0x44e   :  { %v1392_v53 = vmul.f32 %v2502_v51, %v2486_v62  ;;  %2507 = vrcp.f32 %v1371_v52 }
 0x450   :  { %v2504_v54 = vpop.eup %2503  ;;  %v1400_v57 = vpack.c.bf16 %v1392_v53, %v1392_v53 }
 0x451   :  { %v1393_v1 = vmul.f32 %v2504_v54, %v2488_v2  ;;  %v1374_v11 = vpop.xlane.xlu0 %1373  ;;  %v2416_v2 = vpack.c.bf16 %v1883_v3, %v1882_v19 }
 0x452   :  { %2339 = vmatmul.mubr.msk.bf16.vlgmr.msra.gmra.mrb[48].mxu0 %vm1311_vm8, %v1400_v57  ;;  %2509 = vrcp.f32 %v1374_v11 }
 0x453   :  { %v1401_v17 = vpack.c.bf16 %v1393_v1, %v1393_v1  ;;  %2349 = vmatpush3.bf16.msra.mxu0 %v2629_v27  ;;  %2350 = vmatprep.mubr.msk.bf16.mxu0 %vm2518_vm1, %v2517_v0 }
 0x454   :  { %v2506_v58 = vpop.eup %2505  ;;  %2360 = vmatprep.subr.bf16.mxu0 %v2517_v0 }
 0x455   :  { %v1394_v59 = vmul.f32 %v2506_v58, %v2490_v25  ;;  %2345 = vmatmul.mubr.msk.bf16.vlgmr.msra.gmra.mrb[48].mxu1 %vm1311_vm8, %v1401_v17  ;;  %v1377_v63 = vpop.xlane.xlu1 %1376  ;;  %v9_v25 = vstv %s3117_s3 }
 0x456   :  { %2511 = vrcp.f32 %v1377_v63  ;;  %2355 = vmatpush3.bf16.msra.mxu1 %v2631_v28  ;;  %2356 = vmatprep.mubr.msk.bf16.mxu1 %vm2518_vm1, %v2517_v0  ;;  %10 = vst [vmem:[#allocation2] sm:$0x1] %v9_v25 }
 0x457   :  { %v1402_v22 = vpack.c.bf16 %v1394_v59, %v1394_v59  ;;  %2366 = vmatprep.subr.bf16.mxu1 %v2517_v0 }
 0x458   :  { %v2508_v27 = vpop.eup %2507 }
 0x459   :  { %v1395_v49 = vmul.f32 %v2508_v27, %v2492_v33  ;;  %v1380_v20 = vpop.xlane.xlu0 %1379 }
 0x45a   :  { %2351 = vmatmul.mubr.msk.bf16.vlgmr.msra.gmra.mrb[52].mxu0 %vm1311_vm8, %v1402_v22  ;;  %2513 = vrcp.f32 %v1380_v20 }
 0x45b   :  { %v1403_v7 = vpack.c.bf16 %v1395_v49, %v1395_v49  ;;  %2361 = vmatpush3.bf16.msra.mxu0 %v2669_v39  ;;  %2362 = vmatprep.mubr.msk.bf16.mxu0 %vm2518_vm1, %v2517_v0 }
 0x45c   :  { %v2510_v8 = vpop.eup %2509  ;;  %2372 = vmatprep.subr.bf16.mxu0 %v2517_v0 }
 0x45d   :  { %v1396_v28 = vmul.f32 %v2510_v8, %v2494_v16  ;;  %2357 = vmatmul.mubr.msk.bf16.vlgmr.msra.gmra.mrb[52].mxu1 %vm1311_vm8, %v1403_v7  ;;  %v1383_v32 = vpop.xlane.xlu1 %1382 }
 0x45e   :  { %2515 = vrcp.f32 %v1383_v32  ;;  %2367 = vmatpush3.bf16.msra.mxu1 %v2671_v40  ;;  %2368 = vmatprep.mubr.msk.bf16.mxu1 %vm2518_vm1, %v2517_v0 }
 0x45f   :  { %v1404_v9 = vpack.c.bf16 %v1396_v28, %v1396_v28  ;;  %2378 = vmatprep.subr.bf16.mxu1 %v2517_v0 }
 0x460   :  { %v2512_v39 = vpop.eup %2511 }
 0x461   :  { %v1397_v55 = vmul.f32 %v2512_v39, %v2496_v5 }
 0x462   :  { %2363 = vmatmul.mubr.msk.bf16.vlgmr.msra.gmra.mrb[56].mxu0 %vm1311_vm8, %v1404_v9 }
 0x463   :  { %v1405_v29 = vpack.c.bf16 %v1397_v55, %v1397_v55  ;;  %2373 = vmatpush3.bf16.msra.mxu0 %v2699_v47  ;;  %2374 = vmatprep.mubr.msk.bf16.mxu0 %vm2518_vm1, %v2517_v0  ;;  %v1880_v47 = vld [vmem:[%s3116_s2] sm:$0xff] }
 0x464   :  { %v2514_v10 = vpop.eup %2513  ;;  %2406 = vmatprep.subr.bf16.mxu0 %v2519_v50  ;;  %v2413_v43 = vpack.c.bf16 %v1881_v18, %v1880_v47 }
 0x465   :  { %v1398_v40 = vmul.f32 %v2514_v10, %v3022_v35  ;;  %2369 = vmatmul.mubr.msk.bf16.vlgmr.msra.gmra.mrb[56].mxu1 %vm1311_vm8, %v1405_v29 }
 0x466   :  { %2379 = vmatpush3.bf16.msra.mxu1 %v2701_v48  ;;  %2380 = vmatprep.mubr.msk.bf16.mxu1 %vm2518_vm1, %v2517_v0 }
 0x467   :  { %v1406_v41 = vpack.c.bf16 %v1398_v40, %v1398_v40  ;;  %2412 = vmatprep.subr.bf16.mxu1 %v2519_v50 }
 0x468   :  { %v2516_v30 = vpop.eup %2515 }
 0x469   :  { %v1399_v62 = vmul.f32 %v2516_v30, %v3026_v44 }
 0x46a   :  { %2375 = vmatmul.mubr.msk.bf16.vlgmr.msra.gmra.mrb[60].mxu0 %vm1311_vm8, %v1406_v41 }
 0x46b   :  { %v1407_v48 = vpack.c.bf16 %v1399_v62, %v1399_v62  ;;  %2392 = vmatprep.mubr.msk.f32.mxu0 %vm2518_vm1, %v2517_v0  ;;  %2408 = vmatpush3.bf16.msra.mxu0 %v2407_v13 }
 0x46c   :  { %2409 = vmatprep.subr.bf16.mxu0 %v2519_v50 }
 0x46d   :  { %2381 = vmatmul.mubr.msk.bf16.vlgmr.msra.gmra.mrb[60].mxu1 %vm1311_vm8, %v1407_v48 }
 0x46e   :  { %2414 = vmatpush3.bf16.msra.mxu1 %v2413_v43  ;;  %2403 = vmatprep.mubr.msk.f32.mxu1 %vm2518_vm1, %v2517_v0  ;;  %v1886_v0 = vld [vmem:[%s3116_s2 + $0x30] sm:$0xff] }
 0x46f   :  { %2415 = vmatprep.subr.bf16.mxu1 %v2519_v50 }
 0x472   :  { %2417 = vmatpush3.bf16.msra.mxu1 %v2416_v2 }
 0x475   :  { %2404 = vmatmul.mubr.msk.f32.vlgmr.msra.gmra.mrb[64].mxu1 %vm60_vm0, %v3009_v46  ;;  %v2410_v46 = vpack.c.bf16 %v1887_v14, %v1886_v0 }
 0x477   :  { %2411 = vmatpush3.bf16.msra.mxu0 %v2410_v46 }
 0x525   :  { %v1445_v26 = vpop.f32.mrb[48].mxu0 }
 0x526   :  { %v1824_v15 = vsel %vm60_vm0, %v1445_v26, -inf  ;;  %v2340_v37 = vpop.f32.mrb[49].mxu0 }
 0x527   :  { %v1825_v56 = vrot.slane %v1824_v15, 4  ;;  %v1448_v33 = vpop.f32.mrb[50].mxu0 }
 0x528   :  { %v2341_v24 = vpop.f32.mrb[51].mxu0  ;;  %v1488_v36 = vpop.f32.mrb[48].mxu1 }
 0x529   :  { %v1826_v23 = vmax.f32 %v1824_v15, %v1825_v56  ;;  %v1831_v38 = vsel %vm60_vm0, %v1488_v36, -inf  ;;  %v2346_v16 = vpop.f32.mrb[49].mxu1 }
 0x52a   :  { %v1832_v42 = vrot.slane %v1831_v38, 4  ;;  %v1491_v61 = vpop.f32.mrb[50].mxu1 }
 0x52b   :  { %v1827_v5 = vrot.slane %v1826_v23, 2  ;;  %v2347_v31 = vpop.f32.mrb[51].mxu1 }
 0x52c   :  { %v1833_v35 = vmax.f32 %v1831_v38, %v1832_v42 }
 0x52d   :  { %v1828_v6 = vmax.f32 %v1826_v23, %v1827_v5  ;;  %v1531_v44 = vpop.f32.mrb[52].mxu0 }
 0x52e   :  { %v1834_v45 = vrot.slane %v1833_v35, 2  ;;  %v1838_v21 = vsel %vm60_vm0, %v1531_v44, -inf  ;;  %v2352_v60 = vpop.f32.mrb[53].mxu0 }
 0x52f   :  { %v1839_v12 = vrot.slane %v1838_v21, 4  ;;  %v1534_v51 = vpop.f32.mrb[54].mxu0  ;;  %v1829_v52 = vrot.slane %v1828_v6, 1 }
 0x530   :  { %v1835_v53 = vmax.f32 %v1833_v35, %v1834_v45  ;;  %v2353_v54 = vpop.f32.mrb[55].mxu0  ;;  %v1574_v57 = vpop.f32.mrb[52].mxu1 }
 0x531   :  { %v1840_v1 = vmax.f32 %v1838_v21, %v1839_v12  ;;  %v1845_v11 = vsel %vm60_vm0, %v1574_v57, -inf  ;;  %v2358_v17 = vpop.f32.mrb[53].mxu1  ;;  %v1830_v49 = vmax.f32 %v1828_v6, %v1829_v52 }
 0x532   :  { %v1836_v58 = vrot.slane %v1835_v53, 1  ;;  %v1846_v59 = vrot.slane %v1845_v11, 4  ;;  %v1577_v63 = vpop.f32.mrb[54].mxu1 }
 0x533   :  { %v1841_v22 = vrot.slane %v1840_v1, 2  ;;  %v2359_v27 = vpop.f32.mrb[55].mxu1 }
 0x534   :  { %v1837_v20 = vmax.f32 %v1835_v53, %v1836_v58  ;;  %v1847_v7 = vmax.f32 %v1845_v11, %v1846_v59 }
 0x535   :  { %v1842_v8 = vmax.f32 %v1840_v1, %v1841_v22  ;;  %v1617_v28 = vpop.f32.mrb[56].mxu0 }
 0x536   :  { %v1897_v32 = vsel %vm1896_vm4, %v1837_v20, %v1830_v49  ;;  %v1848_v9 = vrot.slane %v1847_v7, 2  ;;  %v1852_v39 = vsel %vm60_vm0, %v1617_v28, -inf  ;;  %v2364_v55 = vpop.f32.mrb[57].mxu0  ;;  %v2117_v49 = vld [vmem:[#allocation2] ss:$0 sm:$0xff] }
 0x537   :  { %v1843_v29 = vrot.slane %v1842_v8, 1  ;;  %v1853_v10 = vrot.slane %v1852_v39, 4  ;;  %v1620_v50 = vpop.f32.mrb[58].mxu0 }
 0x538   :  { %v1849_v40 = vmax.f32 %v1847_v7, %v1848_v9  ;;  %v2365_v41 = vpop.f32.mrb[59].mxu0  ;;  %v1660_v47 = vpop.f32.mrb[56].mxu1 }
 0x539   :  { %v1844_v18 = vmax.f32 %v1842_v8, %v1843_v29  ;;  %v1854_v30 = vmax.f32 %v1852_v39, %v1853_v10  ;;  %v1859_v62 = vsel %vm60_vm0, %v1660_v47, -inf  ;;  %v2370_v43 = vpop.f32.mrb[57].mxu1 }
 0x53a   :  { %v1850_v48 = vrot.slane %v1849_v40, 1  ;;  %v1860_v19 = vrot.slane %v1859_v62, 4  ;;  %v1663_v3 = vpop.f32.mrb[58].mxu1 }
 0x53b   :  { %v1899_v2 = vsel %vm1898_vm5, %v1844_v18, %v1897_v32  ;;  %v1855_v4 = vrot.slane %v1854_v30, 2  ;;  %v2371_v34 = vpop.f32.mrb[59].mxu1 }
 0x53c   :  { %v1851_v13 = vmax.f32 %v1849_v40, %v1850_v48  ;;  %v1861_v0 = vmax.f32 %v1859_v62, %v1860_v19 }
 0x53d   :  { %v1856_v14 = vmax.f32 %v1854_v30, %v1855_v4  ;;  %v1703_v46 = vpop.f32.mrb[60].mxu0 }
 0x53e   :  { %v1901_v25 = vsel %vm1900_vm6, %v1851_v13, %v1899_v2  ;;  %v1862_v26 = vrot.slane %v1861_v0, 2  ;;  %v1866_v15 = vsel %vm60_vm0, %v1703_v46, -inf  ;;  %v2376_v37 = vpop.f32.mrb[61].mxu0 }
 0x53f   :  { %v1857_v56 = vrot.slane %v1856_v14, 1  ;;  %v1867_v33 = vrot.slane %v1866_v15, 4  ;;  %v1706_v24 = vpop.f32.mrb[62].mxu0 }
 0x540   :  { %v1863_v36 = vmax.f32 %v1861_v0, %v1862_v26  ;;  %v2377_v23 = vpop.f32.mrb[63].mxu0  ;;  %v1746_v38 = vpop.f32.mrb[60].mxu1 }
 0x541   :  { %v1858_v16 = vmax.f32 %v1856_v14, %v1857_v56  ;;  %v1868_v42 = vmax.f32 %v1866_v15, %v1867_v33  ;;  %v1873_v61 = vsel %vm60_vm0, %v1746_v38, -inf  ;;  %v2382_v5 = vpop.f32.mrb[61].mxu1 }
 0x542   :  { %v1864_v31 = vrot.slane %v1863_v36, 1  ;;  %v1874_v35 = vrot.slane %v1873_v61, 4  ;;  %v1749_v6 = vpop.f32.mrb[62].mxu1 }
 0x543   :  { %v1903_v44 = vsel %vm1902_vm7, %v1858_v16, %v1901_v25  ;;  %v1869_v45 = vrot.slane %v1868_v42, 2  ;;  %v2383_v21 = vpop.f32.mrb[63].mxu1 }
 0x544   :  { %v1865_v60 = vmax.f32 %v1863_v36, %v1864_v31  ;;  %v1875_v12 = vmax.f32 %v1873_v61, %v1874_v35 }
 0x545   :  { %v1870_v51 = vmax.f32 %v1868_v42, %v1869_v45 }
 0x546   :  { %v1905_v52 = vsel %vm1904_vm9, %v1865_v60, %v1903_v44  ;;  %v1876_v53 = vrot.slane %v1875_v12, 2 }
 0x547   :  { %v1871_v54 = vrot.slane %v1870_v51, 1 }
 0x548   :  { %v1877_v57 = vmax.f32 %v1875_v12, %v1876_v53  ;;  %v2065_v1 = vpop.f32.mrb[64].mxu1 }
 0x549   :  { %v1872_v11 = vmax.f32 %v1870_v51, %v1871_v54  ;;  %v2405_v17 = vpop.f32.mrb[65].mxu1 }
 0x54a   :  { %v1878_v58 = vrot.slane %v1877_v57, 1 }
 0x54b   :  { %v1907_v59 = vsel %vm1906_vm10, %v1872_v11, %v1905_v52 }
 0x54c   :  { %v1879_v63 = vmax.f32 %v1877_v57, %v1878_v58 }
 0x54e   :  { %v1909_v22 = vsel %vm1908_vm11, %v1879_v63, %v1907_v59 }
 0x54f   :  { %2393 = vmatmul.mubr.msk.f32.vlgmr.msra.gmra.mrb[64].mxu0 %vm60_vm0, %v1909_v22 }
 0x622   :  { %v1978_v27 = vpop.f32.mrb[64].mxu0 }
 0x623   :  { %v2066_v20 = vadd.f32 %v2065_v1, %v1978_v27  ;;  %v2394_v7 = vpop.f32.mrb[65].mxu0 }
 0x625   :  { %v2076_v8 = vadd.f32 %v2117_v49, %v2066_v20 }
 0x627   :  { %2078 = vst.msk [vmem:[%s3118_s4] sm:$0xff] %vm2077_vm12, %v2076_v8 }

// kernel: qa_forward.3
= control target key start
LH: loop header
LB: loop body
LE: loop exit
PB: predicated region body
PF: predicated region fallthrough
CT: control target
= control target key end

     0   :  { %s4298_s15 = smov 0   ;;  %s4300_s16 = smov 0   ;;  %s5852_s0 = inlined_call_operand.vmem [shape: bf16[8,16,32], index: 0, kind: input, shape index: {}]   ;;  %s5853_s1 = inlined_call_operand.vmem [shape: bf16[32,128], index: 1, kind: input, shape index: {}]   ;;  %s5854_s2 = inlined_call_operand.vmem [shape: bf16[32,128], index: 2, kind: input, shape index: {}]   ;;  %s5855_s3 = inlined_call_operand.vmem [shape: f32[1,128], index: 3, kind: input, shape index: {}]   ;;  %s5856_s4 = inlined_call_operand.vmem [shape: f32[8,16,32], index: 4, kind: output, shape index: {}]  }
   0x1   :  { %s4302_s17 = smov 0  }
   0x2 LB: > { %s4314_s18 = sadd.s32 4294967295, %s4265_s17   ;;  %s4317_s19 = sadd.s32 1, %s4265_s17   ;;  %s4265_s17 = sphi %s4302_s17, %s5941_s17   ;;  %s4261_s16 = sphi %s4300_s16, %s5940_s16   ;;  %s4257_s15 = sphi %s4298_s15, %s5939_s15  }
   0x3   : > { %s18_s20 = ssub.s32 %s4265_s17, %s4317_s19  ;;  %s21_s21 = sadd.s32 1, %s4261_s16 }
   0x4   : > { %p19_p0 = scmp.eq.s32.totalorder %s18_s20, 0  ;;  %p28_p1 = scmp.ne.s32.totalorder %s4261_s16, %s4257_s15 }
   0x5   : > { %p29_p2 = scmp.eq.s32.totalorder %s4265_s17, 0  ;;  %p121_p3 = scmp.eq.s32.totalorder %s4314_s18, 1 }
   0x6   : > { %s4327_s22 = scalar_select %p19_p0, %s4261_s16, %s21_s21  }
   0x7   : > { %p30_p4 = por %p29_p2, %p28_p1  ;;  %p4329_p5 = por %p121_p3, %p28_p1 }
   0x8   : > { %p3487_p6 = scmp.ge.s32.totalorder %s4265_s17, 2 }
   0xa   : > { %152 = sbr.rel (%p3487_p6) target bundleno = 26 (0x1a), region = 28 }
  0x11   : > { %155 = sbr.rel (!%p30_p4) target bundleno = 26 (0x1a), region = 32  ;;  %s157_s24 = sand.u32 (%p30_p4), 1, %s4261_s16  }
  0x12   : > { %s3489_s25 = sshll.u32 (%p30_p4), %s4265_s17, 2  ;;  %s3488_s26 = sshll.u32 (%p30_p4), %s157_s24, 5 }
  0x13   : > { %s161_s29 = scalar_lea.vmem (%p30_p4), %s5852_s0, %s3489_s25  ;;  %s159_s30 = scalar_lea.vmem (%p30_p4), [#allocation4], %s3488_s26 }
  0x14   : > { %v177_v0 = vld [vmem:[%s161_s29] sm:$0xf] (%p30_p4)  ;;  %v179_v1 = vld [vmem:[%s161_s29 + $0x8] sm:$0xf] (%p30_p4)  ;;  %v181_v2 = vld [vmem:[%s161_s29 + $0x10] sm:$0xf] (%p30_p4) }
  0x15   : > { %178 = vst [vmem:[%s159_s30] sm:$0xf] (%p30_p4), %v177_v0  ;;  %180 = vst [vmem:[%s159_s30 + $0x4] sm:$0xf] (%p30_p4), %v179_v1  ;;  %v183_v3 = vld [vmem:[%s161_s29 + $0x18] sm:$0xf] (%p30_p4) }
  0x16   : > { %v185_v4 = vld [vmem:[%s161_s29 + $0x20] sm:$0xf] (%p30_p4)  ;;  %182 = vst [vmem:[%s159_s30 + $0x8] sm:$0xf] (%p30_p4), %v181_v2  ;;  %184 = vst [vmem:[%s159_s30 + $0xc] sm:$0xf] (%p30_p4), %v183_v3 }
  0x17   : > { %186 = vst [vmem:[%s159_s30 + $0x10] sm:$0xf] (%p30_p4), %v185_v4  ;;  %v187_v5 = vld [vmem:[%s161_s29 + $0x28] sm:$0xf] (%p30_p4)  ;;  %v189_v6 = vld [vmem:[%s161_s29 + $0x30] sm:$0xf] (%p30_p4) }
  0x18   : > { %v191_v7 = vld [vmem:[%s161_s29 + $0x38] sm:$0xf]  ;;  %188 = vst [vmem:[%s159_s30 + $0x14] sm:$0xf] %v187_v5  ;;  %190 = vst [vmem:[%s159_s30 + $0x18] sm:$0xf] %v189_v6 }
  0x19   : > { %192 = vst [vmem:[%s159_s30 + $0x1c] sm:$0xf] %v191_v7 }
  0x1a PF: > { %p3490_p7 = scmp.ge.s32.totalorder %s4265_s17, 1  ;;  %p230_p8 = scmp.lt.s32.totalorder %s4265_s17, 3 }
  0x1c   : > { %p231_p9 = pnand %p3490_p7, %p230_p8 }
  0x1e   : > { %234 = sbr.rel (%p231_p9) target bundleno = 5891 (0x1703), region = 73 }
  0x25   : > { %s237_s5 = sand.u32 1, %s4257_s15   ;;  %p3493_p10 = scmp.ne.s32.totalorder %s4314_s18, 0 }
  0x26   : > { %s3491_s6 = sshll.u32 %s237_s5, 5  ;;  %s3492_s7 = sshll.u32 %s237_s5, 6  ;;  %vm266_vm0 = vcmask (!%p3493_p10), 261120   ;;  %v4267_v8 = vmov (!%p3493_p10), 0.0  }
  0x27   : > { %s4342_s8 = scalar_lea.vmem [#allocation4], %s3491_s6  ;;  %s4344_s9 = scalar_lea.vmem [#allocation5], %s3492_s7  ;;  %267 = vst.msk [vmem:[#allocation2] sm:$0xff] (!%p3493_p10), %vm266_vm0, %v4267_v8  ;;  %268 = vst.msk [vmem:[#allocation3] sm:$0xff] (!%p3493_p10), %vm266_vm0, %v4267_v8 }
  0x28   : > { %265 = sbr.rel (%p3493_p10) target bundleno = 47 (0x2f), region = 81 }
  0x2f PF: > { %v3719_v9 = vld [vmem:[%s5853_s1] sm:$0xff]   ;;  %v5857_v10 = vmov 0.0   ;;  %v3721_v12 = vld [vmem:[%s5853_s1 + $0x8] sm:$0xff]   ;;  %vm4269_vm1 = vmmov 0   ;;  %vm320_vm2 = vcmask 261120   ;;  %v3723_v14 = vld [vmem:[%s4342_s8] sm:$0xff]  }
  0x30   : > { %3625 = vmatprep.subr.bf16.mxu1 %v5857_v10  ;;  %v4354_v11 = vld [vmem:[%s5854_s2] sm:$0xff]   ;;  %3613 = vmatprep.subr.bf16.mxu0 %v3719_v9  ;;  %v4365_v13 = vld [vmem:[%s5854_s2 + $0x8] sm:$0xff]   ;;  %v3724_v17 = vld [vmem:[%s4342_s8 + $0x8] sm:$0xff]   ;;  %s4270_s25 = smov 32   ;;  %vm774_vm3 = vcmask 1041409   ;;  %vm777_vm4 = vcmask 1042434  }
  0x31   : > { %3629 = vmatprep.mubr.msk.bf16.mxu1 %vm4269_vm1, %v5857_v10  ;;  %3626 = vmatpush3.bf16.msra.mxu1 %v4354_v11  ;;  %v402_v15 = vld [vmem:[#allocation2] sm:$0xff]  ;;  %v3726_v19 = vld [vmem:[%s4342_s8 + $0x18] sm:$0xff]   ;;  %vm780_vm5 = vcmask 1043459   ;;  %vm783_vm6 = vcmask 1044484   ;;  %vm786_vm7 = vcmask 1045509   ;;  %vm789_vm8 = vcmask 1046534  }
  0x32   : > { %3614 = vmatpush3.bf16.msra.mxu0 %v3719_v9  ;;  %3627 = vmatprep.subr.bf16.mxu1 %v5857_v10  ;;  %v404_v16 = vpack.c.bf16 %v402_v15, %v402_v15  ;;  %v3725_v18 = vld [vmem:[%s4342_s8 + $0x10] sm:$0xff]   ;;  %v4424_v62 = vld [vmem:[#allocation3] sm:$0xff]  ;;  %vm792_vm9 = vcmask 1047559   ;;  %s4271_s26 = smov 64   ;;  %vm740_vm10 = vcmask 253952   ;;  %vm1112_vm11 = vcmask 254977  }
  0x33   : > { %3615 = vmatprep.subr.bf16.mxu0 %v3721_v12  ;;  %3617 = vmatprep.mubr.msk.bf16.mxu0 %vm320_vm2, %v3723_v14  ;;  %v3494_v20 = vld [vmem:[%s5855_s3] ss:$0 sm:$0xff]  ;;  %v541_v0 = vrot.slane %v4424_v62, 1  ;;  %v542_v2 = vrot.slane %v4424_v62, 2  ;;  %v543_v3 = vrot.slane %v4424_v62, 3  ;;  %v546_v4 = vrot.slane %v4424_v62, 6 }
  0x34   : > { %v544_v5 = vrot.slane %v4424_v62, 4  ;;  %v545_v6 = vrot.slane %v4424_v62, 5  ;;  %vm1477_vm12 = vcmask 256002   ;;  %vm1842_vm13 = vcmask 257027   ;;  %s4272_s10 = smov 96   ;;  %s3580_s11 = sshll.u32 (%p4329_p5), %s4314_s18, 3 }
  0x35   : > { %3628 = vmatpush3.bf16.msra.mxu1 %v4365_v13  ;;  %vm2207_vm14 = vcmask 258052   ;;  %vm2572_vm15 = vcmask 259077   ;;  %vm2937_vm0 = vcmask 260102   ;;  %s3367_s14 = scalar_lea.vmem (%p4329_p5), %s5856_s4, %s3580_s11 }
  0x36   : > { %3616 = vmatpush3.bf16.msra.mxu0 %v3721_v12  ;;  %3633 = vmatprep.subr.bf16.mxu1 %v5857_v10 }
  0x37   : > { %3641 = vmatprep.subr.bf16.mxu0 %v5857_v10 }
  0x38   : > { %3630 = vmatmul.mubr.msk.bf16.vlgmr.msra.gmra.mrb[0].mxu1 %vm320_vm2, %v404_v16 }
  0x39   : > { %3618 = vmatmul.mubr.msk.bf16.vlgmr.msra.gmra.mrb[0].mxu0 %vm320_vm2, %v3724_v17  ;;  %3634 = vmatpush3.bf16.msra.mxu1 %v4354_v11 }
  0x3a   : > { %3621 = vmatprep.mubr.msk.bf16.mxu0 %vm320_vm2, %v3725_v18  ;;  %3635 = vmatprep.subr.bf16.mxu1 %v5857_v10 }
  0x3b   : > { %3637 = vmatprep.mubr.msk.bf16.mxu1 %vm4269_vm1, %v5857_v10  ;;  %3642 = vmatpush3.bf16.msra.mxu0 %v4354_v11 }
  0x3c   : > { %3643 = vmatprep.subr.bf16.mxu0 %v5857_v10 }
  0x3d   : > { %3636 = vmatpush3.bf16.msra.mxu1 %v4365_v13 }
  0x3e   : > { %3649 = vmatprep.subr.bf16.mxu1 %v5857_v10 }
  0x3f   : > { %3644 = vmatpush3.bf16.msra.mxu0 %v4365_v13 }
  0x40   : > { %3657 = vmatprep.subr.bf16.mxu0 %v5857_v10 }
  0x41   : > { %3622 = vmatmul.mubr.msk.bf16.gmra.mrb[4].mxu0 %vm320_vm2, %v3726_v19 }
  0x42   : > { %3645 = vmatprep.mubr.msk.bf16.mxu0 %vm4269_vm1, %v5857_v10 }
 0x10b   : > { %v454_v21 = vpop.f32.mrb[0].mxu1 }
 0x10c   : > { %v3619_v22 = vpop.f32.mrb[0].mxu0  ;;  %v3631_v23 = vpop.f32.mrb[1].mxu1  ;;  %v462_v31 = vrot.slane %v454_v21, 2  ;;  %v461_v32 = vrot.slane %v454_v21, 1  ;;  %v463_v38 = vrot.slane %v454_v21, 3  ;;  %v464_v42 = vrot.slane %v454_v21, 4 }
 0x10d   : > { %v367_v24 = vpop.f32.mrb[1].mxu0  ;;  %v4395_v25 = vadd.f32 %v3619_v22, %v3494_v20  ;;  %v457_v27 = vpop.f32.mrb[2].mxu1  ;;  %v465_v47 = vrot.slane %v454_v21, 5  ;;  %v466_v50 = vrot.slane %v454_v21, 6  ;;  %v467_v56 = vrot.slane %v454_v21, 7 }
 0x10e   : > { %v4397_v26 = vadd.f32 %v3494_v20, %v367_v24  ;;  %v3620_v28 = vpop.f32.mrb[2].mxu0  ;;  %v3632_v29 = vpop.f32.mrb[3].mxu1 }
 0x10f   : > { %v370_v30 = vpop.f32.mrb[3].mxu0  ;;  %v4402_v35 = vadd.f32 %v3620_v28, %v3494_v20  ;;  %v478_v36 = vadd.f32 %v462_v31, %v4395_v25 }
 0x110   : > { %v4399_v33 = vadd.f32 %v3494_v20, %v370_v30  ;;  %v476_v34 = vadd.f32 %v454_v21, %v4397_v26 }
 0x111   : > { %v479_v41 = vadd.f32 %v463_v38, %v4402_v35  ;;  %v3510_v7 = vmul.f32 -1.442695, %v478_v36 }
 0x112   : > { %3727 = vtanh.f32 %v476_v34  ;;  %v477_v37 = vadd.f32 %v461_v32, %v4399_v33  ;;  %v3508_v8 = vmul.f32 -1.442695, %v476_v34 }
 0x113   : > { %3729 = vtanh.f32 %v478_v36  ;;  %v3511_v9 = vmul.f32 -1.442695, %v479_v41 }
 0x114   : > { %v3623_v39 = vpop.f32.mrb[4].mxu0  ;;  %3731 = vtanh.f32 %v477_v37  ;;  %v3509_v12 = vmul.f32 -1.442695, %v477_v37 }
 0x115   : > { %v383_v40 = vpop.f32.mrb[5].mxu0  ;;  %v4409_v45 = vadd.f32 %v3623_v39, %v3494_v20  ;;  %3733 = vtanh.f32 %v479_v41 }
 0x116   : > { %v4407_v43 = vadd.f32 %v3494_v20, %v383_v40  ;;  %v3624_v44 = vpop.f32.mrb[6].mxu0 }
 0x117   : > { %v386_v46 = vpop.f32.mrb[7].mxu0  ;;  %v4415_v52 = vadd.f32 %v3624_v44, %v3494_v20  ;;  %v482_v53 = vadd.f32 %v466_v50, %v4409_v45 }
 0x118   : > { %v4411_v48 = vadd.f32 %v3494_v20, %v386_v46  ;;  %v480_v49 = vadd.f32 %v464_v42, %v4407_v43 }
 0x119   : > { %v483_v57 = vadd.f32 %v467_v56, %v4415_v52  ;;  %v3514_v17 = vmul.f32 -1.442695, %v482_v53 }
 0x11a   : > { %3735 = vtanh.f32 %v480_v49  ;;  %v481_v51 = vadd.f32 %v465_v47, %v4411_v48  ;;  %v3512_v14 = vmul.f32 -1.442695, %v480_v49 }
 0x11b   : > { %v3515_v20 = vmul.f32 -1.442695, %v483_v57 }
 0x11c   : > { %v3728_v54 = vpop.eup %3727  ;;  %3737 = vtanh.f32 %v481_v51  ;;  %v3513_v16 = vmul.f32 -1.442695, %v481_v51 }
 0x11d   : > { %v3730_v55 = vpop.eup %3729  ;;  %588 = vrot.lane.b32.xlu1 %v3728_v54, %s4270_s25  ;;  %3739 = vtanh.f32 %v482_v53 }
 0x11e   : > { %592 = vrot.lane.b32.xlu0 %v3730_v55, %s4270_s25  ;;  %v3732_v58 = vpop.eup %3731  ;;  %3741 = vtanh.f32 %v483_v57 }
 0x11f   : > { %v3734_v59 = vpop.eup %3733  ;;  %3743 = vpow2.f32 %v3510_v7 }
 0x120   : > { %3745 = vpow2.f32 %v3508_v8 }
 0x121   : > { %594 = vrot.lane.b32.xlu1 %v3734_v59, %s4270_s25  ;;  %3747 = vpow2.f32 %v3511_v9 }
 0x122   : > { %590 = vrot.lane.b32.xlu0 %v3732_v58, %s4270_s25  ;;  %3749 = vpow2.f32 %v3509_v12  ;;  %v547_v58 = vrot.slane %v4424_v62, 7 }
 0x123   : > { %3751 = vpow2.f32 %v3512_v14 }
 0x124   : > { %v3736_v60 = vpop.eup %3735  ;;  %3753 = vpow2.f32 %v3513_v16 }
 0x125   : > { %3755 = vpow2.f32 %v3514_v17 }
 0x126   : > { %596 = vrot.lane.b32.xlu0 %v3736_v60, %s4270_s25  ;;  %v3738_v61 = vpop.eup %3737 }
 0x127   : > { %598 = vrot.lane.b32.xlu1 %v3738_v61, %s4270_s25  ;;  %v3740_v63 = vpop.eup %3739 }
 0x128   : > { %v3742_v1 = vpop.eup %3741 }
 0x129   : > { %v3744_v15 = vpop.eup %3743 }
 0x12a   : > { %600 = vrot.lane.b32.xlu0 %v3740_v63, %s4270_s25  ;;  %v510_v18 = vadd.f32 1.0, %v3744_v15  ;;  %v3746_v19 = vpop.eup %3745 }
 0x12b   : > { %602 = vrot.lane.b32.xlu1 %v3742_v1, %s4270_s25  ;;  %v3748_v21 = vpop.eup %3747  ;;  %v508_v23 = vadd.f32 1.0, %v3746_v19 }
 0x12c   : > { %v3750_v22 = vpop.eup %3749  ;;  %3757 = vrcp.f32 %v510_v18  ;;  %v511_v27 = vadd.f32 1.0, %v3748_v21 }
 0x12d   : > { %v3752_v24 = vpop.eup %3751  ;;  %3759 = vpow2.f32 %v3515_v20  ;;  %v509_v28 = vadd.f32 1.0, %v3750_v22 }
 0x12e   : > { %550 = vrot.lane.b32.xlu0 %v541_v0, %s4270_s25  ;;  %3761 = vrcp.f32 %v508_v23  ;;  %v512_v29 = vadd.f32 1.0, %v3752_v24  ;;  %v3754_v30 = vpop.eup %3753 }
 0x12f   : > { %552 = vrot.lane.b32.xlu1 %v542_v2, %s4270_s25  ;;  %3763 = vrcp.f32 %v511_v27  ;;  %v3756_v31 = vpop.eup %3755  ;;  %v513_v37 = vadd.f32 1.0, %v3754_v30 }
 0x130   : > { %3765 = vrcp.f32 %v509_v28  ;;  %v514_v40 = vadd.f32 1.0, %v3756_v31 }
 0x131   : > { %3767 = vrcp.f32 %v512_v29 }
 0x132   : > { %548 = vrot.lane.b32.xlu0 %v4424_v62, %s4270_s25  ;;  %3769 = vrcp.f32 %v513_v37 }
 0x133   : > { %554 = vrot.lane.b32.xlu1 %v543_v3, %s4270_s25  ;;  %3771 = vrcp.f32 %v514_v40 }
 0x136   : > { %560 = vrot.lane.b32.xlu0 %v546_v4, %s4270_s25  ;;  %v4443_v32 = vpop.eup %3757 }
 0x137   : > { %556 = vrot.lane.b32.xlu1 %v544_v5, %s4270_s25  ;;  %v3760_v38 = vpop.eup %3759 }
 0x138   : > { %v4447_v41 = vpop.eup %3761  ;;  %v515_v44 = vadd.f32 1.0, %v3760_v38 }
 0x139   : > { %v4450_v47 = vpop.eup %3763 }
 0x13a   : > { %v4452_v50 = vpop.eup %3765  ;;  %3773 = vrcp.f32 %v515_v44 }
 0x13b   : > { %558 = vrot.lane.b32.xlu1 %v545_v6, %s4270_s25  ;;  %v4456_v53 = vpop.eup %3767 }
 0x13c   : > { %v4464_v59 = vpop.eup %3769 }
 0x13d   : > { %v4468_v63 = vpop.eup %3771 }
 0x144   : > { %v4472_v2 = vpop.eup %3773 }
 0x18f   : > { %v589_v36 = vpop.permute.xlu1 %588 }
 0x190   : > { %v593_v34 = vpop.permute.xlu0 %592  ;;  %v612_v46 = vmul.f32 %v4447_v41, %v589_v36 }
 0x191   : > { %v614_v39 = vmul.f32 %v4443_v32, %v593_v34 }
 0x193   : > { %632 = vrot.lane.b32.xlu0 %v614_v39, %s4270_s25  ;;  %v595_v49 = vpop.permute.xlu1 %594 }
 0x194   : > { %v591_v42 = vpop.permute.xlu0 %590  ;;  %v615_v51 = vmul.f32 %v4450_v47, %v595_v49 }
 0x195   : > { %v613_v55 = vmul.f32 %v4452_v50, %v591_v42 }
 0x196   : > { %634 = vrot.lane.b32.xlu1 %v615_v51, %s4270_s25 }
 0x197   : > { %628 = vrot.lane.b32.xlu0 %v612_v46, %s4270_s25 }
 0x198   : > { %v597_v54 = vpop.permute.xlu0 %596 }
 0x199   : > { %v616_v56 = vmul.f32 %v4456_v53, %v597_v54  ;;  %v599_v57 = vpop.permute.xlu1 %598 }
 0x19a   : > { %v617_v61 = vmul.f32 %v4464_v59, %v599_v57 }
 0x19b   : > { %630 = vrot.lane.b32.xlu0 %v613_v55, %s4270_s25  ;;  %636 = vrot.lane.b32.xlu1 %v616_v56, %s4270_s25 }
 0x19c   : > { %v601_v60 = vpop.permute.xlu0 %600 }
 0x19d   : > { %v603_v0 = vpop.permute.xlu1 %602  ;;  %v618_v1 = vmul.f32 %v4468_v63, %v601_v60 }
 0x19e   : > { %v619_v62 = vmul.f32 %v4472_v2, %v603_v0 }
 0x19f   : > { %562 = vrot.lane.b32.xlu0 %v547_v58, %s4270_s25  ;;  %638 = vrot.lane.b32.xlu1 %v617_v61, %s4270_s25 }
 0x1a0   : > { %v551_v3 = vpop.permute.xlu0 %550 }
 0x1a1   : > { %v553_v4 = vpop.permute.xlu1 %552  ;;  %v573_v21 = vmul.f32 %v4452_v50, %v551_v3 }
 0x1a2   : > { %v574_v9 = vmul.f32 %v4443_v32, %v553_v4 }
 0x1a3   : > { %640 = vrot.lane.b32.xlu0 %v618_v1, %s4270_s25  ;;  %642 = vrot.lane.b32.xlu1 %v619_v62, %s4270_s25 }
 0x1a4   : > { %v549_v5 = vpop.permute.xlu0 %548 }
 0x1a5   : > { %v555_v6 = vpop.permute.xlu1 %554  ;;  %v572_v16 = vmul.f32 %v4447_v41, %v549_v5 }
 0x1a6   : > { %v575_v18 = vmul.f32 %v4450_v47, %v555_v6 }
 0x1a8   : > { %v561_v7 = vpop.permute.xlu0 %560 }
 0x1a9   : > { %v557_v8 = vpop.permute.xlu1 %556  ;;  %v578_v37 = vmul.f32 %v4468_v63, %v561_v7 }
 0x1aa   : > { %v576_v24 = vmul.f32 %v4456_v53, %v557_v8 }
 0x1ad   : > { %v559_v15 = vpop.permute.xlu1 %558 }
 0x1ae   : > { %v577_v34 = vmul.f32 %v4464_v59, %v559_v15 }
 0x205   : > { %v633_v12 = vpop.permute.xlu0 %632 }
 0x206   : > { %v4478_v14 = vadd.f32 %v633_v12, %v574_v9 }
 0x208   : > { %3775 = vtanh.f32 %v4478_v14  ;;  %v635_v20 = vpop.permute.xlu1 %634 }
 0x209   : > { %v629_v17 = vpop.permute.xlu0 %628  ;;  %v4487_v22 = vadd.f32 %v635_v20, %v575_v18 }
 0x20a   : > { %v4483_v19 = vadd.f32 %v629_v17, %v572_v16 }
 0x20c   : > { %3777 = vtanh.f32 %v4483_v19 }
 0x20d   : > { %v631_v23 = vpop.permute.xlu0 %630  ;;  %3779 = vtanh.f32 %v4487_v22  ;;  %v637_v28 = vpop.permute.xlu1 %636 }
 0x20e   : > { %v4491_v27 = vadd.f32 %v631_v23, %v573_v21  ;;  %v4494_v29 = vadd.f32 %v637_v28, %v576_v24 }
 0x210   : > { %3781 = vtanh.f32 %v4491_v27 }
 0x211   : > { %v563_v30 = vpop.permute.xlu0 %562  ;;  %v639_v36 = vpop.permute.xlu1 %638  ;;  %3783 = vtanh.f32 %v4494_v29 }
 0x212   : > { %v3776_v31 = vpop.eup %3775  ;;  %v4500_v38 = vadd.f32 %v639_v36, %v577_v34  ;;  %v579_v42 = vmul.f32 %v4472_v2, %v563_v30 }
 0x213   : > { %680 = vrot.lane.b32.xlu1 %v3776_v31, %s4270_s25 }
 0x214   : > { %3785 = vtanh.f32 %v4500_v38 }
 0x215   : > { %v641_v39 = vpop.permute.xlu0 %640  ;;  %v643_v46 = vpop.permute.xlu1 %642 }
 0x216   : > { %v3778_v40 = vpop.eup %3777  ;;  %v4504_v44 = vadd.f32 %v641_v39, %v578_v37  ;;  %v4508_v51 = vadd.f32 %v643_v46, %v579_v42 }
 0x217   : > { %676 = vrot.lane.b32.xlu0 %v3778_v40, %s4270_s25  ;;  %v3780_v49 = vpop.eup %3779 }
 0x218   : > { %3787 = vtanh.f32 %v4504_v44  ;;  %682 = vrot.lane.b32.xlu1 %v3780_v49, %s4270_s25 }
 0x219   : > { %3789 = vtanh.f32 %v4508_v51 }
 0x21a   : > { %v3782_v54 = vpop.eup %3781 }
 0x21b   : > { %678 = vrot.lane.b32.xlu0 %v3782_v54, %s4270_s25  ;;  %v3784_v55 = vpop.eup %3783 }
 0x21e   : > { %v3786_v56 = vpop.eup %3785 }
 0x21f   : > { %684 = vrot.lane.b32.xlu0 %v3784_v55, %s4270_s25  ;;  %686 = vrot.lane.b32.xlu1 %v3786_v56, %s4270_s25 }
 0x222   : > { %v3788_v57 = vpop.eup %3787 }
 0x223   : > { %688 = vrot.lane.b32.xlu0 %v3788_v57, %s4270_s25  ;;  %v3790_v58 = vpop.eup %3789 }
 0x224   : > { %690 = vrot.lane.b32.xlu1 %v3790_v58, %s4270_s25 }
 0x285   : > { %v681_v60 = vpop.permute.xlu1 %680 }
 0x286   : > { %v4518_v61 = vmul.f32 %v4443_v32, %v681_v60 }
 0x288   : > { %v751_v4 = vpack.c.bf16 %v4518_v61, %v4518_v61 }
 0x289   : > { %v677_v0 = vpop.permute.xlu0 %676 }
 0x28a   : > { %v683_v1 = vpop.permute.xlu1 %682  ;;  %v4521_v62 = vmul.f32 %v4447_v41, %v677_v0  ;;  %v767_v8 = vunpack.c.l.b16 %v751_v4 }
 0x28b   : > { %v4524_v3 = vmul.f32 %v4450_v47, %v683_v1 }
 0x28c   : > { %v749_v32 = vpack.c.bf16 %v4521_v62, %v4521_v62  ;;  %v776_v21 = vrot.slane %v767_v8, 6 }
 0x28d   : > { %v679_v5 = vpop.permute.xlu0 %678  ;;  %v752_v6 = vpack.c.bf16 %v4524_v3, %v4524_v3 }
 0x28e   : > { %v4531_v7 = vmul.f32 %v4452_v50, %v679_v5  ;;  %v765_v17 = vunpack.c.l.b16 %v749_v32 }
 0x28f   : > { %v768_v9 = vunpack.c.l.b16 %v752_v6 }
 0x290   : > { %v750_v41 = vpack.c.bf16 %v4531_v7, %v4531_v7 }
 0x291   : > { %v685_v47 = vpop.permute.xlu0 %684  ;;  %v687_v16 = vpop.permute.xlu1 %686  ;;  %v779_v23 = vrot.slane %v768_v9, 5 }
 0x292   : > { %v766_v12 = vunpack.c.l.b16 %v750_v41  ;;  %v4538_v15 = vmul.f32 %v4456_v53, %v685_v47  ;;  %v4543_v20 = vmul.f32 %v4464_v59, %v687_v16 }
 0x294   : > { %v773_v18 = vrot.slane %v766_v12, 7  ;;  %v753_v50 = vpack.c.bf16 %v4538_v15, %v4538_v15  ;;  %v754_v53 = vpack.c.bf16 %v4543_v20, %v4543_v20 }
 0x295   : > { %v689_v24 = vpop.permute.xlu0 %688 }
 0x296   : > { %v775_v28 = vsel %vm774_vm3, %v773_v18, %v765_v17  ;;  %v769_v30 = vunpack.c.l.b16 %v753_v50  ;;  %v4549_v31 = vmul.f32 %v4468_v63, %v689_v24  ;;  %v691_v36 = vpop.permute.xlu1 %690  ;;  %v770_v39 = vunpack.c.l.b16 %v754_v53 }
 0x297   : > { %v778_v34 = vsel %vm777_vm4, %v776_v21, %v775_v28  ;;  %v4556_v42 = vmul.f32 %v4472_v2, %v691_v36 }
 0x298   : > { %v781_v59 = vsel %vm780_vm5, %v779_v23, %v778_v34  ;;  %v782_v37 = vrot.slane %v769_v30, 4  ;;  %v755_v40 = vpack.c.bf16 %v4549_v31, %v4549_v31  ;;  %v785_v49 = vrot.slane %v770_v39, 3 }
 0x299   : > { %v756_v63 = vpack.c.bf16 %v4556_v42, %v4556_v42 }
 0x29a   : > { %v784_v46 = vsel %vm783_vm6, %v782_v37, %v781_v59  ;;  %v771_v54 = vunpack.c.l.b16 %v755_v40 }
 0x29b   : > { %v772_v56 = vunpack.c.l.b16 %v756_v63  ;;  %v787_v57 = vsel %vm786_vm7, %v785_v49, %v784_v46 }
 0x29c   : > { %v788_v55 = vrot.slane %v771_v54, 2 }
 0x29d   : > { %v791_v60 = vrot.slane %v772_v56, 1 }
 0x29e   : > { %v790_v58 = vsel %vm789_vm8, %v788_v55, %v787_v57 }
 0x29f   : > { %v793_v2 = vsel %vm792_vm9, %v791_v60, %v790_v58 }
 0x2a0   : > { %v794_v0 = vpack.c.b16 %v793_v2, %v793_v2 }
 0x2a2   : > { %795 = vrot.lane.b32.xlu0 %v794_v0, %s4271_s26 }
 0x314   : > { %v796_v1 = vpop.permute.xlu0 %795 }
 0x315   : > { %3638 = vmatmul.mubr.msk.bf16.vlgmr.msra.gmra.mrb[4].mxu1 %vm320_vm2, %v796_v1 }
 0x316   : > { %3650 = vmatpush3.bf16.msra.mxu1 %v4354_v11  ;;  %3653 = vmatprep.mubr.msk.bf16.mxu1 %vm4269_vm1, %v5857_v10 }
 0x317   : > { %3651 = vmatprep.subr.bf16.mxu1 %v5857_v10 }
 0x31a   : > { %3652 = vmatpush3.bf16.msra.mxu1 %v4365_v13 }
 0x31b   : > { %3665 = vmatprep.subr.bf16.mxu1 %v5857_v10 }
 0x3e8   : > { %v834_v4 = vpop.f32.mrb[4].mxu1 }
 0x3e9   : > { %v3639_v5 = vpop.f32.mrb[5].mxu1  ;;  %v842_v41 = vrot.slane %v834_v4, 1  ;;  %v841_v8 = vrot.slane %v834_v4, 7  ;;  %v857_v9 = vadd.f32 %v834_v4, %v4399_v33  ;;  %v843_v47 = vrot.slane %v834_v4, 2 }
 0x3ea   : > { %v837_v6 = vpop.f32.mrb[6].mxu1  ;;  %v844_v12 = vrot.slane %v834_v4, 3  ;;  %v845_v17 = vrot.slane %v834_v4, 4  ;;  %v846_v18 = vrot.slane %v834_v4, 5  ;;  %v847_v21 = vrot.slane %v834_v4, 6 }
 0x3eb   : > { %v3640_v32 = vpop.f32.mrb[7].mxu1  ;;  %v858_v11 = vadd.f32 %v842_v41, %v4395_v25  ;;  %v856_v16 = vadd.f32 %v841_v8, %v4397_v26  ;;  %3791 = vtanh.f32 %v857_v9  ;;  %v859_v13 = vadd.f32 %v843_v47, %v4402_v35 }
 0x3ec   : > { %v860_v50 = vadd.f32 %v844_v12, %v4407_v43  ;;  %v861_v23 = vadd.f32 %v845_v17, %v4411_v48  ;;  %v862_v24 = vadd.f32 %v846_v18, %v4409_v45  ;;  %v863_v28 = vadd.f32 %v847_v21, %v4415_v52 }
 0x3ed   : > { %3793 = vtanh.f32 %v858_v11  ;;  %v3518_v46 = vmul.f32 -1.442695, %v857_v9  ;;  %v3519_v49 = vmul.f32 -1.442695, %v858_v11  ;;  %v3517_v54 = vmul.f32 -1.442695, %v856_v16 }
 0x3ee   : > { %3795 = vtanh.f32 %v856_v16  ;;  %v3520_v63 = vmul.f32 -1.442695, %v859_v13  ;;  %v3521_v55 = vmul.f32 -1.442695, %v860_v50  ;;  %v3522_v56 = vmul.f32 -1.442695, %v861_v23 }
 0x3ef   : > { %3797 = vtanh.f32 %v859_v13  ;;  %v3523_v57 = vmul.f32 -1.442695, %v862_v24  ;;  %v3524_v58 = vmul.f32 -1.442695, %v863_v28 }
 0x3f0   : > { %3799 = vtanh.f32 %v860_v50 }
 0x3f1   : > { %3801 = vtanh.f32 %v861_v23 }
 0x3f2   : > { %3803 = vtanh.f32 %v862_v24 }
 0x3f3   : > { %3805 = vtanh.f32 %v863_v28 }
 0x3f4   : > { %3807 = vpow2.f32 %v3518_v46 }
 0x3f5   : > { %v3792_v30 = vpop.eup %3791  ;;  %3809 = vpow2.f32 %v3519_v49 }
 0x3f6   : > { %962 = vrot.lane.b32.xlu1 %v3792_v30, %s4270_s25  ;;  %3811 = vpow2.f32 %v3517_v54 }
 0x3f7   : > { %v3794_v53 = vpop.eup %3793  ;;  %3813 = vpow2.f32 %v3520_v63 }
 0x3f8   : > { %964 = vrot.lane.b32.xlu0 %v3794_v53, %s4270_s25  ;;  %v3796_v34 = vpop.eup %3795  ;;  %3815 = vpow2.f32 %v3521_v55 }
 0x3f9   : > { %v3798_v36 = vpop.eup %3797  ;;  %3817 = vpow2.f32 %v3522_v56 }
 0x3fa   : > { %960 = vrot.lane.b32.xlu1 %v3796_v34, %s4270_s25  ;;  %v3800_v59 = vpop.eup %3799  ;;  %3819 = vpow2.f32 %v3523_v57 }
 0x3fb   : > { %v3802_v37 = vpop.eup %3801  ;;  %3821 = vpow2.f32 %v3524_v58 }
 0x3fc   : > { %966 = vrot.lane.b32.xlu0 %v3798_v36, %s4270_s25  ;;  %v3804_v39 = vpop.eup %3803 }
 0x3fd   : > { %v3806_v40 = vpop.eup %3805 }
 0x3fe   : > { %968 = vrot.lane.b32.xlu1 %v3800_v59, %s4270_s25  ;;  %v3808_v60 = vpop.eup %3807 }
 0x3ff   : > { %v3810_v2 = vpop.eup %3809  ;;  %v889_v0 = vadd.f32 1.0, %v3808_v60 }
 0x400   : > { %970 = vrot.lane.b32.xlu0 %v3802_v37, %s4270_s25  ;;  %v3812_v1 = vpop.eup %3811  ;;  %v890_v4 = vadd.f32 1.0, %v3810_v2  ;;  %v929_v2 = vrot.slane %v4491_v27, 7 }
 0x401   : > { %v3814_v5 = vpop.eup %3813  ;;  %3823 = vrcp.f32 %v889_v0  ;;  %v888_v6 = vadd.f32 1.0, %v3812_v1  ;;  %v930_v0 = vrot.slane %v4478_v14, 7 }
 0x402   : > { %972 = vrot.lane.b32.xlu1 %v3804_v39, %s4270_s25  ;;  %v3816_v32 = vpop.eup %3815  ;;  %3825 = vrcp.f32 %v890_v4  ;;  %v891_v41 = vadd.f32 1.0, %v3814_v5 }
 0x403   : > { %v3818_v8 = vpop.eup %3817  ;;  %3827 = vrcp.f32 %v888_v6  ;;  %v892_v9 = vadd.f32 1.0, %v3816_v32  ;;  %v928_v6 = vrot.slane %v4483_v19, 7 }
 0x404   : > { %974 = vrot.lane.b32.xlu0 %v3806_v40, %s4270_s25  ;;  %v3820_v47 = vpop.eup %3819  ;;  %3829 = vrcp.f32 %v891_v41  ;;  %v893_v11 = vadd.f32 1.0, %v3818_v8  ;;  %v931_v8 = vrot.slane %v4487_v22, 7 }
 0x405   : > { %v3822_v12 = vpop.eup %3821  ;;  %3831 = vrcp.f32 %v892_v9  ;;  %v894_v16 = vadd.f32 1.0, %v3820_v47 }
 0x406   : > { %3833 = vrcp.f32 %v893_v11  ;;  %v895_v17 = vadd.f32 1.0, %v3822_v12  ;;  %v932_v11 = vrot.slane %v4494_v29, 7 }
 0x407   : > { %3835 = vrcp.f32 %v894_v16  ;;  %v933_v16 = vrot.slane %v4500_v38, 7 }
 0x408   : > { %3837 = vrcp.f32 %v895_v17 }
 0x40b   : > { %v4588_v13 = vpop.eup %3823 }
 0x40c   : > { %v4590_v50 = vpop.eup %3825  ;;  %v945_v1 = vmul.f32 %v4588_v13, %v929_v2 }
 0x40d   : > { %v4595_v28 = vpop.eup %3827  ;;  %v946_v5 = vmul.f32 %v4590_v50, %v930_v0 }
 0x40e   : > { %v4598_v53 = vpop.eup %3829  ;;  %v944_v27 = vmul.f32 %v4595_v28, %v928_v6 }
 0x40f   : > { %v4603_v37 = vpop.eup %3831  ;;  %v947_v47 = vmul.f32 %v4598_v53, %v931_v8 }
 0x410   : > { %v4606_v40 = vpop.eup %3833  ;;  %v948_v22 = vmul.f32 %v4603_v37, %v932_v11 }
 0x411   : > { %v4611_v63 = vpop.eup %3835 }
 0x412   : > { %v4614_v56 = vpop.eup %3837 }
 0x468   : > { %v963_v18 = vpop.permute.xlu1 %962 }
 0x469   : > { %v985_v21 = vmul.f32 %v4588_v13, %v963_v18 }
 0x46a   : > { %v965_v23 = vpop.permute.xlu0 %964 }
 0x46b   : > { %v986_v24 = vmul.f32 %v4590_v50, %v965_v23  ;;  %1002 = vrot.lane.b32.xlu1 %v985_v21, %s4270_s25  ;;  %v949_v21 = vmul.f32 %v4606_v40, %v933_v16  ;;  %v934_v23 = vrot.slane %v4504_v44, 7 }
 0x46c   : > { %v961_v30 = vpop.permute.xlu1 %960 }
 0x46d   : > { %1004 = vrot.lane.b32.xlu0 %v986_v24, %s4270_s25  ;;  %v984_v34 = vmul.f32 %v4595_v28, %v961_v30  ;;  %v935_v30 = vrot.slane %v4508_v51, 7  ;;  %v950_v38 = vmul.f32 %v4611_v63, %v934_v23 }
 0x46e   : > { %v967_v36 = vpop.permute.xlu0 %966 }
 0x46f   : > { %v987_v59 = vmul.f32 %v4598_v53, %v967_v36  ;;  %1000 = vrot.lane.b32.xlu1 %v984_v34, %s4270_s25 }
 0x470   : > { %v969_v39 = vpop.permute.xlu1 %968 }
 0x471   : > { %1006 = vrot.lane.b32.xlu0 %v987_v59, %s4270_s25  ;;  %v988_v46 = vmul.f32 %v4603_v37, %v969_v39  ;;  %v951_v59 = vmul.f32 %v4614_v56, %v935_v30 }
 0x472   : > { %v971_v49 = vpop.permute.xlu0 %970 }
 0x473   : > { %v989_v54 = vmul.f32 %v4606_v40, %v971_v49  ;;  %1008 = vrot.lane.b32.xlu1 %v988_v46, %s4270_s25 }
 0x474   : > { %v973_v55 = vpop.permute.xlu1 %972 }
 0x475   : > { %1010 = vrot.lane.b32.xlu0 %v989_v54, %s4270_s25  ;;  %v990_v57 = vmul.f32 %v4611_v63, %v973_v55 }
 0x476   : > { %v975_v58 = vpop.permute.xlu0 %974 }
 0x477   : > { %v991_v60 = vmul.f32 %v4614_v56, %v975_v58  ;;  %1012 = vrot.lane.b32.xlu1 %v990_v57, %s4270_s25 }
 0x479   : > { %1014 = vrot.lane.b32.xlu0 %v991_v60, %s4270_s25 }
 0x4dd   : > { %v1003_v4 = vpop.permute.xlu1 %1002 }
 0x4de   : > { %v4625_v32 = vadd.f32 %v1003_v4, %v945_v1 }
 0x4df   : > { %v1005_v41 = vpop.permute.xlu0 %1004 }
 0x4e0   : > { %v4628_v9 = vadd.f32 %v1005_v41, %v946_v5  ;;  %3839 = vtanh.f32 %v4625_v32 }
 0x4e1   : > { %v1001_v14 = vpop.permute.xlu1 %1000 }
 0x4e2   : > { %3841 = vtanh.f32 %v4628_v9  ;;  %v4635_v12 = vadd.f32 %v1001_v14, %v944_v27 }
 0x4e3   : > { %v1007_v19 = vpop.permute.xlu0 %1006 }
 0x4e4   : > { %v4638_v17 = vadd.f32 %v1007_v19, %v947_v47  ;;  %3843 = vtanh.f32 %v4635_v12 }
 0x4e5   : > { %v1009_v18 = vpop.permute.xlu1 %1008 }
 0x4e6   : > { %3845 = vtanh.f32 %v4638_v17  ;;  %v4645_v24 = vadd.f32 %v1009_v18, %v948_v22 }
 0x4e7   : > { %v1011_v29 = vpop.permute.xlu0 %1010 }
 0x4e8   : > { %v4648_v34 = vadd.f32 %v1011_v29, %v949_v21  ;;  %3847 = vtanh.f32 %v4645_v24 }
 0x4e9   : > { %v1013_v36 = vpop.permute.xlu1 %1012 }
 0x4ea   : > { %3849 = vtanh.f32 %v4648_v34  ;;  %v3840_v39 = vpop.eup %3839  ;;  %v4654_v46 = vadd.f32 %v1013_v36, %v950_v38 }
 0x4eb   : > { %v1015_v44 = vpop.permute.xlu0 %1014  ;;  %1050 = vrot.lane.b32.xlu1 %v3840_v39, %s4270_s25 }
 0x4ec   : > { %v3842_v49 = vpop.eup %3841  ;;  %v4656_v54 = vadd.f32 %v1015_v44, %v951_v59  ;;  %3851 = vtanh.f32 %v4654_v46 }
 0x4ed   : > { %1052 = vrot.lane.b32.xlu0 %v3842_v49, %s4270_s25 }
 0x4ee   : > { %3853 = vtanh.f32 %v4656_v54  ;;  %v3844_v51 = vpop.eup %3843 }
 0x4ef   : > { %1048 = vrot.lane.b32.xlu1 %v3844_v51, %s4270_s25 }
 0x4f0   : > { %v3846_v55 = vpop.eup %3845 }
 0x4f1   : > { %1054 = vrot.lane.b32.xlu0 %v3846_v55, %s4270_s25 }
 0x4f2   : > { %v3848_v57 = vpop.eup %3847 }
 0x4f3   : > { %1056 = vrot.lane.b32.xlu1 %v3848_v57, %s4270_s25 }
 0x4f4   : > { %v3850_v58 = vpop.eup %3849 }
 0x4f5   : > { %1058 = vrot.lane.b32.xlu0 %v3850_v58, %s4270_s25 }
 0x4f6   : > { %v3852_v60 = vpop.eup %3851 }
 0x4f7   : > { %1060 = vrot.lane.b32.xlu1 %v3852_v60, %s4270_s25 }
 0x4f8   : > { %v3854_v2 = vpop.eup %3853 }
 0x4f9   : > { %1062 = vrot.lane.b32.xlu0 %v3854_v2, %s4270_s25 }
 0x55d   : > { %v1051_v0 = vpop.permute.xlu1 %1050 }
 0x55e   : > { %v4672_v5 = vmul.f32 %v4588_v13, %v1051_v0 }
 0x55f   : > { %v1053_v1 = vpop.permute.xlu0 %1052 }
 0x560   : > { %v4669_v4 = vmul.f32 %v4590_v50, %v1053_v1  ;;  %v1122_v47 = vpack.c.bf16 %v4672_v5, %v4672_v5 }
 0x561   : > { %v1049_v41 = vpop.permute.xlu1 %1048 }
 0x562   : > { %v1123_v6 = vpack.c.bf16 %v4669_v4, %v4669_v4  ;;  %v4677_v8 = vmul.f32 %v4595_v28, %v1049_v41  ;;  %v1138_v21 = vunpack.c.l.b16 %v1122_v47 }
 0x563   : > { %v1055_v27 = vpop.permute.xlu0 %1054 }
 0x564   : > { %v4680_v14 = vmul.f32 %v4598_v53, %v1055_v27  ;;  %v1121_v50 = vpack.c.bf16 %v4677_v8, %v4677_v8  ;;  %v1139_v11 = vunpack.c.l.b16 %v1123_v6 }
 0x565   : > { %v1057_v19 = vpop.permute.xlu1 %1056 }
 0x566   : > { %v1124_v13 = vpack.c.bf16 %v4680_v14, %v4680_v14  ;;  %v1137_v16 = vunpack.c.l.b16 %v1121_v50  ;;  %v4689_v22 = vmul.f32 %v4603_v37, %v1057_v19  ;;  %v1147_v30 = vrot.slane %v1139_v11, 7  ;;  %v4720_v19 = vld [vmem:[%s5854_s2] sm:$0xff]  }
 0x567   : > { %v1059_v28 = vpop.permute.xlu0 %1058 }
 0x568   : > { %v1140_v18 = vunpack.c.l.b16 %v1124_v13  ;;  %v4692_v53 = vmul.f32 %v4606_v40, %v1059_v28  ;;  %v1145_v23 = vrot.slane %v1137_v16, 1  ;;  %v1125_v29 = vpack.c.bf16 %v4689_v22, %v4689_v22  ;;  %v4729_v16 = vld [vmem:[%s5854_s2 + $0x8] sm:$0xff]  }
 0x569   : > { %v1061_v59 = vpop.permute.xlu1 %1060 }
 0x56a   : > { %v1149_v38 = vrot.slane %v1140_v18, 6  ;;  %v1126_v36 = vpack.c.bf16 %v4692_v53, %v4692_v53  ;;  %v1146_v39 = vsel %vm774_vm3, %v1138_v21, %v1145_v23  ;;  %v1141_v37 = vunpack.c.l.b16 %v1125_v29 }
 0x56b   : > { %v4700_v44 = vmul.f32 %v4611_v63, %v1061_v59  ;;  %v1063_v49 = vpop.permute.xlu0 %1062  ;;  %v1148_v40 = vsel %vm777_vm4, %v1147_v30, %v1146_v39 }
 0x56c   : > { %v1142_v51 = vunpack.c.l.b16 %v1126_v36  ;;  %v4704_v55 = vmul.f32 %v4614_v56, %v1063_v49  ;;  %v1150_v57 = vsel %vm780_vm5, %v1149_v38, %v1148_v40  ;;  %v1151_v58 = vrot.slane %v1141_v37, 5 }
 0x56d   : > { %v1127_v60 = vpack.c.bf16 %v4700_v44, %v4700_v44 }
 0x56e   : > { %v1153_v2 = vrot.slane %v1142_v51, 4  ;;  %v1128_v0 = vpack.c.bf16 %v4704_v55, %v4704_v55  ;;  %v1152_v63 = vsel %vm783_vm6, %v1151_v58, %v1150_v57 }
 0x56f   : > { %v1143_v1 = vunpack.c.l.b16 %v1127_v60 }
 0x570   : > { %v1144_v6 = vunpack.c.l.b16 %v1128_v0  ;;  %v1154_v41 = vsel %vm786_vm7, %v1153_v2, %v1152_v63 }
 0x571   : > { %v1155_v27 = vrot.slane %v1143_v1, 3 }
 0x572   : > { %v1157_v47 = vrot.slane %v1144_v6, 2 }
 0x573   : > { %v1156_v56 = vsel %vm789_vm8, %v1155_v27, %v1154_v41 }
 0x574   : > { %v1158_v50 = vsel %vm792_vm9, %v1157_v47, %v1156_v56 }
 0x575   : > { %v1159_v11 = vpack.c.b16 %v1158_v50, %v1158_v50 }
 0x577   : > { %1160 = vrot.lane.b32.xlu1 %v1159_v11, %s4271_s26 }
 0x5e9   : > { %v1161_v13 = vpop.permute.xlu1 %1160 }
 0x5ea   : > { %3646 = vmatmul.mubr.msk.bf16.vlgmr.msra.gmra.mrb[8].mxu0 %vm320_vm2, %v1161_v13 }
 0x5eb   : > { %3658 = vmatpush3.bf16.msra.mxu0 %v4720_v19  ;;  %3661 = vmatprep.mubr.msk.bf16.mxu0 %vm4269_vm1, %v5857_v10 }
 0x5ec   : > { %3659 = vmatprep.subr.bf16.mxu0 %v5857_v10 }
 0x5ef   : > { %3660 = vmatpush3.bf16.msra.mxu0 %v4729_v16 }
 0x5f0   : > { %3673 = vmatprep.subr.bf16.mxu0 %v5857_v10 }
 0x6bd   : > { %v1199_v28 = vpop.f32.mrb[8].mxu0 }
 0x6be   : > { %v1206_v18 = vrot.slane %v1199_v28, 6  ;;  %v3647_v21 = vpop.f32.mrb[9].mxu0  ;;  %v1208_v38 = vrot.slane %v1199_v28, 1  ;;  %v1207_v36 = vrot.slane %v1199_v28, 7  ;;  %v1223_v59 = vadd.f32 %v1199_v28, %v4395_v25 }
 0x6bf   : > { %v1202_v23 = vpop.f32.mrb[10].mxu0  ;;  %v1209_v39 = vrot.slane %v1199_v28, 2  ;;  %v1210_v40 = vrot.slane %v1199_v28, 3  ;;  %v1211_v57 = vrot.slane %v1199_v28, 4  ;;  %v1212_v60 = vrot.slane %v1199_v28, 5 }
 0x6c0   : > { %v1221_v29 = vadd.f32 %v1206_v18, %v4397_v26  ;;  %v3648_v30 = vpop.f32.mrb[11].mxu0  ;;  %v1224_v37 = vadd.f32 %v1208_v38, %v4402_v35  ;;  %v1222_v51 = vadd.f32 %v1207_v36, %v4399_v33  ;;  %v3528_v13 = vmul.f32 -1.442695, %v1223_v59 }
 0x6c1   : > { %v1225_v58 = vadd.f32 %v1209_v39, %v4407_v43  ;;  %v1226_v2 = vadd.f32 %v1210_v40, %v4411_v48  ;;  %v1227_v0 = vadd.f32 %v1211_v57, %v4409_v45  ;;  %v1228_v63 = vadd.f32 %v1212_v60, %v4415_v52 }
 0x6c2   : > { %3855 = vtanh.f32 %v1221_v29  ;;  %v3526_v11 = vmul.f32 -1.442695, %v1221_v29  ;;  %v3529_v28 = vmul.f32 -1.442695, %v1224_v37  ;;  %v3527_v21 = vmul.f32 -1.442695, %v1222_v51 }
 0x6c3   : > { %3857 = vtanh.f32 %v1223_v59  ;;  %v3530_v23 = vmul.f32 -1.442695, %v1225_v58  ;;  %v3531_v38 = vmul.f32 -1.442695, %v1226_v2  ;;  %v3532_v36 = vmul.f32 -1.442695, %v1227_v0 }
 0x6c4   : > { %3859 = vtanh.f32 %v1224_v37  ;;  %v3533_v39 = vmul.f32 -1.442695, %v1228_v63 }
 0x6c5   : > { %3861 = vtanh.f32 %v1222_v51 }
 0x6c6   : > { %3863 = vtanh.f32 %v1225_v58 }
 0x6c7   : > { %3865 = vtanh.f32 %v1226_v2 }
 0x6c8   : > { %3867 = vtanh.f32 %v1227_v0 }
 0x6c9   : > { %3869 = vtanh.f32 %v1228_v63 }
 0x6ca   : > { %3871 = vpow2.f32 %v3526_v11 }
 0x6cb   : > { %3873 = vpow2.f32 %v3528_v13 }
 0x6cc   : > { %v3856_v49 = vpop.eup %3855  ;;  %3875 = vpow2.f32 %v3529_v28 }
 0x6cd   : > { %1325 = vrot.lane.b32.xlu0 %v3856_v49, %s4270_s25  ;;  %v3858_v1 = vpop.eup %3857  ;;  %3877 = vpow2.f32 %v3527_v21 }
 0x6ce   : > { %v3860_v6 = vpop.eup %3859  ;;  %1329 = vrot.lane.b32.xlu1 %v3858_v1, %s4270_s25  ;;  %3879 = vpow2.f32 %v3530_v23 }
 0x6cf   : > { %v3862_v41 = vpop.eup %3861 }
 0x6d0   : > { %v3864_v27 = vpop.eup %3863 }
 0x6d1   : > { %1331 = vrot.lane.b32.xlu0 %v3860_v6, %s4270_s25  ;;  %v3866_v47 = vpop.eup %3865 }
 0x6d2   : > { %1327 = vrot.lane.b32.xlu1 %v3862_v41, %s4270_s25  ;;  %v3868_v56 = vpop.eup %3867 }
 0x6d3   : > { %v3870_v50 = vpop.eup %3869 }
 0x6d4   : > { %v3872_v18 = vpop.eup %3871 }
 0x6d5   : > { %1333 = vrot.lane.b32.xlu0 %v3864_v27, %s4270_s25  ;;  %v1253_v30 = vadd.f32 1.0, %v3872_v18  ;;  %v3874_v49 = vpop.eup %3873 }
 0x6d6   : > { %1335 = vrot.lane.b32.xlu1 %v3866_v47, %s4270_s25  ;;  %v3876_v40 = vpop.eup %3875  ;;  %v1255_v29 = vadd.f32 1.0, %v3874_v49 }
 0x6d7   : > { %3881 = vrcp.f32 %v1253_v30  ;;  %v3878_v59 = vpop.eup %3877  ;;  %v1256_v37 = vadd.f32 1.0, %v3876_v40 }
 0x6d8   : > { %3883 = vpow2.f32 %v3531_v38  ;;  %v3880_v57 = vpop.eup %3879  ;;  %v1254_v60 = vadd.f32 1.0, %v3878_v59 }
 0x6d9   : > { %1337 = vrot.lane.b32.xlu0 %v3868_v56, %s4270_s25  ;;  %3885 = vpow2.f32 %v3532_v36  ;;  %v1257_v0 = vadd.f32 1.0, %v3880_v57 }
 0x6da   : > { %1339 = vrot.lane.b32.xlu1 %v3870_v50, %s4270_s25  ;;  %3887 = vpow2.f32 %v3533_v39 }
 0x6db   : > { %3889 = vrcp.f32 %v1255_v29 }
 0x6dc   : > { %3891 = vrcp.f32 %v1256_v37 }
 0x6dd   : > { %3893 = vrcp.f32 %v1254_v60 }
 0x6de   : > { %3895 = vrcp.f32 %v1257_v0 }
 0x6e1   : > { %v4749_v51 = vpop.eup %3881 }
 0x6e2   : > { %v3884_v1 = vpop.eup %3883 }
 0x6e3   : > { %v3886_v6 = vpop.eup %3885  ;;  %v1258_v63 = vadd.f32 1.0, %v3884_v1 }
 0x6e4   : > { %v3888_v41 = vpop.eup %3887  ;;  %v1259_v27 = vadd.f32 1.0, %v3886_v6 }
 0x6e5   : > { %3897 = vrcp.f32 %v1258_v63  ;;  %v1260_v47 = vadd.f32 1.0, %v3888_v41  ;;  %v4753_v56 = vpop.eup %3889  ;;  %v1295_v41 = vrot.slane %v4628_v9, 7 }
 0x6e6   : > { %3899 = vrcp.f32 %v1259_v27  ;;  %v4755_v11 = vpop.eup %3891  ;;  %v1296_v27 = vrot.slane %v4638_v17, 7 }
 0x6e7   : > { %3901 = vrcp.f32 %v1260_v47  ;;  %v4760_v21 = vpop.eup %3893  ;;  %v1311_v47 = vmul.f32 %v4753_v56, %v1295_v41 }
 0x6e8   : > { %v4763_v30 = vpop.eup %3895 }
 0x6ef   : > { %v4768_v49 = vpop.eup %3897 }
 0x6f0   : > { %v4771_v29 = vpop.eup %3899 }
 0x73f   : > { %v1326_v58 = vpop.permute.xlu0 %1325 }
 0x740   : > { %v1349_v2 = vmul.f32 %v4749_v51, %v1326_v58  ;;  %v1330_v50 = vpop.permute.xlu1 %1329  ;;  %v4776_v58 = vpop.eup %3901 }
 0x741   : > { %v1351_v13 = vmul.f32 %v4753_v56, %v1330_v50 }
 0x742   : > { %1365 = vrot.lane.b32.xlu0 %v1349_v2, %s4270_s25  ;;  %v1293_v2 = vrot.slane %v4635_v12, 7 }
 0x743   : > { %v1332_v28 = vpop.permute.xlu0 %1331  ;;  %1369 = vrot.lane.b32.xlu1 %v1351_v13, %s4270_s25  ;;  %v1312_v13 = vmul.f32 %v4755_v11, %v1296_v27 }
 0x744   : > { %v1352_v18 = vmul.f32 %v4755_v11, %v1332_v28  ;;  %v1328_v23 = vpop.permute.xlu1 %1327  ;;  %v1309_v0 = vmul.f32 %v4749_v51, %v1293_v2  ;;  %v1294_v28 = vrot.slane %v4625_v32, 7  ;;  %v1298_v32 = vrot.slane %v4648_v34, 7 }
 0x745   : > { %v1350_v38 = vmul.f32 %v4760_v21, %v1328_v23  ;;  %v1297_v23 = vrot.slane %v4645_v24, 7  ;;  %v1299_v24 = vrot.slane %v4654_v46, 7  ;;  %v1300_v2 = vrot.slane %v4656_v54, 7 }
 0x746   : > { %1371 = vrot.lane.b32.xlu0 %v1352_v18, %s4270_s25  ;;  %v1310_v9 = vmul.f32 %v4760_v21, %v1294_v28 }
 0x747   : > { %v1334_v36 = vpop.permute.xlu0 %1333  ;;  %1367 = vrot.lane.b32.xlu1 %v1350_v38, %s4270_s25  ;;  %v1316_v46 = vmul.f32 %v4776_v58, %v1300_v2 }
 0x748   : > { %v1353_v39 = vmul.f32 %v4763_v30, %v1334_v36  ;;  %v1336_v40 = vpop.permute.xlu1 %1335 }
 0x749   : > { %v1354_v59 = vmul.f32 %v4768_v49, %v1336_v40 }
 0x74a   : > { %1373 = vrot.lane.b32.xlu0 %v1353_v39, %s4270_s25  ;;  %v1313_v39 = vmul.f32 %v4763_v30, %v1297_v23 }
 0x74b   : > { %v1338_v37 = vpop.permute.xlu0 %1337  ;;  %1375 = vrot.lane.b32.xlu1 %v1354_v59, %s4270_s25 }
 0x74c   : > { %v1355_v57 = vmul.f32 %v4771_v29, %v1338_v37  ;;  %v1340_v60 = vpop.permute.xlu1 %1339 }
 0x74d   : > { %v1356_v1 = vmul.f32 %v4776_v58, %v1340_v60 }
 0x74e   : > { %1377 = vrot.lane.b32.xlu0 %v1355_v57, %s4270_s25  ;;  %v1314_v57 = vmul.f32 %v4768_v49, %v1298_v32 }
 0x74f   : > { %1379 = vrot.lane.b32.xlu1 %v1356_v1, %s4270_s25  ;;  %v1315_v1 = vmul.f32 %v4771_v29, %v1299_v24 }
 0x7b4   : > { %v1366_v6 = vpop.permute.xlu0 %1365 }
 0x7b5   : > { %v4783_v63 = vadd.f32 %v1366_v6, %v1309_v0  ;;  %v1370_v50 = vpop.permute.xlu1 %1369 }
 0x7b6   : > { %v4791_v18 = vadd.f32 %v1370_v50, %v1311_v47 }
 0x7b7   : > { %3903 = vtanh.f32 %v4783_v63 }
 0x7b8   : > { %v1372_v12 = vpop.permute.xlu0 %1371  ;;  %3905 = vtanh.f32 %v4791_v18 }
 0x7b9   : > { %v4794_v38 = vadd.f32 %v1372_v12, %v1312_v13  ;;  %v1368_v17 = vpop.permute.xlu1 %1367 }
 0x7ba   : > { %v4802_v40 = vadd.f32 %v1368_v17, %v1310_v9 }
 0x7bb   : > { %3907 = vtanh.f32 %v4794_v38 }
 0x7bc   : > { %v1374_v59 = vpop.permute.xlu0 %1373  ;;  %3909 = vtanh.f32 %v4802_v40 }
 0x7bd   : > { %v4805_v37 = vadd.f32 %v1374_v59, %v1313_v39  ;;  %v1376_v60 = vpop.permute.xlu1 %1375 }
 0x7be   : > { %v4812_v0 = vadd.f32 %v1376_v60, %v1314_v57 }
 0x7bf   : > { %3911 = vtanh.f32 %v4805_v37 }
 0x7c0   : > { %v1378_v34 = vpop.permute.xlu0 %1377  ;;  %3913 = vtanh.f32 %v4812_v0 }
 0x7c1   : > { %v3904_v36 = vpop.eup %3903  ;;  %v4814_v6 = vadd.f32 %v1378_v34, %v1315_v1  ;;  %v1380_v41 = vpop.permute.xlu1 %1379 }
 0x7c2   : > { %1413 = vrot.lane.b32.xlu0 %v3904_v36, %s4270_s25  ;;  %v3906_v27 = vpop.eup %3905  ;;  %v4819_v47 = vadd.f32 %v1380_v41, %v1316_v46 }
 0x7c3   : > { %3915 = vtanh.f32 %v4814_v6  ;;  %1417 = vrot.lane.b32.xlu1 %v3906_v27, %s4270_s25 }
 0x7c4   : > { %3917 = vtanh.f32 %v4819_v47 }
 0x7c5   : > { %v3908_v50 = vpop.eup %3907 }
 0x7c6   : > { %1419 = vrot.lane.b32.xlu0 %v3908_v50, %s4270_s25  ;;  %v3910_v54 = vpop.eup %3909 }
 0x7c7   : > { %1415 = vrot.lane.b32.xlu1 %v3910_v54, %s4270_s25 }
 0x7c9   : > { %v3912_v13 = vpop.eup %3911 }
 0x7ca   : > { %1421 = vrot.lane.b32.xlu0 %v3912_v13, %s4270_s25  ;;  %v3914_v28 = vpop.eup %3913 }
 0x7cb   : > { %1423 = vrot.lane.b32.xlu1 %v3914_v28, %s4270_s25 }
 0x7cd   : > { %v3916_v12 = vpop.eup %3915 }
 0x7ce   : > { %1425 = vrot.lane.b32.xlu0 %v3916_v12, %s4270_s25  ;;  %v3918_v23 = vpop.eup %3917 }
 0x7cf   : > { %1427 = vrot.lane.b32.xlu1 %v3918_v23, %s4270_s25 }
 0x834   : > { %v1414_v36 = vpop.permute.xlu0 %1413 }
 0x835   : > { %v4830_v9 = vmul.f32 %v4749_v51, %v1414_v36  ;;  %v1418_v17 = vpop.permute.xlu1 %1417 }
 0x836   : > { %v4838_v24 = vmul.f32 %v4753_v56, %v1418_v17 }
 0x837   : > { %v1486_v59 = vpack.c.bf16 %v4830_v9, %v4830_v9 }
 0x838   : > { %v1420_v39 = vpop.permute.xlu0 %1419  ;;  %v1488_v56 = vpack.c.bf16 %v4838_v24, %v4838_v24 }
 0x839   : > { %v4833_v32 = vmul.f32 %v4755_v11, %v1420_v39  ;;  %v1416_v57 = vpop.permute.xlu1 %1415  ;;  %v1502_v34 = vunpack.c.l.b16 %v1486_v59 }
 0x83a   : > { %v4843_v1 = vmul.f32 %v4760_v21, %v1416_v57  ;;  %v1504_v17 = vunpack.c.l.b16 %v1488_v56 }
 0x83b   : > { %v1489_v60 = vpack.c.bf16 %v4833_v32, %v4833_v32  ;;  %v1510_v28 = vrot.slane %v1502_v34, 2 }
 0x83c   : > { %v1422_v51 = vpop.permute.xlu0 %1421  ;;  %v1487_v11 = vpack.c.bf16 %v4843_v1, %v4843_v1 }
 0x83d   : > { %v4846_v2 = vmul.f32 %v4763_v30, %v1422_v51  ;;  %v1505_v46 = vunpack.c.l.b16 %v1489_v60  ;;  %v1424_v41 = vpop.permute.xlu1 %1423 }
 0x83e   : > { %v1503_v50 = vunpack.c.l.b16 %v1487_v11  ;;  %v4855_v21 = vmul.f32 %v4768_v49, %v1424_v41 }
 0x83f   : > { %v1490_v27 = vpack.c.bf16 %v4846_v2, %v4846_v2  ;;  %v1514_v23 = vrot.slane %v1505_v46, 7 }
 0x840   : > { %v1426_v54 = vpop.permute.xlu0 %1425  ;;  %v1511_v12 = vrot.slane %v1503_v50, 1  ;;  %v1491_v36 = vpack.c.bf16 %v4855_v21, %v4855_v21 }
 0x841   : > { %v1506_v13 = vunpack.c.l.b16 %v1490_v27  ;;  %v4858_v30 = vmul.f32 %v4771_v29, %v1426_v54  ;;  %v1428_v59 = vpop.permute.xlu1 %1427 }
 0x842   : > { %v1512_v49 = vsel %vm774_vm3, %v1511_v12, %v1510_v28  ;;  %v1507_v60 = vunpack.c.l.b16 %v1491_v36  ;;  %v4866_v51 = vmul.f32 %v4776_v58, %v1428_v59 }
 0x843   : > { %5886 = vst [vmem:[#allocation6_spill] sm:$0xff] %v4858_v30  ;;  %v1516_v39 = vrot.slane %v1506_v13, 6  ;;  %v1492_v57 = vpack.c.bf16 %v4858_v30, %v4858_v30  ;;  %v1513_v29 = vsel %vm777_vm4, %v1504_v17, %v1512_v49 }
 0x844   : > { %v1515_v11 = vsel %vm780_vm5, %v1514_v23, %v1513_v29  ;;  %v1518_v46 = vrot.slane %v1507_v60, 5  ;;  %v1493_v56 = vpack.c.bf16 %v4866_v51, %v4866_v51 }
 0x845   : > { %v1508_v34 = vunpack.c.l.b16 %v1492_v57  ;;  %v1517_v41 = vsel %vm783_vm6, %v1516_v39, %v1515_v11 }
 0x846   : > { %v1509_v50 = vunpack.c.l.b16 %v1493_v56  ;;  %v1519_v54 = vsel %vm786_vm7, %v1518_v46, %v1517_v41 }
 0x847   : > { %v1520_v27 = vrot.slane %v1508_v34, 4 }
 0x848   : > { %v1522_v28 = vrot.slane %v1509_v50, 3 }
 0x849   : > { %v1521_v13 = vsel %vm789_vm8, %v1520_v27, %v1519_v54 }
 0x84a   : > { %v1523_v58 = vsel %vm792_vm9, %v1522_v28, %v1521_v13 }
 0x84b   : > { %v1524_v12 = vpack.c.b16 %v1523_v58, %v1523_v58 }
 0x84d   : > { %1525 = vrot.lane.b32.xlu0 %v1524_v12, %s4271_s26 }
 0x8bf   : > { %v1526_v36 = vpop.permute.xlu0 %1525 }
 0x8c0   : > { %3654 = vmatmul.mubr.msk.bf16.vlgmr.msra.gmra.mrb[8].mxu1 %vm320_vm2, %v1526_v36 }
 0x8c1   : > { %3666 = vmatpush3.bf16.msra.mxu1 %v4720_v19  ;;  %3669 = vmatprep.mubr.msk.bf16.mxu1 %vm4269_vm1, %v5857_v10 }
 0x8c2   : > { %3667 = vmatprep.subr.bf16.mxu1 %v5857_v10 }
 0x8c5   : > { %3668 = vmatpush3.bf16.msra.mxu1 %v4729_v16 }
 0x8c6   : > { %3681 = vmatprep.subr.bf16.mxu1 %v5857_v10 }
 0x993   : > { %v1564_v23 = vpop.f32.mrb[8].mxu1 }
 0x994   : > { %v3655_v17 = vpop.f32.mrb[9].mxu1  ;;  %v1572_v57 = vrot.slane %v1564_v23, 6  ;;  %v1574_v49 = vrot.slane %v1564_v23, 1  ;;  %v1571_v29 = vrot.slane %v1564_v23, 5  ;;  %v1589_v34 = vadd.f32 %v1564_v23, %v4402_v35 }
 0x995   : > { %v1567_v39 = vpop.f32.mrb[10].mxu1  ;;  %v1575_v11 = vrot.slane %v1564_v23, 2  ;;  %v1573_v56 = vrot.slane %v1564_v23, 7  ;;  %v1577_v27 = vrot.slane %v1564_v23, 4  ;;  %v1576_v54 = vrot.slane %v1564_v23, 3 }
 0x996   : > { %v3656_v59 = vpop.f32.mrb[11].mxu1  ;;  %v1587_v60 = vadd.f32 %v1572_v57, %v4399_v33  ;;  %v1590_v46 = vadd.f32 %v1574_v49, %v4407_v43  ;;  %v1586_v41 = vadd.f32 %v1571_v29, %v4397_v26 }
 0x997   : > { %v1591_v50 = vadd.f32 %v1575_v11, %v4411_v48  ;;  %v1588_v13 = vadd.f32 %v1573_v56, %v4395_v25  ;;  %v1593_v28 = vadd.f32 %v1577_v27, %v4415_v52  ;;  %v1592_v12 = vadd.f32 %v1576_v54, %v4409_v45 }
 0x998   : > { %3919 = vtanh.f32 %v1587_v60  ;;  %v3536_v29 = vmul.f32 -1.442695, %v1587_v60  ;;  %v3538_v11 = vmul.f32 -1.442695, %v1589_v34  ;;  %v3539_v56 = vmul.f32 -1.442695, %v1590_v46 }
 0x999   : > { %3921 = vtanh.f32 %v1589_v34  ;;  %v3535_v27 = vmul.f32 -1.442695, %v1586_v41  ;;  %v3540_v54 = vmul.f32 -1.442695, %v1591_v50 }
 0x99a   : > { %3923 = vtanh.f32 %v1590_v46 }
 0x99b   : > { %3925 = vtanh.f32 %v1586_v41 }
 0x99c   : > { %3927 = vtanh.f32 %v1591_v50 }
 0x99d   : > { %3929 = vtanh.f32 %v1588_v13 }
 0x99e   : > { %3931 = vtanh.f32 %v1593_v28 }
 0x99f   : > { %3933 = vtanh.f32 %v1592_v12 }
 0x9a0   : > { %3935 = vpow2.f32 %v3536_v29 }
 0x9a1   : > { %3937 = vpow2.f32 %v3538_v11 }
 0x9a2   : > { %v3920_v58 = vpop.eup %3919  ;;  %3939 = vpow2.f32 %v3539_v56 }
 0x9a3   : > { %1692 = vrot.lane.b32.xlu0 %v3920_v58, %s4270_s25  ;;  %v3922_v36 = vpop.eup %3921  ;;  %3941 = vpow2.f32 %v3535_v27  ;;  %v3537_v58 = vmul.f32 -1.442695, %v1588_v13 }
 0x9a4   : > { %1696 = vrot.lane.b32.xlu1 %v3922_v36, %s4270_s25  ;;  %v3924_v17 = vpop.eup %3923  ;;  %3943 = vpow2.f32 %v3540_v54  ;;  %v3542_v36 = vmul.f32 -1.442695, %v1593_v28 }
 0x9a5   : > { %v3926_v23 = vpop.eup %3925  ;;  %3945 = vpow2.f32 %v3537_v58 }
 0x9a6   : > { %v3928_v39 = vpop.eup %3927  ;;  %3947 = vpow2.f32 %v3542_v36 }
 0x9a7   : > { %1698 = vrot.lane.b32.xlu0 %v3924_v17, %s4270_s25  ;;  %v3930_v59 = vpop.eup %3929 }
 0x9a8   : > { %1690 = vrot.lane.b32.xlu1 %v3926_v23, %s4270_s25  ;;  %v3932_v57 = vpop.eup %3931  ;;  %v3541_v23 = vmul.f32 -1.442695, %v1592_v12 }
 0x9a9   : > { %v3934_v49 = vpop.eup %3933 }
 0x9aa   : > { %v3936_v17 = vpop.eup %3935  ;;  %3949 = vpow2.f32 %v3541_v23 }
 0x9ab   : > { %1700 = vrot.lane.b32.xlu0 %v3928_v39, %s4270_s25  ;;  %v3938_v39 = vpop.eup %3937 }
 0x9ac   : > { %1694 = vrot.lane.b32.xlu1 %v3930_v59, %s4270_s25  ;;  %v1619_v59 = vadd.f32 1.0, %v3936_v17  ;;  %v1621_v60 = vadd.f32 1.0, %v3938_v39 }
 0x9ae   : > { %3951 = vrcp.f32 %v1619_v59 }
 0x9af   : > { %1704 = vrot.lane.b32.xlu0 %v3932_v57, %s4270_s25  ;;  %v3940_v57 = vpop.eup %3939  ;;  %3953 = vrcp.f32 %v1621_v60 }
 0x9b0   : > { %1702 = vrot.lane.b32.xlu1 %v3934_v49, %s4270_s25  ;;  %v3942_v34 = vpop.eup %3941  ;;  %v1622_v46 = vadd.f32 1.0, %v3940_v57 }
 0x9b1   : > { %v3944_v41 = vpop.eup %3943  ;;  %v1618_v49 = vadd.f32 1.0, %v3942_v34 }
 0x9b2   : > { %v3946_v50 = vpop.eup %3945  ;;  %3955 = vrcp.f32 %v1622_v46  ;;  %v1623_v13 = vadd.f32 1.0, %v3944_v41 }
 0x9b3   : > { %v3948_v29 = vpop.eup %3947  ;;  %3957 = vrcp.f32 %v1618_v49  ;;  %v1620_v28 = vadd.f32 1.0, %v3946_v50 }
 0x9b4   : > { %v3950_v11 = vpop.eup %3949  ;;  %3959 = vrcp.f32 %v1623_v13  ;;  %v1625_v12 = vadd.f32 1.0, %v3948_v29 }
 0x9b5   : > { %3961 = vrcp.f32 %v1620_v28  ;;  %v1624_v54 = vadd.f32 1.0, %v3950_v11 }
 0x9b6   : > { %3963 = vrcp.f32 %v1625_v12 }
 0x9b7   : > { %3965 = vrcp.f32 %v1624_v54 }
 0x9b8   : > { %v4900_v56 = vpop.eup %3951 }
 0x9b9   : > { %v4903_v36 = vpop.eup %3953 }
 0x9bc   : > { %v4907_v39 = vpop.eup %3955 }
 0x9bd   : > { %v4911_v60 = vpop.eup %3957 }
 0x9be   : > { %v4915_v41 = vpop.eup %3959 }
 0x9bf   : > { %v4919_v13 = vpop.eup %3961 }
 0x9c0   : > { %v4923_v11 = vpop.eup %3963 }
 0x9c1   : > { %v4927_v54 = vpop.eup %3965 }
 0xa15   : > { %v1693_v27 = vpop.permute.xlu0 %1692 }
 0xa16   : > { %v1715_v58 = vmul.f32 %v4900_v56, %v1693_v27  ;;  %v1697_v17 = vpop.permute.xlu1 %1696 }
 0xa17   : > { %v1717_v23 = vmul.f32 %v4903_v36, %v1697_v17 }
 0xa18   : > { %1732 = vrot.lane.b32.xlu0 %v1715_v58, %s4270_s25 }
 0xa19   : > { %v1699_v59 = vpop.permute.xlu0 %1698  ;;  %1736 = vrot.lane.b32.xlu1 %v1717_v23, %s4270_s25  ;;  %v1659_v23 = vrot.slane %v4802_v40, 7 }
 0xa1a   : > { %v1718_v57 = vmul.f32 %v4907_v39, %v1699_v59  ;;  %v1691_v34 = vpop.permute.xlu1 %1690  ;;  %v1661_v59 = vrot.slane %v4794_v38, 7  ;;  %v1663_v38 = vrot.slane %v4812_v0, 7 }
 0xa1b   : > { %v1714_v46 = vmul.f32 %v4911_v60, %v1691_v34 }
 0xa1c   : > { %1738 = vrot.lane.b32.xlu0 %v1718_v57, %s4270_s25  ;;  %v1675_v57 = vmul.f32 %v4900_v56, %v1659_v23  ;;  %v1660_v23 = vrot.slane %v4791_v18, 7 }
 0xa1d   : > { %v1701_v49 = vpop.permute.xlu0 %1700  ;;  %1730 = vrot.lane.b32.xlu1 %v1714_v46, %s4270_s25  ;;  %v1662_v46 = vrot.slane %v4805_v37, 7 }
 0xa1e   : > { %v1719_v50 = vmul.f32 %v4915_v41, %v1701_v49  ;;  %v1695_v29 = vpop.permute.xlu1 %1694  ;;  %v1677_v49 = vmul.f32 %v4903_v36, %v1661_v59  ;;  %v1676_v0 = vmul.f32 %v4919_v13, %v1660_v23 }
 0xa1f   : > { %v1716_v28 = vmul.f32 %v4919_v13, %v1695_v29  ;;  %v1678_v40 = vmul.f32 %v4907_v39, %v1662_v46 }
 0xa20   : > { %1740 = vrot.lane.b32.xlu0 %v1719_v50, %s4270_s25 }
 0xa21   : > { %v1705_v12 = vpop.permute.xlu0 %1704  ;;  %1734 = vrot.lane.b32.xlu1 %v1716_v28, %s4270_s25  ;;  %v1658_v28 = vrot.slane %v4783_v63, 7  ;;  %v1679_v63 = vmul.f32 %v4915_v41, %v1663_v38 }
 0xa22   : > { %v1721_v27 = vmul.f32 %v4923_v11, %v1705_v12  ;;  %v1703_v58 = vpop.permute.xlu1 %1702 }
 0xa23   : > { %v1720_v17 = vmul.f32 %v4927_v54, %v1703_v58  ;;  %v1674_v37 = vmul.f32 %v4911_v60, %v1658_v28 }
 0xa24   : > { %1744 = vrot.lane.b32.xlu0 %v1721_v27, %s4270_s25 }
 0xa25   : > { %1742 = vrot.lane.b32.xlu1 %v1720_v17, %s4270_s25 }
 0xa8a   : > { %v1733_v34 = vpop.permute.xlu0 %1732 }
 0xa8b   : > { %v4937_v50 = vadd.f32 %v1733_v34, %v1675_v57  ;;  %v1737_v29 = vpop.permute.xlu1 %1736  ;;  %v1665_v34 = vrot.slane %v4819_v47, 7 }
 0xa8c   : > { %v4940_v12 = vadd.f32 %v1737_v29, %v1677_v49  ;;  %v1664_v29 = vrot.slane %v4814_v6, 7 }
 0xa8d   : > { %3967 = vtanh.f32 %v4937_v50  ;;  %v1681_v18 = vmul.f32 %v4923_v11, %v1665_v34 }
 0xa8e   : > { %v1739_v27 = vpop.permute.xlu0 %1738  ;;  %3969 = vtanh.f32 %v4940_v12  ;;  %v1680_v47 = vmul.f32 %v4927_v54, %v1664_v29 }
 0xa8f   : > { %v4947_v58 = vadd.f32 %v1739_v27, %v1678_v40  ;;  %v1731_v17 = vpop.permute.xlu1 %1730 }
 0xa90   : > { %v4950_v59 = vadd.f32 %v1731_v17, %v1674_v37 }
 0xa91   : > { %3971 = vtanh.f32 %v4947_v58 }
 0xa92   : > { %v1741_v57 = vpop.permute.xlu0 %1740  ;;  %3973 = vtanh.f32 %v4950_v59 }
 0xa93   : > { %v4957_v46 = vadd.f32 %v1741_v57, %v1679_v63  ;;  %v1735_v49 = vpop.permute.xlu1 %1734 }
 0xa94   : > { %v4960_v28 = vadd.f32 %v1735_v49, %v1676_v0 }
 0xa95   : > { %3975 = vtanh.f32 %v4957_v46 }
 0xa96   : > { %v1745_v40 = vpop.permute.xlu0 %1744  ;;  %3977 = vtanh.f32 %v4960_v28 }
 0xa97   : > { %v3968_v27 = vpop.eup %3967  ;;  %v4966_v38 = vadd.f32 %v1745_v40, %v1681_v18  ;;  %v1743_v37 = vpop.permute.xlu1 %1742 }
 0xa98   : > { %1780 = vrot.lane.b32.xlu0 %v3968_v27, %s4270_s25  ;;  %v3970_v17 = vpop.eup %3969  ;;  %v4969_v23 = vadd.f32 %v1743_v37, %v1680_v47 }
 0xa99   : > { %3979 = vtanh.f32 %v4966_v38  ;;  %1784 = vrot.lane.b32.xlu1 %v3970_v17, %s4270_s25 }
 0xa9a   : > { %3981 = vtanh.f32 %v4969_v23 }
 0xa9b   : > { %v3972_v6 = vpop.eup %3971 }
 0xa9c   : > { %1786 = vrot.lane.b32.xlu0 %v3972_v6, %s4270_s25  ;;  %v3974_v63 = vpop.eup %3973 }
 0xa9d   : > { %1778 = vrot.lane.b32.xlu1 %v3974_v63, %s4270_s25 }
 0xa9f   : > { %v3976_v57 = vpop.eup %3975 }
 0xaa0   : > { %1788 = vrot.lane.b32.xlu0 %v3976_v57, %s4270_s25  ;;  %v3978_v34 = vpop.eup %3977 }
 0xaa1   : > { %1782 = vrot.lane.b32.xlu1 %v3978_v34, %s4270_s25 }
 0xaa3   : > { %v3980_v0 = vpop.eup %3979 }
 0xaa4   : > { %1792 = vrot.lane.b32.xlu0 %v3980_v0, %s4270_s25  ;;  %v3982_v49 = vpop.eup %3981 }
 0xaa5   : > { %1790 = vrot.lane.b32.xlu1 %v3982_v49, %s4270_s25 }
 0xb0a   : > { %v1781_v29 = vpop.permute.xlu0 %1780 }
 0xb0b   : > { %v1785_v18 = vpop.permute.xlu1 %1784  ;;  %v4981_v40 = vmul.f32 %v4900_v56, %v1781_v29 }
 0xb0c   : > { %v4997_v56 = vmul.f32 %v4903_v36, %v1785_v18 }
 0xb0d   : > { %v1852_v6 = vpack.c.bf16 %v4981_v40, %v4981_v40 }
 0xb0e   : > { %v1787_v27 = vpop.permute.xlu0 %1786  ;;  %5890 = vst [vmem:[#allocation10_spill] sm:$0xff] %v4997_v56  ;;  %v1854_v36 = vpack.c.bf16 %v4997_v56, %v4997_v56 }
 0xb0f   : > { %v1779_v47 = vpop.permute.xlu1 %1778  ;;  %v4987_v17 = vmul.f32 %v4907_v39, %v1787_v27  ;;  %v1868_v27 = vunpack.c.l.b16 %v1852_v6 }
 0xb10   : > { %v4984_v37 = vmul.f32 %v4911_v60, %v1779_v47 }
 0xb11   : > { %5888 = vst [vmem:[#allocation8_spill] sm:$0xff] %v4987_v17  ;;  %v1855_v60 = vpack.c.bf16 %v4987_v17, %v4987_v17 }
 0xb12   : > { %5887 = vst [vmem:[#allocation7_spill] sm:$0xff] %v4984_v37  ;;  %v1789_v63 = vpop.permute.xlu0 %1788  ;;  %v1851_v57 = vpack.c.bf16 %v4984_v37, %v4984_v37  ;;  %v1876_v37 = vrot.slane %v1868_v27, 2 }
 0xb13   : > { %v4994_v34 = vmul.f32 %v4915_v41, %v1789_v63  ;;  %v1783_v0 = vpop.permute.xlu1 %1782  ;;  %v1871_v17 = vunpack.c.l.b16 %v1855_v60 }
 0xb14   : > { %v1867_v49 = vunpack.c.l.b16 %v1851_v57  ;;  %v5002_v39 = vmul.f32 %v4919_v13, %v1783_v0 }
 0xb15   : > { %5889 = vst [vmem:[#allocation9_spill] sm:$0xff] %v4994_v34  ;;  %v1856_v29 = vpack.c.bf16 %v4994_v34, %v4994_v34 }
 0xb16   : > { %5891 = vst [vmem:[#allocation11_spill] sm:$0xff] %v5002_v39  ;;  %v1793_v47 = vpop.permute.xlu0 %1792  ;;  %v1853_v41 = vpack.c.bf16 %v5002_v39, %v5002_v39  ;;  %v1875_v18 = vrot.slane %v1867_v49, 3 }
 0xb17   : > { %v5009_v63 = vmul.f32 %v4923_v11, %v1793_v47  ;;  %v1872_v57 = vunpack.c.l.b16 %v1856_v29  ;;  %v1791_v10 = vpop.permute.xlu1 %1790  ;;  %v1870_v47 = vunpack.c.l.b16 %v1854_v36  ;;  %v1881_v29 = vrot.slane %v1871_v17, 7 }
 0xb18   : > { %v1869_v13 = vunpack.c.l.b16 %v1853_v41  ;;  %v5014_v0 = vmul.f32 %v4927_v54, %v1791_v10  ;;  %v1877_v39 = vsel %vm774_vm3, %v1876_v37, %v1875_v18  ;;  %v5894_v17 = vmov 0.0  }
 0xb19   : > { %5892 = vst [vmem:[#allocation12_spill] sm:$0xff] %v5009_v63  ;;  %v1858_v6 = vpack.c.bf16 %v5009_v63, %v5009_v63  ;;  %v1883_v30 = vrot.slane %v1872_v57, 6 }
 0xb1a   : > { %5893 = vst [vmem:[#allocation13_spill] sm:$0xff] %v5014_v0  ;;  %v1878_v34 = vrot.slane %v1869_v13, 1  ;;  %v1857_v11 = vpack.c.bf16 %v5014_v0, %v5014_v0 }
 0xb1b   : > { %v1874_v49 = vunpack.c.l.b16 %v1858_v6 }
 0xb1c   : > { %v1879_v60 = vsel %vm777_vm4, %v1878_v34, %v1877_v39  ;;  %v1873_v41 = vunpack.c.l.b16 %v1857_v11 }
 0xb1d   : > { %v1880_v10 = vsel %vm780_vm5, %v1870_v47, %v1879_v60  ;;  %v1887_v54 = vrot.slane %v1874_v49, 4 }
 0xb1e   : > { %v1882_v27 = vsel %vm783_vm6, %v1881_v29, %v1880_v10  ;;  %v1885_v56 = vrot.slane %v1873_v41, 5 }
 0xb1f   : > { %v1884_v13 = vsel %vm786_vm7, %v1883_v30, %v1882_v27 }
 0xb20   : > { %v1886_v63 = vsel %vm789_vm8, %v1885_v56, %v1884_v13 }
 0xb21   : > { %v1888_v36 = vsel %vm792_vm9, %v1887_v54, %v1886_v63 }
 0xb22   : > { %v1889_v0 = vpack.c.b16 %v1888_v36, %v1888_v36 }
 0xb24   : > { %1890 = vrot.lane.b32.xlu1 %v1889_v0, %s4271_s26 }
 0xb96   : > { %v1891_v37 = vpop.permute.xlu1 %1890 }
 0xb97   : > { %3662 = vmatmul.mubr.msk.bf16.vlgmr.msra.gmra.mrb[12].mxu0 %vm320_vm2, %v1891_v37 }
 0xb98   : > { %3674 = vmatpush3.bf16.msra.mxu0 %v4720_v19  ;;  %3677 = vmatprep.mubr.msk.bf16.mxu0 %vm4269_vm1, %v5894_v17 }
 0xb99   : > { %3675 = vmatprep.subr.bf16.mxu0 %v5894_v17 }
 0xb9c   : > { %3676 = vmatpush3.bf16.msra.mxu0 %v4729_v16 }
 0xc6a   : > { %v1929_v30 = vpop.f32.mrb[12].mxu0 }
 0xc6b   : > { %v1936_v34 = vrot.slane %v1929_v30, 4  ;;  %v3663_v56 = vpop.f32.mrb[13].mxu0  ;;  %v1938_v57 = vrot.slane %v1929_v30, 6  ;;  %v1940_v0 = vrot.slane %v1929_v30, 1  ;;  %v1937_v19 = vrot.slane %v1929_v30, 5 }
 0xc6c   : > { %v1932_v39 = vpop.f32.mrb[14].mxu0  ;;  %v1955_v11 = vadd.f32 %v1929_v30, %v4407_v43  ;;  %v1941_v49 = vrot.slane %v1929_v30, 2  ;;  %v1939_v16 = vrot.slane %v1929_v30, 7  ;;  %v1942_v10 = vrot.slane %v1929_v30, 3 }
 0xc6d   : > { %v1951_v63 = vadd.f32 %v1936_v34, %v4397_v26  ;;  %v3664_v18 = vpop.f32.mrb[15].mxu0  ;;  %v1953_v6 = vadd.f32 %v1938_v57, %v4395_v25  ;;  %v1956_v29 = vadd.f32 %v1940_v0, %v4411_v48  ;;  %v1952_v60 = vadd.f32 %v1937_v19, %v4399_v33 }
 0xc6e   : > { %v1957_v41 = vadd.f32 %v1941_v49, %v4409_v45  ;;  %v1954_v54 = vadd.f32 %v1939_v16, %v4402_v35  ;;  %v1958_v13 = vadd.f32 %v1942_v10, %v4415_v52  ;;  %v3548_v0 = vmul.f32 -1.442695, %v1955_v11 }
 0xc6f   : > { %3983 = vtanh.f32 %v1951_v63  ;;  %v3544_v18 = vmul.f32 -1.442695, %v1951_v63  ;;  %v3546_v57 = vmul.f32 -1.442695, %v1953_v6  ;;  %v3545_v49 = vmul.f32 -1.442695, %v1952_v60 }
 0xc70   : > { %3985 = vtanh.f32 %v1953_v6  ;;  %v3550_v10 = vmul.f32 -1.442695, %v1957_v41 }
 0xc71   : > { %3987 = vtanh.f32 %v1955_v11 }
 0xc72   : > { %3989 = vtanh.f32 %v1956_v29 }
 0xc73   : > { %3991 = vtanh.f32 %v1952_v60 }
 0xc74   : > { %3993 = vtanh.f32 %v1957_v41 }
 0xc75   : > { %3995 = vtanh.f32 %v1954_v54 }
 0xc76   : > { %3997 = vtanh.f32 %v1958_v13 }
 0xc77   : > { %3999 = vpow2.f32 %v3544_v18 }
 0xc78   : > { %4001 = vpow2.f32 %v3546_v57 }
 0xc79   : > { %v3984_v47 = vpop.eup %3983  ;;  %4003 = vpow2.f32 %v3548_v0 }
 0xc7a   : > { %2055 = vrot.lane.b32.xlu0 %v3984_v47, %s4270_s25  ;;  %v3986_v27 = vpop.eup %3985  ;;  %v3549_v47 = vmul.f32 -1.442695, %v1956_v29 }
 0xc7b   : > { %v3988_v36 = vpop.eup %3987 }
 0xc7c   : > { %2063 = vrot.lane.b32.xlu1 %v3988_v36, %s4270_s25  ;;  %v3990_v37 = vpop.eup %3989  ;;  %4005 = vpow2.f32 %v3549_v47 }
 0xc7d   : > { %v3992_v34 = vpop.eup %3991  ;;  %4007 = vpow2.f32 %v3545_v49 }
 0xc7e   : > { %2059 = vrot.lane.b32.xlu0 %v3986_v27, %s4270_s25  ;;  %v3994_v30 = vpop.eup %3993  ;;  %v3547_v27 = vmul.f32 -1.442695, %v1954_v54 }
 0xc7f   : > { %v3996_v56 = vpop.eup %3995 }
 0xc80   : > { %2057 = vrot.lane.b32.xlu1 %v3992_v34, %s4270_s25  ;;  %v3998_v39 = vpop.eup %3997 }
 0xc81   : > { %v4000_v19 = vpop.eup %3999 }
 0xc82   : > { %2065 = vrot.lane.b32.xlu0 %v3990_v37, %s4270_s25  ;;  %v1983_v16 = vadd.f32 1.0, %v4000_v19  ;;  %v4002_v36 = vpop.eup %4001  ;;  %v3551_v37 = vmul.f32 -1.442695, %v1958_v13 }
 0xc83   : > { %v4004_v34 = vpop.eup %4003  ;;  %v1985_v63 = vadd.f32 1.0, %v4002_v36 }
 0xc84   : > { %2061 = vrot.lane.b32.xlu1 %v3996_v56, %s4270_s25  ;;  %4009 = vrcp.f32 %v1983_v16  ;;  %v1987_v6 = vadd.f32 1.0, %v4004_v34 }
 0xc85   : > { %4011 = vpow2.f32 %v3550_v10 }
 0xc86   : > { %2067 = vrot.lane.b32.xlu0 %v3994_v30, %s4270_s25  ;;  %4013 = vpow2.f32 %v3547_v27  ;;  %v4006_v30 = vpop.eup %4005 }
 0xc87   : > { %4015 = vpow2.f32 %v3551_v37  ;;  %v4008_v11 = vpop.eup %4007  ;;  %v1988_v60 = vadd.f32 1.0, %v4006_v30 }
 0xc88   : > { %2069 = vrot.lane.b32.xlu1 %v3998_v39, %s4270_s25  ;;  %4017 = vrcp.f32 %v1985_v63  ;;  %v1984_v54 = vadd.f32 1.0, %v4008_v11 }
 0xc89   : > { %4019 = vrcp.f32 %v1987_v6 }
 0xc8a   : > { %4021 = vrcp.f32 %v1988_v60 }
 0xc8b   : > { %4023 = vrcp.f32 %v1984_v54 }
 0xc8e   : > { %v5050_v56 = vpop.eup %4009 }
 0xc8f   : > { %v4012_v39 = vpop.eup %4011 }
 0xc90   : > { %v4014_v18 = vpop.eup %4013  ;;  %v1989_v13 = vadd.f32 1.0, %v4012_v39 }
 0xc91   : > { %v1986_v57 = vadd.f32 1.0, %v4014_v18  ;;  %v4016_v0 = vpop.eup %4015 }
 0xc92   : > { %4025 = vrcp.f32 %v1989_v13  ;;  %v5054_v19 = vpop.eup %4017  ;;  %v1990_v49 = vadd.f32 1.0, %v4016_v0 }
 0xc93   : > { %4027 = vrcp.f32 %v1986_v57  ;;  %v5057_v10 = vpop.eup %4019 }
 0xc94   : > { %v5061_v37 = vpop.eup %4021  ;;  %4029 = vrcp.f32 %v1990_v49 }
 0xc95   : > { %v5065_v30 = vpop.eup %4023 }
 0xcec   : > { %v2056_v29 = vpop.permute.xlu0 %2055 }
 0xced   : > { %v2079_v41 = vmul.f32 %v5050_v56, %v2056_v29  ;;  %v5069_v29 = vpop.eup %4025 }
 0xcee   : > { %v2064_v27 = vpop.permute.xlu1 %2063 }
 0xcef   : > { %2095 = vrot.lane.b32.xlu0 %v2079_v41, %s4270_s25  ;;  %v2083_v36 = vmul.f32 %v5057_v10, %v2064_v27  ;;  %v5073_v41 = vpop.eup %4027 }
 0xcf0   : > { %v2060_v47 = vpop.permute.xlu0 %2059  ;;  %v5078_v13 = vpop.eup %4029 }
 0xcf1   : > { %v2081_v16 = vmul.f32 %v5054_v19, %v2060_v47  ;;  %2103 = vrot.lane.b32.xlu1 %v2083_v36, %s4270_s25  ;;  %v2023_v47 = vrot.slane %v4950_v59, 7  ;;  %v2025_v36 = vrot.slane %v4960_v28, 7 }
 0xcf2   : > { %v2058_v6 = vpop.permute.xlu1 %2057 }
 0xcf3   : > { %2099 = vrot.lane.b32.xlu0 %v2081_v16, %s4270_s25  ;;  %v2080_v11 = vmul.f32 %v5065_v30, %v2058_v6  ;;  %v2039_v49 = vmul.f32 %v5050_v56, %v2023_v47 }
 0xcf4   : > { %v2066_v34 = vpop.permute.xlu0 %2065 }
 0xcf5   : > { %v2084_v63 = vmul.f32 %v5061_v37, %v2066_v34  ;;  %2097 = vrot.lane.b32.xlu1 %v2080_v11, %s4270_s25  ;;  %v2027_v34 = vrot.slane %v4947_v58, 7  ;;  %v2028_v11 = vrot.slane %v4957_v46, 7 }
 0xcf6   : > { %v2062_v54 = vpop.permute.xlu1 %2061 }
 0xcf7   : > { %2105 = vrot.lane.b32.xlu0 %v2084_v63, %s4270_s25  ;;  %v2082_v18 = vmul.f32 %v5073_v41, %v2062_v54  ;;  %v2041_v63 = vmul.f32 %v5054_v19, %v2025_v36  ;;  %v2044_v28 = vmul.f32 %v5061_v37, %v2028_v11  ;;  %v2030_v11 = vrot.slane %v4966_v38, 7 }
 0xcf8   : > { %v2068_v60 = vpop.permute.xlu0 %2067 }
 0xcf9   : > { %v2085_v39 = vmul.f32 %v5069_v29, %v2068_v60  ;;  %2101 = vrot.lane.b32.xlu1 %v2082_v18, %s4270_s25  ;;  %v2043_v60 = vmul.f32 %v5057_v10, %v2027_v34  ;;  %v2024_v18 = vrot.slane %v4937_v50, 7  ;;  %v2026_v50 = vrot.slane %v4940_v12, 7 }
 0xcfa   : > { %v2070_v57 = vpop.permute.xlu1 %2069 }
 0xcfb   : > { %2107 = vrot.lane.b32.xlu0 %v2085_v39, %s4270_s25  ;;  %v2086_v0 = vmul.f32 %v5078_v13, %v2070_v57  ;;  %v2040_v46 = vmul.f32 %v5065_v30, %v2024_v18 }
 0xcfd   : > { %2109 = vrot.lane.b32.xlu1 %v2086_v0, %s4270_s25  ;;  %v2029_v0 = vrot.slane %v4969_v23, 7  ;;  %v2042_v23 = vmul.f32 %v5073_v41, %v2026_v50 }
 0xcff   : > { %v2045_v36 = vmul.f32 %v5069_v29, %v2029_v0 }
 0xd61   : > { %v2096_v16 = vpop.permute.xlu0 %2095 }
 0xd62   : > { %v5084_v27 = vadd.f32 %v2096_v16, %v2039_v49 }
 0xd63   : > { %v2104_v59 = vpop.permute.xlu1 %2103 }
 0xd64   : > { %4031 = vtanh.f32 %v5084_v27  ;;  %v5095_v57 = vadd.f32 %v2104_v59, %v2043_v60  ;;  %v2046_v59 = vmul.f32 %v5078_v13, %v2030_v11 }
 0xd65   : > { %v2100_v6 = vpop.permute.xlu0 %2099 }
 0xd66   : > { %v5092_v39 = vadd.f32 %v2100_v6, %v2041_v63 }
 0xd67   : > { %v2098_v49 = vpop.permute.xlu1 %2097 }
 0xd68   : > { %4033 = vtanh.f32 %v5092_v39  ;;  %v5106_v16 = vadd.f32 %v2098_v49, %v2040_v46 }
 0xd69   : > { %v2106_v58 = vpop.permute.xlu0 %2105  ;;  %4035 = vtanh.f32 %v5095_v57 }
 0xd6a   : > { %v5103_v47 = vadd.f32 %v2106_v58, %v2044_v28 }
 0xd6b   : > { %v2102_v6 = vpop.permute.xlu1 %2101 }
 0xd6c   : > { %4037 = vtanh.f32 %v5103_v47  ;;  %v5115_v60 = vadd.f32 %v2102_v6, %v2042_v23 }
 0xd6d   : > { %v2108_v34 = vpop.permute.xlu0 %2107  ;;  %4039 = vtanh.f32 %v5106_v16 }
 0xd6e   : > { %v4032_v54 = vpop.eup %4031  ;;  %v5112_v63 = vadd.f32 %v2108_v34, %v2045_v36 }
 0xd6f   : > { %2143 = vrot.lane.b32.xlu0 %v4032_v54, %s4270_s25  ;;  %v2110_v54 = vpop.permute.xlu1 %2109 }
 0xd70   : > { %4041 = vtanh.f32 %v5112_v63  ;;  %v5121_v28 = vadd.f32 %v2110_v54, %v2046_v59 }
 0xd71   : > { %4043 = vtanh.f32 %v5115_v60 }
 0xd72   : > { %v4034_v12 = vpop.eup %4033  ;;  %4045 = vtanh.f32 %v5121_v28 }
 0xd73   : > { %2147 = vrot.lane.b32.xlu0 %v4034_v12, %s4270_s25  ;;  %v4036_v18 = vpop.eup %4035 }
 0xd74   : > { %2151 = vrot.lane.b32.xlu1 %v4036_v18, %s4270_s25 }
 0xd76   : > { %v4038_v58 = vpop.eup %4037 }
 0xd77   : > { %2153 = vrot.lane.b32.xlu0 %v4038_v58, %s4270_s25  ;;  %v4040_v38 = vpop.eup %4039 }
 0xd78   : > { %2145 = vrot.lane.b32.xlu1 %v4040_v38, %s4270_s25 }
 0xd7a   : > { %v4042_v0 = vpop.eup %4041 }
 0xd7b   : > { %2155 = vrot.lane.b32.xlu0 %v4042_v0, %s4270_s25  ;;  %v4044_v46 = vpop.eup %4043 }
 0xd7c   : > { %2149 = vrot.lane.b32.xlu1 %v4044_v46, %s4270_s25  ;;  %v4046_v49 = vpop.eup %4045 }
 0xd80   : > { %2157 = vrot.lane.b32.xlu1 %v4046_v49, %s4270_s25 }
 0xde1   : > { %v2144_v50 = vpop.permute.xlu0 %2143 }
 0xde2   : > { %v5131_v34 = vmul.f32 %v5050_v56, %v2144_v50 }
 0xde4   : > { %v2216_v59 = vpack.c.bf16 %v5131_v34, %v5131_v34 }
 0xde5   : > { %v2148_v36 = vpop.permute.xlu0 %2147 }
 0xde6   : > { %v5134_v23 = vmul.f32 %v5054_v19, %v2148_v36  ;;  %v2152_v6 = vpop.permute.xlu1 %2151  ;;  %v2232_v0 = vunpack.c.l.b16 %v2216_v59 }
 0xde7   : > { %v5154_v50 = vmul.f32 %v5057_v10, %v2152_v6 }
 0xde8   : > { %5895 = vst [vmem:[#allocation14_spill] sm:$0xff] %v5134_v23  ;;  %v2218_v11 = vpack.c.bf16 %v5134_v23, %v5134_v23  ;;  %v2240_v59 = vrot.slane %v2232_v0, 4 }
 0xde9   : > { %v2154_v12 = vpop.permute.xlu0 %2153  ;;  %5898 = vst [vmem:[#allocation17_spill] sm:$0xff] %v5154_v50 }
 0xdea   : > { %v5141_v54 = vmul.f32 %v5061_v37, %v2154_v12  ;;  %v2146_v18 = vpop.permute.xlu1 %2145  ;;  %v2234_v56 = vunpack.c.l.b16 %v2218_v11 }
 0xdeb   : > { %v5144_v58 = vmul.f32 %v5065_v30, %v2146_v18 }
 0xdec   : > { %5896 = vst [vmem:[#allocation15_spill] sm:$0xff] %v5141_v54  ;;  %v2221_v46 = vpack.c.bf16 %v5141_v54, %v5141_v54  ;;  %v2243_v12 = vrot.slane %v2234_v56, 2 }
 0xded   : > { %v2156_v38 = vpop.permute.xlu0 %2155  ;;  %v2217_v19 = vpack.c.bf16 %v5144_v58, %v5144_v58 }
 0xdee   : > { %v5151_v49 = vmul.f32 %v5069_v29, %v2156_v38  ;;  %v2150_v37 = vpop.permute.xlu1 %2149  ;;  %v2237_v54 = vunpack.c.l.b16 %v2221_v46  ;;  %v2220_v29 = vpack.c.bf16 %v5154_v50, %v5154_v50 }
 0xdef   : > { %v2233_v36 = vunpack.c.l.b16 %v2217_v19  ;;  %v5157_v30 = vmul.f32 %v5073_v41, %v2150_v37 }
 0xdf0   : > { %5897 = vst [vmem:[#allocation16_spill] sm:$0xff] %v5151_v49  ;;  %v2222_v11 = vpack.c.bf16 %v5151_v49, %v5151_v49  ;;  %v2248_v0 = vrot.slane %v2237_v54, 7  ;;  %v2236_v49 = vunpack.c.l.b16 %v2220_v29  ;;  %v4241_v29 = vld [vmem:[%s5854_s2] sm:$0xff]  }
 0xdf1   : > { %5899 = vst [vmem:[#allocation18_spill] sm:$0xff] %v5157_v30  ;;  %v2241_v18 = vrot.slane %v2233_v36, 3  ;;  %v2219_v23 = vpack.c.bf16 %v5157_v30, %v5157_v30 }
 0xdf2   : > { %v2158_v10 = vpop.permute.xlu1 %2157  ;;  %v2238_v6 = vunpack.c.l.b16 %v2222_v11 }
 0xdf3   : > { %v2242_v38 = vsel %vm774_vm3, %v2241_v18, %v2240_v59  ;;  %v2235_v19 = vunpack.c.l.b16 %v2219_v23  ;;  %v5167_v41 = vmul.f32 %v5078_v13, %v2158_v10 }
 0xdf4   : > { %v2244_v37 = vsel %vm777_vm4, %v2243_v12, %v2242_v38  ;;  %v2250_v46 = vrot.slane %v2238_v6, 6 }
 0xdf5   : > { %v2245_v56 = vrot.slane %v2235_v19, 1  ;;  %v2223_v36 = vpack.c.bf16 %v5167_v41, %v5167_v41 }
 0xdf7   : > { %v2246_v30 = vsel %vm780_vm5, %v2245_v56, %v2244_v37  ;;  %v2239_v50 = vunpack.c.l.b16 %v2223_v36 }
 0xdf8   : > { %v2247_v11 = vsel %vm783_vm6, %v2236_v49, %v2246_v30  ;;  %v4242_v49 = vld [vmem:[%s5854_s2 + $0x8] sm:$0xff]  }
 0xdf9   : > { %v2249_v59 = vsel %vm786_vm7, %v2248_v0, %v2247_v11  ;;  %v2252_v23 = vrot.slane %v2239_v50, 5 }
 0xdfa   : > { %v2251_v13 = vsel %vm789_vm8, %v2250_v46, %v2249_v59 }
 0xdfb   : > { %v2253_v18 = vsel %vm792_vm9, %v2252_v23, %v2251_v13 }
 0xdfc   : > { %v2254_v12 = vpack.c.b16 %v2253_v18, %v2253_v18 }
 0xdfe   : > { %2255 = vrot.lane.b32.xlu0 %v2254_v12, %s4271_s26 }
 0xe70   : > { %v2256_v54 = vpop.permute.xlu0 %2255 }
 0xe71   : > { %3670 = vmatmul.mubr.msk.bf16.vlgmr.msra.gmra.mrb[12].mxu1 %vm320_vm2, %v2256_v54 }
 0xe72   : > { %3682 = vmatpush3.bf16.msra.mxu1 %v4241_v29  ;;  %3685 = vmatprep.mubr.msk.bf16.mxu1 %vm4269_vm1, %v5894_v17  ;;  %vm3302_vm1 = vcmask 261127  }
 0xe73   : > { %3683 = vmatprep.subr.bf16.mxu1 %v5894_v17 }
 0xe76   : > { %3684 = vmatpush3.bf16.msra.mxu1 %v4242_v49 }
 0xf44   : > { %v2294_v50 = vpop.f32.mrb[12].mxu1 }
 0xf45   : > { %v2301_v30 = vrot.slane %v2294_v50, 3  ;;  %v3671_v10 = vpop.f32.mrb[13].mxu1  ;;  %v2302_v37 = vrot.slane %v2294_v50, 4  ;;  %v2303_v56 = vrot.slane %v2294_v50, 5  ;;  %v2304_v0 = vrot.slane %v2294_v50, 6 }
 0xf46   : > { %v2297_v6 = vpop.f32.mrb[14].mxu1  ;;  %v2305_v46 = vrot.slane %v2294_v50, 7  ;;  %v2306_v11 = vrot.slane %v2294_v50, 1  ;;  %v2307_v18 = vrot.slane %v2294_v50, 2  ;;  %v2321_v54 = vadd.f32 %v2294_v50, %v4411_v48 }
 0xf47   : > { %v2316_v38 = vadd.f32 %v2301_v30, %v4397_v26  ;;  %v3672_v19 = vpop.f32.mrb[15].mxu1  ;;  %v2317_v36 = vadd.f32 %v2302_v37, %v4399_v33  ;;  %v2318_v17 = vadd.f32 %v2303_v56, %v4395_v25  ;;  %v2319_v59 = vadd.f32 %v2304_v0, %v4402_v35 }
 0xf48   : > { %v2320_v13 = vadd.f32 %v2305_v46, %v4407_v43  ;;  %v2322_v12 = vadd.f32 %v2306_v11, %v4409_v45  ;;  %v2323_v29 = vadd.f32 %v2307_v18, %v4415_v52 }
 0xf49   : > { %4047 = vtanh.f32 %v2316_v38  ;;  %v3553_v56 = vmul.f32 -1.442695, %v2316_v38  ;;  %v3554_v0 = vmul.f32 -1.442695, %v2317_v36  ;;  %v3555_v46 = vmul.f32 -1.442695, %v2318_v17 }
 0xf4a   : > { %4049 = vtanh.f32 %v2317_v36  ;;  %v3556_v11 = vmul.f32 -1.442695, %v2319_v59  ;;  %v3557_v18 = vmul.f32 -1.442695, %v2320_v13 }
 0xf4b   : > { %4051 = vtanh.f32 %v2318_v17 }
 0xf4c   : > { %4053 = vtanh.f32 %v2319_v59 }
 0xf4d   : > { %4055 = vtanh.f32 %v2320_v13 }
 0xf4e   : > { %4057 = vtanh.f32 %v2322_v12 }
 0xf4f   : > { %4059 = vtanh.f32 %v2321_v54 }
 0xf50   : > { %4061 = vtanh.f32 %v2323_v29 }
 0xf51   : > { %4063 = vpow2.f32 %v3553_v56 }
 0xf52   : > { %4065 = vpow2.f32 %v3554_v0 }
 0xf53   : > { %v4048_v23 = vpop.eup %4047  ;;  %4067 = vpow2.f32 %v3555_v46 }
 0xf54   : > { %2420 = vrot.lane.b32.xlu1 %v4048_v23, %s4270_s25  ;;  %v4050_v49 = vpop.eup %4049  ;;  %4069 = vpow2.f32 %v3556_v11 }
 0xf55   : > { %v4052_v30 = vpop.eup %4051  ;;  %2422 = vrot.lane.b32.xlu0 %v4050_v49, %s4270_s25  ;;  %v3559_v49 = vmul.f32 -1.442695, %v2322_v12  ;;  %4071 = vpow2.f32 %v3557_v18 }
 0xf56   : > { %v4054_v10 = vpop.eup %4053 }
 0xf57   : > { %v4056_v6 = vpop.eup %4055  ;;  %4073 = vpow2.f32 %v3559_v49 }
 0xf58   : > { %2424 = vrot.lane.b32.xlu1 %v4052_v30, %s4270_s25  ;;  %v4058_v19 = vpop.eup %4057 }
 0xf59   : > { %2426 = vrot.lane.b32.xlu0 %v4054_v10, %s4270_s25  ;;  %v4060_v50 = vpop.eup %4059  ;;  %v3558_v10 = vmul.f32 -1.442695, %v2321_v54 }
 0xf5a   : > { %v4062_v37 = vpop.eup %4061 }
 0xf5b   : > { %v4064_v23 = vpop.eup %4063 }
 0xf5c   : > { %2428 = vrot.lane.b32.xlu1 %v4056_v6, %s4270_s25  ;;  %v2348_v30 = vadd.f32 1.0, %v4064_v23  ;;  %v3560_v6 = vmul.f32 -1.442695, %v2323_v29 }
 0xf5d   : > { %2432 = vrot.lane.b32.xlu0 %v4058_v19, %s4270_s25  ;;  %v4066_v19 = vpop.eup %4065 }
 0xf5e   : > { %4075 = vrcp.f32 %v2348_v30  ;;  %v2349_v38 = vadd.f32 1.0, %v4066_v19 }
 0xf5f   : > { %4077 = vpow2.f32 %v3558_v10 }
 0xf60   : > { %2430 = vrot.lane.b32.xlu1 %v4060_v50, %s4270_s25  ;;  %v4068_v50 = vpop.eup %4067  ;;  %4079 = vpow2.f32 %v3560_v6 }
 0xf61   : > { %2434 = vrot.lane.b32.xlu0 %v4062_v37, %s4270_s25  ;;  %v4070_v36 = vpop.eup %4069  ;;  %v2350_v17 = vadd.f32 1.0, %v4068_v50  ;;  %4081 = vrcp.f32 %v2349_v38 }
 0xf62   : > { %v4072_v37 = vpop.eup %4071  ;;  %v2351_v56 = vadd.f32 1.0, %v4070_v36 }
 0xf63   : > { %v4074_v59 = vpop.eup %4073  ;;  %4083 = vrcp.f32 %v2350_v17  ;;  %v2352_v0 = vadd.f32 1.0, %v4072_v37 }
 0xf64   : > { %4085 = vrcp.f32 %v2351_v56  ;;  %v2354_v46 = vadd.f32 1.0, %v4074_v59 }
 0xf65   : > { %4087 = vrcp.f32 %v2352_v0 }
 0xf66   : > { %4089 = vrcp.f32 %v2354_v46 }
 0xf68   : > { %v5204_v13 = vpop.eup %4075 }
 0xf69   : > { %v4078_v54 = vpop.eup %4077 }
 0xf6a   : > { %v4080_v11 = vpop.eup %4079  ;;  %v2353_v23 = vadd.f32 1.0, %v4078_v54 }
 0xf6b   : > { %v2355_v18 = vadd.f32 1.0, %v4080_v11  ;;  %v5208_v49 = vpop.eup %4081 }
 0xf6c   : > { %4091 = vrcp.f32 %v2353_v23 }
 0xf6d   : > { %v5210_v10 = vpop.eup %4083  ;;  %4093 = vrcp.f32 %v2355_v18 }
 0xf6e   : > { %v5215_v38 = vpop.eup %4085 }
 0xf6f   : > { %v5218_v17 = vpop.eup %4087 }
 0xfc6   : > { %v2421_v12 = vpop.permute.xlu1 %2420 }
 0xfc7   : > { %v2444_v29 = vmul.f32 %v5204_v13, %v2421_v12  ;;  %v2423_v30 = vpop.permute.xlu0 %2422  ;;  %v5223_v12 = vpop.eup %4089 }
 0xfc8   : > { %v2445_v6 = vmul.f32 %v5208_v49, %v2423_v30  ;;  %v5226_v54 = vpop.eup %4091 }
 0xfc9   : > { %2460 = vrot.lane.b32.xlu1 %v2444_v29, %s4270_s25  ;;  %v5231_v23 = vpop.eup %4093 }
 0xfca   : > { %v2425_v19 = vpop.permute.xlu1 %2424  ;;  %2462 = vrot.lane.b32.xlu0 %v2445_v6, %s4270_s25  ;;  %v2388_v6 = vrot.slane %v5084_v27, 7 }
 0xfcb   : > { %v2446_v50 = vmul.f32 %v5210_v10, %v2425_v19  ;;  %v2427_v36 = vpop.permute.xlu0 %2426 }
 0xfcc   : > { %v2447_v37 = vmul.f32 %v5215_v38, %v2427_v36  ;;  %v2404_v19 = vmul.f32 %v5204_v13, %v2388_v6 }
 0xfcd   : > { %2464 = vrot.lane.b32.xlu1 %v2446_v50, %s4270_s25 }
 0xfce   : > { %v2429_v59 = vpop.permute.xlu1 %2428  ;;  %2466 = vrot.lane.b32.xlu0 %v2447_v37, %s4270_s25  ;;  %v2389_v37 = vrot.slane %v5106_v16, 7 }
 0xfcf   : > { %v2448_v56 = vmul.f32 %v5218_v17, %v2429_v59  ;;  %v2433_v0 = vpop.permute.xlu0 %2432  ;;  %v2390_v59 = vrot.slane %v5092_v39, 7 }
 0xfd0   : > { %v2450_v29 = vmul.f32 %v5223_v12, %v2433_v0 }
 0xfd1   : > { %2468 = vrot.lane.b32.xlu1 %v2448_v56, %s4270_s25  ;;  %v2405_v56 = vmul.f32 %v5208_v49, %v2389_v37 }
 0xfd2   : > { %v2431_v46 = vpop.permute.xlu1 %2430  ;;  %2472 = vrot.lane.b32.xlu0 %v2450_v29, %s4270_s25  ;;  %v2406_v29 = vmul.f32 %v5210_v10, %v2390_v59 }
 0xfd3   : > { %v2449_v11 = vmul.f32 %v5226_v54, %v2431_v46  ;;  %v2435_v18 = vpop.permute.xlu0 %2434  ;;  %v2391_v46 = vrot.slane %v5115_v60, 7 }
 0xfd4   : > { %v2451_v30 = vmul.f32 %v5231_v23, %v2435_v18  ;;  %v2392_v18 = vrot.slane %v5095_v57, 7  ;;  %v2393_v57 = vrot.slane %v5103_v47, 7 }
 0xfd5   : > { %2470 = vrot.lane.b32.xlu1 %v2449_v11, %s4270_s25  ;;  %v2407_v16 = vmul.f32 %v5215_v38, %v2391_v46 }
 0xfd6   : > { %2474 = vrot.lane.b32.xlu0 %v2451_v30, %s4270_s25 }
0x103b   : > { %v2461_v50 = vpop.permute.xlu1 %2460 }
0x103c   : > { %v5238_v36 = vadd.f32 %v2461_v50, %v2404_v19  ;;  %v2463_v0 = vpop.permute.xlu0 %2462  ;;  %v2408_v19 = vmul.f32 %v5218_v17, %v2392_v18  ;;  %v2394_v50 = vrot.slane %v5112_v63, 7  ;;  %v2395_v63 = vrot.slane %v5121_v28, 7 }
0x103d   : > { %v5246_v11 = vadd.f32 %v2463_v0, %v2405_v56 }
0x103e   : > { %4095 = vtanh.f32 %v5238_v36  ;;  %v2410_v56 = vmul.f32 %v5223_v12, %v2394_v50  ;;  %v2411_v47 = vmul.f32 %v5231_v23, %v2395_v63 }
0x103f   : > { %v2465_v27 = vpop.permute.xlu1 %2464  ;;  %4097 = vtanh.f32 %v5246_v11 }
0x1040   : > { %v5249_v30 = vadd.f32 %v2465_v27, %v2406_v29  ;;  %v2467_v39 = vpop.permute.xlu0 %2466  ;;  %v2409_v29 = vmul.f32 %v5226_v54, %v2393_v57 }
0x1041   : > { %v5256_v60 = vadd.f32 %v2467_v39, %v2407_v16 }
0x1042   : > { %4099 = vtanh.f32 %v5249_v30 }
0x1043   : > { %v2469_v37 = vpop.permute.xlu1 %2468  ;;  %4101 = vtanh.f32 %v5256_v60 }
0x1044   : > { %v5260_v59 = vadd.f32 %v2469_v37, %v2408_v19  ;;  %v2473_v0 = vpop.permute.xlu0 %2472 }
0x1045   : > { %v5267_v46 = vadd.f32 %v2473_v0, %v2410_v56 }
0x1046   : > { %4103 = vtanh.f32 %v5260_v59 }
0x1047   : > { %v2471_v27 = vpop.permute.xlu1 %2470  ;;  %4105 = vtanh.f32 %v5267_v46 }
0x1048   : > { %v4096_v6 = vpop.eup %4095  ;;  %v5269_v18 = vadd.f32 %v2471_v27, %v2409_v29  ;;  %v2475_v16 = vpop.permute.xlu0 %2474 }
0x1049   : > { %2508 = vrot.lane.b32.xlu1 %v4096_v6, %s4270_s25  ;;  %v4098_v6 = vpop.eup %4097  ;;  %v5274_v39 = vadd.f32 %v2475_v16, %v2411_v47 }
0x104a   : > { %4107 = vtanh.f32 %v5269_v18  ;;  %2510 = vrot.lane.b32.xlu0 %v4098_v6, %s4270_s25 }
0x104b   : > { %4109 = vtanh.f32 %v5274_v39 }
0x104c   : > { %v4100_v19 = vpop.eup %4099 }
0x104d   : > { %2512 = vrot.lane.b32.xlu1 %v4100_v19, %s4270_s25  ;;  %v4102_v28 = vpop.eup %4101 }
0x104e   : > { %2514 = vrot.lane.b32.xlu0 %v4102_v28, %s4270_s25 }
0x1050   : > { %v4104_v50 = vpop.eup %4103 }
0x1051   : > { %2516 = vrot.lane.b32.xlu1 %v4104_v50, %s4270_s25  ;;  %v4106_v37 = vpop.eup %4105 }
0x1052   : > { %2520 = vrot.lane.b32.xlu0 %v4106_v37, %s4270_s25 }
0x1054   : > { %v4108_v57 = vpop.eup %4107 }
0x1055   : > { %2518 = vrot.lane.b32.xlu1 %v4108_v57, %s4270_s25  ;;  %v4110_v56 = vpop.eup %4109 }
0x1056   : > { %2522 = vrot.lane.b32.xlu0 %v4110_v56, %s4270_s25 }
0x10bb   : > { %v2509_v0 = vpop.permute.xlu1 %2508 }
0x10bc   : > { %v5285_v29 = vmul.f32 %v5204_v13, %v2509_v0  ;;  %v2511_v27 = vpop.permute.xlu0 %2510 }
0x10bd   : > { %v5290_v47 = vmul.f32 %v5208_v49, %v2511_v27 }
0x10be   : > { %5900 = vst [vmem:[#allocation19_spill] sm:$0xff] %v5285_v29  ;;  %v2581_v63 = vpack.c.bf16 %v5285_v29, %v5285_v29 }
0x10bf   : > { %5901 = vst [vmem:[#allocation20_spill] sm:$0xff] %v5290_v47  ;;  %v2513_v6 = vpop.permute.xlu1 %2512  ;;  %v2582_v28 = vpack.c.bf16 %v5290_v47, %v5290_v47 }
0x10c0   : > { %v2597_v16 = vunpack.c.l.b16 %v2581_v63  ;;  %v5293_v19 = vmul.f32 %v5210_v10, %v2513_v6  ;;  %v2515_v50 = vpop.permute.xlu0 %2514 }
0x10c1   : > { %v2598_v37 = vunpack.c.l.b16 %v2582_v28  ;;  %v5300_v56 = vmul.f32 %v5215_v38, %v2515_v50 }
0x10c2   : > { %5902 = vst [vmem:[#allocation21_spill] sm:$0xff] %v5293_v19  ;;  %v2583_v13 = vpack.c.bf16 %v5293_v19, %v5293_v19  ;;  %v2605_v57 = vrot.slane %v2597_v16, 5 }
0x10c3   : > { %5903 = vst [vmem:[#allocation22_spill] sm:$0xff] %v5300_v56  ;;  %v2517_v0 = vpop.permute.xlu1 %2516  ;;  %v2606_v27 = vrot.slane %v2598_v37, 4  ;;  %v2584_v10 = vpack.c.bf16 %v5300_v56, %v5300_v56 }
0x10c4   : > { %v2599_v49 = vunpack.c.l.b16 %v2583_v13  ;;  %v5303_v63 = vmul.f32 %v5218_v17, %v2517_v0  ;;  %v2521_v29 = vpop.permute.xlu0 %2520 }
0x10c5   : > { %v2607_v28 = vsel %vm774_vm3, %v2606_v27, %v2605_v57  ;;  %v2600_v16 = vunpack.c.l.b16 %v2584_v10  ;;  %v5311_v38 = vmul.f32 %v5223_v12, %v2521_v29 }
0x10c6   : > { %5904 = vst [vmem:[#allocation23_spill] sm:$0xff] %v5303_v63  ;;  %v2608_v6 = vrot.slane %v2599_v49, 3  ;;  %v2585_v47 = vpack.c.bf16 %v5303_v63, %v5303_v63 }
0x10c7   : > { %5905 = vst [vmem:[#allocation24_spill] sm:$0xff] %v5311_v38  ;;  %v2519_v50 = vpop.permute.xlu1 %2518  ;;  %v2610_v0 = vrot.slane %v2600_v16, 2  ;;  %v2587_v49 = vpack.c.bf16 %v5311_v38, %v5311_v38 }
0x10c8   : > { %v2609_v13 = vsel %vm777_vm4, %v2608_v6, %v2607_v28  ;;  %v2601_v17 = vunpack.c.l.b16 %v2585_v47  ;;  %v5315_v37 = vmul.f32 %v5226_v54, %v2519_v50  ;;  %v2523_v56 = vpop.permute.xlu0 %2522 }
0x10c9   : > { %v2603_v27 = vunpack.c.l.b16 %v2587_v49  ;;  %v2611_v12 = vsel %vm780_vm5, %v2610_v0, %v2609_v13  ;;  %v5323_v29 = vmul.f32 %v5231_v23, %v2523_v56 }
0x10ca   : > { %5906 = vst [vmem:[#allocation25_spill] sm:$0xff] %v5315_v37  ;;  %v2612_v19 = vrot.slane %v2601_v17, 1  ;;  %v2586_v57 = vpack.c.bf16 %v5315_v37, %v5315_v37 }
0x10cb   : > { %5907 = vst [vmem:[#allocation26_spill] sm:$0xff] %v5323_v29  ;;  %v2588_v54 = vpack.c.bf16 %v5323_v29, %v5323_v29  ;;  %v2615_v6 = vrot.slane %v2603_v27, 7 }
0x10cc   : > { %v2613_v47 = vsel %vm783_vm6, %v2612_v19, %v2611_v12  ;;  %v2602_v10 = vunpack.c.l.b16 %v2586_v57 }
0x10cd   : > { %v2604_v16 = vunpack.c.l.b16 %v2588_v54 }
0x10ce   : > { %v2614_v28 = vsel %vm786_vm7, %v2602_v10, %v2613_v47 }
0x10cf   : > { %v2616_v50 = vsel %vm789_vm8, %v2615_v6, %v2614_v28  ;;  %v2617_v17 = vrot.slane %v2604_v16, 6 }
0x10d1   : > { %v2618_v49 = vsel %vm792_vm9, %v2617_v17, %v2616_v50 }
0x10d2   : > { %v2619_v38 = vpack.c.b16 %v2618_v49, %v2618_v49 }
0x10d4   : > { %2620 = vrot.lane.b32.xlu1 %v2619_v38, %s4271_s26 }
0x1146   : > { %v2621_v23 = vpop.permute.xlu1 %2620 }
0x1147   : > { %3678 = vmatmul.mubr.msk.bf16.vlgmr.msra.gmra.mrb[16].mxu0 %vm320_vm2, %v2621_v23 }
0x121a   : > { %v2659_v19 = vpop.f32.mrb[16].mxu0 }
0x121b   : > { %v2666_v56 = vrot.slane %v2659_v19, 2  ;;  %v3679_v13 = vpop.f32.mrb[17].mxu0  ;;  %v2667_v12 = vrot.slane %v2659_v19, 3  ;;  %v2668_v47 = vrot.slane %v2659_v19, 4  ;;  %v2669_v10 = vrot.slane %v2659_v19, 5 }
0x121c   : > { %v2662_v0 = vpop.f32.mrb[18].mxu0  ;;  %v2670_v6 = vrot.slane %v2659_v19, 6  ;;  %v2671_v38 = vrot.slane %v2659_v19, 7  ;;  %v2672_v17 = vrot.slane %v2659_v19, 1  ;;  %v2687_v13 = vadd.f32 %v2659_v19, %v4409_v45 }
0x121d   : > { %v2681_v57 = vadd.f32 %v2666_v56, %v4397_v26  ;;  %v3680_v27 = vpop.f32.mrb[19].mxu0  ;;  %v2682_v54 = vadd.f32 %v2667_v12, %v4399_v33  ;;  %v2683_v28 = vadd.f32 %v2668_v47, %v4395_v25  ;;  %v2684_v16 = vadd.f32 %v2669_v10, %v4402_v35 }
0x121e   : > { %v2685_v49 = vadd.f32 %v2670_v6, %v4407_v43  ;;  %v2686_v23 = vadd.f32 %v2671_v38, %v4411_v48  ;;  %v2688_v56 = vadd.f32 %v2672_v17, %v4415_v52 }
0x121f   : > { %4111 = vtanh.f32 %v2681_v57  ;;  %v3562_v38 = vmul.f32 -1.442695, %v2681_v57  ;;  %v3564_v17 = vmul.f32 -1.442695, %v2683_v28 }
0x1220   : > { %4113 = vtanh.f32 %v2682_v54  ;;  %v3567_v63 = vmul.f32 -1.442695, %v2686_v23  ;;  %v3569_v29 = vmul.f32 -1.442695, %v2688_v56 }
0x1221   : > { %4115 = vtanh.f32 %v2683_v28 }
0x1222   : > { %4117 = vtanh.f32 %v2684_v16 }
0x1223   : > { %4119 = vtanh.f32 %v2685_v49 }
0x1224   : > { %4121 = vtanh.f32 %v2686_v23 }
0x1225   : > { %4123 = vtanh.f32 %v2688_v56 }
0x1226   : > { %4125 = vtanh.f32 %v2687_v13 }
0x1227   : > { %4127 = vpow2.f32 %v3562_v38 }
0x1229   : > { %v4112_v50 = vpop.eup %4111 }
0x122a   : > { %2785 = vrot.lane.b32.xlu0 %v4112_v50, %s4270_s25  ;;  %v4114_v0 = vpop.eup %4113  ;;  %v3563_v50 = vmul.f32 -1.442695, %v2682_v54 }
0x122b   : > { %v4116_v27 = vpop.eup %4115  ;;  %2787 = vrot.lane.b32.xlu1 %v4114_v0, %s4270_s25  ;;  %v3565_v0 = vmul.f32 -1.442695, %v2684_v16 }
0x122c   : > { %v4118_v12 = vpop.eup %4117  ;;  %4129 = vpow2.f32 %v3563_v50 }
0x122d   : > { %v4120_v47 = vpop.eup %4119  ;;  %4131 = vpow2.f32 %v3564_v17 }
0x122e   : > { %2789 = vrot.lane.b32.xlu0 %v4116_v27, %s4270_s25  ;;  %v4122_v10 = vpop.eup %4121  ;;  %4133 = vpow2.f32 %v3565_v0 }
0x122f   : > { %2791 = vrot.lane.b32.xlu1 %v4118_v12, %s4270_s25  ;;  %v4124_v6 = vpop.eup %4123  ;;  %v3566_v12 = vmul.f32 -1.442695, %v2685_v49 }
0x1230   : > { %v4126_v19 = vpop.eup %4125 }
0x1231   : > { %v4128_v27 = vpop.eup %4127  ;;  %4135 = vpow2.f32 %v3566_v12 }
0x1232   : > { %2793 = vrot.lane.b32.xlu0 %v4120_v47, %s4270_s25  ;;  %v2713_v47 = vadd.f32 1.0, %v4128_v27  ;;  %4137 = vpow2.f32 %v3567_v63 }
0x1233   : > { %2795 = vrot.lane.b32.xlu1 %v4122_v10, %s4270_s25  ;;  %v3568_v10 = vmul.f32 -1.442695, %v2687_v13 }
0x1234   : > { %4139 = vrcp.f32 %v2713_v47 }
0x1235   : > { %4141 = vpow2.f32 %v3569_v29 }
0x1236   : > { %2799 = vrot.lane.b32.xlu0 %v4124_v6, %s4270_s25  ;;  %v4130_v6 = vpop.eup %4129  ;;  %4143 = vpow2.f32 %v3568_v10 }
0x1237   : > { %2797 = vrot.lane.b32.xlu1 %v4126_v19, %s4270_s25  ;;  %v4132_v19 = vpop.eup %4131  ;;  %v2714_v57 = vadd.f32 1.0, %v4130_v6 }
0x1238   : > { %v4134_v54 = vpop.eup %4133  ;;  %v2715_v28 = vadd.f32 1.0, %v4132_v19 }
0x1239   : > { %4145 = vrcp.f32 %v2714_v57  ;;  %v2716_v50 = vadd.f32 1.0, %v4134_v54 }
0x123a   : > { %4147 = vrcp.f32 %v2715_v28 }
0x123b   : > { %v4136_v38 = vpop.eup %4135  ;;  %4149 = vrcp.f32 %v2716_v50 }
0x123c   : > { %v4138_v16 = vpop.eup %4137  ;;  %v2717_v17 = vadd.f32 1.0, %v4136_v38 }
0x123d   : > { %v2718_v29 = vadd.f32 1.0, %v4138_v16 }
0x123e   : > { %v5349_v49 = vpop.eup %4139  ;;  %4151 = vrcp.f32 %v2717_v17 }
0x123f   : > { %v4142_v56 = vpop.eup %4141  ;;  %4153 = vrcp.f32 %v2718_v29 }
0x1240   : > { %v4144_v13 = vpop.eup %4143  ;;  %v2720_v0 = vadd.f32 1.0, %v4142_v56 }
0x1241   : > { %v2719_v27 = vadd.f32 1.0, %v4144_v13 }
0x1242   : > { %4155 = vrcp.f32 %v2720_v0 }
0x1243   : > { %v5353_v12 = vpop.eup %4145  ;;  %4157 = vrcp.f32 %v2719_v27 }
0x1244   : > { %v5355_v10 = vpop.eup %4147 }
0x1245   : > { %v5360_v54 = vpop.eup %4149 }
0x1248   : > { %v5363_v38 = vpop.eup %4151 }
0x1249   : > { %v5368_v17 = vpop.eup %4153 }
0x129c   : > { %v2786_v23 = vpop.permute.xlu0 %2785 }
0x129d   : > { %v2809_v63 = vmul.f32 %v5349_v49, %v2786_v23  ;;  %v2788_v47 = vpop.permute.xlu1 %2787 }
0x129e   : > { %v2810_v6 = vmul.f32 %v5353_v12, %v2788_v47 }
0x129f   : > { %2825 = vrot.lane.b32.xlu0 %v2809_v63, %s4270_s25  ;;  %v5371_v63 = vpop.eup %4155 }
0x12a0   : > { %v2790_v19 = vpop.permute.xlu0 %2789  ;;  %2827 = vrot.lane.b32.xlu1 %v2810_v6, %s4270_s25  ;;  %v5376_v27 = vpop.eup %4157 }
0x12a1   : > { %v2811_v57 = vmul.f32 %v5355_v10, %v2790_v19  ;;  %v2792_v28 = vpop.permute.xlu1 %2791  ;;  %v2753_v19 = vrot.slane %v5238_v36, 7 }
0x12a2   : > { %v2812_v16 = vmul.f32 %v5360_v54, %v2792_v28 }
0x12a3   : > { %2829 = vrot.lane.b32.xlu0 %v2811_v57, %s4270_s25  ;;  %v2769_v57 = vmul.f32 %v5349_v49, %v2753_v19 }
0x12a4   : > { %v2794_v50 = vpop.permute.xlu0 %2793  ;;  %2831 = vrot.lane.b32.xlu1 %v2812_v16, %s4270_s25 }
0x12a5   : > { %v2813_v23 = vmul.f32 %v5363_v38, %v2794_v50  ;;  %v2796_v56 = vpop.permute.xlu1 %2795  ;;  %v2754_v50 = vrot.slane %v5246_v11, 7 }
0x12a6   : > { %v2814_v29 = vmul.f32 %v5368_v17, %v2796_v56 }
0x12a7   : > { %2833 = vrot.lane.b32.xlu0 %v2813_v23, %s4270_s25  ;;  %v2755_v23 = vrot.slane %v5249_v30, 7  ;;  %v2770_v56 = vmul.f32 %v5353_v12, %v2754_v50  ;;  %v2758_v50 = vrot.slane %v5269_v18, 7  ;;  %v2759_v18 = vrot.slane %v5267_v46, 7 }
0x12a8   : > { %v2800_v13 = vpop.permute.xlu0 %2799  ;;  %2835 = vrot.lane.b32.xlu1 %v2814_v29, %s4270_s25 }
0x12a9   : > { %v2816_v0 = vmul.f32 %v5371_v63, %v2800_v13  ;;  %v2798_v47 = vpop.permute.xlu1 %2797  ;;  %v2771_v13 = vmul.f32 %v5355_v10, %v2755_v23 }
0x12aa   : > { %v2815_v6 = vmul.f32 %v5376_v27, %v2798_v47 }
0x12ab   : > { %2839 = vrot.lane.b32.xlu0 %v2816_v0, %s4270_s25  ;;  %v2756_v0 = vrot.slane %v5256_v60, 7 }
0x12ac   : > { %2837 = vrot.lane.b32.xlu1 %v2815_v6, %s4270_s25  ;;  %v2757_v6 = vrot.slane %v5260_v59, 7  ;;  %v2760_v59 = vrot.slane %v5274_v39, 7  ;;  %v2775_v39 = vmul.f32 %v5376_v27, %v2759_v18 }
0x12ad   : > { %v2772_v11 = vmul.f32 %v5360_v54, %v2756_v0 }
0x12ae   : > { %v2776_v0 = vmul.f32 %v5371_v63, %v2760_v59 }
0x1311   : > { %v2826_v28 = vpop.permute.xlu0 %2825 }
0x1312   : > { %v5383_v16 = vadd.f32 %v2826_v28, %v2769_v57  ;;  %v2828_v29 = vpop.permute.xlu1 %2827  ;;  %v2773_v28 = vmul.f32 %v5363_v38, %v2757_v6 }
0x1313   : > { %v5391_v47 = vadd.f32 %v2828_v29, %v2770_v56  ;;  %v2774_v29 = vmul.f32 %v5368_v17, %v2758_v50 }
0x1314   : > { %4159 = vtanh.f32 %v5383_v16 }
0x1315   : > { %v2830_v36 = vpop.permute.xlu0 %2829  ;;  %4161 = vtanh.f32 %v5391_v47 }
0x1316   : > { %v5394_v19 = vadd.f32 %v2830_v36, %v2771_v13  ;;  %v2832_v30 = vpop.permute.xlu1 %2831 }
0x1317   : > { %v5401_v60 = vadd.f32 %v2832_v30, %v2772_v11 }
0x1318   : > { %4163 = vtanh.f32 %v5394_v19 }
0x1319   : > { %v2834_v23 = vpop.permute.xlu0 %2833  ;;  %4165 = vtanh.f32 %v5401_v60 }
0x131a   : > { %v5405_v56 = vadd.f32 %v2834_v23, %v2773_v28  ;;  %v2836_v13 = vpop.permute.xlu1 %2835 }
0x131b   : > { %v5412_v36 = vadd.f32 %v2836_v13, %v2774_v29 }
0x131c   : > { %4167 = vtanh.f32 %v5405_v56 }
0x131d   : > { %v2840_v6 = vpop.permute.xlu0 %2839  ;;  %4169 = vtanh.f32 %v5412_v36 }
0x131e   : > { %v4160_v57 = vpop.eup %4159  ;;  %v5414_v11 = vadd.f32 %v2840_v6, %v2776_v0 }
0x131f   : > { %2873 = vrot.lane.b32.xlu0 %v4160_v57, %s4270_s25  ;;  %v2838_v57 = vpop.permute.xlu1 %2837  ;;  %v4162_v30 = vpop.eup %4161 }
0x1320   : > { %4171 = vtanh.f32 %v5414_v11  ;;  %v5419_v28 = vadd.f32 %v2838_v57, %v2775_v39  ;;  %2875 = vrot.lane.b32.xlu1 %v4162_v30, %s4270_s25 }
0x1322   : > { %v4164_v50 = vpop.eup %4163  ;;  %4173 = vtanh.f32 %v5419_v28 }
0x1323   : > { %2877 = vrot.lane.b32.xlu0 %v4164_v50, %s4270_s25  ;;  %v4166_v46 = vpop.eup %4165 }
0x1324   : > { %2879 = vrot.lane.b32.xlu1 %v4166_v46, %s4270_s25 }
0x1326   : > { %v4168_v23 = vpop.eup %4167 }
0x1327   : > { %2881 = vrot.lane.b32.xlu0 %v4168_v23, %s4270_s25  ;;  %v4170_v59 = vpop.eup %4169 }
0x1328   : > { %2883 = vrot.lane.b32.xlu1 %v4170_v59, %s4270_s25 }
0x132a   : > { %v4172_v29 = vpop.eup %4171 }
0x132b   : > { %2887 = vrot.lane.b32.xlu0 %v4172_v29, %s4270_s25 }
0x132c   : > { %v4174_v13 = vpop.eup %4173 }
0x132d   : > { %2885 = vrot.lane.b32.xlu1 %v4174_v13, %s4270_s25 }
0x1391   : > { %v2874_v0 = vpop.permute.xlu0 %2873 }
0x1392   : > { %v5430_v18 = vmul.f32 %v5349_v49, %v2874_v0  ;;  %v2876_v39 = vpop.permute.xlu1 %2875 }
0x1393   : > { %v5435_v57 = vmul.f32 %v5353_v12, %v2876_v39 }
0x1394   : > { %5908 = vst [vmem:[#allocation27_spill] sm:$0xff] %v5430_v18  ;;  %v2946_v6 = vpack.c.bf16 %v5430_v18, %v5430_v18 }
0x1395   : > { %5909 = vst [vmem:[#allocation28_spill] sm:$0xff] %v5435_v57  ;;  %v2878_v50 = vpop.permute.xlu0 %2877  ;;  %v2947_v23 = vpack.c.bf16 %v5435_v57, %v5435_v57 }
0x1396   : > { %v2962_v30 = vunpack.c.l.b16 %v2946_v6  ;;  %v5438_v46 = vmul.f32 %v5355_v10, %v2878_v50  ;;  %v2880_v59 = vpop.permute.xlu1 %2879 }
0x1397   : > { %v2963_v29 = vunpack.c.l.b16 %v2947_v23  ;;  %v5445_v0 = vmul.f32 %v5360_v54, %v2880_v59 }
0x1398   : > { %5910 = vst [vmem:[#allocation29_spill] sm:$0xff] %v5438_v46  ;;  %v2948_v49 = vpack.c.bf16 %v5438_v46, %v5438_v46  ;;  %v2970_v13 = vrot.slane %v2962_v30, 6 }
0x1399   : > { %5911 = vst [vmem:[#allocation30_spill] sm:$0xff] %v5445_v0  ;;  %v2882_v18 = vpop.permute.xlu0 %2881  ;;  %v2971_v39 = vrot.slane %v2963_v29, 5  ;;  %v2949_v10 = vpack.c.bf16 %v5445_v0, %v5445_v0 }
0x139a   : > { %v2964_v12 = vunpack.c.l.b16 %v2948_v49  ;;  %v5448_v6 = vmul.f32 %v5363_v38, %v2882_v18  ;;  %v2884_v57 = vpop.permute.xlu1 %2883 }
0x139b   : > { %v2972_v23 = vsel %vm774_vm3, %v2971_v39, %v2970_v13  ;;  %v2965_v30 = vunpack.c.l.b16 %v2949_v10  ;;  %v5456_v54 = vmul.f32 %v5368_v17, %v2884_v57 }
0x139c   : > { %5912 = vst [vmem:[#allocation31_spill] sm:$0xff] %v5448_v6  ;;  %v2973_v50 = vrot.slane %v2964_v12, 4  ;;  %v2950_v37 = vpack.c.bf16 %v5448_v6, %v5448_v6 }
0x139d   : > { %v2888_v59 = vpop.permute.xlu0 %2887  ;;  %v2975_v29 = vrot.slane %v2965_v30, 3  ;;  %v2951_v12 = vpack.c.bf16 %v5456_v54, %v5456_v54 }
0x139e   : > { %v2974_v49 = vsel %vm777_vm4, %v2973_v50, %v2972_v23  ;;  %v2966_v38 = vunpack.c.l.b16 %v2950_v37  ;;  %v5460_v18 = vmul.f32 %v5371_v63, %v2888_v59 }
0x139f   : > { %v2886_v0 = vpop.permute.xlu1 %2885  ;;  %v2967_v39 = vunpack.c.l.b16 %v2951_v12  ;;  %v2976_v17 = vsel %vm780_vm5, %v2975_v29, %v2974_v49 }
0x13a0   : > { %v2977_v46 = vrot.slane %v2966_v38, 2  ;;  %v2953_v13 = vpack.c.bf16 %v5460_v18, %v5460_v18  ;;  %v5468_v57 = vmul.f32 %v5376_v27, %v2886_v0 }
0x13a1   : > { %v2979_v63 = vrot.slane %v2967_v39, 1 }
0x13a2   : > { %v2978_v37 = vsel %vm783_vm6, %v2977_v46, %v2976_v17  ;;  %v2969_v10 = vunpack.c.l.b16 %v2953_v13  ;;  %v2952_v50 = vpack.c.bf16 %v5468_v57, %v5468_v57 }
0x13a3   : > { %v2980_v59 = vsel %vm786_vm7, %v2979_v63, %v2978_v37 }
0x13a4   : > { %v2982_v23 = vrot.slane %v2969_v10, 7  ;;  %v2968_v30 = vunpack.c.l.b16 %v2952_v50 }
0x13a6   : > { %v2981_v38 = vsel %vm789_vm8, %v2968_v30, %v2980_v59 }
0x13a7   : > { %v2983_v12 = vsel %vm792_vm9, %v2982_v23, %v2981_v38 }
0x13a8   : > { %v2984_v6 = vpack.c.b16 %v2983_v12, %v2983_v12 }
0x13aa   : > { %2985 = vrot.lane.b32.xlu0 %v2984_v6, %s4271_s26 }
0x141c   : > { %v2986_v27 = vpop.permute.xlu0 %2985 }
0x141d   : > { %3686 = vmatmul.mubr.msk.bf16.vlgmr.msra.gmra.mrb[16].mxu1 %vm320_vm2, %v2986_v27  ;;  %vm3328_vm2 = vcmask 260096  }
0x14f0   : > { %v3024_v46 = vpop.f32.mrb[16].mxu1 }
0x14f1   : > { %v3687_v0 = vpop.f32.mrb[17].mxu1  ;;  %v3032_v13 = vrot.slane %v3024_v46, 2  ;;  %v3033_v39 = vrot.slane %v3024_v46, 3  ;;  %v3034_v17 = vrot.slane %v3024_v46, 4  ;;  %v3035_v37 = vrot.slane %v3024_v46, 5 }
0x14f2   : > { %v3027_v49 = vpop.f32.mrb[18].mxu1  ;;  %v3036_v50 = vrot.slane %v3024_v46, 6  ;;  %v3037_v6 = vrot.slane %v3024_v46, 7  ;;  %v3031_v38 = vrot.slane %v3024_v46, 1 }
0x14f3   : > { %v3688_v29 = vpop.f32.mrb[19].mxu1  ;;  %v3047_v10 = vadd.f32 %v3032_v13, %v4399_v33  ;;  %v3048_v63 = vadd.f32 %v3033_v39, %v4395_v25  ;;  %v3049_v23 = vadd.f32 %v3034_v17, %v4402_v35  ;;  %v3050_v30 = vadd.f32 %v3035_v37, %v4407_v43 }
0x14f4   : > { %v3051_v59 = vadd.f32 %v3036_v50, %v4411_v48  ;;  %v3052_v12 = vadd.f32 %v3037_v6, %v4409_v45  ;;  %v3053_v33 = vadd.f32 %v3024_v46, %v4415_v52  ;;  %v3046_v25 = vadd.f32 %v3031_v38, %v4397_v26 }
0x14f5   : > { %4175 = vtanh.f32 %v3047_v10  ;;  %v3572_v29 = vmul.f32 -1.442695, %v3047_v10  ;;  %v3574_v13 = vmul.f32 -1.442695, %v3049_v23 }
0x14f6   : > { %4177 = vtanh.f32 %v3048_v63  ;;  %v3578_v0 = vmul.f32 -1.442695, %v3053_v33  ;;  %v3571_v49 = vmul.f32 -1.442695, %v3046_v25 }
0x14f7   : > { %4179 = vtanh.f32 %v3049_v23 }
0x14f8   : > { %4181 = vtanh.f32 %v3050_v30 }
0x14f9   : > { %4183 = vtanh.f32 %v3051_v59 }
0x14fa   : > { %4185 = vtanh.f32 %v3052_v12 }
0x14fb   : > { %4187 = vtanh.f32 %v3053_v33 }
0x14fc   : > { %4189 = vtanh.f32 %v3046_v25 }
0x14ff   : > { %v4176_v27 = vpop.eup %4175 }
0x1500   : > { %v4178_v35 = vpop.eup %4177  ;;  %3152 = vrot.lane.b32.xlu1 %v4176_v27, %s4270_s25 }
0x1501   : > { %3154 = vrot.lane.b32.xlu0 %v4178_v35, %s4270_s25  ;;  %v4180_v43 = vpop.eup %4179 }
0x1502   : > { %v4182_v48 = vpop.eup %4181 }
0x1503   : > { %v4184_v45 = vpop.eup %4183 }
0x1504   : > { %3156 = vrot.lane.b32.xlu1 %v4180_v43, %s4270_s25  ;;  %v4186_v52 = vpop.eup %4185 }
0x1505   : > { %3158 = vrot.lane.b32.xlu0 %v4182_v48, %s4270_s25  ;;  %v4188_v26 = vpop.eup %4187 }
0x1506   : > { %v4190_v46 = vpop.eup %4189 }
0x1508   : > { %3160 = vrot.lane.b32.xlu1 %v4184_v45, %s4270_s25 }
0x1509   : > { %3162 = vrot.lane.b32.xlu0 %v4186_v52, %s4270_s25 }
0x150c   : > { %3164 = vrot.lane.b32.xlu1 %v4188_v26, %s4270_s25 }
0x150d   : > { %3150 = vrot.lane.b32.xlu0 %v4190_v46, %s4270_s25 }
0x1510   : > { %716 = vrot.lane.b32.xlu1 %v4521_v62, %s4271_s26  ;;  %v3573_v62 = vmul.f32 -1.442695, %v3048_v63 }
0x1511   : > { %718 = vrot.lane.b32.xlu0 %v4531_v7, %s4271_s26  ;;  %v3575_v7 = vmul.f32 -1.442695, %v3050_v30 }
0x1512   : > { %4191 = vpow2.f32 %v3573_v62 }
0x1513   : > { %4193 = vpow2.f32 %v3575_v7 }
0x1514   : > { %720 = vrot.lane.b32.xlu1 %v4518_v61, %s4271_s26  ;;  %v3577_v61 = vmul.f32 -1.442695, %v3052_v12 }
0x1515   : > { %722 = vrot.lane.b32.xlu0 %v4524_v3, %s4271_s26 }
0x1516   : > { %4195 = vpow2.f32 %v3577_v61 }
0x1517   : > { %4197 = vpow2.f32 %v3578_v0 }
0x1518   : > { %724 = vrot.lane.b32.xlu1 %v4538_v15, %s4271_s26  ;;  %4199 = vpow2.f32 %v3571_v49 }
0x1519   : > { %726 = vrot.lane.b32.xlu0 %v4543_v20, %s4271_s26  ;;  %4201 = vpow2.f32 %v3572_v29 }
0x151c   : > { %728 = vrot.lane.b32.xlu1 %v4549_v31, %s4271_s26  ;;  %v4192_v3 = vpop.eup %4191 }
0x151d   : > { %730 = vrot.lane.b32.xlu0 %v4556_v42, %s4271_s26  ;;  %v3080_v15 = vadd.f32 1.0, %v4192_v3  ;;  %v4194_v20 = vpop.eup %4193  ;;  %v3576_v42 = vmul.f32 -1.442695, %v3051_v59 }
0x151e   : > { %v3082_v31 = vadd.f32 1.0, %v4194_v20 }
0x151f   : > { %4203 = vrcp.f32 %v3080_v15 }
0x1520   : > { %v4196_v39 = vpop.eup %4195  ;;  %4205 = vpow2.f32 %v3574_v13 }
0x1521   : > { %v4198_v17 = vpop.eup %4197  ;;  %4207 = vrcp.f32 %v3082_v31  ;;  %v3084_v37 = vadd.f32 1.0, %v4196_v39 }
0x1522   : > { %v4200_v63 = vpop.eup %4199  ;;  %4209 = vpow2.f32 %v3576_v42  ;;  %v3085_v50 = vadd.f32 1.0, %v4198_v17 }
0x1523   : > { %v4202_v6 = vpop.eup %4201  ;;  %4211 = vrcp.f32 %v3084_v37  ;;  %v3078_v10 = vadd.f32 1.0, %v4200_v63 }
0x1524   : > { %v3079_v33 = vadd.f32 1.0, %v4202_v6  ;;  %4213 = vrcp.f32 %v3085_v50 }
0x1525   : > { %4215 = vrcp.f32 %v3078_v10 }
0x1526   : > { %4217 = vrcp.f32 %v3079_v33  ;;  %v3125_v33 = vrot.slane %v5414_v11, 7 }
0x1529   : > { %v5510_v38 = vpop.eup %4203 }
0x152a   : > { %v4206_v25 = vpop.eup %4205 }
0x152b   : > { %v5514_v27 = vpop.eup %4207  ;;  %v3081_v48 = vadd.f32 1.0, %v4206_v25 }
0x152c   : > { %v4210_v45 = vpop.eup %4209 }
0x152d   : > { %v5518_v26 = vpop.eup %4211  ;;  %4219 = vrcp.f32 %v3081_v48  ;;  %v3083_v7 = vadd.f32 1.0, %v4210_v45 }
0x152e   : > { %v5521_v61 = vpop.eup %4213 }
0x152f   : > { %v5524_v49 = vpop.eup %4215  ;;  %4221 = vrcp.f32 %v3083_v7 }
0x1530   : > { %v5529_v20 = vpop.eup %4217 }
0x1537   : > { %v5538_v42 = vpop.eup %4219 }
0x1539   : > { %v5548_v50 = vpop.eup %4221 }
0x1572   : > { %v3153_v30 = vpop.permute.xlu1 %3152 }
0x1573   : > { %v3155_v12 = vpop.permute.xlu0 %3154  ;;  %v3175_v31 = vmul.f32 %v5529_v20, %v3153_v30 }
0x1574   : > { %v3176_v23 = vmul.f32 %v5510_v38, %v3155_v12 }
0x1576   : > { %3194 = vrot.lane.b32.xlu0 %v3176_v23, %s4270_s25  ;;  %v3157_v59 = vpop.permute.xlu1 %3156  ;;  %v3124_v23 = vrot.slane %v5419_v28, 7 }
0x1577   : > { %v3159_v35 = vpop.permute.xlu0 %3158  ;;  %v3177_v37 = vmul.f32 %v5538_v42, %v3157_v59  ;;  %v3118_v59 = vrot.slane %v5383_v16, 7 }
0x1578   : > { %v3178_v43 = vmul.f32 %v5514_v27, %v3159_v35 }
0x1579   : > { %v3134_v28 = vmul.f32 %v5524_v49, %v3118_v59 }
0x157a   : > { %3198 = vrot.lane.b32.xlu0 %v3178_v43, %s4270_s25  ;;  %v3161_v52 = vpop.permute.xlu1 %3160  ;;  %v3119_v43 = vrot.slane %v5391_v47, 7 }
0x157b   : > { %v3163_v46 = vpop.permute.xlu0 %3162 }
0x157c   : > { %v3180_v62 = vmul.f32 %v5518_v26, %v3163_v46  ;;  %v3135_v11 = vmul.f32 %v5529_v20, %v3119_v43 }
0x157e   : > { %3202 = vrot.lane.b32.xlu0 %v3180_v62, %s4270_s25  ;;  %v3165_v0 = vpop.permute.xlu1 %3164  ;;  %v3121_v62 = vrot.slane %v5401_v60, 7 }
0x157f   : > { %v3181_v3 = vmul.f32 %v5521_v61, %v3165_v0  ;;  %v3151_v29 = vpop.permute.xlu0 %3150 }
0x1580   : > { %v3174_v15 = vmul.f32 %v5524_v49, %v3151_v29 }
0x1581   : > { %3204 = vrot.lane.b32.xlu1 %v3181_v3, %s4270_s25 }
0x1582   : > { %3190 = vrot.lane.b32.xlu0 %v3174_v15, %s4270_s25  ;;  %v717_v13 = vpop.permute.xlu1 %716  ;;  %v3137_v15 = vmul.f32 %v5538_v42, %v3121_v62 }
0x1583   : > { %741 = vst.msk [vmem:[%s4344_s9] sm:$0x1] %vm740_vm10, %v717_v13  ;;  %v719_v39 = vpop.permute.xlu0 %718 }
0x1584   : > { %742 = vst.msk [vmem:[%s4344_s9 + $0x8] sm:$0x1] %vm740_vm10, %v719_v39 }
0x1585   : > { %3192 = vrot.lane.b32.xlu1 %v3175_v31, %s4270_s25  ;;  %v3123_v31 = vrot.slane %v5412_v36, 7 }
0x1586   : > { %1090 = vrot.lane.b32.xlu0 %v4672_v5, %s4271_s26  ;;  %v721_v17 = vpop.permute.xlu1 %720  ;;  %v3179_v5 = vmul.f32 %v5548_v50, %v3161_v52 }
0x1587   : > { %743 = vst.msk [vmem:[%s4344_s9 + $0x10] sm:$0x1] %vm740_vm10, %v721_v17  ;;  %v723_v63 = vpop.permute.xlu0 %722 }
0x1588   : > { %744 = vst.msk [vmem:[%s4344_s9 + $0x18] sm:$0x1] %vm740_vm10, %v723_v63  ;;  %v5921_v63 = vld [vmem:[#allocation18_spill] sm:$0xff] }
0x1589   : > { %3196 = vrot.lane.b32.xlu1 %v3177_v37, %s4270_s25 }
0x158a   : > { %1094 = vrot.lane.b32.xlu0 %v4680_v14, %s4271_s26  ;;  %v725_v6 = vpop.permute.xlu1 %724  ;;  %v5915_v14 = vld [vmem:[#allocation9_spill] sm:$0xff] }
0x158b   : > { %745 = vst.msk [vmem:[%s4344_s9 + $0x20] sm:$0x1] %vm740_vm10, %v725_v6  ;;  %v727_v10 = vpop.permute.xlu0 %726  ;;  %v3139_v6 = vmul.f32 %v5548_v50, %v3123_v31 }
0x158c   : > { %746 = vst.msk [vmem:[%s4344_s9 + $0x28] sm:$0x1] %vm740_vm10, %v727_v10 }
0x158d   : > { %3200 = vrot.lane.b32.xlu1 %v3179_v5, %s4270_s25 }
0x158e   : > { %1098 = vrot.lane.b32.xlu0 %v4692_v53, %s4271_s26  ;;  %v729_v30 = vpop.permute.xlu1 %728  ;;  %v5917_v53 = vld [vmem:[#allocation12_spill] sm:$0xff] }
0x158f   : > { %747 = vst.msk [vmem:[%s4344_s9 + $0x30] sm:$0x1] %vm740_vm10, %v729_v30  ;;  %v731_v12 = vpop.permute.xlu0 %730 }
0x1590   : > { %748 = vst.msk [vmem:[%s4344_s9 + $0x38] sm:$0x1] %vm740_vm10, %v731_v12 }
0x1591   : > { %1088 = vrot.lane.b32.xlu1 %v4677_v8, %s4271_s26  ;;  %v5914_v8 = vld [vmem:[#allocation6_spill] sm:$0xff] }
0x1592   : > { %1102 = vrot.lane.b32.xlu0 %v4704_v55, %s4271_s26  ;;  %v5919_v55 = vld [vmem:[#allocation8_spill] sm:$0xff] }
0x1595   : > { %1092 = vrot.lane.b32.xlu1 %v4669_v4, %s4271_s26  ;;  %v5913_v4 = vld [vmem:[#allocation10_spill] sm:$0xff] }
0x1596   : > { %1455 = vrot.lane.b32.xlu0 %v4843_v1, %s4271_s26 }
0x1599   : > { %1096 = vrot.lane.b32.xlu1 %v4689_v22, %s4271_s26  ;;  %v5916_v22 = vld [vmem:[#allocation7_spill] sm:$0xff] }
0x159a   : > { %1459 = vrot.lane.b32.xlu0 %v4833_v32, %s4271_s26  ;;  %v3120_v32 = vrot.slane %v5394_v19, 7  ;;  %v3141_v19 = vmul.f32 %v5521_v61, %v3125_v33 }
0x159d   : > { %1100 = vrot.lane.b32.xlu1 %v4700_v44, %s4271_s26  ;;  %v5918_v44 = vld [vmem:[#allocation11_spill] sm:$0xff] }
0x159e   : > { %1463 = vrot.lane.b32.xlu0 %v4855_v21, %s4271_s26 }
0x15a1   : > { %1453 = vrot.lane.b32.xlu1 %v4830_v9, %s4271_s26  ;;  %v5920_v9 = vld [vmem:[#allocation13_spill] sm:$0xff] }
0x15a2   : > { %1467 = vrot.lane.b32.xlu0 %v4866_v51, %s4271_s26 }
0x15a5   : > { %1457 = vrot.lane.b32.xlu1 %v4838_v24, %s4271_s26  ;;  %v3136_v24 = vmul.f32 %v5510_v38, %v3120_v32 }
0x15a6   : > { %1820 = vrot.lane.b32.xlu0 %v4981_v40, %s4271_s26 }
0x15a9   : > { %1461 = vrot.lane.b32.xlu1 %v4846_v2, %s4271_s26  ;;  %v3122_v2 = vrot.slane %v5405_v56, 7 }
0x15aa   : > { %1824 = vrot.lane.b32.xlu0 %v5913_v4, %s4271_s26 }
0x15ab   : > { %v3138_v51 = vmul.f32 %v5514_v27, %v3122_v2 }
0x15ad   : > { %1465 = vrot.lane.b32.xlu1 %v5914_v8, %s4271_s26 }
0x15ae   : > { %1828 = vrot.lane.b32.xlu0 %v5915_v14, %s4271_s26 }
0x15b1   : > { %1818 = vrot.lane.b32.xlu1 %v5916_v22, %s4271_s26 }
0x15b2   : > { %1832 = vrot.lane.b32.xlu0 %v5917_v53, %s4271_s26 }
0x15b5   : > { %1822 = vrot.lane.b32.xlu1 %v5918_v44, %s4271_s26 }
0x15b6   : > { %2185 = vrot.lane.b32.xlu0 %v5144_v58, %s4271_s26 }
0x15b9   : > { %1826 = vrot.lane.b32.xlu1 %v5919_v55, %s4271_s26 }
0x15bd   : > { %1830 = vrot.lane.b32.xlu1 %v5920_v9, %s4271_s26 }
0x15c1   : > { %2183 = vrot.lane.b32.xlu1 %v5131_v34, %s4271_s26  ;;  %v3140_v34 = vmul.f32 %v5518_v26, %v3124_v23  ;;  %v5922_v23 = vld [vmem:[#allocation15_spill] sm:$0xff] }
0x15e8   : > { %v3195_v1 = vpop.permute.xlu0 %3194 }
0x15e9   : > { %v3216_v21 = vadd.f32 %v3195_v1, %v3136_v24 }
0x15eb   : > { %4223 = vtanh.f32 %v3216_v21  ;;  %v3339_v3 = vrot.slane %v3216_v21, 6 }
0x15ec   : > { %v3199_v40 = vpop.permute.xlu0 %3198 }
0x15ed   : > { %v3218_v58 = vadd.f32 %v3199_v40, %v3138_v51 }
0x15ef   : > { %4225 = vtanh.f32 %v3218_v58  ;;  %v3343_v5 = vrot.slane %v3218_v58, 4 }
0x15f0   : > { %v3203_v25 = vpop.permute.xlu0 %3202 }
0x15f1   : > { %v3220_v35 = vadd.f32 %v3203_v25, %v3140_v34 }
0x15f3   : > { %v3205_v56 = vpop.permute.xlu1 %3204  ;;  %v3347_v53 = vrot.slane %v3220_v35, 2 }
0x15f4   : > { %v3221_v48 = vadd.f32 %v3205_v56, %v3141_v19  ;;  %v3191_v45 = vpop.permute.xlu0 %3190  ;;  %v5924_v56 = vld [vmem:[#allocation20_spill] sm:$0xff] }
0x15f5   : > { %v4224_v52 = vpop.eup %4223  ;;  %v5623_v46 = vadd.f32 %v3191_v45, %v3134_v28  ;;  %v5926_v45 = vld [vmem:[#allocation22_spill] sm:$0xff] }
0x15f6   : > { %4227 = vtanh.f32 %v3221_v48  ;;  %3242 = vrot.lane.b32.xlu0 %v4224_v52, %s4270_s25  ;;  %v3349_v9 = vrot.slane %v3221_v48, 1 }
0x15f7   : > { %4229 = vtanh.f32 %v3220_v35  ;;  %v3193_v16 = vpop.permute.xlu1 %3192  ;;  %v5923_v35 = vld [vmem:[#allocation14_spill] sm:$0xff] }
0x15f8   : > { %v3215_v47 = vadd.f32 %v3193_v16, %v3135_v11  ;;  %v1091_v7 = vpop.permute.xlu0 %1090  ;;  %v5927_v11 = vld [vmem:[#allocation16_spill] sm:$0xff]  ;;  %v5928_v16 = vld [vmem:[#allocation25_spill] sm:$0xff] }
0x15f9   : > { %v4226_v0 = vpop.eup %4225  ;;  %1114 = vst.msk [vmem:[%s4344_s9 + $0x8] sm:$0x2] %vm1112_vm11, %v1091_v7  ;;  %v5929_v7 = vld [vmem:[#allocation19_spill] sm:$0xff] }
0x15fa   : > { %4231 = vtanh.f32 %v3215_v47  ;;  %v3338_v29 = vrot.slane %v3215_v47, 7  ;;  %3246 = vrot.lane.b32.xlu0 %v4226_v0, %s4270_s25  ;;  %v5930_v0 = vld [vmem:[#allocation26_spill] sm:$0xff] }
0x15fb   : > { %4233 = vtanh.f32 %v5623_v46  ;;  %v3197_v13 = vpop.permute.xlu1 %3196 }
0x15fc   : > { %v3340_v60 = vsel %vm774_vm3, %v3339_v3, %v3338_v29  ;;  %v3217_v39 = vadd.f32 %v3197_v13, %v3137_v15  ;;  %v1095_v17 = vpop.permute.xlu0 %1094  ;;  %v5931_v15 = vld [vmem:[#allocation21_spill] sm:$0xff]  ;;  %v5932_v13 = vld [vmem:[#allocation28_spill] sm:$0xff] }
0x15fd   : > { %1116 = vst.msk [vmem:[%s4344_s9 + $0x18] sm:$0x2] %vm1112_vm11, %v1095_v17  ;;  %v5934_v17 = vld [vmem:[#allocation30_spill] sm:$0xff] }
0x15fe   : > { %4235 = vtanh.f32 %v3217_v39  ;;  %v3341_v37 = vrot.slane %v3217_v39, 5  ;;  %2189 = vrot.lane.b32.xlu0 %v5921_v63, %s4271_s26  ;;  %v5933_v39 = vld [vmem:[#allocation23_spill] sm:$0xff] }
0x15ff   : > { %v3201_v10 = vpop.permute.xlu1 %3200 }
0x1600   : > { %v4228_v30 = vpop.eup %4227  ;;  %v3342_v36 = vsel %vm777_vm4, %v3341_v37, %v3340_v60  ;;  %v3219_v12 = vadd.f32 %v3201_v10, %v3139_v6  ;;  %v1099_v4 = vpop.permute.xlu0 %1098  ;;  %v5935_v6 = vld [vmem:[#allocation24_spill] sm:$0xff]  ;;  %v5936_v10 = vld [vmem:[#allocation27_spill] sm:$0xff] }
0x1601   : > { %v4230_v8 = vpop.eup %4229  ;;  %v3344_v14 = vsel %vm780_vm5, %v3343_v5, %v3342_v36  ;;  %1118 = vst.msk [vmem:[%s4344_s9 + $0x28] sm:$0x2] %vm1112_vm11, %v1099_v4  ;;  %3252 = vrot.lane.b32.xlu1 %v4228_v30, %s4270_s25  ;;  %v5937_v36 = vld [vmem:[#allocation29_spill] sm:$0xff] }
0x1602   : > { %4237 = vtanh.f32 %v3219_v12  ;;  %v3345_v22 = vrot.slane %v3219_v12, 3  ;;  %3250 = vrot.lane.b32.xlu0 %v4230_v8, %s4270_s25 }
0x1603   : > { %v1089_v44 = vpop.permute.xlu1 %1088 }
0x1604   : > { %v4232_v55 = vpop.eup %4231  ;;  %v3346_v32 = vsel %vm783_vm6, %v3345_v22, %v3344_v14  ;;  %1113 = vst.msk [vmem:[%s4344_s9] sm:$0x2] %vm1112_vm11, %v1089_v44  ;;  %v1103_v24 = vpop.permute.xlu0 %1102 }
0x1605   : > { %v4234_v1 = vpop.eup %4233  ;;  %1120 = vst.msk [vmem:[%s4344_s9 + $0x38] sm:$0x2] %vm1112_vm11, %v1103_v24  ;;  %3240 = vrot.lane.b32.xlu1 %v4232_v55, %s4270_s25  ;;  %v3348_v2 = vsel %vm786_vm7, %v3347_v53, %v3346_v32 }
0x1606   : > { %3238 = vrot.lane.b32.xlu0 %v4234_v1, %s4270_s25  ;;  %v5653_v21 = vsel %vm789_vm8, %v3349_v9, %v3348_v2 }
0x1607   : > { %v1093_v51 = vpop.permute.xlu1 %1092 }
0x1608   : > { %v4236_v40 = vpop.eup %4235  ;;  %1115 = vst.msk [vmem:[%s4344_s9 + $0x10] sm:$0x2] %vm1112_vm11, %v1093_v51  ;;  %v1456_v58 = vpop.permute.xlu0 %1455 }
0x1609   : > { %1479 = vst.msk [vmem:[%s4344_s9 + $0x8] sm:$0x4] %vm1477_vm12, %v1456_v58  ;;  %3244 = vrot.lane.b32.xlu1 %v4236_v40, %s4270_s25 }
0x160a   : > { %2193 = vrot.lane.b32.xlu0 %v5922_v23, %s4271_s26 }
0x160b   : > { %v1097_v33 = vpop.permute.xlu1 %1096 }
0x160c   : > { %v4238_v25 = vpop.eup %4237  ;;  %1117 = vst.msk [vmem:[%s4344_s9 + $0x20] sm:$0x2] %vm1112_vm11, %v1097_v33  ;;  %v1460_v34 = vpop.permute.xlu0 %1459 }
0x160d   : > { %1481 = vst.msk [vmem:[%s4344_s9 + $0x18] sm:$0x4] %vm1477_vm12, %v1460_v34  ;;  %3248 = vrot.lane.b32.xlu1 %v4238_v25, %s4270_s25 }
0x160e   : > { %2197 = vrot.lane.b32.xlu0 %v5167_v41, %s4271_s26  ;;  %v5925_v41 = vld [vmem:[#allocation17_spill] sm:$0xff] }
0x160f   : > { %v1101_v19 = vpop.permute.xlu1 %1100 }
0x1610   : > { %1119 = vst.msk [vmem:[%s4344_s9 + $0x30] sm:$0x2] %vm1112_vm11, %v1101_v19  ;;  %v1464_v59 = vpop.permute.xlu0 %1463 }
0x1611   : > { %1483 = vst.msk [vmem:[%s4344_s9 + $0x28] sm:$0x4] %vm1477_vm12, %v1464_v59  ;;  %2187 = vrot.lane.b32.xlu1 %v5923_v35, %s4271_s26 }
0x1612   : > { %2550 = vrot.lane.b32.xlu0 %v5924_v56, %s4271_s26 }
0x1613   : > { %v1454_v43 = vpop.permute.xlu1 %1453 }
0x1614   : > { %1478 = vst.msk [vmem:[%s4344_s9] sm:$0x4] %vm1477_vm12, %v1454_v43  ;;  %v1468_v48 = vpop.permute.xlu0 %1467 }
0x1615   : > { %1485 = vst.msk [vmem:[%s4344_s9 + $0x38] sm:$0x4] %vm1477_vm12, %v1468_v48  ;;  %2191 = vrot.lane.b32.xlu1 %v5925_v41, %s4271_s26 }
0x1616   : > { %2554 = vrot.lane.b32.xlu0 %v5926_v45, %s4271_s26 }
0x1617   : > { %v1458_v52 = vpop.permute.xlu1 %1457 }
0x1618   : > { %1480 = vst.msk [vmem:[%s4344_s9 + $0x10] sm:$0x4] %vm1477_vm12, %v1458_v52  ;;  %v1821_v28 = vpop.permute.xlu0 %1820 }
0x1619   : > { %1844 = vst.msk [vmem:[%s4344_s9 + $0x8] sm:$0x8] %vm1842_vm13, %v1821_v28  ;;  %2195 = vrot.lane.b32.xlu1 %v5927_v11, %s4271_s26 }
0x161a   : > { %2558 = vrot.lane.b32.xlu0 %v5928_v16, %s4271_s26 }
0x161b   : > { %v1462_v62 = vpop.permute.xlu1 %1461 }
0x161c   : > { %1482 = vst.msk [vmem:[%s4344_s9 + $0x20] sm:$0x4] %vm1477_vm12, %v1462_v62  ;;  %v1825_v47 = vpop.permute.xlu0 %1824 }
0x161d   : > { %1846 = vst.msk [vmem:[%s4344_s9 + $0x18] sm:$0x8] %vm1842_vm13, %v1825_v47  ;;  %2548 = vrot.lane.b32.xlu1 %v5929_v7, %s4271_s26 }
0x161e   : > { %2562 = vrot.lane.b32.xlu0 %v5930_v0, %s4271_s26 }
0x161f   : > { %v1466_v3 = vpop.permute.xlu1 %1465 }
0x1620   : > { %1484 = vst.msk [vmem:[%s4344_s9 + $0x30] sm:$0x4] %vm1477_vm12, %v1466_v3  ;;  %v1829_v29 = vpop.permute.xlu0 %1828 }
0x1621   : > { %1848 = vst.msk [vmem:[%s4344_s9 + $0x28] sm:$0x8] %vm1842_vm13, %v1829_v29  ;;  %2552 = vrot.lane.b32.xlu1 %v5931_v15, %s4271_s26 }
0x1622   : > { %2915 = vrot.lane.b32.xlu0 %v5932_v13, %s4271_s26 }
0x1623   : > { %v1819_v31 = vpop.permute.xlu1 %1818 }
0x1624   : > { %1843 = vst.msk [vmem:[%s4344_s9] sm:$0x8] %vm1842_vm13, %v1819_v31  ;;  %v1833_v60 = vpop.permute.xlu0 %1832 }
0x1625   : > { %1850 = vst.msk [vmem:[%s4344_s9 + $0x38] sm:$0x8] %vm1842_vm13, %v1833_v60  ;;  %2556 = vrot.lane.b32.xlu1 %v5933_v39, %s4271_s26 }
0x1626   : > { %2919 = vrot.lane.b32.xlu0 %v5934_v17, %s4271_s26 }
0x1627   : > { %v1823_v37 = vpop.permute.xlu1 %1822 }
0x1628   : > { %1845 = vst.msk [vmem:[%s4344_s9 + $0x10] sm:$0x8] %vm1842_vm13, %v1823_v37  ;;  %v2186_v63 = vpop.permute.xlu0 %2185 }
0x1629   : > { %2209 = vst.msk [vmem:[%s4344_s9 + $0x8] sm:$0x10] %vm2207_vm14, %v2186_v63  ;;  %2560 = vrot.lane.b32.xlu1 %v5935_v6, %s4271_s26 }
0x162a   : > { %2923 = vrot.lane.b32.xlu0 %v5456_v54, %s4271_s26  ;;  %v5938_v54 = vld [vmem:[#allocation31_spill] sm:$0xff] }
0x162b   : > { %v1827_v5 = vpop.permute.xlu1 %1826 }
0x162c   : > { %1847 = vst.msk [vmem:[%s4344_s9 + $0x20] sm:$0x8] %vm1842_vm13, %v1827_v5 }
0x162d   : > { %2913 = vrot.lane.b32.xlu1 %v5936_v10, %s4271_s26 }
0x162e   : > { %2927 = vrot.lane.b32.xlu0 %v5460_v18, %s4271_s26 }
0x162f   : > { %v1831_v30 = vpop.permute.xlu1 %1830 }
0x1630   : > { %1849 = vst.msk [vmem:[%s4344_s9 + $0x30] sm:$0x8] %vm1842_vm13, %v1831_v30 }
0x1631   : > { %2917 = vrot.lane.b32.xlu1 %v5937_v36, %s4271_s26 }
0x1633   : > { %v2184_v12 = vpop.permute.xlu1 %2183 }
0x1634   : > { %2208 = vst.msk [vmem:[%s4344_s9] sm:$0x10] %vm2207_vm14, %v2184_v12 }
0x1635   : > { %2921 = vrot.lane.b32.xlu1 %v5938_v54, %s4271_s26 }
0x1639   : > { %2925 = vrot.lane.b32.xlu1 %v5468_v57, %s4271_s26 }
0x1668   : > { %v3243_v4 = vpop.permute.xlu0 %3242 }
0x1669   : > { %v3264_v32 = vmul.f32 %v5510_v38, %v3243_v4 }
0x166b   : > { %v3312_v51 = vrot.slane %v3264_v32, 6 }
0x166c   : > { %v3247_v8 = vpop.permute.xlu0 %3246 }
0x166d   : > { %v3266_v40 = vmul.f32 %v5514_v27, %v3247_v8 }
0x166f   : > { %v3316_v33 = vrot.slane %v3266_v40, 4 }
0x1670   : > { %v2190_v14 = vpop.permute.xlu0 %2189 }
0x1671   : > { %2211 = vst.msk [vmem:[%s4344_s9 + $0x18] sm:$0x10] %vm2207_vm14, %v2190_v14 }
0x1673   : > { %v3253_v18 = vpop.permute.xlu1 %3252 }
0x1674   : > { %v3269_v22 = vmul.f32 %v5521_v61, %v3253_v18  ;;  %v3251_v53 = vpop.permute.xlu0 %3250 }
0x1675   : > { %v3268_v27 = vmul.f32 %v5518_v26, %v3251_v53 }
0x1676   : > { %3292 = vrot.lane.b32.xlu0 %v3269_v22, %s4271_s26  ;;  %v3322_v43 = vrot.slane %v3269_v22, 1 }
0x1677   : > { %v3241_v44 = vpop.permute.xlu1 %3240  ;;  %v3320_v26 = vrot.slane %v3268_v27, 2 }
0x1678   : > { %v3263_v55 = vmul.f32 %v5529_v20, %v3241_v44  ;;  %v3239_v9 = vpop.permute.xlu0 %3238 }
0x1679   : > { %v3262_v57 = vmul.f32 %v5524_v49, %v3239_v9 }
0x167a   : > { %3280 = vrot.lane.b32.xlu0 %v3263_v55, %s4271_s26  ;;  %v3311_v24 = vrot.slane %v3263_v55, 7 }
0x167b   : > { %3278 = vrot.lane.b32.xlu1 %v3262_v57, %s4271_s26  ;;  %v3245_v1 = vpop.permute.xlu1 %3244 }
0x167c   : > { %v3265_v61 = vmul.f32 %v5538_v42, %v3245_v1  ;;  %v2194_v2 = vpop.permute.xlu0 %2193  ;;  %v3313_v38 = vsel %vm774_vm3, %v3312_v51, %v3311_v24 }
0x167d   : > { %2213 = vst.msk [vmem:[%s4344_s9 + $0x28] sm:$0x10] %vm2207_vm14, %v2194_v2 }
0x167e   : > { %v3314_v20 = vrot.slane %v3265_v61, 5  ;;  %3284 = vrot.lane.b32.xlu0 %v3265_v61, %s4271_s26 }
0x167f   : > { %3282 = vrot.lane.b32.xlu1 %v3264_v32, %s4271_s26  ;;  %v3249_v49 = vpop.permute.xlu1 %3248 }
0x1680   : > { %v3315_v58 = vsel %vm777_vm4, %v3314_v20, %v3313_v38  ;;  %v3267_v42 = vmul.f32 %v5548_v50, %v3249_v49  ;;  %v2198_v23 = vpop.permute.xlu0 %2197 }
0x1681   : > { %2215 = vst.msk [vmem:[%s4344_s9 + $0x38] sm:$0x10] %vm2207_vm14, %v2198_v23  ;;  %v3317_v34 = vsel %vm780_vm5, %v3316_v33, %v3315_v58 }
0x1682   : > { %v3318_v25 = vrot.slane %v3267_v42, 3  ;;  %3288 = vrot.lane.b32.xlu0 %v3267_v42, %s4271_s26 }
0x1683   : > { %3286 = vrot.lane.b32.xlu1 %v3266_v40, %s4271_s26  ;;  %v2188_v19 = vpop.permute.xlu1 %2187 }
0x1684   : > { %v3319_v59 = vsel %vm783_vm6, %v3318_v25, %v3317_v34  ;;  %2210 = vst.msk [vmem:[%s4344_s9 + $0x10] sm:$0x10] %vm2207_vm14, %v2188_v19  ;;  %v2551_v50 = vpop.permute.xlu0 %2550 }
0x1685   : > { %2574 = vst.msk [vmem:[%s4344_s9 + $0x8] sm:$0x20] %vm2572_vm15, %v2551_v50  ;;  %v3321_v56 = vsel %vm786_vm7, %v3320_v26, %v3319_v59 }
0x1686   : > { %3351 = vrot.lane.b32.xlu0 %v5623_v46, %s4272_s10  ;;  %v3323_v41 = vsel %vm789_vm8, %v3322_v43, %v3321_v56 }
0x1687   : > { %3290 = vrot.lane.b32.xlu1 %v3268_v27, %s4271_s26  ;;  %v2192_v35 = vpop.permute.xlu1 %2191 }
0x1688   : > { %2212 = vst.msk [vmem:[%s4344_s9 + $0x20] sm:$0x10] %vm2207_vm14, %v2192_v35  ;;  %v2555_v48 = vpop.permute.xlu0 %2554 }
0x1689   : > { %2576 = vst.msk [vmem:[%s4344_s9 + $0x18] sm:$0x20] %vm2572_vm15, %v2555_v48 }
0x168b   : > { %3324 = vrot.lane.b32.xlu1 %v3323_v41, %s4271_s26  ;;  %v2196_v46 = vpop.permute.xlu1 %2195 }
0x168c   : > { %2214 = vst.msk [vmem:[%s4344_s9 + $0x30] sm:$0x10] %vm2207_vm14, %v2196_v46  ;;  %v2559_v45 = vpop.permute.xlu0 %2558 }
0x168d   : > { %2578 = vst.msk [vmem:[%s4344_s9 + $0x28] sm:$0x20] %vm2572_vm15, %v2559_v45 }
0x168f   : > { %3353 = vrot.lane.b32.xlu1 %v5653_v21, %s4272_s10  ;;  %v2549_v52 = vpop.permute.xlu1 %2548 }
0x1690   : > { %2573 = vst.msk [vmem:[%s4344_s9] sm:$0x20] %vm2572_vm15, %v2549_v52  ;;  %v2563_v28 = vpop.permute.xlu0 %2562 }
0x1691   : > { %2580 = vst.msk [vmem:[%s4344_s9 + $0x38] sm:$0x20] %vm2572_vm15, %v2563_v28 }
0x1693   : > { %v2553_v11 = vpop.permute.xlu1 %2552 }
0x1694   : > { %2575 = vst.msk [vmem:[%s4344_s9 + $0x10] sm:$0x20] %vm2572_vm15, %v2553_v11  ;;  %v2916_v16 = vpop.permute.xlu0 %2915 }
0x1695   : > { %2939 = vst.msk [vmem:[%s4344_s9 + $0x8] sm:$0x40] %vm2937_vm0, %v2916_v16 }
0x1697   : > { %v2557_v62 = vpop.permute.xlu1 %2556 }
0x1698   : > { %2577 = vst.msk [vmem:[%s4344_s9 + $0x20] sm:$0x20] %vm2572_vm15, %v2557_v62  ;;  %v2920_v21 = vpop.permute.xlu0 %2919 }
0x1699   : > { %2941 = vst.msk [vmem:[%s4344_s9 + $0x18] sm:$0x40] %vm2937_vm0, %v2920_v21 }
0x169b   : > { %v2561_v47 = vpop.permute.xlu1 %2560 }
0x169c   : > { %2579 = vst.msk [vmem:[%s4344_s9 + $0x30] sm:$0x20] %vm2572_vm15, %v2561_v47  ;;  %v2924_v7 = vpop.permute.xlu0 %2923 }
0x169d   : > { %2943 = vst.msk [vmem:[%s4344_s9 + $0x28] sm:$0x40] %vm2937_vm0, %v2924_v7 }
0x169f   : > { %v2914_v0 = vpop.permute.xlu1 %2913 }
0x16a0   : > { %2938 = vst.msk [vmem:[%s4344_s9] sm:$0x40] %vm2937_vm0, %v2914_v0  ;;  %v2928_v3 = vpop.permute.xlu0 %2927 }
0x16a1   : > { %2945 = vst.msk [vmem:[%s4344_s9 + $0x38] sm:$0x40] %vm2937_vm0, %v2928_v3 }
0x16a3   : > { %v2918_v29 = vpop.permute.xlu1 %2917 }
0x16a4   : > { %2940 = vst.msk [vmem:[%s4344_s9 + $0x10] sm:$0x40] %vm2937_vm0, %v2918_v29 }
0x16a7   : > { %v2922_v15 = vpop.permute.xlu1 %2921 }
0x16a8   : > { %2942 = vst.msk [vmem:[%s4344_s9 + $0x20] sm:$0x40] %vm2937_vm0, %v2922_v15 }
0x16ab   : > { %v2926_v13 = vpop.permute.xlu1 %2925 }
0x16ac   : > { %2944 = vst.msk [vmem:[%s4344_s9 + $0x30] sm:$0x40] %vm2937_vm0, %v2926_v13 }
0x16e8   : > { %v3293_v31 = vpop.permute.xlu0 %3292 }
0x16e9   : > { %3310 = vst.msk [vmem:[%s4344_s9 + $0x38] sm:$0x80] %vm3302_vm1, %v3293_v31 }
0x16ec   : > { %v3281_v60 = vpop.permute.xlu0 %3280 }
0x16ed   : > { %v3279_v39 = vpop.permute.xlu1 %3278  ;;  %3304 = vst.msk [vmem:[%s4344_s9 + $0x8] sm:$0x80] %vm3302_vm1, %v3281_v60 }
0x16ee   : > { %3303 = vst.msk [vmem:[%s4344_s9] sm:$0x80] %vm3302_vm1, %v3279_v39  ;;  %3327 = vst.msk [vmem:[#allocation2 - $0x7] sm:$0x80] %vm3302_vm1, %v3279_v39 }
0x16f0   : > { %v3285_v17 = vpop.permute.xlu0 %3284  ;;  %v3423_v53 = vld [vmem:[%s4344_s9 + $0x38] sm:$0xff] (%p4329_p5) }
0x16f1   : > { %v3283_v37 = vpop.permute.xlu1 %3282  ;;  %3306 = vst.msk [vmem:[%s4344_s9 + $0x18] sm:$0x80] %vm3302_vm1, %v3285_v17  ;;  %3424 = vst [vmem:[%s3367_s14 + $0x70] sm:$0xff] (%p4329_p5), %v3423_v53 }
0x16f2   : > { %3305 = vst.msk [vmem:[%s4344_s9 + $0x10] sm:$0x80] %vm3302_vm1, %v3283_v37 }
0x16f4   : > { %v3289_v63 = vpop.permute.xlu0 %3288  ;;  %v3411_v54 = vld [vmem:[%s4344_s9 + $0x8] sm:$0xff] (%p4329_p5) }
0x16f5   : > { %v3287_v6 = vpop.permute.xlu1 %3286  ;;  %3308 = vst.msk [vmem:[%s4344_s9 + $0x28] sm:$0x80] %vm3302_vm1, %v3289_v63  ;;  %v3409_v12 = vld [vmem:[%s4344_s9] sm:$0xff] (%p4329_p5)  ;;  %3412 = vst [vmem:[%s3367_s14 + $0x10] sm:$0xff] (%p4329_p5), %v3411_v54 }
0x16f6   : > { %3307 = vst.msk [vmem:[%s4344_s9 + $0x20] sm:$0x80] %vm3302_vm1, %v3287_v6  ;;  %3410 = vst [vmem:[%s3367_s14] sm:$0xff] (%p4329_p5), %v3409_v12 }
0x16f8   : > { %v3352_v5 = vpop.permute.xlu0 %3351  ;;  %v3415_v8 = vld [vmem:[%s4344_s9 + $0x18] sm:$0xff] (%p4329_p5) }
0x16f9   : > { %v3291_v10 = vpop.permute.xlu1 %3290  ;;  %3357 = vst.msk [vmem:[#allocation3 - $0x7] sm:$0x80] %vm3302_vm1, %v3352_v5  ;;  %v3413_v4 = vld [vmem:[%s4344_s9 + $0x10] sm:$0xff] (%p4329_p5)  ;;  %3416 = vst [vmem:[%s3367_s14 + $0x30] sm:$0xff] (%p4329_p5), %v3415_v8 }
0x16fa   : > { %3309 = vst.msk [vmem:[%s4344_s9 + $0x30] sm:$0x80] %vm3302_vm1, %v3291_v10  ;;  %3414 = vst [vmem:[%s3367_s14 + $0x20] sm:$0xff] (%p4329_p5), %v3413_v4 }
0x16fc   : > { %3365 = sbr.rel (!%p4329_p5) target bundleno = 5891 (0x1703), region = 85  ;;  %v3419_v18 = vld [vmem:[%s4344_s9 + $0x28] sm:$0xff] (%p4329_p5) }
0x16fd   : > { %v3325_v30 = vpop.permute.xlu1 %3324  ;;  %v3417_v14 = vld [vmem:[%s4344_s9 + $0x20] sm:$0xff] (%p4329_p5)  ;;  %3420 = vst [vmem:[%s3367_s14 + $0x50] sm:$0xff] (%p4329_p5), %v3419_v18 }
0x16fe   : > { %3329 = vst.msk [vmem:[#allocation2 + $0x1] sm:$0x7f] %vm3328_vm2, %v3325_v30  ;;  %3418 = vst [vmem:[%s3367_s14 + $0x40] sm:$0xff] (%p4329_p5), %v3417_v14 }
0x1701   : > { %v3354_v36 = vpop.permute.xlu1 %3353  ;;  %v3421_v22 = vld [vmem:[%s4344_s9 + $0x30] sm:$0xff] (%p4329_p5) }
0x1702   : > { %3358 = vst.msk [vmem:[#allocation3 + $0x1] sm:$0x7f] %vm3328_vm2, %v3354_v36  ;;  %3422 = vst [vmem:[%s3367_s14 + $0x60] sm:$0xff] (%p4329_p5), %v3421_v22 }
0x1703 PF: > { %p11_p11 = scmp.ge.s32.totalorder %s4317_s19, 4   ;;  %s5939_s15 = smov %s4261_s16 }
0x1704   : > { %s5940_s16 = smov %s4327_s22  ;;  %s5941_s17 = smov %s4317_s19 }
0x1705   :  { %13 = sbr.rel (!%p11_p11) target bundleno = 2 (0x2), region = 154 }

// kernel: qa_forward.4
= control target key start
LH: loop header
LB: loop body
LE: loop exit
PB: predicated region body
PF: predicated region fallthrough
CT: control target
= control target key end

     0   :  { %vm22_vm0 = vcmask 261120   ;;  %v5495_v0 = vmov 0.0   ;;  %vm3840_vm1 = vmmov 0   ;;  %vm530_vm2 = vcmask 1041409   ;;  %s3843_s6 = smov 96   ;;  %s5490_s1 = inlined_call_operand.vmem [shape: bf16[32,128], index: 1, kind: input, shape index: {}]   ;;  %s5491_s2 = inlined_call_operand.vmem [shape: bf16[32,128], index: 2, kind: input, shape index: {}]   ;;  %s5492_s0 = inlined_call_operand.vmem [shape: bf16[8,8,32], index: 0, kind: input, shape index: {}]   ;;  %s5493_s3 = inlined_call_operand.vmem [shape: f32[1,128], index: 3, kind: input, shape index: {}]   ;;  %s5494_s4 = inlined_call_operand.vmem [shape: f32[8,8,32], index: 4, kind: output, shape index: {}]  }
   0x1   :  { %3246 = vmatprep.subr.bf16.mxu1 %v5495_v0  ;;  %v3315_v1 = vld [vmem:[%s5490_s1] sm:$0xff]   ;;  %3250 = vmatprep.mubr.msk.bf16.mxu1 %vm3840_vm1, %v5495_v0  ;;  %23 = vst.msk [vmem:[#allocation2] sm:$0xff] %vm22_vm0, %v5495_v0  ;;  %24 = vst.msk [vmem:[#allocation3] sm:$0xff] %vm22_vm0, %v5495_v0  ;;  %v3317_v3 = vld [vmem:[%s5490_s1 + $0x8] sm:$0xff]   ;;  %vm533_vm3 = vcmask 1042434   ;;  %vm536_vm4 = vcmask 1043459  }
   0x2   :  { %v3882_v2 = vld [vmem:[%s5491_s2] sm:$0xff]   ;;  %3234 = vmatprep.subr.bf16.mxu0 %v3315_v1  ;;  %v3891_v4 = vld [vmem:[%s5491_s2 + $0x8] sm:$0xff]   ;;  %v3321_v7 = vld [vmem:[%s5492_s0 + $0x10] sm:$0xff]   ;;  %vm539_vm5 = vcmask 1044484   ;;  %vm542_vm6 = vcmask 1045509   ;;  %vm545_vm7 = vcmask 1046534  }
   0x3   :  { %3247 = vmatpush3.bf16.msra.mxu1 %v3882_v2  ;;  %3235 = vmatpush3.bf16.msra.mxu0 %v3315_v1  ;;  %v3319_v5 = vld [vmem:[%s5492_s0] sm:$0xff]   ;;  %v3320_v6 = vld [vmem:[%s5492_s0 + $0x8] sm:$0xff]   ;;  %v3322_v10 = vld [vmem:[%s5492_s0 + $0x18] sm:$0xff]   ;;  %s3841_s0 = smov 32   ;;  %vm548_vm8 = vcmask 1047559   ;;  %vm496_vm9 = vcmask 253952  }
   0x4   :  { %3248 = vmatprep.subr.bf16.mxu1 %v5495_v0  ;;  %3236 = vmatprep.subr.bf16.mxu0 %v3317_v3  ;;  %v3119_v11 = vld [vmem:[%s5493_s3] ss:$0 sm:$0xff]  ;;  %s3842_s3 = smov 64   ;;  %vm868_vm10 = vcmask 254977   ;;  %vm1233_vm11 = vcmask 256002   ;;  %vm1598_vm12 = vcmask 257027  }
   0x5   :  { %3238 = vmatprep.mubr.msk.bf16.mxu0 %vm22_vm0, %v3319_v5  ;;  %vm1963_vm13 = vcmask 258052   ;;  %vm2328_vm14 = vcmask 259077   ;;  %vm2693_vm15 = vcmask 260102  }
   0x7   :  { %3249 = vmatpush3.bf16.msra.mxu1 %v3891_v4  ;;  %3237 = vmatpush3.bf16.msra.mxu0 %v3317_v3 }
   0x8   :  { %v158_v8 = vld [vmem:[#allocation2] sm:$0xff]  ;;  %3254 = vmatprep.subr.bf16.mxu1 %v5495_v0  ;;  %3262 = vmatprep.subr.bf16.mxu0 %v5495_v0  ;;  %v3958_v53 = vld [vmem:[#allocation3] sm:$0xff] }
   0x9   :  { %v160_v9 = vpack.c.bf16 %v158_v8, %v158_v8  ;;  %v297_v55 = vrot.slane %v3958_v53, 1  ;;  %v298_v57 = vrot.slane %v3958_v53, 2  ;;  %v299_v58 = vrot.slane %v3958_v53, 3 }
   0xa   :  { %3239 = vmatmul.mubr.msk.bf16.vlgmr.msra.gmra.mrb[0].mxu0 %vm22_vm0, %v3320_v6  ;;  %v302_v59 = vrot.slane %v3958_v53, 6  ;;  %v300_v60 = vrot.slane %v3958_v53, 4  ;;  %v301_v61 = vrot.slane %v3958_v53, 5 }
   0xb   :  { %3251 = vmatmul.mubr.msk.bf16.vlgmr.msra.gmra.mrb[0].mxu1 %vm22_vm0, %v160_v9  ;;  %3242 = vmatprep.mubr.msk.bf16.mxu0 %vm22_vm0, %v3321_v7 }
   0xc   :  { %3255 = vmatpush3.bf16.msra.mxu1 %v3882_v2  ;;  %3258 = vmatprep.mubr.msk.bf16.mxu1 %vm3840_vm1, %v5495_v0 }
   0xd   :  { %3256 = vmatprep.subr.bf16.mxu1 %v5495_v0  ;;  %3263 = vmatpush3.bf16.msra.mxu0 %v3882_v2 }
   0xe   :  { %3264 = vmatprep.subr.bf16.mxu0 %v5495_v0 }
  0x10   :  { %3257 = vmatpush3.bf16.msra.mxu1 %v3891_v4 }
  0x11   :  { %3270 = vmatprep.subr.bf16.mxu1 %v5495_v0  ;;  %3265 = vmatpush3.bf16.msra.mxu0 %v3891_v4 }
  0x12   :  { %3243 = vmatmul.mubr.msk.bf16.gmra.mrb[4].mxu0 %vm22_vm0, %v3322_v10  ;;  %3278 = vmatprep.subr.bf16.mxu0 %v5495_v0 }
  0x13   :  { %3266 = vmatprep.mubr.msk.bf16.mxu0 %vm3840_vm1, %v5495_v0 }
  0xdd   :  { %v3240_v13 = vpop.f32.mrb[0].mxu0 }
  0xde   :  { %v210_v12 = vpop.f32.mrb[0].mxu1  ;;  %v123_v15 = vpop.f32.mrb[1].mxu0  ;;  %v3929_v16 = vadd.f32 %v3240_v13, %v3119_v11 }
  0xdf   :  { %v3252_v14 = vpop.f32.mrb[1].mxu1  ;;  %v3931_v17 = vadd.f32 %v3119_v11, %v123_v15  ;;  %v3241_v19 = vpop.f32.mrb[2].mxu0  ;;  %v218_v22 = vrot.slane %v210_v12, 2  ;;  %v217_v23 = vrot.slane %v210_v12, 1  ;;  %v219_v29 = vrot.slane %v210_v12, 3 }
  0xe0   :  { %v213_v18 = vpop.f32.mrb[2].mxu1  ;;  %v126_v21 = vpop.f32.mrb[3].mxu0  ;;  %v3936_v26 = vadd.f32 %v3241_v19, %v3119_v11  ;;  %v220_v33 = vrot.slane %v210_v12, 4  ;;  %v221_v38 = vrot.slane %v210_v12, 5  ;;  %v222_v41 = vrot.slane %v210_v12, 6 }
  0xe1   :  { %v3253_v20 = vpop.f32.mrb[3].mxu1  ;;  %v3933_v24 = vadd.f32 %v3119_v11, %v126_v21  ;;  %v232_v25 = vadd.f32 %v210_v12, %v3931_v17  ;;  %v234_v27 = vadd.f32 %v218_v22, %v3929_v16  ;;  %v223_v47 = vrot.slane %v210_v12, 7 }
  0xe2   :  { %v235_v32 = vadd.f32 %v219_v29, %v3936_v26 }
  0xe3   :  { %3323 = vtanh.f32 %v232_v25  ;;  %v233_v28 = vadd.f32 %v217_v23, %v3933_v24  ;;  %v3135_v62 = vmul.f32 -1.442695, %v234_v27  ;;  %v3133_v63 = vmul.f32 -1.442695, %v232_v25 }
  0xe4   :  { %3325 = vtanh.f32 %v234_v27  ;;  %v3136_v1 = vmul.f32 -1.442695, %v235_v32 }
  0xe5   :  { %v3244_v30 = vpop.f32.mrb[4].mxu0  ;;  %3327 = vtanh.f32 %v233_v28  ;;  %v3134_v3 = vmul.f32 -1.442695, %v233_v28 }
  0xe6   :  { %v139_v31 = vpop.f32.mrb[5].mxu0  ;;  %v3943_v36 = vadd.f32 %v3244_v30, %v3119_v11  ;;  %3329 = vtanh.f32 %v235_v32 }
  0xe7   :  { %v3941_v34 = vadd.f32 %v3119_v11, %v139_v31  ;;  %v3245_v35 = vpop.f32.mrb[6].mxu0 }
  0xe8   :  { %v142_v37 = vpop.f32.mrb[7].mxu0  ;;  %v3949_v43 = vadd.f32 %v3245_v35, %v3119_v11  ;;  %v238_v44 = vadd.f32 %v222_v41, %v3943_v36 }
  0xe9   :  { %v3945_v39 = vadd.f32 %v3119_v11, %v142_v37  ;;  %v236_v40 = vadd.f32 %v220_v33, %v3941_v34 }
  0xea   :  { %v239_v48 = vadd.f32 %v223_v47, %v3949_v43  ;;  %v3139_v8 = vmul.f32 -1.442695, %v238_v44 }
  0xeb   :  { %3331 = vtanh.f32 %v236_v40  ;;  %v237_v42 = vadd.f32 %v221_v38, %v3945_v39  ;;  %v3137_v5 = vmul.f32 -1.442695, %v236_v40 }
  0xec   :  { %v3140_v11 = vmul.f32 -1.442695, %v239_v48 }
  0xed   :  { %v3324_v45 = vpop.eup %3323  ;;  %3333 = vtanh.f32 %v237_v42  ;;  %v3138_v7 = vmul.f32 -1.442695, %v237_v42 }
  0xee   :  { %v3326_v46 = vpop.eup %3325  ;;  %344 = vrot.lane.b32.xlu1 %v3324_v45, %s3841_s0  ;;  %3335 = vtanh.f32 %v238_v44 }
  0xef   :  { %348 = vrot.lane.b32.xlu0 %v3326_v46, %s3841_s0  ;;  %v3328_v49 = vpop.eup %3327  ;;  %3337 = vtanh.f32 %v239_v48 }
  0xf0   :  { %v3330_v50 = vpop.eup %3329  ;;  %3339 = vpow2.f32 %v3135_v62 }
  0xf1   :  { %3341 = vpow2.f32 %v3133_v63 }
  0xf2   :  { %350 = vrot.lane.b32.xlu1 %v3330_v50, %s3841_s0  ;;  %3343 = vpow2.f32 %v3136_v1 }
  0xf3   :  { %346 = vrot.lane.b32.xlu0 %v3328_v49, %s3841_s0  ;;  %3345 = vpow2.f32 %v3134_v3  ;;  %v303_v49 = vrot.slane %v3958_v53, 7 }
  0xf4   :  { %3347 = vpow2.f32 %v3137_v5 }
  0xf5   :  { %v3332_v51 = vpop.eup %3331  ;;  %3349 = vpow2.f32 %v3138_v7 }
  0xf6   :  { %3351 = vpow2.f32 %v3139_v8 }
  0xf7   :  { %352 = vrot.lane.b32.xlu0 %v3332_v51, %s3841_s0  ;;  %v3334_v52 = vpop.eup %3333 }
  0xf8   :  { %354 = vrot.lane.b32.xlu1 %v3334_v52, %s3841_s0  ;;  %v3336_v54 = vpop.eup %3335 }
  0xf9   :  { %v3338_v56 = vpop.eup %3337 }
  0xfa   :  { %v3340_v6 = vpop.eup %3339 }
  0xfb   :  { %356 = vrot.lane.b32.xlu0 %v3336_v54, %s3841_s0  ;;  %v266_v9 = vadd.f32 1.0, %v3340_v6  ;;  %v3342_v10 = vpop.eup %3341 }
  0xfc   :  { %358 = vrot.lane.b32.xlu1 %v3338_v56, %s3841_s0  ;;  %v3344_v12 = vpop.eup %3343  ;;  %v264_v14 = vadd.f32 1.0, %v3342_v10 }
  0xfd   :  { %v3346_v13 = vpop.eup %3345  ;;  %3353 = vrcp.f32 %v266_v9  ;;  %v267_v18 = vadd.f32 1.0, %v3344_v12 }
  0xfe   :  { %v3348_v15 = vpop.eup %3347  ;;  %3355 = vpow2.f32 %v3140_v11  ;;  %v265_v19 = vadd.f32 1.0, %v3346_v13 }
  0xff   :  { %306 = vrot.lane.b32.xlu0 %v297_v55, %s3841_s0  ;;  %3357 = vrcp.f32 %v264_v14  ;;  %v268_v20 = vadd.f32 1.0, %v3348_v15  ;;  %v3350_v21 = vpop.eup %3349 }
 0x100   :  { %308 = vrot.lane.b32.xlu1 %v298_v57, %s3841_s0  ;;  %3359 = vrcp.f32 %v267_v18  ;;  %v3352_v22 = vpop.eup %3351  ;;  %v269_v28 = vadd.f32 1.0, %v3350_v21 }
 0x101   :  { %3361 = vrcp.f32 %v265_v19  ;;  %v270_v31 = vadd.f32 1.0, %v3352_v22 }
 0x102   :  { %3363 = vrcp.f32 %v268_v20 }
 0x103   :  { %304 = vrot.lane.b32.xlu0 %v3958_v53, %s3841_s0  ;;  %3365 = vrcp.f32 %v269_v28 }
 0x104   :  { %310 = vrot.lane.b32.xlu1 %v299_v58, %s3841_s0  ;;  %3367 = vrcp.f32 %v270_v31 }
 0x107   :  { %316 = vrot.lane.b32.xlu0 %v302_v59, %s3841_s0  ;;  %v3977_v23 = vpop.eup %3353 }
 0x108   :  { %312 = vrot.lane.b32.xlu1 %v300_v60, %s3841_s0  ;;  %v3356_v29 = vpop.eup %3355 }
 0x109   :  { %v3981_v32 = vpop.eup %3357  ;;  %v271_v35 = vadd.f32 1.0, %v3356_v29 }
 0x10a   :  { %v3984_v38 = vpop.eup %3359 }
 0x10b   :  { %v3986_v41 = vpop.eup %3361  ;;  %3369 = vrcp.f32 %v271_v35 }
 0x10c   :  { %314 = vrot.lane.b32.xlu1 %v301_v61, %s3841_s0  ;;  %v3990_v44 = vpop.eup %3363 }
 0x10d   :  { %v3998_v50 = vpop.eup %3365 }
 0x10e   :  { %v4002_v54 = vpop.eup %3367 }
 0x115   :  { %v4006_v57 = vpop.eup %3369 }
 0x160   :  { %v345_v27 = vpop.permute.xlu1 %344 }
 0x161   :  { %v349_v25 = vpop.permute.xlu0 %348  ;;  %v368_v37 = vmul.f32 %v3981_v32, %v345_v27 }
 0x162   :  { %v370_v30 = vmul.f32 %v3977_v23, %v349_v25 }
 0x164   :  { %388 = vrot.lane.b32.xlu0 %v370_v30, %s3841_s0  ;;  %v351_v40 = vpop.permute.xlu1 %350 }
 0x165   :  { %v347_v33 = vpop.permute.xlu0 %346  ;;  %v371_v42 = vmul.f32 %v3984_v38, %v351_v40 }
 0x166   :  { %v369_v46 = vmul.f32 %v3986_v41, %v347_v33 }
 0x167   :  { %390 = vrot.lane.b32.xlu1 %v371_v42, %s3841_s0 }
 0x168   :  { %384 = vrot.lane.b32.xlu0 %v368_v37, %s3841_s0 }
 0x169   :  { %v353_v45 = vpop.permute.xlu0 %352 }
 0x16a   :  { %v372_v47 = vmul.f32 %v3990_v44, %v353_v45  ;;  %v355_v48 = vpop.permute.xlu1 %354 }
 0x16b   :  { %v373_v52 = vmul.f32 %v3998_v50, %v355_v48 }
 0x16c   :  { %386 = vrot.lane.b32.xlu0 %v369_v46, %s3841_s0  ;;  %392 = vrot.lane.b32.xlu1 %v372_v47, %s3841_s0 }
 0x16d   :  { %v357_v51 = vpop.permute.xlu0 %356 }
 0x16e   :  { %v359_v55 = vpop.permute.xlu1 %358  ;;  %v374_v56 = vmul.f32 %v4002_v54, %v357_v51 }
 0x16f   :  { %v375_v53 = vmul.f32 %v4006_v57, %v359_v55 }
 0x170   :  { %318 = vrot.lane.b32.xlu0 %v303_v49, %s3841_s0  ;;  %394 = vrot.lane.b32.xlu1 %v373_v52, %s3841_s0 }
 0x171   :  { %v307_v58 = vpop.permute.xlu0 %306 }
 0x172   :  { %v309_v59 = vpop.permute.xlu1 %308  ;;  %v329_v12 = vmul.f32 %v3986_v41, %v307_v58 }
 0x173   :  { %v330_v1 = vmul.f32 %v3977_v23, %v309_v59 }
 0x174   :  { %396 = vrot.lane.b32.xlu0 %v374_v56, %s3841_s0  ;;  %398 = vrot.lane.b32.xlu1 %v375_v53, %s3841_s0 }
 0x175   :  { %v305_v60 = vpop.permute.xlu0 %304 }
 0x176   :  { %v311_v61 = vpop.permute.xlu1 %310  ;;  %v328_v7 = vmul.f32 %v3981_v32, %v305_v60 }
 0x177   :  { %v331_v9 = vmul.f32 %v3984_v38, %v311_v61 }
 0x179   :  { %v317_v62 = vpop.permute.xlu0 %316 }
 0x17a   :  { %v313_v63 = vpop.permute.xlu1 %312  ;;  %v334_v28 = vmul.f32 %v4002_v54, %v317_v62 }
 0x17b   :  { %v332_v15 = vmul.f32 %v3990_v44, %v313_v63 }
 0x17e   :  { %v315_v6 = vpop.permute.xlu1 %314 }
 0x17f   :  { %v333_v25 = vmul.f32 %v3998_v50, %v315_v6 }
 0x1d6   :  { %v389_v3 = vpop.permute.xlu0 %388 }
 0x1d7   :  { %v4012_v5 = vadd.f32 %v389_v3, %v330_v1 }
 0x1d9   :  { %3371 = vtanh.f32 %v4012_v5  ;;  %v391_v11 = vpop.permute.xlu1 %390 }
 0x1da   :  { %v385_v8 = vpop.permute.xlu0 %384  ;;  %v4021_v13 = vadd.f32 %v391_v11, %v331_v9 }
 0x1db   :  { %v4017_v10 = vadd.f32 %v385_v8, %v328_v7 }
 0x1dd   :  { %3373 = vtanh.f32 %v4017_v10 }
 0x1de   :  { %v387_v14 = vpop.permute.xlu0 %386  ;;  %3375 = vtanh.f32 %v4021_v13  ;;  %v393_v19 = vpop.permute.xlu1 %392 }
 0x1df   :  { %v4025_v18 = vadd.f32 %v387_v14, %v329_v12  ;;  %v4028_v20 = vadd.f32 %v393_v19, %v332_v15 }
 0x1e1   :  { %3377 = vtanh.f32 %v4025_v18 }
 0x1e2   :  { %v319_v21 = vpop.permute.xlu0 %318  ;;  %v395_v27 = vpop.permute.xlu1 %394  ;;  %3379 = vtanh.f32 %v4028_v20 }
 0x1e3   :  { %v3372_v22 = vpop.eup %3371  ;;  %v4034_v29 = vadd.f32 %v395_v27, %v333_v25  ;;  %v335_v33 = vmul.f32 %v4006_v57, %v319_v21 }
 0x1e4   :  { %436 = vrot.lane.b32.xlu1 %v3372_v22, %s3841_s0 }
 0x1e5   :  { %3381 = vtanh.f32 %v4034_v29 }
 0x1e6   :  { %v397_v30 = vpop.permute.xlu0 %396  ;;  %v399_v37 = vpop.permute.xlu1 %398 }
 0x1e7   :  { %v3374_v31 = vpop.eup %3373  ;;  %v4038_v35 = vadd.f32 %v397_v30, %v334_v28  ;;  %v4042_v42 = vadd.f32 %v399_v37, %v335_v33 }
 0x1e8   :  { %432 = vrot.lane.b32.xlu0 %v3374_v31, %s3841_s0  ;;  %v3376_v40 = vpop.eup %3375 }
 0x1e9   :  { %3383 = vtanh.f32 %v4038_v35  ;;  %438 = vrot.lane.b32.xlu1 %v3376_v40, %s3841_s0 }
 0x1ea   :  { %3385 = vtanh.f32 %v4042_v42 }
 0x1eb   :  { %v3378_v45 = vpop.eup %3377 }
 0x1ec   :  { %434 = vrot.lane.b32.xlu0 %v3378_v45, %s3841_s0  ;;  %v3380_v46 = vpop.eup %3379 }
 0x1ef   :  { %v3382_v47 = vpop.eup %3381 }
 0x1f0   :  { %440 = vrot.lane.b32.xlu0 %v3380_v46, %s3841_s0  ;;  %442 = vrot.lane.b32.xlu1 %v3382_v47, %s3841_s0 }
 0x1f3   :  { %v3384_v48 = vpop.eup %3383 }
 0x1f4   :  { %444 = vrot.lane.b32.xlu0 %v3384_v48, %s3841_s0  ;;  %v3386_v49 = vpop.eup %3385 }
 0x1f5   :  { %446 = vrot.lane.b32.xlu1 %v3386_v49, %s3841_s0 }
 0x256   :  { %v437_v51 = vpop.permute.xlu1 %436 }
 0x257   :  { %v4052_v52 = vmul.f32 %v3977_v23, %v437_v51 }
 0x259   :  { %v507_v59 = vpack.c.bf16 %v4052_v52, %v4052_v52 }
 0x25a   :  { %v433_v55 = vpop.permute.xlu0 %432 }
 0x25b   :  { %v439_v56 = vpop.permute.xlu1 %438  ;;  %v4055_v53 = vmul.f32 %v3981_v32, %v433_v55  ;;  %v523_v63 = vunpack.c.l.b16 %v507_v59 }
 0x25c   :  { %v4058_v58 = vmul.f32 %v3984_v38, %v439_v56 }
 0x25d   :  { %v505_v23 = vpack.c.bf16 %v4055_v53, %v4055_v53  ;;  %v532_v12 = vrot.slane %v523_v63, 6 }
 0x25e   :  { %v435_v60 = vpop.permute.xlu0 %434  ;;  %v508_v61 = vpack.c.bf16 %v4058_v58, %v4058_v58 }
 0x25f   :  { %v4065_v62 = vmul.f32 %v3986_v41, %v435_v60  ;;  %v521_v8 = vunpack.c.l.b16 %v505_v23 }
 0x260   :  { %v524_v1 = vunpack.c.l.b16 %v508_v61 }
 0x261   :  { %v506_v32 = vpack.c.bf16 %v4065_v62, %v4065_v62 }
 0x262   :  { %v441_v38 = vpop.permute.xlu0 %440  ;;  %v443_v7 = vpop.permute.xlu1 %442  ;;  %v535_v14 = vrot.slane %v524_v1, 5 }
 0x263   :  { %v522_v3 = vunpack.c.l.b16 %v506_v32  ;;  %v4072_v6 = vmul.f32 %v3990_v44, %v441_v38  ;;  %v4077_v11 = vmul.f32 %v3998_v50, %v443_v7 }
 0x265   :  { %v529_v9 = vrot.slane %v522_v3, 7  ;;  %v509_v41 = vpack.c.bf16 %v4072_v6, %v4072_v6  ;;  %v510_v44 = vpack.c.bf16 %v4077_v11, %v4077_v11 }
 0x266   :  { %v445_v15 = vpop.permute.xlu0 %444 }
 0x267   :  { %v531_v19 = vsel %vm530_vm2, %v529_v9, %v521_v8  ;;  %v525_v21 = vunpack.c.l.b16 %v509_v41  ;;  %v4083_v22 = vmul.f32 %v4002_v54, %v445_v15  ;;  %v447_v27 = vpop.permute.xlu1 %446  ;;  %v526_v30 = vunpack.c.l.b16 %v510_v44 }
 0x268   :  { %v534_v25 = vsel %vm533_vm3, %v532_v12, %v531_v19  ;;  %v4090_v33 = vmul.f32 %v4006_v57, %v447_v27 }
 0x269   :  { %v537_v50 = vsel %vm536_vm4, %v535_v14, %v534_v25  ;;  %v538_v28 = vrot.slane %v525_v21, 4  ;;  %v511_v31 = vpack.c.bf16 %v4083_v22, %v4083_v22  ;;  %v541_v40 = vrot.slane %v526_v30, 3 }
 0x26a   :  { %v512_v54 = vpack.c.bf16 %v4090_v33, %v4090_v33 }
 0x26b   :  { %v540_v37 = vsel %vm539_vm5, %v538_v28, %v537_v50  ;;  %v527_v45 = vunpack.c.l.b16 %v511_v31 }
 0x26c   :  { %v528_v47 = vunpack.c.l.b16 %v512_v54  ;;  %v543_v48 = vsel %vm542_vm6, %v541_v40, %v540_v37 }
 0x26d   :  { %v544_v46 = vrot.slane %v527_v45, 2 }
 0x26e   :  { %v547_v51 = vrot.slane %v528_v47, 1 }
 0x26f   :  { %v546_v49 = vsel %vm545_vm7, %v544_v46, %v543_v48 }
 0x270   :  { %v549_v57 = vsel %vm548_vm8, %v547_v51, %v546_v49 }
 0x271   :  { %v550_v55 = vpack.c.b16 %v549_v57, %v549_v57 }
 0x273   :  { %551 = vrot.lane.b32.xlu0 %v550_v55, %s3842_s3 }
 0x2e5   :  { %v552_v56 = vpop.permute.xlu0 %551 }
 0x2e6   :  { %3259 = vmatmul.mubr.msk.bf16.vlgmr.msra.gmra.mrb[4].mxu1 %vm22_vm0, %v552_v56 }
 0x2e7   :  { %3271 = vmatpush3.bf16.msra.mxu1 %v3882_v2  ;;  %3274 = vmatprep.mubr.msk.bf16.mxu1 %vm3840_vm1, %v5495_v0 }
 0x2e8   :  { %3272 = vmatprep.subr.bf16.mxu1 %v5495_v0 }
 0x2eb   :  { %3273 = vmatpush3.bf16.msra.mxu1 %v3891_v4 }
 0x2ec   :  { %3286 = vmatprep.subr.bf16.mxu1 %v5495_v0 }
 0x3b9   :  { %v590_v59 = vpop.f32.mrb[4].mxu1 }
 0x3ba   :  { %v3260_v60 = vpop.f32.mrb[5].mxu1  ;;  %v598_v32 = vrot.slane %v590_v59, 1  ;;  %v597_v63 = vrot.slane %v590_v59, 7  ;;  %v613_v1 = vadd.f32 %v590_v59, %v3933_v24  ;;  %v599_v38 = vrot.slane %v590_v59, 2 }
 0x3bb   :  { %v593_v61 = vpop.f32.mrb[6].mxu1  ;;  %v600_v3 = vrot.slane %v590_v59, 3  ;;  %v601_v8 = vrot.slane %v590_v59, 4  ;;  %v602_v9 = vrot.slane %v590_v59, 5  ;;  %v603_v12 = vrot.slane %v590_v59, 6 }
 0x3bc   :  { %v3261_v23 = vpop.f32.mrb[7].mxu1  ;;  %v614_v2 = vadd.f32 %v598_v32, %v3929_v16  ;;  %v612_v7 = vadd.f32 %v597_v63, %v3931_v17  ;;  %3387 = vtanh.f32 %v613_v1  ;;  %v615_v4 = vadd.f32 %v599_v38, %v3936_v26 }
 0x3bd   :  { %v616_v41 = vadd.f32 %v600_v3, %v3941_v34  ;;  %v617_v14 = vadd.f32 %v601_v8, %v3945_v39  ;;  %v618_v15 = vadd.f32 %v602_v9, %v3943_v36  ;;  %v619_v19 = vadd.f32 %v603_v12, %v3949_v43 }
 0x3be   :  { %3389 = vtanh.f32 %v614_v2  ;;  %v3143_v37 = vmul.f32 -1.442695, %v613_v1  ;;  %v3144_v40 = vmul.f32 -1.442695, %v614_v2  ;;  %v3142_v45 = vmul.f32 -1.442695, %v612_v7 }
 0x3bf   :  { %3391 = vtanh.f32 %v612_v7  ;;  %v3145_v54 = vmul.f32 -1.442695, %v615_v4  ;;  %v3146_v46 = vmul.f32 -1.442695, %v616_v41  ;;  %v3147_v47 = vmul.f32 -1.442695, %v617_v14 }
 0x3c0   :  { %3393 = vtanh.f32 %v615_v4  ;;  %v3148_v48 = vmul.f32 -1.442695, %v618_v15  ;;  %v3149_v49 = vmul.f32 -1.442695, %v619_v19 }
 0x3c1   :  { %3395 = vtanh.f32 %v616_v41 }
 0x3c2   :  { %3397 = vtanh.f32 %v617_v14 }
 0x3c3   :  { %3399 = vtanh.f32 %v618_v15 }
 0x3c4   :  { %3401 = vtanh.f32 %v619_v19 }
 0x3c5   :  { %3403 = vpow2.f32 %v3143_v37 }
 0x3c6   :  { %v3388_v21 = vpop.eup %3387  ;;  %3405 = vpow2.f32 %v3144_v40 }
 0x3c7   :  { %718 = vrot.lane.b32.xlu1 %v3388_v21, %s3841_s0  ;;  %3407 = vpow2.f32 %v3142_v45 }
 0x3c8   :  { %v3390_v44 = vpop.eup %3389  ;;  %3409 = vpow2.f32 %v3145_v54 }
 0x3c9   :  { %720 = vrot.lane.b32.xlu0 %v3390_v44, %s3841_s0  ;;  %v3392_v25 = vpop.eup %3391  ;;  %3411 = vpow2.f32 %v3146_v46 }
 0x3ca   :  { %v3394_v27 = vpop.eup %3393  ;;  %3413 = vpow2.f32 %v3147_v47 }
 0x3cb   :  { %716 = vrot.lane.b32.xlu1 %v3392_v25, %s3841_s0  ;;  %v3396_v50 = vpop.eup %3395  ;;  %3415 = vpow2.f32 %v3148_v48 }
 0x3cc   :  { %v3398_v28 = vpop.eup %3397  ;;  %3417 = vpow2.f32 %v3149_v49 }
 0x3cd   :  { %722 = vrot.lane.b32.xlu0 %v3394_v27, %s3841_s0  ;;  %v3400_v30 = vpop.eup %3399 }
 0x3ce   :  { %v3402_v31 = vpop.eup %3401 }
 0x3cf   :  { %724 = vrot.lane.b32.xlu1 %v3396_v50, %s3841_s0  ;;  %v3404_v51 = vpop.eup %3403 }
 0x3d0   :  { %v3406_v57 = vpop.eup %3405  ;;  %v645_v55 = vadd.f32 1.0, %v3404_v51 }
 0x3d1   :  { %726 = vrot.lane.b32.xlu0 %v3398_v28, %s3841_s0  ;;  %v3408_v56 = vpop.eup %3407  ;;  %v646_v59 = vadd.f32 1.0, %v3406_v57  ;;  %v685_v57 = vrot.slane %v4025_v18, 7 }
 0x3d2   :  { %v3410_v60 = vpop.eup %3409  ;;  %3419 = vrcp.f32 %v645_v55  ;;  %v644_v61 = vadd.f32 1.0, %v3408_v56  ;;  %v686_v55 = vrot.slane %v4012_v5, 7 }
 0x3d3   :  { %728 = vrot.lane.b32.xlu1 %v3400_v30, %s3841_s0  ;;  %v3412_v23 = vpop.eup %3411  ;;  %3421 = vrcp.f32 %v646_v59  ;;  %v647_v32 = vadd.f32 1.0, %v3410_v60 }
 0x3d4   :  { %v3414_v63 = vpop.eup %3413  ;;  %3423 = vrcp.f32 %v644_v61  ;;  %v648_v1 = vadd.f32 1.0, %v3412_v23  ;;  %v684_v61 = vrot.slane %v4017_v10, 7 }
 0x3d5   :  { %730 = vrot.lane.b32.xlu0 %v3402_v31, %s3841_s0  ;;  %v3416_v38 = vpop.eup %3415  ;;  %3425 = vrcp.f32 %v647_v32  ;;  %v649_v2 = vadd.f32 1.0, %v3414_v63  ;;  %v687_v63 = vrot.slane %v4021_v13, 7 }
 0x3d6   :  { %v3418_v3 = vpop.eup %3417  ;;  %3427 = vrcp.f32 %v648_v1  ;;  %v650_v7 = vadd.f32 1.0, %v3416_v38 }
 0x3d7   :  { %3429 = vrcp.f32 %v649_v2  ;;  %v651_v8 = vadd.f32 1.0, %v3418_v3  ;;  %v688_v2 = vrot.slane %v4028_v20, 7 }
 0x3d8   :  { %3431 = vrcp.f32 %v650_v7  ;;  %v689_v7 = vrot.slane %v4034_v29, 7 }
 0x3d9   :  { %3433 = vrcp.f32 %v651_v8 }
 0x3dc   :  { %v4122_v4 = vpop.eup %3419 }
 0x3dd   :  { %v4124_v41 = vpop.eup %3421  ;;  %v701_v56 = vmul.f32 %v4122_v4, %v685_v57 }
 0x3de   :  { %v4129_v19 = vpop.eup %3423  ;;  %v702_v60 = vmul.f32 %v4124_v41, %v686_v55 }
 0x3df   :  { %v4132_v44 = vpop.eup %3425  ;;  %v700_v18 = vmul.f32 %v4129_v19, %v684_v61 }
 0x3e0   :  { %v4137_v28 = vpop.eup %3427  ;;  %v703_v38 = vmul.f32 %v4132_v44, %v687_v63 }
 0x3e1   :  { %v4140_v31 = vpop.eup %3429  ;;  %v704_v13 = vmul.f32 %v4137_v28, %v688_v2 }
 0x3e2   :  { %v4145_v54 = vpop.eup %3431 }
 0x3e3   :  { %v4148_v47 = vpop.eup %3433 }
 0x439   :  { %v719_v9 = vpop.permute.xlu1 %718 }
 0x43a   :  { %v741_v12 = vmul.f32 %v4122_v4, %v719_v9 }
 0x43b   :  { %v721_v14 = vpop.permute.xlu0 %720 }
 0x43c   :  { %v742_v15 = vmul.f32 %v4124_v41, %v721_v14  ;;  %758 = vrot.lane.b32.xlu1 %v741_v12, %s3841_s0  ;;  %v705_v12 = vmul.f32 %v4140_v31, %v689_v7  ;;  %v690_v14 = vrot.slane %v4038_v35, 7 }
 0x43d   :  { %v717_v21 = vpop.permute.xlu1 %716 }
 0x43e   :  { %760 = vrot.lane.b32.xlu0 %v742_v15, %s3841_s0  ;;  %v740_v25 = vmul.f32 %v4129_v19, %v717_v21  ;;  %v691_v21 = vrot.slane %v4042_v42, 7  ;;  %v706_v29 = vmul.f32 %v4145_v54, %v690_v14 }
 0x43f   :  { %v723_v27 = vpop.permute.xlu0 %722 }
 0x440   :  { %v743_v50 = vmul.f32 %v4132_v44, %v723_v27  ;;  %756 = vrot.lane.b32.xlu1 %v740_v25, %s3841_s0 }
 0x441   :  { %v725_v30 = vpop.permute.xlu1 %724 }
 0x442   :  { %762 = vrot.lane.b32.xlu0 %v743_v50, %s3841_s0  ;;  %v744_v37 = vmul.f32 %v4137_v28, %v725_v30  ;;  %v707_v50 = vmul.f32 %v4148_v47, %v691_v21 }
 0x443   :  { %v727_v40 = vpop.permute.xlu0 %726 }
 0x444   :  { %v745_v45 = vmul.f32 %v4140_v31, %v727_v40  ;;  %764 = vrot.lane.b32.xlu1 %v744_v37, %s3841_s0 }
 0x445   :  { %v729_v46 = vpop.permute.xlu1 %728 }
 0x446   :  { %766 = vrot.lane.b32.xlu0 %v745_v45, %s3841_s0  ;;  %v746_v48 = vmul.f32 %v4145_v54, %v729_v46 }
 0x447   :  { %v731_v49 = vpop.permute.xlu0 %730 }
 0x448   :  { %v747_v51 = vmul.f32 %v4148_v47, %v731_v49  ;;  %768 = vrot.lane.b32.xlu1 %v746_v48, %s3841_s0 }
 0x44a   :  { %770 = vrot.lane.b32.xlu0 %v747_v51, %s3841_s0 }
 0x4ae   :  { %v759_v59 = vpop.permute.xlu1 %758 }
 0x4af   :  { %v4159_v23 = vadd.f32 %v759_v59, %v701_v56 }
 0x4b0   :  { %v761_v32 = vpop.permute.xlu0 %760 }
 0x4b1   :  { %v4162_v1 = vadd.f32 %v761_v32, %v702_v60  ;;  %3435 = vtanh.f32 %v4159_v23 }
 0x4b2   :  { %v757_v5 = vpop.permute.xlu1 %756 }
 0x4b3   :  { %3437 = vtanh.f32 %v4162_v1  ;;  %v4169_v3 = vadd.f32 %v757_v5, %v700_v18 }
 0x4b4   :  { %v763_v10 = vpop.permute.xlu0 %762 }
 0x4b5   :  { %v4172_v8 = vadd.f32 %v763_v10, %v703_v38  ;;  %3439 = vtanh.f32 %v4169_v3 }
 0x4b6   :  { %v765_v9 = vpop.permute.xlu1 %764 }
 0x4b7   :  { %3441 = vtanh.f32 %v4172_v8  ;;  %v4179_v15 = vadd.f32 %v765_v9, %v704_v13 }
 0x4b8   :  { %v767_v20 = vpop.permute.xlu0 %766 }
 0x4b9   :  { %v4182_v25 = vadd.f32 %v767_v20, %v705_v12  ;;  %3443 = vtanh.f32 %v4179_v15 }
 0x4ba   :  { %v769_v27 = vpop.permute.xlu1 %768 }
 0x4bb   :  { %3445 = vtanh.f32 %v4182_v25  ;;  %v3436_v30 = vpop.eup %3435  ;;  %v4188_v37 = vadd.f32 %v769_v27, %v706_v29 }
 0x4bc   :  { %v771_v35 = vpop.permute.xlu0 %770  ;;  %806 = vrot.lane.b32.xlu1 %v3436_v30, %s3841_s0 }
 0x4bd   :  { %v3438_v40 = vpop.eup %3437  ;;  %v4190_v45 = vadd.f32 %v771_v35, %v707_v50  ;;  %3447 = vtanh.f32 %v4188_v37 }
 0x4be   :  { %808 = vrot.lane.b32.xlu0 %v3438_v40, %s3841_s0 }
 0x4bf   :  { %3449 = vtanh.f32 %v4190_v45  ;;  %v3440_v42 = vpop.eup %3439 }
 0x4c0   :  { %804 = vrot.lane.b32.xlu1 %v3440_v42, %s3841_s0 }
 0x4c1   :  { %v3442_v46 = vpop.eup %3441 }
 0x4c2   :  { %810 = vrot.lane.b32.xlu0 %v3442_v46, %s3841_s0 }
 0x4c3   :  { %v3444_v48 = vpop.eup %3443 }
 0x4c4   :  { %812 = vrot.lane.b32.xlu1 %v3444_v48, %s3841_s0 }
 0x4c5   :  { %v3446_v49 = vpop.eup %3445 }
 0x4c6   :  { %814 = vrot.lane.b32.xlu0 %v3446_v49, %s3841_s0 }
 0x4c7   :  { %v3448_v51 = vpop.eup %3447 }
 0x4c8   :  { %816 = vrot.lane.b32.xlu1 %v3448_v51, %s3841_s0 }
 0x4c9   :  { %v3450_v57 = vpop.eup %3449 }
 0x4ca   :  { %818 = vrot.lane.b32.xlu0 %v3450_v57, %s3841_s0 }
 0x52e   :  { %v807_v55 = vpop.permute.xlu1 %806 }
 0x52f   :  { %v4206_v60 = vmul.f32 %v4122_v4, %v807_v55 }
 0x530   :  { %v809_v56 = vpop.permute.xlu0 %808 }
 0x531   :  { %v4203_v59 = vmul.f32 %v4124_v41, %v809_v56  ;;  %v878_v38 = vpack.c.bf16 %v4206_v60, %v4206_v60 }
 0x532   :  { %v805_v32 = vpop.permute.xlu1 %804 }
 0x533   :  { %v879_v61 = vpack.c.bf16 %v4203_v59, %v4203_v59  ;;  %v4211_v63 = vmul.f32 %v4129_v19, %v805_v32  ;;  %v894_v12 = vunpack.c.l.b16 %v878_v38 }
 0x534   :  { %v811_v18 = vpop.permute.xlu0 %810 }
 0x535   :  { %v4214_v5 = vmul.f32 %v4132_v44, %v811_v18  ;;  %v877_v41 = vpack.c.bf16 %v4211_v63, %v4211_v63  ;;  %v895_v2 = vunpack.c.l.b16 %v879_v61 }
 0x536   :  { %v813_v10 = vpop.permute.xlu1 %812 }
 0x537   :  { %v880_v4 = vpack.c.bf16 %v4214_v5, %v4214_v5  ;;  %v893_v7 = vunpack.c.l.b16 %v877_v41  ;;  %v4223_v13 = vmul.f32 %v4137_v28, %v813_v10  ;;  %v903_v21 = vrot.slane %v895_v2, 7  ;;  %v4254_v10 = vld [vmem:[%s5491_s2] sm:$0xff]  }
 0x538   :  { %v815_v19 = vpop.permute.xlu0 %814 }
 0x539   :  { %v896_v9 = vunpack.c.l.b16 %v880_v4  ;;  %v4226_v44 = vmul.f32 %v4140_v31, %v815_v19  ;;  %v901_v14 = vrot.slane %v893_v7, 1  ;;  %v881_v20 = vpack.c.bf16 %v4223_v13, %v4223_v13  ;;  %v4263_v7 = vld [vmem:[%s5491_s2 + $0x8] sm:$0xff]  }
 0x53a   :  { %v817_v50 = vpop.permute.xlu1 %816 }
 0x53b   :  { %v905_v29 = vrot.slane %v896_v9, 6  ;;  %v882_v27 = vpack.c.bf16 %v4226_v44, %v4226_v44  ;;  %v902_v30 = vsel %vm530_vm2, %v894_v12, %v901_v14  ;;  %v897_v28 = vunpack.c.l.b16 %v881_v20 }
 0x53c   :  { %v4234_v35 = vmul.f32 %v4145_v54, %v817_v50  ;;  %v819_v40 = vpop.permute.xlu0 %818  ;;  %v904_v31 = vsel %vm533_vm3, %v903_v21, %v902_v30 }
 0x53d   :  { %v898_v42 = vunpack.c.l.b16 %v882_v27  ;;  %v4238_v46 = vmul.f32 %v4148_v47, %v819_v40  ;;  %v906_v48 = vsel %vm536_vm4, %v905_v29, %v904_v31  ;;  %v907_v49 = vrot.slane %v897_v28, 5 }
 0x53e   :  { %v883_v51 = vpack.c.bf16 %v4234_v35, %v4234_v35 }
 0x53f   :  { %v909_v57 = vrot.slane %v898_v42, 4  ;;  %v884_v55 = vpack.c.bf16 %v4238_v46, %v4238_v46  ;;  %v908_v54 = vsel %vm539_vm5, %v907_v49, %v906_v48 }
 0x540   :  { %v899_v56 = vunpack.c.l.b16 %v883_v51 }
 0x541   :  { %v900_v61 = vunpack.c.l.b16 %v884_v55  ;;  %v910_v32 = vsel %vm542_vm6, %v909_v57, %v908_v54 }
 0x542   :  { %v911_v18 = vrot.slane %v899_v56, 3 }
 0x543   :  { %v913_v38 = vrot.slane %v900_v61, 2 }
 0x544   :  { %v912_v47 = vsel %vm545_vm7, %v911_v18, %v910_v32 }
 0x545   :  { %v914_v41 = vsel %vm548_vm8, %v913_v38, %v912_v47 }
 0x546   :  { %v915_v2 = vpack.c.b16 %v914_v41, %v914_v41 }
 0x548   :  { %916 = vrot.lane.b32.xlu1 %v915_v2, %s3842_s3 }
 0x5ba   :  { %v917_v4 = vpop.permute.xlu1 %916 }
 0x5bb   :  { %3267 = vmatmul.mubr.msk.bf16.vlgmr.msra.gmra.mrb[8].mxu0 %vm22_vm0, %v917_v4 }
 0x5bc   :  { %3279 = vmatpush3.bf16.msra.mxu0 %v4254_v10  ;;  %3282 = vmatprep.mubr.msk.bf16.mxu0 %vm3840_vm1, %v5495_v0 }
 0x5bd   :  { %3280 = vmatprep.subr.bf16.mxu0 %v5495_v0 }
 0x5c0   :  { %3281 = vmatpush3.bf16.msra.mxu0 %v4263_v7 }
 0x5c1   :  { %3294 = vmatprep.subr.bf16.mxu0 %v5495_v0 }
 0x68e   :  { %v955_v19 = vpop.f32.mrb[8].mxu0 }
 0x68f   :  { %v962_v9 = vrot.slane %v955_v19, 6  ;;  %v3268_v12 = vpop.f32.mrb[9].mxu0  ;;  %v964_v29 = vrot.slane %v955_v19, 1  ;;  %v963_v27 = vrot.slane %v955_v19, 7  ;;  %v979_v50 = vadd.f32 %v955_v19, %v3929_v16 }
 0x690   :  { %v958_v14 = vpop.f32.mrb[10].mxu0  ;;  %v965_v30 = vrot.slane %v955_v19, 2  ;;  %v966_v31 = vrot.slane %v955_v19, 3  ;;  %v967_v48 = vrot.slane %v955_v19, 4  ;;  %v968_v51 = vrot.slane %v955_v19, 5 }
 0x691   :  { %v977_v20 = vadd.f32 %v962_v9, %v3931_v17  ;;  %v3269_v21 = vpop.f32.mrb[11].mxu0  ;;  %v980_v28 = vadd.f32 %v964_v29, %v3936_v26  ;;  %v978_v42 = vadd.f32 %v963_v27, %v3933_v24  ;;  %v3153_v4 = vmul.f32 -1.442695, %v979_v50 }
 0x692   :  { %v981_v49 = vadd.f32 %v965_v30, %v3941_v34  ;;  %v982_v57 = vadd.f32 %v966_v31, %v3945_v39  ;;  %v983_v55 = vadd.f32 %v967_v48, %v3943_v36  ;;  %v984_v54 = vadd.f32 %v968_v51, %v3949_v43 }
 0x693   :  { %3451 = vtanh.f32 %v977_v20  ;;  %v3151_v2 = vmul.f32 -1.442695, %v977_v20  ;;  %v3154_v19 = vmul.f32 -1.442695, %v980_v28  ;;  %v3152_v12 = vmul.f32 -1.442695, %v978_v42 }
 0x694   :  { %3453 = vtanh.f32 %v979_v50  ;;  %v3155_v14 = vmul.f32 -1.442695, %v981_v49  ;;  %v3156_v29 = vmul.f32 -1.442695, %v982_v57  ;;  %v3157_v27 = vmul.f32 -1.442695, %v983_v55 }
 0x695   :  { %3455 = vtanh.f32 %v980_v28  ;;  %v3158_v30 = vmul.f32 -1.442695, %v984_v54 }
 0x696   :  { %3457 = vtanh.f32 %v978_v42 }
 0x697   :  { %3459 = vtanh.f32 %v981_v49 }
 0x698   :  { %3461 = vtanh.f32 %v982_v57 }
 0x699   :  { %3463 = vtanh.f32 %v983_v55 }
 0x69a   :  { %3465 = vtanh.f32 %v984_v54 }
 0x69b   :  { %3467 = vpow2.f32 %v3151_v2 }
 0x69c   :  { %3469 = vpow2.f32 %v3153_v4 }
 0x69d   :  { %v3452_v40 = vpop.eup %3451  ;;  %3471 = vpow2.f32 %v3154_v19 }
 0x69e   :  { %1081 = vrot.lane.b32.xlu0 %v3452_v40, %s3841_s0  ;;  %v3454_v56 = vpop.eup %3453  ;;  %3473 = vpow2.f32 %v3152_v12 }
 0x69f   :  { %v3456_v61 = vpop.eup %3455  ;;  %1085 = vrot.lane.b32.xlu1 %v3454_v56, %s3841_s0  ;;  %3475 = vpow2.f32 %v3155_v14 }
 0x6a0   :  { %v3458_v32 = vpop.eup %3457 }
 0x6a1   :  { %v3460_v18 = vpop.eup %3459 }
 0x6a2   :  { %1087 = vrot.lane.b32.xlu0 %v3456_v61, %s3841_s0  ;;  %v3462_v38 = vpop.eup %3461 }
 0x6a3   :  { %1083 = vrot.lane.b32.xlu1 %v3458_v32, %s3841_s0  ;;  %v3464_v47 = vpop.eup %3463 }
 0x6a4   :  { %v3466_v41 = vpop.eup %3465 }
 0x6a5   :  { %v3468_v9 = vpop.eup %3467 }
 0x6a6   :  { %1089 = vrot.lane.b32.xlu0 %v3460_v18, %s3841_s0  ;;  %v1009_v21 = vadd.f32 1.0, %v3468_v9  ;;  %v3470_v40 = vpop.eup %3469 }
 0x6a7   :  { %1091 = vrot.lane.b32.xlu1 %v3462_v38, %s3841_s0  ;;  %v3472_v31 = vpop.eup %3471  ;;  %v1011_v20 = vadd.f32 1.0, %v3470_v40 }
 0x6a8   :  { %3477 = vrcp.f32 %v1009_v21  ;;  %v3474_v50 = vpop.eup %3473  ;;  %v1012_v28 = vadd.f32 1.0, %v3472_v31 }
 0x6a9   :  { %3479 = vpow2.f32 %v3156_v29  ;;  %v3476_v48 = vpop.eup %3475  ;;  %v1010_v51 = vadd.f32 1.0, %v3474_v50 }
 0x6aa   :  { %1093 = vrot.lane.b32.xlu0 %v3464_v47, %s3841_s0  ;;  %3481 = vpow2.f32 %v3157_v27  ;;  %v1013_v55 = vadd.f32 1.0, %v3476_v48 }
 0x6ab   :  { %1095 = vrot.lane.b32.xlu1 %v3466_v41, %s3841_s0  ;;  %3483 = vpow2.f32 %v3158_v30 }
 0x6ac   :  { %3485 = vrcp.f32 %v1011_v20 }
 0x6ad   :  { %3487 = vrcp.f32 %v1012_v28 }
 0x6ae   :  { %3489 = vrcp.f32 %v1010_v51 }
 0x6af   :  { %3491 = vrcp.f32 %v1013_v55 }
 0x6b2   :  { %v4283_v42 = vpop.eup %3477 }
 0x6b3   :  { %v3480_v56 = vpop.eup %3479 }
 0x6b4   :  { %v3482_v61 = vpop.eup %3481  ;;  %v1014_v54 = vadd.f32 1.0, %v3480_v56 }
 0x6b5   :  { %v3484_v32 = vpop.eup %3483  ;;  %v1015_v18 = vadd.f32 1.0, %v3482_v61 }
 0x6b6   :  { %3493 = vrcp.f32 %v1014_v54  ;;  %v1016_v38 = vadd.f32 1.0, %v3484_v32  ;;  %v4287_v47 = vpop.eup %3485  ;;  %v1051_v32 = vrot.slane %v4162_v1, 7 }
 0x6b7   :  { %3495 = vrcp.f32 %v1015_v18  ;;  %v4289_v2 = vpop.eup %3487  ;;  %v1052_v18 = vrot.slane %v4172_v8, 7 }
 0x6b8   :  { %3497 = vrcp.f32 %v1016_v38  ;;  %v4294_v12 = vpop.eup %3489  ;;  %v1067_v38 = vmul.f32 %v4287_v47, %v1051_v32 }
 0x6b9   :  { %v4297_v21 = vpop.eup %3491 }
 0x6c0   :  { %v4302_v40 = vpop.eup %3493 }
 0x6c1   :  { %v4305_v20 = vpop.eup %3495 }
 0x710   :  { %v1082_v49 = vpop.permute.xlu0 %1081 }
 0x711   :  { %v1105_v57 = vmul.f32 %v4283_v42, %v1082_v49  ;;  %v1086_v41 = vpop.permute.xlu1 %1085  ;;  %v4310_v49 = vpop.eup %3497 }
 0x712   :  { %v1107_v4 = vmul.f32 %v4287_v47, %v1086_v41 }
 0x713   :  { %1121 = vrot.lane.b32.xlu0 %v1105_v57, %s3841_s0  ;;  %v1049_v57 = vrot.slane %v4169_v3, 7 }
 0x714   :  { %v1088_v19 = vpop.permute.xlu0 %1087  ;;  %1125 = vrot.lane.b32.xlu1 %v1107_v4, %s3841_s0  ;;  %v1068_v4 = vmul.f32 %v4289_v2, %v1052_v18 }
 0x715   :  { %v1108_v9 = vmul.f32 %v4289_v2, %v1088_v19  ;;  %v1084_v14 = vpop.permute.xlu1 %1083  ;;  %v1065_v55 = vmul.f32 %v4283_v42, %v1049_v57  ;;  %v1050_v19 = vrot.slane %v4159_v23, 7  ;;  %v1054_v23 = vrot.slane %v4182_v25, 7 }
 0x716   :  { %v1106_v29 = vmul.f32 %v4294_v12, %v1084_v14  ;;  %v1053_v14 = vrot.slane %v4179_v15, 7  ;;  %v1055_v15 = vrot.slane %v4188_v37, 7  ;;  %v1056_v57 = vrot.slane %v4190_v45, 7 }
 0x717   :  { %1127 = vrot.lane.b32.xlu0 %v1108_v9, %s3841_s0  ;;  %v1066_v1 = vmul.f32 %v4294_v12, %v1050_v19 }
 0x718   :  { %v1090_v27 = vpop.permute.xlu0 %1089  ;;  %1123 = vrot.lane.b32.xlu1 %v1106_v29, %s3841_s0  ;;  %v1072_v37 = vmul.f32 %v4310_v49, %v1056_v57 }
 0x719   :  { %v1109_v30 = vmul.f32 %v4297_v21, %v1090_v27  ;;  %v1092_v31 = vpop.permute.xlu1 %1091 }
 0x71a   :  { %v1110_v50 = vmul.f32 %v4302_v40, %v1092_v31 }
 0x71b   :  { %1129 = vrot.lane.b32.xlu0 %v1109_v30, %s3841_s0  ;;  %v1069_v30 = vmul.f32 %v4297_v21, %v1053_v14 }
 0x71c   :  { %v1094_v28 = vpop.permute.xlu0 %1093  ;;  %1131 = vrot.lane.b32.xlu1 %v1110_v50, %s3841_s0 }
 0x71d   :  { %v1111_v48 = vmul.f32 %v4305_v20, %v1094_v28  ;;  %v1096_v51 = vpop.permute.xlu1 %1095 }
 0x71e   :  { %v1112_v56 = vmul.f32 %v4310_v49, %v1096_v51 }
 0x71f   :  { %1133 = vrot.lane.b32.xlu0 %v1111_v48, %s3841_s0  ;;  %v1070_v48 = vmul.f32 %v4302_v40, %v1054_v23 }
 0x720   :  { %1135 = vrot.lane.b32.xlu1 %v1112_v56, %s3841_s0  ;;  %v1071_v56 = vmul.f32 %v4305_v20, %v1055_v15 }
 0x785   :  { %v1122_v61 = vpop.permute.xlu0 %1121 }
 0x786   :  { %v4317_v54 = vadd.f32 %v1122_v61, %v1065_v55  ;;  %v1126_v41 = vpop.permute.xlu1 %1125 }
 0x787   :  { %v4325_v9 = vadd.f32 %v1126_v41, %v1067_v38 }
 0x788   :  { %3499 = vtanh.f32 %v4317_v54 }
 0x789   :  { %v1128_v3 = vpop.permute.xlu0 %1127  ;;  %3501 = vtanh.f32 %v4325_v9 }
 0x78a   :  { %v4328_v29 = vadd.f32 %v1128_v3, %v1068_v4  ;;  %v1124_v8 = vpop.permute.xlu1 %1123 }
 0x78b   :  { %v4336_v31 = vadd.f32 %v1124_v8, %v1066_v1 }
 0x78c   :  { %3503 = vtanh.f32 %v4328_v29 }
 0x78d   :  { %v1130_v50 = vpop.permute.xlu0 %1129  ;;  %3505 = vtanh.f32 %v4336_v31 }
 0x78e   :  { %v4339_v28 = vadd.f32 %v1130_v50, %v1069_v30  ;;  %v1132_v51 = vpop.permute.xlu1 %1131 }
 0x78f   :  { %v4346_v55 = vadd.f32 %v1132_v51, %v1070_v48 }
 0x790   :  { %3507 = vtanh.f32 %v4339_v28 }
 0x791   :  { %v1134_v25 = vpop.permute.xlu0 %1133  ;;  %3509 = vtanh.f32 %v4346_v55 }
 0x792   :  { %v3500_v27 = vpop.eup %3499  ;;  %v4348_v61 = vadd.f32 %v1134_v25, %v1071_v56  ;;  %v1136_v32 = vpop.permute.xlu1 %1135 }
 0x793   :  { %1169 = vrot.lane.b32.xlu0 %v3500_v27, %s3841_s0  ;;  %v3502_v18 = vpop.eup %3501  ;;  %v4353_v38 = vadd.f32 %v1136_v32, %v1072_v37 }
 0x794   :  { %3511 = vtanh.f32 %v4348_v61  ;;  %1173 = vrot.lane.b32.xlu1 %v3502_v18, %s3841_s0 }
 0x795   :  { %3513 = vtanh.f32 %v4353_v38 }
 0x796   :  { %v3504_v41 = vpop.eup %3503 }
 0x797   :  { %1175 = vrot.lane.b32.xlu0 %v3504_v41, %s3841_s0  ;;  %v3506_v45 = vpop.eup %3505 }
 0x798   :  { %1171 = vrot.lane.b32.xlu1 %v3506_v45, %s3841_s0 }
 0x79a   :  { %v3508_v4 = vpop.eup %3507 }
 0x79b   :  { %1177 = vrot.lane.b32.xlu0 %v3508_v4, %s3841_s0  ;;  %v3510_v19 = vpop.eup %3509 }
 0x79c   :  { %1179 = vrot.lane.b32.xlu1 %v3510_v19, %s3841_s0 }
 0x79e   :  { %v3512_v3 = vpop.eup %3511 }
 0x79f   :  { %1181 = vrot.lane.b32.xlu0 %v3512_v3, %s3841_s0  ;;  %v3514_v14 = vpop.eup %3513 }
 0x7a0   :  { %1183 = vrot.lane.b32.xlu1 %v3514_v14, %s3841_s0 }
 0x805   :  { %v1170_v27 = vpop.permute.xlu0 %1169 }
 0x806   :  { %v4364_v1 = vmul.f32 %v4283_v42, %v1170_v27  ;;  %v1174_v8 = vpop.permute.xlu1 %1173 }
 0x807   :  { %v4372_v15 = vmul.f32 %v4287_v47, %v1174_v8 }
 0x808   :  { %v1242_v50 = vpack.c.bf16 %v4364_v1, %v4364_v1 }
 0x809   :  { %v1176_v30 = vpop.permute.xlu0 %1175  ;;  %v1244_v47 = vpack.c.bf16 %v4372_v15, %v4372_v15 }
 0x80a   :  { %v4367_v23 = vmul.f32 %v4289_v2, %v1176_v30  ;;  %v1172_v48 = vpop.permute.xlu1 %1171  ;;  %v1258_v25 = vunpack.c.l.b16 %v1242_v50 }
 0x80b   :  { %v4377_v56 = vmul.f32 %v4294_v12, %v1172_v48  ;;  %v1260_v8 = vunpack.c.l.b16 %v1244_v47 }
 0x80c   :  { %v1245_v51 = vpack.c.bf16 %v4367_v23, %v4367_v23  ;;  %v1266_v19 = vrot.slane %v1258_v25, 2 }
 0x80d   :  { %v1178_v42 = vpop.permute.xlu0 %1177  ;;  %v1243_v2 = vpack.c.bf16 %v4377_v56, %v4377_v56 }
 0x80e   :  { %v4380_v57 = vmul.f32 %v4297_v21, %v1178_v42  ;;  %v1261_v37 = vunpack.c.l.b16 %v1245_v51  ;;  %v1180_v32 = vpop.permute.xlu1 %1179 }
 0x80f   :  { %v1259_v41 = vunpack.c.l.b16 %v1243_v2  ;;  %v4389_v12 = vmul.f32 %v4302_v40, %v1180_v32 }
 0x810   :  { %v1246_v18 = vpack.c.bf16 %v4380_v57, %v4380_v57  ;;  %v1270_v14 = vrot.slane %v1261_v37, 7 }
 0x811   :  { %v1182_v45 = vpop.permute.xlu0 %1181  ;;  %v1267_v3 = vrot.slane %v1259_v41, 1  ;;  %v1247_v27 = vpack.c.bf16 %v4389_v12, %v4389_v12 }
 0x812   :  { %v1262_v4 = vunpack.c.l.b16 %v1246_v18  ;;  %v4392_v21 = vmul.f32 %v4305_v20, %v1182_v45  ;;  %v1184_v50 = vpop.permute.xlu1 %1183 }
 0x813   :  { %v1268_v40 = vsel %vm530_vm2, %v1267_v3, %v1266_v19  ;;  %v1263_v51 = vunpack.c.l.b16 %v1247_v27  ;;  %v4400_v42 = vmul.f32 %v4310_v49, %v1184_v50 }
 0x814   :  { %5523 = vst [vmem:[#allocation4_spill] sm:$0xff] %v4392_v21  ;;  %v1272_v30 = vrot.slane %v1262_v4, 6  ;;  %v1248_v48 = vpack.c.bf16 %v4392_v21, %v4392_v21  ;;  %v1269_v20 = vsel %vm533_vm3, %v1260_v8, %v1268_v40 }
 0x815   :  { %v1271_v2 = vsel %vm536_vm4, %v1270_v14, %v1269_v20  ;;  %v1274_v37 = vrot.slane %v1263_v51, 5  ;;  %v1249_v47 = vpack.c.bf16 %v4400_v42, %v4400_v42 }
 0x816   :  { %v1264_v25 = vunpack.c.l.b16 %v1248_v48  ;;  %v1273_v32 = vsel %vm539_vm5, %v1272_v30, %v1271_v2 }
 0x817   :  { %v1265_v41 = vunpack.c.l.b16 %v1249_v47  ;;  %v1275_v45 = vsel %vm542_vm6, %v1274_v37, %v1273_v32 }
 0x818   :  { %v1276_v18 = vrot.slane %v1264_v25, 4 }
 0x819   :  { %v1278_v19 = vrot.slane %v1265_v41, 3 }
 0x81a   :  { %v1277_v4 = vsel %vm545_vm7, %v1276_v18, %v1275_v45 }
 0x81b   :  { %v1279_v49 = vsel %vm548_vm8, %v1278_v19, %v1277_v4 }
 0x81c   :  { %v1280_v3 = vpack.c.b16 %v1279_v49, %v1279_v49 }
 0x81e   :  { %1281 = vrot.lane.b32.xlu0 %v1280_v3, %s3842_s3 }
 0x890   :  { %v1282_v27 = vpop.permute.xlu0 %1281 }
 0x891   :  { %3275 = vmatmul.mubr.msk.bf16.vlgmr.msra.gmra.mrb[8].mxu1 %vm22_vm0, %v1282_v27 }
 0x892   :  { %3287 = vmatpush3.bf16.msra.mxu1 %v4254_v10  ;;  %3290 = vmatprep.mubr.msk.bf16.mxu1 %vm3840_vm1, %v5495_v0 }
 0x893   :  { %3288 = vmatprep.subr.bf16.mxu1 %v5495_v0 }
 0x896   :  { %3289 = vmatpush3.bf16.msra.mxu1 %v4263_v7 }
 0x897   :  { %3302 = vmatprep.subr.bf16.mxu1 %v5495_v0 }
 0x964   :  { %v1320_v14 = vpop.f32.mrb[8].mxu1 }
 0x965   :  { %v3276_v8 = vpop.f32.mrb[9].mxu1  ;;  %v1328_v48 = vrot.slane %v1320_v14, 6  ;;  %v1330_v40 = vrot.slane %v1320_v14, 1  ;;  %v1327_v20 = vrot.slane %v1320_v14, 5  ;;  %v1345_v25 = vadd.f32 %v1320_v14, %v3936_v26 }
 0x966   :  { %v1323_v30 = vpop.f32.mrb[10].mxu1  ;;  %v1331_v2 = vrot.slane %v1320_v14, 2  ;;  %v1329_v47 = vrot.slane %v1320_v14, 7  ;;  %v1333_v18 = vrot.slane %v1320_v14, 4  ;;  %v1332_v45 = vrot.slane %v1320_v14, 3 }
 0x967   :  { %v3277_v50 = vpop.f32.mrb[11].mxu1  ;;  %v1343_v51 = vadd.f32 %v1328_v48, %v3933_v24  ;;  %v1346_v37 = vadd.f32 %v1330_v40, %v3941_v34  ;;  %v1342_v32 = vadd.f32 %v1327_v20, %v3931_v17 }
 0x968   :  { %v1347_v41 = vadd.f32 %v1331_v2, %v3945_v39  ;;  %v1344_v4 = vadd.f32 %v1329_v47, %v3929_v16  ;;  %v1349_v19 = vadd.f32 %v1333_v18, %v3949_v43  ;;  %v1348_v3 = vadd.f32 %v1332_v45, %v3943_v36 }
 0x969   :  { %3515 = vtanh.f32 %v1343_v51  ;;  %v3161_v20 = vmul.f32 -1.442695, %v1343_v51  ;;  %v3163_v2 = vmul.f32 -1.442695, %v1345_v25  ;;  %v3164_v47 = vmul.f32 -1.442695, %v1346_v37 }
 0x96a   :  { %3517 = vtanh.f32 %v1345_v25  ;;  %v3160_v18 = vmul.f32 -1.442695, %v1342_v32  ;;  %v3165_v45 = vmul.f32 -1.442695, %v1347_v41 }
 0x96b   :  { %3519 = vtanh.f32 %v1346_v37 }
 0x96c   :  { %3521 = vtanh.f32 %v1342_v32 }
 0x96d   :  { %3523 = vtanh.f32 %v1347_v41 }
 0x96e   :  { %3525 = vtanh.f32 %v1344_v4 }
 0x96f   :  { %3527 = vtanh.f32 %v1349_v19 }
 0x970   :  { %3529 = vtanh.f32 %v1348_v3 }
 0x971   :  { %3531 = vpow2.f32 %v3161_v20 }
 0x972   :  { %3533 = vpow2.f32 %v3163_v2 }
 0x973   :  { %v3516_v49 = vpop.eup %3515  ;;  %3535 = vpow2.f32 %v3164_v47 }
 0x974   :  { %1448 = vrot.lane.b32.xlu0 %v3516_v49, %s3841_s0  ;;  %v3518_v27 = vpop.eup %3517  ;;  %3537 = vpow2.f32 %v3160_v18  ;;  %v3162_v49 = vmul.f32 -1.442695, %v1344_v4 }
 0x975   :  { %1452 = vrot.lane.b32.xlu1 %v3518_v27, %s3841_s0  ;;  %v3520_v8 = vpop.eup %3519  ;;  %3539 = vpow2.f32 %v3165_v45  ;;  %v3167_v27 = vmul.f32 -1.442695, %v1349_v19 }
 0x976   :  { %v3522_v14 = vpop.eup %3521  ;;  %3541 = vpow2.f32 %v3162_v49 }
 0x977   :  { %v3524_v30 = vpop.eup %3523  ;;  %3543 = vpow2.f32 %v3167_v27 }
 0x978   :  { %1454 = vrot.lane.b32.xlu0 %v3520_v8, %s3841_s0  ;;  %v3526_v50 = vpop.eup %3525 }
 0x979   :  { %1446 = vrot.lane.b32.xlu1 %v3522_v14, %s3841_s0  ;;  %v3528_v48 = vpop.eup %3527  ;;  %v3166_v14 = vmul.f32 -1.442695, %v1348_v3 }
 0x97a   :  { %v3530_v40 = vpop.eup %3529 }
 0x97b   :  { %v3532_v8 = vpop.eup %3531  ;;  %3545 = vpow2.f32 %v3166_v14 }
 0x97c   :  { %1456 = vrot.lane.b32.xlu0 %v3524_v30, %s3841_s0  ;;  %v3534_v30 = vpop.eup %3533 }
 0x97d   :  { %1450 = vrot.lane.b32.xlu1 %v3526_v50, %s3841_s0  ;;  %v1375_v50 = vadd.f32 1.0, %v3532_v8  ;;  %v1377_v51 = vadd.f32 1.0, %v3534_v30 }
 0x97f   :  { %3547 = vrcp.f32 %v1375_v50 }
 0x980   :  { %1460 = vrot.lane.b32.xlu0 %v3528_v48, %s3841_s0  ;;  %v3536_v48 = vpop.eup %3535  ;;  %3549 = vrcp.f32 %v1377_v51 }
 0x981   :  { %1458 = vrot.lane.b32.xlu1 %v3530_v40, %s3841_s0  ;;  %v3538_v25 = vpop.eup %3537  ;;  %v1378_v37 = vadd.f32 1.0, %v3536_v48 }
 0x982   :  { %v3540_v32 = vpop.eup %3539  ;;  %v1374_v40 = vadd.f32 1.0, %v3538_v25 }
 0x983   :  { %v3542_v41 = vpop.eup %3541  ;;  %3551 = vrcp.f32 %v1378_v37  ;;  %v1379_v4 = vadd.f32 1.0, %v3540_v32 }
 0x984   :  { %v3544_v20 = vpop.eup %3543  ;;  %3553 = vrcp.f32 %v1374_v40  ;;  %v1376_v19 = vadd.f32 1.0, %v3542_v41 }
 0x985   :  { %v3546_v2 = vpop.eup %3545  ;;  %3555 = vrcp.f32 %v1379_v4  ;;  %v1381_v3 = vadd.f32 1.0, %v3544_v20 }
 0x986   :  { %3557 = vrcp.f32 %v1376_v19  ;;  %v1380_v45 = vadd.f32 1.0, %v3546_v2 }
 0x987   :  { %3559 = vrcp.f32 %v1381_v3 }
 0x988   :  { %3561 = vrcp.f32 %v1380_v45 }
 0x989   :  { %v4434_v47 = vpop.eup %3547 }
 0x98a   :  { %v4437_v27 = vpop.eup %3549 }
 0x98d   :  { %v4441_v30 = vpop.eup %3551 }
 0x98e   :  { %v4445_v51 = vpop.eup %3553 }
 0x98f   :  { %v4449_v32 = vpop.eup %3555 }
 0x990   :  { %v4453_v4 = vpop.eup %3557 }
 0x991   :  { %v4457_v2 = vpop.eup %3559 }
 0x992   :  { %v4461_v45 = vpop.eup %3561 }
 0x9e6   :  { %v1449_v18 = vpop.permute.xlu0 %1448 }
 0x9e7   :  { %v1471_v49 = vmul.f32 %v4434_v47, %v1449_v18  ;;  %v1453_v8 = vpop.permute.xlu1 %1452 }
 0x9e8   :  { %v1473_v14 = vmul.f32 %v4437_v27, %v1453_v8 }
 0x9e9   :  { %1488 = vrot.lane.b32.xlu0 %v1471_v49, %s3841_s0 }
 0x9ea   :  { %v1455_v50 = vpop.permute.xlu0 %1454  ;;  %1492 = vrot.lane.b32.xlu1 %v1473_v14, %s3841_s0  ;;  %v1415_v14 = vrot.slane %v4336_v31, 7 }
 0x9eb   :  { %v1474_v48 = vmul.f32 %v4441_v30, %v1455_v50  ;;  %v1447_v25 = vpop.permute.xlu1 %1446  ;;  %v1417_v50 = vrot.slane %v4328_v29, 7  ;;  %v1419_v29 = vrot.slane %v4346_v55, 7 }
 0x9ec   :  { %v1470_v37 = vmul.f32 %v4445_v51, %v1447_v25 }
 0x9ed   :  { %1494 = vrot.lane.b32.xlu0 %v1474_v48, %s3841_s0  ;;  %v1431_v48 = vmul.f32 %v4434_v47, %v1415_v14  ;;  %v1416_v14 = vrot.slane %v4325_v9, 7 }
 0x9ee   :  { %v1457_v40 = vpop.permute.xlu0 %1456  ;;  %1486 = vrot.lane.b32.xlu1 %v1470_v37, %s3841_s0  ;;  %v1418_v37 = vrot.slane %v4339_v28, 7 }
 0x9ef   :  { %v1475_v41 = vmul.f32 %v4449_v32, %v1457_v40  ;;  %v1451_v20 = vpop.permute.xlu1 %1450  ;;  %v1433_v40 = vmul.f32 %v4437_v27, %v1417_v50  ;;  %v1432_v55 = vmul.f32 %v4453_v4, %v1416_v14 }
 0x9f0   :  { %v1472_v19 = vmul.f32 %v4453_v4, %v1451_v20  ;;  %v1434_v31 = vmul.f32 %v4441_v30, %v1418_v37 }
 0x9f1   :  { %1496 = vrot.lane.b32.xlu0 %v1475_v41, %s3841_s0 }
 0x9f2   :  { %v1461_v3 = vpop.permute.xlu0 %1460  ;;  %1490 = vrot.lane.b32.xlu1 %v1472_v19, %s3841_s0  ;;  %v1414_v19 = vrot.slane %v4317_v54, 7  ;;  %v1435_v54 = vmul.f32 %v4449_v32, %v1419_v29 }
 0x9f3   :  { %v1477_v18 = vmul.f32 %v4457_v2, %v1461_v3  ;;  %v1459_v49 = vpop.permute.xlu1 %1458 }
 0x9f4   :  { %v1476_v8 = vmul.f32 %v4461_v45, %v1459_v49  ;;  %v1430_v28 = vmul.f32 %v4445_v51, %v1414_v19 }
 0x9f5   :  { %1500 = vrot.lane.b32.xlu0 %v1477_v18, %s3841_s0 }
 0x9f6   :  { %1498 = vrot.lane.b32.xlu1 %v1476_v8, %s3841_s0 }
 0xa5b   :  { %v1489_v25 = vpop.permute.xlu0 %1488 }
 0xa5c   :  { %v4471_v41 = vadd.f32 %v1489_v25, %v1431_v48  ;;  %v1493_v20 = vpop.permute.xlu1 %1492  ;;  %v1421_v25 = vrot.slane %v4353_v38, 7 }
 0xa5d   :  { %v4474_v3 = vadd.f32 %v1493_v20, %v1433_v40  ;;  %v1420_v20 = vrot.slane %v4348_v61, 7 }
 0xa5e   :  { %3563 = vtanh.f32 %v4471_v41  ;;  %v1437_v9 = vmul.f32 %v4457_v2, %v1421_v25 }
 0xa5f   :  { %v1495_v18 = vpop.permute.xlu0 %1494  ;;  %3565 = vtanh.f32 %v4474_v3  ;;  %v1436_v38 = vmul.f32 %v4461_v45, %v1420_v20 }
 0xa60   :  { %v4481_v49 = vadd.f32 %v1495_v18, %v1434_v31  ;;  %v1487_v8 = vpop.permute.xlu1 %1486 }
 0xa61   :  { %v4484_v50 = vadd.f32 %v1487_v8, %v1430_v28 }
 0xa62   :  { %3567 = vtanh.f32 %v4481_v49 }
 0xa63   :  { %v1497_v48 = vpop.permute.xlu0 %1496  ;;  %3569 = vtanh.f32 %v4484_v50 }
 0xa64   :  { %v4491_v37 = vadd.f32 %v1497_v48, %v1435_v54  ;;  %v1491_v40 = vpop.permute.xlu1 %1490 }
 0xa65   :  { %v4494_v19 = vadd.f32 %v1491_v40, %v1432_v55 }
 0xa66   :  { %3571 = vtanh.f32 %v4491_v37 }
 0xa67   :  { %v1501_v31 = vpop.permute.xlu0 %1500  ;;  %3573 = vtanh.f32 %v4494_v19 }
 0xa68   :  { %v3564_v18 = vpop.eup %3563  ;;  %v4500_v29 = vadd.f32 %v1501_v31, %v1437_v9  ;;  %v1499_v28 = vpop.permute.xlu1 %1498 }
 0xa69   :  { %1536 = vrot.lane.b32.xlu0 %v3564_v18, %s3841_s0  ;;  %v3566_v8 = vpop.eup %3565  ;;  %v4503_v14 = vadd.f32 %v1499_v28, %v1436_v38 }
 0xa6a   :  { %3575 = vtanh.f32 %v4500_v29  ;;  %1540 = vrot.lane.b32.xlu1 %v3566_v8, %s3841_s0 }
 0xa6b   :  { %3577 = vtanh.f32 %v4503_v14 }
 0xa6c   :  { %v3568_v61 = vpop.eup %3567 }
 0xa6d   :  { %1542 = vrot.lane.b32.xlu0 %v3568_v61, %s3841_s0  ;;  %v3570_v54 = vpop.eup %3569 }
 0xa6e   :  { %1534 = vrot.lane.b32.xlu1 %v3570_v54, %s3841_s0 }
 0xa70   :  { %v3572_v48 = vpop.eup %3571 }
 0xa71   :  { %1544 = vrot.lane.b32.xlu0 %v3572_v48, %s3841_s0  ;;  %v3574_v25 = vpop.eup %3573 }
 0xa72   :  { %1538 = vrot.lane.b32.xlu1 %v3574_v25, %s3841_s0 }
 0xa74   :  { %v3576_v55 = vpop.eup %3575 }
 0xa75   :  { %1548 = vrot.lane.b32.xlu0 %v3576_v55, %s3841_s0  ;;  %v3578_v40 = vpop.eup %3577 }
 0xa76   :  { %1546 = vrot.lane.b32.xlu1 %v3578_v40, %s3841_s0 }
 0xadb   :  { %v1537_v20 = vpop.permute.xlu0 %1536 }
 0xadc   :  { %v1541_v9 = vpop.permute.xlu1 %1540  ;;  %v4515_v31 = vmul.f32 %v4434_v47, %v1537_v20 }
 0xadd   :  { %v4531_v47 = vmul.f32 %v4437_v27, %v1541_v9 }
 0xade   :  { %v1608_v61 = vpack.c.bf16 %v4515_v31, %v4515_v31 }
 0xadf   :  { %v1543_v18 = vpop.permute.xlu0 %1542  ;;  %5527 = vst [vmem:[#allocation8_spill] sm:$0xff] %v4531_v47  ;;  %v1610_v27 = vpack.c.bf16 %v4531_v47, %v4531_v47 }
 0xae0   :  { %v1535_v38 = vpop.permute.xlu1 %1534  ;;  %v4521_v8 = vmul.f32 %v4441_v30, %v1543_v18  ;;  %v1624_v18 = vunpack.c.l.b16 %v1608_v61 }
 0xae1   :  { %v4518_v28 = vmul.f32 %v4445_v51, %v1535_v38 }
 0xae2   :  { %5525 = vst [vmem:[#allocation6_spill] sm:$0xff] %v4521_v8  ;;  %v1611_v51 = vpack.c.bf16 %v4521_v8, %v4521_v8 }
 0xae3   :  { %5524 = vst [vmem:[#allocation5_spill] sm:$0xff] %v4518_v28  ;;  %v1545_v54 = vpop.permute.xlu0 %1544  ;;  %v1607_v48 = vpack.c.bf16 %v4518_v28, %v4518_v28  ;;  %v1632_v28 = vrot.slane %v1624_v18, 2 }
 0xae4   :  { %v4528_v25 = vmul.f32 %v4449_v32, %v1545_v54  ;;  %v1539_v55 = vpop.permute.xlu1 %1538  ;;  %v1627_v8 = vunpack.c.l.b16 %v1611_v51 }
 0xae5   :  { %v1623_v40 = vunpack.c.l.b16 %v1607_v48  ;;  %v4536_v30 = vmul.f32 %v4453_v4, %v1539_v55 }
 0xae6   :  { %5526 = vst [vmem:[#allocation7_spill] sm:$0xff] %v4528_v25  ;;  %v1612_v20 = vpack.c.bf16 %v4528_v25, %v4528_v25 }
 0xae7   :  { %5528 = vst [vmem:[#allocation9_spill] sm:$0xff] %v4536_v30  ;;  %v1549_v38 = vpop.permute.xlu0 %1548  ;;  %v1609_v32 = vpack.c.bf16 %v4536_v30, %v4536_v30  ;;  %v1631_v9 = vrot.slane %v1623_v40, 3 }
 0xae8   :  { %v4543_v54 = vmul.f32 %v4457_v2, %v1549_v38  ;;  %v1628_v48 = vunpack.c.l.b16 %v1612_v20  ;;  %v1547_v0 = vpop.permute.xlu1 %1546  ;;  %v1626_v38 = vunpack.c.l.b16 %v1610_v27  ;;  %v1637_v20 = vrot.slane %v1627_v8, 7 }
 0xae9   :  { %v1625_v4 = vunpack.c.l.b16 %v1609_v32  ;;  %v4548_v55 = vmul.f32 %v4461_v45, %v1547_v0  ;;  %v1633_v30 = vsel %vm530_vm2, %v1632_v28, %v1631_v9  ;;  %v5531_v8 = vmov 0.0  }
 0xaea   :  { %5529 = vst [vmem:[#allocation10_spill] sm:$0xff] %v4543_v54  ;;  %v1614_v61 = vpack.c.bf16 %v4543_v54, %v4543_v54  ;;  %v1639_v21 = vrot.slane %v1628_v48, 6 }
 0xaeb   :  { %5530 = vst [vmem:[#allocation11_spill] sm:$0xff] %v4548_v55  ;;  %v1634_v25 = vrot.slane %v1625_v4, 1  ;;  %v1613_v2 = vpack.c.bf16 %v4548_v55, %v4548_v55 }
 0xaec   :  { %v1630_v40 = vunpack.c.l.b16 %v1614_v61 }
 0xaed   :  { %v1635_v51 = vsel %vm533_vm3, %v1634_v25, %v1633_v30  ;;  %v1629_v32 = vunpack.c.l.b16 %v1613_v2 }
 0xaee   :  { %v1636_v0 = vsel %vm536_vm4, %v1626_v38, %v1635_v51  ;;  %v1643_v45 = vrot.slane %v1630_v40, 4 }
 0xaef   :  { %v1638_v18 = vsel %vm539_vm5, %v1637_v20, %v1636_v0  ;;  %v1641_v47 = vrot.slane %v1629_v32, 5 }
 0xaf0   :  { %v1640_v4 = vsel %vm542_vm6, %v1639_v21, %v1638_v18 }
 0xaf1   :  { %v1642_v54 = vsel %vm545_vm7, %v1641_v47, %v1640_v4 }
 0xaf2   :  { %v1644_v27 = vsel %vm548_vm8, %v1643_v45, %v1642_v54 }
 0xaf3   :  { %v1645_v55 = vpack.c.b16 %v1644_v27, %v1644_v27 }
 0xaf5   :  { %1646 = vrot.lane.b32.xlu1 %v1645_v55, %s3842_s3 }
 0xb67   :  { %v1647_v28 = vpop.permute.xlu1 %1646 }
 0xb68   :  { %3283 = vmatmul.mubr.msk.bf16.vlgmr.msra.gmra.mrb[12].mxu0 %vm22_vm0, %v1647_v28 }
 0xb69   :  { %3295 = vmatpush3.bf16.msra.mxu0 %v4254_v10  ;;  %3298 = vmatprep.mubr.msk.bf16.mxu0 %vm3840_vm1, %v5531_v8 }
 0xb6a   :  { %3296 = vmatprep.subr.bf16.mxu0 %v5531_v8 }
 0xb6d   :  { %3297 = vmatpush3.bf16.msra.mxu0 %v4263_v7 }
 0xc3b   :  { %v1685_v21 = vpop.f32.mrb[12].mxu0 }
 0xc3c   :  { %v1692_v25 = vrot.slane %v1685_v21, 4  ;;  %v3284_v47 = vpop.f32.mrb[13].mxu0  ;;  %v1694_v48 = vrot.slane %v1685_v21, 6  ;;  %v1696_v55 = vrot.slane %v1685_v21, 1  ;;  %v1693_v10 = vrot.slane %v1685_v21, 5 }
 0xc3d   :  { %v1688_v30 = vpop.f32.mrb[14].mxu0  ;;  %v1711_v2 = vadd.f32 %v1685_v21, %v3941_v34  ;;  %v1697_v40 = vrot.slane %v1685_v21, 2  ;;  %v1695_v7 = vrot.slane %v1685_v21, 7  ;;  %v1698_v0 = vrot.slane %v1685_v21, 3 }
 0xc3e   :  { %v1707_v54 = vadd.f32 %v1692_v25, %v3931_v17  ;;  %v3285_v9 = vpop.f32.mrb[15].mxu0  ;;  %v1709_v61 = vadd.f32 %v1694_v48, %v3929_v16  ;;  %v1712_v20 = vadd.f32 %v1696_v55, %v3945_v39  ;;  %v1708_v51 = vadd.f32 %v1693_v10, %v3933_v24 }
 0xc3f   :  { %v1713_v32 = vadd.f32 %v1697_v40, %v3943_v36  ;;  %v1710_v45 = vadd.f32 %v1695_v7, %v3936_v26  ;;  %v1714_v4 = vadd.f32 %v1698_v0, %v3949_v43  ;;  %v3173_v55 = vmul.f32 -1.442695, %v1711_v2 }
 0xc40   :  { %3579 = vtanh.f32 %v1707_v54  ;;  %v3169_v9 = vmul.f32 -1.442695, %v1707_v54  ;;  %v3171_v48 = vmul.f32 -1.442695, %v1709_v61  ;;  %v3170_v40 = vmul.f32 -1.442695, %v1708_v51 }
 0xc41   :  { %3581 = vtanh.f32 %v1709_v61  ;;  %v3175_v0 = vmul.f32 -1.442695, %v1713_v32 }
 0xc42   :  { %3583 = vtanh.f32 %v1711_v2 }
 0xc43   :  { %3585 = vtanh.f32 %v1712_v20 }
 0xc44   :  { %3587 = vtanh.f32 %v1708_v51 }
 0xc45   :  { %3589 = vtanh.f32 %v1713_v32 }
 0xc46   :  { %3591 = vtanh.f32 %v1710_v45 }
 0xc47   :  { %3593 = vtanh.f32 %v1714_v4 }
 0xc48   :  { %3595 = vpow2.f32 %v3169_v9 }
 0xc49   :  { %3597 = vpow2.f32 %v3171_v48 }
 0xc4a   :  { %v3580_v38 = vpop.eup %3579  ;;  %3599 = vpow2.f32 %v3173_v55 }
 0xc4b   :  { %1811 = vrot.lane.b32.xlu0 %v3580_v38, %s3841_s0  ;;  %v3582_v18 = vpop.eup %3581  ;;  %v3174_v38 = vmul.f32 -1.442695, %v1712_v20 }
 0xc4c   :  { %v3584_v27 = vpop.eup %3583 }
 0xc4d   :  { %1819 = vrot.lane.b32.xlu1 %v3584_v27, %s3841_s0  ;;  %v3586_v28 = vpop.eup %3585  ;;  %3601 = vpow2.f32 %v3174_v38 }
 0xc4e   :  { %v3588_v25 = vpop.eup %3587  ;;  %3603 = vpow2.f32 %v3170_v40 }
 0xc4f   :  { %1815 = vrot.lane.b32.xlu0 %v3582_v18, %s3841_s0  ;;  %v3590_v21 = vpop.eup %3589  ;;  %v3172_v18 = vmul.f32 -1.442695, %v1710_v45 }
 0xc50   :  { %v3592_v47 = vpop.eup %3591 }
 0xc51   :  { %1813 = vrot.lane.b32.xlu1 %v3588_v25, %s3841_s0  ;;  %v3594_v30 = vpop.eup %3593 }
 0xc52   :  { %v3596_v10 = vpop.eup %3595 }
 0xc53   :  { %1821 = vrot.lane.b32.xlu0 %v3586_v28, %s3841_s0  ;;  %v1739_v7 = vadd.f32 1.0, %v3596_v10  ;;  %v3598_v27 = vpop.eup %3597  ;;  %v3176_v28 = vmul.f32 -1.442695, %v1714_v4 }
 0xc54   :  { %v3600_v25 = vpop.eup %3599  ;;  %v1741_v54 = vadd.f32 1.0, %v3598_v27 }
 0xc55   :  { %1817 = vrot.lane.b32.xlu1 %v3592_v47, %s3841_s0  ;;  %3605 = vrcp.f32 %v1739_v7  ;;  %v1743_v61 = vadd.f32 1.0, %v3600_v25 }
 0xc56   :  { %3607 = vpow2.f32 %v3175_v0 }
 0xc57   :  { %1823 = vrot.lane.b32.xlu0 %v3590_v21, %s3841_s0  ;;  %3609 = vpow2.f32 %v3172_v18  ;;  %v3602_v21 = vpop.eup %3601 }
 0xc58   :  { %3611 = vpow2.f32 %v3176_v28  ;;  %v3604_v2 = vpop.eup %3603  ;;  %v1744_v51 = vadd.f32 1.0, %v3602_v21 }
 0xc59   :  { %1825 = vrot.lane.b32.xlu1 %v3594_v30, %s3841_s0  ;;  %3613 = vrcp.f32 %v1741_v54  ;;  %v1740_v45 = vadd.f32 1.0, %v3604_v2 }
 0xc5a   :  { %3615 = vrcp.f32 %v1743_v61 }
 0xc5b   :  { %3617 = vrcp.f32 %v1744_v51 }
 0xc5c   :  { %3619 = vrcp.f32 %v1740_v45 }
 0xc5f   :  { %v4584_v47 = vpop.eup %3605 }
 0xc60   :  { %v3608_v30 = vpop.eup %3607 }
 0xc61   :  { %v3610_v9 = vpop.eup %3609  ;;  %v1745_v4 = vadd.f32 1.0, %v3608_v30 }
 0xc62   :  { %v1742_v48 = vadd.f32 1.0, %v3610_v9  ;;  %v3612_v55 = vpop.eup %3611 }
 0xc63   :  { %3621 = vrcp.f32 %v1745_v4  ;;  %v4588_v10 = vpop.eup %3613  ;;  %v1746_v40 = vadd.f32 1.0, %v3612_v55 }
 0xc64   :  { %3623 = vrcp.f32 %v1742_v48  ;;  %v4591_v0 = vpop.eup %3615 }
 0xc65   :  { %v4595_v28 = vpop.eup %3617  ;;  %3625 = vrcp.f32 %v1746_v40 }
 0xc66   :  { %v4599_v21 = vpop.eup %3619 }
 0xcbd   :  { %v1812_v20 = vpop.permute.xlu0 %1811 }
 0xcbe   :  { %v1835_v32 = vmul.f32 %v4584_v47, %v1812_v20  ;;  %v4603_v20 = vpop.eup %3621 }
 0xcbf   :  { %v1820_v18 = vpop.permute.xlu1 %1819 }
 0xcc0   :  { %1851 = vrot.lane.b32.xlu0 %v1835_v32, %s3841_s0  ;;  %v1839_v27 = vmul.f32 %v4591_v0, %v1820_v18  ;;  %v4607_v32 = vpop.eup %3623 }
 0xcc1   :  { %v1816_v38 = vpop.permute.xlu0 %1815  ;;  %v4612_v4 = vpop.eup %3625 }
 0xcc2   :  { %v1837_v7 = vmul.f32 %v4588_v10, %v1816_v38  ;;  %1859 = vrot.lane.b32.xlu1 %v1839_v27, %s3841_s0  ;;  %v1779_v38 = vrot.slane %v4484_v50, 7  ;;  %v1781_v27 = vrot.slane %v4494_v19, 7 }
 0xcc3   :  { %v1814_v61 = vpop.permute.xlu1 %1813 }
 0xcc4   :  { %1855 = vrot.lane.b32.xlu0 %v1837_v7, %s3841_s0  ;;  %v1836_v2 = vmul.f32 %v4599_v21, %v1814_v61  ;;  %v1795_v40 = vmul.f32 %v4584_v47, %v1779_v38 }
 0xcc5   :  { %v1822_v25 = vpop.permute.xlu0 %1821 }
 0xcc6   :  { %v1840_v54 = vmul.f32 %v4595_v28, %v1822_v25  ;;  %1853 = vrot.lane.b32.xlu1 %v1836_v2, %s3841_s0  ;;  %v1783_v25 = vrot.slane %v4481_v49, 7  ;;  %v1784_v2 = vrot.slane %v4491_v37, 7 }
 0xcc7   :  { %v1818_v45 = vpop.permute.xlu1 %1817 }
 0xcc8   :  { %1861 = vrot.lane.b32.xlu0 %v1840_v54, %s3841_s0  ;;  %v1838_v9 = vmul.f32 %v4607_v32, %v1818_v45  ;;  %v1797_v54 = vmul.f32 %v4588_v10, %v1781_v27  ;;  %v1800_v19 = vmul.f32 %v4595_v28, %v1784_v2  ;;  %v1786_v2 = vrot.slane %v4500_v29, 7 }
 0xcc9   :  { %v1824_v51 = vpop.permute.xlu0 %1823 }
 0xcca   :  { %v1841_v30 = vmul.f32 %v4603_v20, %v1824_v51  ;;  %1857 = vrot.lane.b32.xlu1 %v1838_v9, %s3841_s0  ;;  %v1799_v51 = vmul.f32 %v4591_v0, %v1783_v25  ;;  %v1780_v9 = vrot.slane %v4471_v41, 7  ;;  %v1782_v41 = vrot.slane %v4474_v3, 7 }
 0xccb   :  { %v1826_v48 = vpop.permute.xlu1 %1825 }
 0xccc   :  { %1863 = vrot.lane.b32.xlu0 %v1841_v30, %s3841_s0  ;;  %v1842_v55 = vmul.f32 %v4612_v4, %v1826_v48  ;;  %v1796_v37 = vmul.f32 %v4599_v21, %v1780_v9 }
 0xcce   :  { %1865 = vrot.lane.b32.xlu1 %v1842_v55, %s3841_s0  ;;  %v1785_v55 = vrot.slane %v4503_v14, 7  ;;  %v1798_v14 = vmul.f32 %v4607_v32, %v1782_v41 }
 0xcd0   :  { %v1801_v27 = vmul.f32 %v4603_v20, %v1785_v55 }
 0xd32   :  { %v1852_v7 = vpop.permute.xlu0 %1851 }
 0xd33   :  { %v4618_v18 = vadd.f32 %v1852_v7, %v1795_v40 }
 0xd34   :  { %v1860_v50 = vpop.permute.xlu1 %1859 }
 0xd35   :  { %3627 = vtanh.f32 %v4618_v18  ;;  %v4629_v48 = vadd.f32 %v1860_v50, %v1799_v51  ;;  %v1802_v50 = vmul.f32 %v4612_v4, %v1786_v2 }
 0xd36   :  { %v1856_v61 = vpop.permute.xlu0 %1855 }
 0xd37   :  { %v4626_v30 = vadd.f32 %v1856_v61, %v1797_v54 }
 0xd38   :  { %v1854_v40 = vpop.permute.xlu1 %1853 }
 0xd39   :  { %3629 = vtanh.f32 %v4626_v30  ;;  %v4640_v7 = vadd.f32 %v1854_v40, %v1796_v37 }
 0xd3a   :  { %v1862_v49 = vpop.permute.xlu0 %1861  ;;  %3631 = vtanh.f32 %v4629_v48 }
 0xd3b   :  { %v4637_v38 = vadd.f32 %v1862_v49, %v1800_v19 }
 0xd3c   :  { %v1858_v61 = vpop.permute.xlu1 %1857 }
 0xd3d   :  { %3633 = vtanh.f32 %v4637_v38  ;;  %v4649_v51 = vadd.f32 %v1858_v61, %v1798_v14 }
 0xd3e   :  { %v1864_v25 = vpop.permute.xlu0 %1863  ;;  %3635 = vtanh.f32 %v4640_v7 }
 0xd3f   :  { %v3628_v45 = vpop.eup %3627  ;;  %v4646_v54 = vadd.f32 %v1864_v25, %v1801_v27 }
 0xd40   :  { %1899 = vrot.lane.b32.xlu0 %v3628_v45, %s3841_s0  ;;  %v1866_v45 = vpop.permute.xlu1 %1865 }
 0xd41   :  { %3637 = vtanh.f32 %v4646_v54  ;;  %v4655_v19 = vadd.f32 %v1866_v45, %v1802_v50 }
 0xd42   :  { %3639 = vtanh.f32 %v4649_v51 }
 0xd43   :  { %v3630_v3 = vpop.eup %3629  ;;  %3641 = vtanh.f32 %v4655_v19 }
 0xd44   :  { %1903 = vrot.lane.b32.xlu0 %v3630_v3, %s3841_s0  ;;  %v3632_v9 = vpop.eup %3631 }
 0xd45   :  { %1907 = vrot.lane.b32.xlu1 %v3632_v9, %s3841_s0 }
 0xd47   :  { %v3634_v49 = vpop.eup %3633 }
 0xd48   :  { %1909 = vrot.lane.b32.xlu0 %v3634_v49, %s3841_s0  ;;  %v3636_v29 = vpop.eup %3635 }
 0xd49   :  { %1901 = vrot.lane.b32.xlu1 %v3636_v29, %s3841_s0 }
 0xd4b   :  { %v3638_v55 = vpop.eup %3637 }
 0xd4c   :  { %1911 = vrot.lane.b32.xlu0 %v3638_v55, %s3841_s0  ;;  %v3640_v37 = vpop.eup %3639 }
 0xd4d   :  { %1905 = vrot.lane.b32.xlu1 %v3640_v37, %s3841_s0  ;;  %v3642_v40 = vpop.eup %3641 }
 0xd51   :  { %1913 = vrot.lane.b32.xlu1 %v3642_v40, %s3841_s0 }
 0xdb2   :  { %v1900_v41 = vpop.permute.xlu0 %1899 }
 0xdb3   :  { %v4665_v25 = vmul.f32 %v4584_v47, %v1900_v41 }
 0xdb5   :  { %v1972_v50 = vpack.c.bf16 %v4665_v25, %v4665_v25 }
 0xdb6   :  { %v1904_v27 = vpop.permute.xlu0 %1903 }
 0xdb7   :  { %v4668_v14 = vmul.f32 %v4588_v10, %v1904_v27  ;;  %v1908_v61 = vpop.permute.xlu1 %1907  ;;  %v1988_v55 = vunpack.c.l.b16 %v1972_v50 }
 0xdb8   :  { %v4688_v41 = vmul.f32 %v4591_v0, %v1908_v61 }
 0xdb9   :  { %5532 = vst [vmem:[#allocation12_spill] sm:$0xff] %v4668_v14  ;;  %v1974_v2 = vpack.c.bf16 %v4668_v14, %v4668_v14  ;;  %v1996_v50 = vrot.slane %v1988_v55, 4 }
 0xdba   :  { %v1910_v3 = vpop.permute.xlu0 %1909  ;;  %5535 = vst [vmem:[#allocation15_spill] sm:$0xff] %v4688_v41 }
 0xdbb   :  { %v4675_v45 = vmul.f32 %v4595_v28, %v1910_v3  ;;  %v1902_v9 = vpop.permute.xlu1 %1901  ;;  %v1990_v47 = vunpack.c.l.b16 %v1974_v2 }
 0xdbc   :  { %v4678_v49 = vmul.f32 %v4599_v21, %v1902_v9 }
 0xdbd   :  { %5533 = vst [vmem:[#allocation13_spill] sm:$0xff] %v4675_v45  ;;  %v1977_v37 = vpack.c.bf16 %v4675_v45, %v4675_v45  ;;  %v1999_v3 = vrot.slane %v1990_v47, 2 }
 0xdbe   :  { %v1912_v29 = vpop.permute.xlu0 %1911  ;;  %v1973_v10 = vpack.c.bf16 %v4678_v49, %v4678_v49 }
 0xdbf   :  { %v4685_v40 = vmul.f32 %v4603_v20, %v1912_v29  ;;  %v1906_v28 = vpop.permute.xlu1 %1905  ;;  %v1993_v45 = vunpack.c.l.b16 %v1977_v37  ;;  %v1976_v20 = vpack.c.bf16 %v4688_v41, %v4688_v41 }
 0xdc0   :  { %v1989_v27 = vunpack.c.l.b16 %v1973_v10  ;;  %v4691_v21 = vmul.f32 %v4607_v32, %v1906_v28 }
 0xdc1   :  { %5534 = vst [vmem:[#allocation14_spill] sm:$0xff] %v4685_v40  ;;  %v1978_v2 = vpack.c.bf16 %v4685_v40, %v4685_v40  ;;  %v2004_v55 = vrot.slane %v1993_v45, 7  ;;  %v1992_v40 = vunpack.c.l.b16 %v1976_v20  ;;  %v3837_v20 = vld [vmem:[%s5491_s2] sm:$0xff]  }
 0xdc2   :  { %5536 = vst [vmem:[#allocation16_spill] sm:$0xff] %v4691_v21  ;;  %v1997_v9 = vrot.slane %v1989_v27, 3  ;;  %v1975_v14 = vpack.c.bf16 %v4691_v21, %v4691_v21 }
 0xdc3   :  { %v1914_v0 = vpop.permute.xlu1 %1913  ;;  %v1994_v61 = vunpack.c.l.b16 %v1978_v2 }
 0xdc4   :  { %v1998_v29 = vsel %vm530_vm2, %v1997_v9, %v1996_v50  ;;  %v1991_v10 = vunpack.c.l.b16 %v1975_v14  ;;  %v4701_v32 = vmul.f32 %v4612_v4, %v1914_v0 }
 0xdc5   :  { %v2000_v28 = vsel %vm533_vm3, %v1999_v3, %v1998_v29  ;;  %v2006_v37 = vrot.slane %v1994_v61, 6 }
 0xdc6   :  { %v2001_v47 = vrot.slane %v1991_v10, 1  ;;  %v1979_v27 = vpack.c.bf16 %v4701_v32, %v4701_v32 }
 0xdc8   :  { %v2002_v21 = vsel %vm536_vm4, %v2001_v47, %v2000_v28  ;;  %v1995_v41 = vunpack.c.l.b16 %v1979_v27 }
 0xdc9   :  { %v2003_v2 = vsel %vm539_vm5, %v1992_v40, %v2002_v21  ;;  %v3838_v40 = vld [vmem:[%s5491_s2 + $0x8] sm:$0xff]  }
 0xdca   :  { %v2005_v50 = vsel %vm542_vm6, %v2004_v55, %v2003_v2  ;;  %v2008_v14 = vrot.slane %v1995_v41, 5 }
 0xdcb   :  { %v2007_v4 = vsel %vm545_vm7, %v2006_v37, %v2005_v50 }
 0xdcc   :  { %v2009_v9 = vsel %vm548_vm8, %v2008_v14, %v2007_v4 }
 0xdcd   :  { %v2010_v3 = vpack.c.b16 %v2009_v9, %v2009_v9 }
 0xdcf   :  { %2011 = vrot.lane.b32.xlu0 %v2010_v3, %s3842_s3 }
 0xe41   :  { %v2012_v45 = vpop.permute.xlu0 %2011 }
 0xe42   :  { %3291 = vmatmul.mubr.msk.bf16.vlgmr.msra.gmra.mrb[12].mxu1 %vm22_vm0, %v2012_v45 }
 0xe43   :  { %3303 = vmatpush3.bf16.msra.mxu1 %v3837_v20  ;;  %3306 = vmatprep.mubr.msk.bf16.mxu1 %vm3840_vm1, %v5531_v8  ;;  %vm3084_vm1 = vcmask 260096  }
 0xe44   :  { %3304 = vmatprep.subr.bf16.mxu1 %v5531_v8 }
 0xe47   :  { %3305 = vmatpush3.bf16.msra.mxu1 %v3838_v40 }
 0xf15   :  { %v2050_v41 = vpop.f32.mrb[12].mxu1 }
 0xf16   :  { %v2057_v21 = vrot.slane %v2050_v41, 3  ;;  %v3292_v0 = vpop.f32.mrb[13].mxu1  ;;  %v2058_v28 = vrot.slane %v2050_v41, 4  ;;  %v2059_v47 = vrot.slane %v2050_v41, 5  ;;  %v2060_v55 = vrot.slane %v2050_v41, 6 }
 0xf17   :  { %v2053_v61 = vpop.f32.mrb[14].mxu1  ;;  %v2061_v37 = vrot.slane %v2050_v41, 7  ;;  %v2062_v2 = vrot.slane %v2050_v41, 1  ;;  %v2063_v9 = vrot.slane %v2050_v41, 2  ;;  %v2077_v45 = vadd.f32 %v2050_v41, %v3945_v39 }
 0xf18   :  { %v2072_v29 = vadd.f32 %v2057_v21, %v3931_v17  ;;  %v3293_v10 = vpop.f32.mrb[15].mxu1  ;;  %v2073_v27 = vadd.f32 %v2058_v28, %v3933_v24  ;;  %v2074_v8 = vadd.f32 %v2059_v47, %v3929_v16  ;;  %v2075_v50 = vadd.f32 %v2060_v55, %v3936_v26 }
 0xf19   :  { %v2076_v4 = vadd.f32 %v2061_v37, %v3941_v34  ;;  %v2078_v3 = vadd.f32 %v2062_v2, %v3943_v36  ;;  %v2079_v20 = vadd.f32 %v2063_v9, %v3949_v43 }
 0xf1a   :  { %3643 = vtanh.f32 %v2072_v29  ;;  %v3178_v47 = vmul.f32 -1.442695, %v2072_v29  ;;  %v3179_v55 = vmul.f32 -1.442695, %v2073_v27  ;;  %v3180_v37 = vmul.f32 -1.442695, %v2074_v8 }
 0xf1b   :  { %3645 = vtanh.f32 %v2073_v27  ;;  %v3181_v2 = vmul.f32 -1.442695, %v2075_v50  ;;  %v3182_v9 = vmul.f32 -1.442695, %v2076_v4 }
 0xf1c   :  { %3647 = vtanh.f32 %v2074_v8 }
 0xf1d   :  { %3649 = vtanh.f32 %v2075_v50 }
 0xf1e   :  { %3651 = vtanh.f32 %v2076_v4 }
 0xf1f   :  { %3653 = vtanh.f32 %v2078_v3 }
 0xf20   :  { %3655 = vtanh.f32 %v2077_v45 }
 0xf21   :  { %3657 = vtanh.f32 %v2079_v20 }
 0xf22   :  { %3659 = vpow2.f32 %v3178_v47 }
 0xf23   :  { %3661 = vpow2.f32 %v3179_v55 }
 0xf24   :  { %v3644_v14 = vpop.eup %3643  ;;  %3663 = vpow2.f32 %v3180_v37 }
 0xf25   :  { %2176 = vrot.lane.b32.xlu1 %v3644_v14, %s3841_s0  ;;  %v3646_v40 = vpop.eup %3645  ;;  %3665 = vpow2.f32 %v3181_v2 }
 0xf26   :  { %v3648_v21 = vpop.eup %3647  ;;  %2178 = vrot.lane.b32.xlu0 %v3646_v40, %s3841_s0  ;;  %v3184_v40 = vmul.f32 -1.442695, %v2078_v3  ;;  %3667 = vpow2.f32 %v3182_v9 }
 0xf27   :  { %v3650_v0 = vpop.eup %3649 }
 0xf28   :  { %v3652_v61 = vpop.eup %3651  ;;  %3669 = vpow2.f32 %v3184_v40 }
 0xf29   :  { %2180 = vrot.lane.b32.xlu1 %v3648_v21, %s3841_s0  ;;  %v3654_v10 = vpop.eup %3653 }
 0xf2a   :  { %2182 = vrot.lane.b32.xlu0 %v3650_v0, %s3841_s0  ;;  %v3656_v41 = vpop.eup %3655  ;;  %v3183_v0 = vmul.f32 -1.442695, %v2077_v45 }
 0xf2b   :  { %v3658_v28 = vpop.eup %3657 }
 0xf2c   :  { %v3660_v14 = vpop.eup %3659 }
 0xf2d   :  { %2184 = vrot.lane.b32.xlu1 %v3652_v61, %s3841_s0  ;;  %v2104_v21 = vadd.f32 1.0, %v3660_v14  ;;  %v3185_v61 = vmul.f32 -1.442695, %v2079_v20 }
 0xf2e   :  { %2188 = vrot.lane.b32.xlu0 %v3654_v10, %s3841_s0  ;;  %v3662_v10 = vpop.eup %3661 }
 0xf2f   :  { %3671 = vrcp.f32 %v2104_v21  ;;  %v2105_v29 = vadd.f32 1.0, %v3662_v10 }
 0xf30   :  { %3673 = vpow2.f32 %v3183_v0 }
 0xf31   :  { %2186 = vrot.lane.b32.xlu1 %v3656_v41, %s3841_s0  ;;  %v3664_v41 = vpop.eup %3663  ;;  %3675 = vpow2.f32 %v3185_v61 }
 0xf32   :  { %2190 = vrot.lane.b32.xlu0 %v3658_v28, %s3841_s0  ;;  %v3666_v27 = vpop.eup %3665  ;;  %v2106_v8 = vadd.f32 1.0, %v3664_v41  ;;  %3677 = vrcp.f32 %v2105_v29 }
 0xf33   :  { %v3668_v28 = vpop.eup %3667  ;;  %v2107_v47 = vadd.f32 1.0, %v3666_v27 }
 0xf34   :  { %v3670_v50 = vpop.eup %3669  ;;  %3679 = vrcp.f32 %v2106_v8  ;;  %v2108_v55 = vadd.f32 1.0, %v3668_v28 }
 0xf35   :  { %3681 = vrcp.f32 %v2107_v47  ;;  %v2110_v37 = vadd.f32 1.0, %v3670_v50 }
 0xf36   :  { %3683 = vrcp.f32 %v2108_v55 }
 0xf37   :  { %3685 = vrcp.f32 %v2110_v37 }
 0xf39   :  { %v4738_v4 = vpop.eup %3671 }
 0xf3a   :  { %v3674_v45 = vpop.eup %3673 }
 0xf3b   :  { %v3676_v2 = vpop.eup %3675  ;;  %v2109_v14 = vadd.f32 1.0, %v3674_v45 }
 0xf3c   :  { %v2111_v9 = vadd.f32 1.0, %v3676_v2  ;;  %v4742_v40 = vpop.eup %3677 }
 0xf3d   :  { %3687 = vrcp.f32 %v2109_v14 }
 0xf3e   :  { %v4744_v0 = vpop.eup %3679  ;;  %3689 = vrcp.f32 %v2111_v9 }
 0xf3f   :  { %v4749_v29 = vpop.eup %3681 }
 0xf40   :  { %v4752_v8 = vpop.eup %3683 }
 0xf97   :  { %v2177_v3 = vpop.permute.xlu1 %2176 }
 0xf98   :  { %v2200_v20 = vmul.f32 %v4738_v4, %v2177_v3  ;;  %v2179_v21 = vpop.permute.xlu0 %2178  ;;  %v4757_v3 = vpop.eup %3685 }
 0xf99   :  { %v2201_v61 = vmul.f32 %v4742_v40, %v2179_v21  ;;  %v4760_v45 = vpop.eup %3687 }
 0xf9a   :  { %2216 = vrot.lane.b32.xlu1 %v2200_v20, %s3841_s0  ;;  %v4765_v14 = vpop.eup %3689 }
 0xf9b   :  { %v2181_v10 = vpop.permute.xlu1 %2180  ;;  %2218 = vrot.lane.b32.xlu0 %v2201_v61, %s3841_s0  ;;  %v2144_v61 = vrot.slane %v4618_v18, 7 }
 0xf9c   :  { %v2202_v41 = vmul.f32 %v4744_v0, %v2181_v10  ;;  %v2183_v27 = vpop.permute.xlu0 %2182 }
 0xf9d   :  { %v2203_v28 = vmul.f32 %v4749_v29, %v2183_v27  ;;  %v2160_v10 = vmul.f32 %v4738_v4, %v2144_v61 }
 0xf9e   :  { %2220 = vrot.lane.b32.xlu1 %v2202_v41, %s3841_s0 }
 0xf9f   :  { %v2185_v50 = vpop.permute.xlu1 %2184  ;;  %2222 = vrot.lane.b32.xlu0 %v2203_v28, %s3841_s0  ;;  %v2145_v28 = vrot.slane %v4640_v7, 7 }
 0xfa0   :  { %v2204_v47 = vmul.f32 %v4752_v8, %v2185_v50  ;;  %v2189_v55 = vpop.permute.xlu0 %2188  ;;  %v2146_v50 = vrot.slane %v4626_v30, 7 }
 0xfa1   :  { %v2206_v20 = vmul.f32 %v4757_v3, %v2189_v55 }
 0xfa2   :  { %2224 = vrot.lane.b32.xlu1 %v2204_v47, %s3841_s0  ;;  %v2161_v47 = vmul.f32 %v4742_v40, %v2145_v28 }
 0xfa3   :  { %v2187_v37 = vpop.permute.xlu1 %2186  ;;  %2228 = vrot.lane.b32.xlu0 %v2206_v20, %s3841_s0  ;;  %v2162_v20 = vmul.f32 %v4744_v0, %v2146_v50 }
 0xfa4   :  { %v2205_v2 = vmul.f32 %v4760_v45, %v2187_v37  ;;  %v2191_v9 = vpop.permute.xlu0 %2190  ;;  %v2147_v37 = vrot.slane %v4649_v51, 7 }
 0xfa5   :  { %v2207_v21 = vmul.f32 %v4765_v14, %v2191_v9  ;;  %v2148_v9 = vrot.slane %v4629_v48, 7  ;;  %v2149_v48 = vrot.slane %v4637_v38, 7 }
 0xfa6   :  { %2226 = vrot.lane.b32.xlu1 %v2205_v2, %s3841_s0  ;;  %v2163_v7 = vmul.f32 %v4749_v29, %v2147_v37 }
 0xfa7   :  { %2230 = vrot.lane.b32.xlu0 %v2207_v21, %s3841_s0 }
0x100c   :  { %v2217_v41 = vpop.permute.xlu1 %2216 }
0x100d   :  { %v4772_v27 = vadd.f32 %v2217_v41, %v2160_v10  ;;  %v2219_v55 = vpop.permute.xlu0 %2218  ;;  %v2164_v10 = vmul.f32 %v4752_v8, %v2148_v9  ;;  %v2150_v41 = vrot.slane %v4646_v54, 7  ;;  %v2151_v54 = vrot.slane %v4655_v19, 7 }
0x100e   :  { %v4780_v2 = vadd.f32 %v2219_v55, %v2161_v47 }
0x100f   :  { %3691 = vtanh.f32 %v4772_v27  ;;  %v2166_v47 = vmul.f32 %v4757_v3, %v2150_v41  ;;  %v2167_v38 = vmul.f32 %v4765_v14, %v2151_v54 }
0x1010   :  { %v2221_v18 = vpop.permute.xlu1 %2220  ;;  %3693 = vtanh.f32 %v4780_v2 }
0x1011   :  { %v4783_v21 = vadd.f32 %v2221_v18, %v2162_v20  ;;  %v2223_v30 = vpop.permute.xlu0 %2222  ;;  %v2165_v20 = vmul.f32 %v4760_v45, %v2149_v48 }
0x1012   :  { %v4790_v51 = vadd.f32 %v2223_v30, %v2163_v7 }
0x1013   :  { %3695 = vtanh.f32 %v4783_v21 }
0x1014   :  { %v2225_v28 = vpop.permute.xlu1 %2224  ;;  %3697 = vtanh.f32 %v4790_v51 }
0x1015   :  { %v4794_v50 = vadd.f32 %v2225_v28, %v2164_v10  ;;  %v2229_v55 = vpop.permute.xlu0 %2228 }
0x1016   :  { %v4801_v37 = vadd.f32 %v2229_v55, %v2166_v47 }
0x1017   :  { %3699 = vtanh.f32 %v4794_v50 }
0x1018   :  { %v2227_v18 = vpop.permute.xlu1 %2226  ;;  %3701 = vtanh.f32 %v4801_v37 }
0x1019   :  { %v3692_v61 = vpop.eup %3691  ;;  %v4803_v9 = vadd.f32 %v2227_v18, %v2165_v20  ;;  %v2231_v7 = vpop.permute.xlu0 %2230 }
0x101a   :  { %2264 = vrot.lane.b32.xlu1 %v3692_v61, %s3841_s0  ;;  %v3694_v61 = vpop.eup %3693  ;;  %v4808_v30 = vadd.f32 %v2231_v7, %v2167_v38 }
0x101b   :  { %3703 = vtanh.f32 %v4803_v9  ;;  %2266 = vrot.lane.b32.xlu0 %v3694_v61, %s3841_s0 }
0x101c   :  { %3705 = vtanh.f32 %v4808_v30 }
0x101d   :  { %v3696_v10 = vpop.eup %3695 }
0x101e   :  { %2268 = vrot.lane.b32.xlu1 %v3696_v10, %s3841_s0  ;;  %v3698_v19 = vpop.eup %3697 }
0x101f   :  { %2270 = vrot.lane.b32.xlu0 %v3698_v19, %s3841_s0 }
0x1021   :  { %v3700_v41 = vpop.eup %3699 }
0x1022   :  { %2272 = vrot.lane.b32.xlu1 %v3700_v41, %s3841_s0  ;;  %v3702_v28 = vpop.eup %3701 }
0x1023   :  { %2276 = vrot.lane.b32.xlu0 %v3702_v28, %s3841_s0 }
0x1025   :  { %v3704_v48 = vpop.eup %3703 }
0x1026   :  { %2274 = vrot.lane.b32.xlu1 %v3704_v48, %s3841_s0  ;;  %v3706_v47 = vpop.eup %3705 }
0x1027   :  { %2278 = vrot.lane.b32.xlu0 %v3706_v47, %s3841_s0 }
0x108c   :  { %v2265_v55 = vpop.permute.xlu1 %2264 }
0x108d   :  { %v4819_v20 = vmul.f32 %v4738_v4, %v2265_v55  ;;  %v2267_v18 = vpop.permute.xlu0 %2266 }
0x108e   :  { %v4824_v38 = vmul.f32 %v4742_v40, %v2267_v18 }
0x108f   :  { %5537 = vst [vmem:[#allocation17_spill] sm:$0xff] %v4819_v20  ;;  %v2337_v54 = vpack.c.bf16 %v4819_v20, %v4819_v20 }
0x1090   :  { %5538 = vst [vmem:[#allocation18_spill] sm:$0xff] %v4824_v38  ;;  %v2269_v61 = vpop.permute.xlu1 %2268  ;;  %v2338_v19 = vpack.c.bf16 %v4824_v38, %v4824_v38 }
0x1091   :  { %v2353_v7 = vunpack.c.l.b16 %v2337_v54  ;;  %v4827_v10 = vmul.f32 %v4744_v0, %v2269_v61  ;;  %v2271_v41 = vpop.permute.xlu0 %2270 }
0x1092   :  { %v2354_v28 = vunpack.c.l.b16 %v2338_v19  ;;  %v4834_v47 = vmul.f32 %v4749_v29, %v2271_v41 }
0x1093   :  { %5539 = vst [vmem:[#allocation19_spill] sm:$0xff] %v4827_v10  ;;  %v2339_v4 = vpack.c.bf16 %v4827_v10, %v4827_v10  ;;  %v2361_v48 = vrot.slane %v2353_v7, 5 }
0x1094   :  { %5540 = vst [vmem:[#allocation20_spill] sm:$0xff] %v4834_v47  ;;  %v2273_v55 = vpop.permute.xlu1 %2272  ;;  %v2362_v18 = vrot.slane %v2354_v28, 4  ;;  %v2340_v0 = vpack.c.bf16 %v4834_v47, %v4834_v47 }
0x1095   :  { %v2355_v40 = vunpack.c.l.b16 %v2339_v4  ;;  %v4837_v54 = vmul.f32 %v4752_v8, %v2273_v55  ;;  %v2277_v20 = vpop.permute.xlu0 %2276 }
0x1096   :  { %v2363_v19 = vsel %vm530_vm2, %v2362_v18, %v2361_v48  ;;  %v2356_v7 = vunpack.c.l.b16 %v2340_v0  ;;  %v4845_v29 = vmul.f32 %v4757_v3, %v2277_v20 }
0x1097   :  { %5541 = vst [vmem:[#allocation21_spill] sm:$0xff] %v4837_v54  ;;  %v2364_v61 = vrot.slane %v2355_v40, 3  ;;  %v2341_v38 = vpack.c.bf16 %v4837_v54, %v4837_v54 }
0x1098   :  { %5542 = vst [vmem:[#allocation22_spill] sm:$0xff] %v4845_v29  ;;  %v2275_v41 = vpop.permute.xlu1 %2274  ;;  %v2366_v55 = vrot.slane %v2356_v7, 2  ;;  %v2343_v40 = vpack.c.bf16 %v4845_v29, %v4845_v29 }
0x1099   :  { %v2365_v4 = vsel %vm533_vm3, %v2364_v61, %v2363_v19  ;;  %v2357_v8 = vunpack.c.l.b16 %v2341_v38  ;;  %v4849_v28 = vmul.f32 %v4760_v45, %v2275_v41  ;;  %v2279_v47 = vpop.permute.xlu0 %2278 }
0x109a   :  { %v2359_v18 = vunpack.c.l.b16 %v2343_v40  ;;  %v2367_v3 = vsel %vm536_vm4, %v2366_v55, %v2365_v4  ;;  %v4857_v20 = vmul.f32 %v4765_v14, %v2279_v47 }
0x109b   :  { %5543 = vst [vmem:[#allocation23_spill] sm:$0xff] %v4849_v28  ;;  %v2368_v10 = vrot.slane %v2357_v8, 1  ;;  %v2342_v48 = vpack.c.bf16 %v4849_v28, %v4849_v28 }
0x109c   :  { %5544 = vst [vmem:[#allocation24_spill] sm:$0xff] %v4857_v20  ;;  %v2344_v45 = vpack.c.bf16 %v4857_v20, %v4857_v20  ;;  %v2371_v61 = vrot.slane %v2359_v18, 7 }
0x109d   :  { %v2369_v38 = vsel %vm539_vm5, %v2368_v10, %v2367_v3  ;;  %v2358_v0 = vunpack.c.l.b16 %v2342_v48 }
0x109e   :  { %v2360_v7 = vunpack.c.l.b16 %v2344_v45 }
0x109f   :  { %v2370_v19 = vsel %vm542_vm6, %v2358_v0, %v2369_v38 }
0x10a0   :  { %v2372_v41 = vsel %vm545_vm7, %v2371_v61, %v2370_v19  ;;  %v2373_v8 = vrot.slane %v2360_v7, 6 }
0x10a2   :  { %v2374_v40 = vsel %vm548_vm8, %v2373_v8, %v2372_v41 }
0x10a3   :  { %v2375_v29 = vpack.c.b16 %v2374_v40, %v2374_v40 }
0x10a5   :  { %2376 = vrot.lane.b32.xlu1 %v2375_v29, %s3842_s3 }
0x1117   :  { %v2377_v14 = vpop.permute.xlu1 %2376 }
0x1118   :  { %3299 = vmatmul.mubr.msk.bf16.vlgmr.msra.gmra.mrb[16].mxu0 %vm22_vm0, %v2377_v14 }
0x11eb   :  { %v2415_v10 = vpop.f32.mrb[16].mxu0 }
0x11ec   :  { %v2422_v47 = vrot.slane %v2415_v10, 2  ;;  %v3300_v4 = vpop.f32.mrb[17].mxu0  ;;  %v2423_v3 = vrot.slane %v2415_v10, 3  ;;  %v2424_v38 = vrot.slane %v2415_v10, 4  ;;  %v2425_v0 = vrot.slane %v2415_v10, 5 }
0x11ed   :  { %v2418_v55 = vpop.f32.mrb[18].mxu0  ;;  %v2426_v61 = vrot.slane %v2415_v10, 6  ;;  %v2427_v29 = vrot.slane %v2415_v10, 7  ;;  %v2428_v8 = vrot.slane %v2415_v10, 1  ;;  %v2443_v4 = vadd.f32 %v2415_v10, %v3943_v36 }
0x11ee   :  { %v2437_v48 = vadd.f32 %v2422_v47, %v3931_v17  ;;  %v3301_v18 = vpop.f32.mrb[19].mxu0  ;;  %v2438_v45 = vadd.f32 %v2423_v3, %v3933_v24  ;;  %v2439_v19 = vadd.f32 %v2424_v38, %v3929_v16  ;;  %v2440_v7 = vadd.f32 %v2425_v0, %v3936_v26 }
0x11ef   :  { %v2441_v40 = vadd.f32 %v2426_v61, %v3941_v34  ;;  %v2442_v14 = vadd.f32 %v2427_v29, %v3945_v39  ;;  %v2444_v47 = vadd.f32 %v2428_v8, %v3949_v43 }
0x11f0   :  { %3707 = vtanh.f32 %v2437_v48  ;;  %v3187_v29 = vmul.f32 -1.442695, %v2437_v48  ;;  %v3189_v8 = vmul.f32 -1.442695, %v2439_v19 }
0x11f1   :  { %3709 = vtanh.f32 %v2438_v45  ;;  %v3192_v54 = vmul.f32 -1.442695, %v2442_v14  ;;  %v3194_v20 = vmul.f32 -1.442695, %v2444_v47 }
0x11f2   :  { %3711 = vtanh.f32 %v2439_v19 }
0x11f3   :  { %3713 = vtanh.f32 %v2440_v7 }
0x11f4   :  { %3715 = vtanh.f32 %v2441_v40 }
0x11f5   :  { %3717 = vtanh.f32 %v2442_v14 }
0x11f6   :  { %3719 = vtanh.f32 %v2444_v47 }
0x11f7   :  { %3721 = vtanh.f32 %v2443_v4 }
0x11f8   :  { %3723 = vpow2.f32 %v3187_v29 }
0x11fa   :  { %v3708_v41 = vpop.eup %3707 }
0x11fb   :  { %2541 = vrot.lane.b32.xlu0 %v3708_v41, %s3841_s0  ;;  %v3710_v55 = vpop.eup %3709  ;;  %v3188_v41 = vmul.f32 -1.442695, %v2438_v45 }
0x11fc   :  { %v3712_v18 = vpop.eup %3711  ;;  %2543 = vrot.lane.b32.xlu1 %v3710_v55, %s3841_s0  ;;  %v3190_v55 = vmul.f32 -1.442695, %v2440_v7 }
0x11fd   :  { %v3714_v3 = vpop.eup %3713  ;;  %3725 = vpow2.f32 %v3188_v41 }
0x11fe   :  { %v3716_v38 = vpop.eup %3715  ;;  %3727 = vpow2.f32 %v3189_v8 }
0x11ff   :  { %2545 = vrot.lane.b32.xlu0 %v3712_v18, %s3841_s0  ;;  %v3718_v0 = vpop.eup %3717  ;;  %3729 = vpow2.f32 %v3190_v55 }
0x1200   :  { %2547 = vrot.lane.b32.xlu1 %v3714_v3, %s3841_s0  ;;  %v3720_v61 = vpop.eup %3719  ;;  %v3191_v3 = vmul.f32 -1.442695, %v2441_v40 }
0x1201   :  { %v3722_v10 = vpop.eup %3721 }
0x1202   :  { %v3724_v18 = vpop.eup %3723  ;;  %3731 = vpow2.f32 %v3191_v3 }
0x1203   :  { %2549 = vrot.lane.b32.xlu0 %v3716_v38, %s3841_s0  ;;  %v2469_v38 = vadd.f32 1.0, %v3724_v18  ;;  %3733 = vpow2.f32 %v3192_v54 }
0x1204   :  { %2551 = vrot.lane.b32.xlu1 %v3718_v0, %s3841_s0  ;;  %v3193_v0 = vmul.f32 -1.442695, %v2443_v4 }
0x1205   :  { %3735 = vrcp.f32 %v2469_v38 }
0x1206   :  { %3737 = vpow2.f32 %v3194_v20 }
0x1207   :  { %2555 = vrot.lane.b32.xlu0 %v3720_v61, %s3841_s0  ;;  %v3726_v61 = vpop.eup %3725  ;;  %3739 = vpow2.f32 %v3193_v0 }
0x1208   :  { %2553 = vrot.lane.b32.xlu1 %v3722_v10, %s3841_s0  ;;  %v3728_v10 = vpop.eup %3727  ;;  %v2470_v48 = vadd.f32 1.0, %v3726_v61 }
0x1209   :  { %v3730_v45 = vpop.eup %3729  ;;  %v2471_v19 = vadd.f32 1.0, %v3728_v10 }
0x120a   :  { %3741 = vrcp.f32 %v2470_v48  ;;  %v2472_v41 = vadd.f32 1.0, %v3730_v45 }
0x120b   :  { %3743 = vrcp.f32 %v2471_v19 }
0x120c   :  { %v3732_v29 = vpop.eup %3731  ;;  %3745 = vrcp.f32 %v2472_v41 }
0x120d   :  { %v3734_v7 = vpop.eup %3733  ;;  %v2473_v8 = vadd.f32 1.0, %v3732_v29 }
0x120e   :  { %v2474_v20 = vadd.f32 1.0, %v3734_v7 }
0x120f   :  { %v4883_v40 = vpop.eup %3735  ;;  %3747 = vrcp.f32 %v2473_v8 }
0x1210   :  { %v3738_v47 = vpop.eup %3737  ;;  %3749 = vrcp.f32 %v2474_v20 }
0x1211   :  { %v3740_v4 = vpop.eup %3739  ;;  %v2476_v55 = vadd.f32 1.0, %v3738_v47 }
0x1212   :  { %v2475_v18 = vadd.f32 1.0, %v3740_v4 }
0x1213   :  { %3751 = vrcp.f32 %v2476_v55 }
0x1214   :  { %v4887_v3 = vpop.eup %3741  ;;  %3753 = vrcp.f32 %v2475_v18 }
0x1215   :  { %v4889_v0 = vpop.eup %3743 }
0x1216   :  { %v4894_v45 = vpop.eup %3745 }
0x1219   :  { %v4897_v29 = vpop.eup %3747 }
0x121a   :  { %v4902_v8 = vpop.eup %3749 }
0x126d   :  { %v2542_v14 = vpop.permute.xlu0 %2541 }
0x126e   :  { %v2565_v54 = vmul.f32 %v4883_v40, %v2542_v14  ;;  %v2544_v38 = vpop.permute.xlu1 %2543 }
0x126f   :  { %v2566_v61 = vmul.f32 %v4887_v3, %v2544_v38 }
0x1270   :  { %2581 = vrot.lane.b32.xlu0 %v2565_v54, %s3841_s0  ;;  %v4905_v54 = vpop.eup %3751 }
0x1271   :  { %v2546_v10 = vpop.permute.xlu0 %2545  ;;  %2583 = vrot.lane.b32.xlu1 %v2566_v61, %s3841_s0  ;;  %v4910_v18 = vpop.eup %3753 }
0x1272   :  { %v2567_v48 = vmul.f32 %v4889_v0, %v2546_v10  ;;  %v2548_v19 = vpop.permute.xlu1 %2547  ;;  %v2509_v10 = vrot.slane %v4772_v27, 7 }
0x1273   :  { %v2568_v7 = vmul.f32 %v4894_v45, %v2548_v19 }
0x1274   :  { %2585 = vrot.lane.b32.xlu0 %v2567_v48, %s3841_s0  ;;  %v2525_v48 = vmul.f32 %v4883_v40, %v2509_v10 }
0x1275   :  { %v2550_v41 = vpop.permute.xlu0 %2549  ;;  %2587 = vrot.lane.b32.xlu1 %v2568_v7, %s3841_s0 }
0x1276   :  { %v2569_v14 = vmul.f32 %v4897_v29, %v2550_v41  ;;  %v2552_v47 = vpop.permute.xlu1 %2551  ;;  %v2510_v41 = vrot.slane %v4780_v2, 7 }
0x1277   :  { %v2570_v20 = vmul.f32 %v4902_v8, %v2552_v47 }
0x1278   :  { %2589 = vrot.lane.b32.xlu0 %v2569_v14, %s3841_s0  ;;  %v2511_v14 = vrot.slane %v4783_v21, 7  ;;  %v2526_v47 = vmul.f32 %v4887_v3, %v2510_v41  ;;  %v2514_v41 = vrot.slane %v4803_v9, 7  ;;  %v2515_v9 = vrot.slane %v4801_v37, 7 }
0x1279   :  { %v2556_v4 = vpop.permute.xlu0 %2555  ;;  %2591 = vrot.lane.b32.xlu1 %v2570_v20, %s3841_s0 }
0x127a   :  { %v2572_v55 = vmul.f32 %v4905_v54, %v2556_v4  ;;  %v2554_v38 = vpop.permute.xlu1 %2553  ;;  %v2527_v4 = vmul.f32 %v4889_v0, %v2511_v14 }
0x127b   :  { %v2571_v61 = vmul.f32 %v4910_v18, %v2554_v38 }
0x127c   :  { %2595 = vrot.lane.b32.xlu0 %v2572_v55, %s3841_s0  ;;  %v2512_v55 = vrot.slane %v4790_v51, 7 }
0x127d   :  { %2593 = vrot.lane.b32.xlu1 %v2571_v61, %s3841_s0  ;;  %v2513_v61 = vrot.slane %v4794_v50, 7  ;;  %v2516_v50 = vrot.slane %v4808_v30, 7  ;;  %v2531_v30 = vmul.f32 %v4910_v18, %v2515_v9 }
0x127e   :  { %v2528_v2 = vmul.f32 %v4894_v45, %v2512_v55 }
0x127f   :  { %v2532_v55 = vmul.f32 %v4905_v54, %v2516_v50 }
0x12e2   :  { %v2582_v19 = vpop.permute.xlu0 %2581 }
0x12e3   :  { %v4917_v7 = vadd.f32 %v2582_v19, %v2525_v48  ;;  %v2584_v20 = vpop.permute.xlu1 %2583  ;;  %v2529_v19 = vmul.f32 %v4897_v29, %v2513_v61 }
0x12e4   :  { %v4925_v38 = vadd.f32 %v2584_v20, %v2526_v47  ;;  %v2530_v20 = vmul.f32 %v4902_v8, %v2514_v41 }
0x12e5   :  { %3755 = vtanh.f32 %v4917_v7 }
0x12e6   :  { %v2586_v27 = vpop.permute.xlu0 %2585  ;;  %3757 = vtanh.f32 %v4925_v38 }
0x12e7   :  { %v4928_v10 = vadd.f32 %v2586_v27, %v2527_v4  ;;  %v2588_v21 = vpop.permute.xlu1 %2587 }
0x12e8   :  { %v4935_v51 = vadd.f32 %v2588_v21, %v2528_v2 }
0x12e9   :  { %3759 = vtanh.f32 %v4928_v10 }
0x12ea   :  { %v2590_v14 = vpop.permute.xlu0 %2589  ;;  %3761 = vtanh.f32 %v4935_v51 }
0x12eb   :  { %v4939_v47 = vadd.f32 %v2590_v14, %v2529_v19  ;;  %v2592_v4 = vpop.permute.xlu1 %2591 }
0x12ec   :  { %v4946_v27 = vadd.f32 %v2592_v4, %v2530_v20 }
0x12ed   :  { %3763 = vtanh.f32 %v4939_v47 }
0x12ee   :  { %v2596_v61 = vpop.permute.xlu0 %2595  ;;  %3765 = vtanh.f32 %v4946_v27 }
0x12ef   :  { %v3756_v48 = vpop.eup %3755  ;;  %v4948_v2 = vadd.f32 %v2596_v61, %v2532_v55 }
0x12f0   :  { %2629 = vrot.lane.b32.xlu0 %v3756_v48, %s3841_s0  ;;  %v2594_v48 = vpop.permute.xlu1 %2593  ;;  %v3758_v21 = vpop.eup %3757 }
0x12f1   :  { %3767 = vtanh.f32 %v4948_v2  ;;  %v4953_v19 = vadd.f32 %v2594_v48, %v2531_v30  ;;  %2631 = vrot.lane.b32.xlu1 %v3758_v21, %s3841_s0 }
0x12f3   :  { %v3760_v41 = vpop.eup %3759  ;;  %3769 = vtanh.f32 %v4953_v19 }
0x12f4   :  { %2633 = vrot.lane.b32.xlu0 %v3760_v41, %s3841_s0  ;;  %v3762_v37 = vpop.eup %3761 }
0x12f5   :  { %2635 = vrot.lane.b32.xlu1 %v3762_v37, %s3841_s0 }
0x12f7   :  { %v3764_v14 = vpop.eup %3763 }
0x12f8   :  { %2637 = vrot.lane.b32.xlu0 %v3764_v14, %s3841_s0  ;;  %v3766_v50 = vpop.eup %3765 }
0x12f9   :  { %2639 = vrot.lane.b32.xlu1 %v3766_v50, %s3841_s0 }
0x12fb   :  { %v3768_v20 = vpop.eup %3767 }
0x12fc   :  { %2643 = vrot.lane.b32.xlu0 %v3768_v20, %s3841_s0 }
0x12fd   :  { %v3770_v4 = vpop.eup %3769 }
0x12fe   :  { %2641 = vrot.lane.b32.xlu1 %v3770_v4, %s3841_s0 }
0x1362   :  { %v2630_v55 = vpop.permute.xlu0 %2629 }
0x1363   :  { %v4964_v9 = vmul.f32 %v4883_v40, %v2630_v55  ;;  %v2632_v30 = vpop.permute.xlu1 %2631 }
0x1364   :  { %v4969_v48 = vmul.f32 %v4887_v3, %v2632_v30 }
0x1365   :  { %5545 = vst [vmem:[#allocation25_spill] sm:$0xff] %v4964_v9  ;;  %v2702_v61 = vpack.c.bf16 %v4964_v9, %v4964_v9 }
0x1366   :  { %5546 = vst [vmem:[#allocation26_spill] sm:$0xff] %v4969_v48  ;;  %v2634_v41 = vpop.permute.xlu0 %2633  ;;  %v2703_v14 = vpack.c.bf16 %v4969_v48, %v4969_v48 }
0x1367   :  { %v2718_v21 = vunpack.c.l.b16 %v2702_v61  ;;  %v4972_v37 = vmul.f32 %v4889_v0, %v2634_v41  ;;  %v2636_v50 = vpop.permute.xlu1 %2635 }
0x1368   :  { %v2719_v20 = vunpack.c.l.b16 %v2703_v14  ;;  %v4979_v55 = vmul.f32 %v4894_v45, %v2636_v50 }
0x1369   :  { %5547 = vst [vmem:[#allocation27_spill] sm:$0xff] %v4972_v37  ;;  %v2704_v40 = vpack.c.bf16 %v4972_v37, %v4972_v37  ;;  %v2726_v4 = vrot.slane %v2718_v21, 6 }
0x136a   :  { %5548 = vst [vmem:[#allocation28_spill] sm:$0xff] %v4979_v55  ;;  %v2638_v9 = vpop.permute.xlu0 %2637  ;;  %v2727_v30 = vrot.slane %v2719_v20, 5  ;;  %v2705_v0 = vpack.c.bf16 %v4979_v55, %v4979_v55 }
0x136b   :  { %v2720_v3 = vunpack.c.l.b16 %v2704_v40  ;;  %v4982_v61 = vmul.f32 %v4897_v29, %v2638_v9  ;;  %v2640_v48 = vpop.permute.xlu1 %2639 }
0x136c   :  { %v2728_v14 = vsel %vm530_vm2, %v2727_v30, %v2726_v4  ;;  %v2721_v21 = vunpack.c.l.b16 %v2705_v0  ;;  %v4990_v45 = vmul.f32 %v4902_v8, %v2640_v48 }
0x136d   :  { %5549 = vst [vmem:[#allocation29_spill] sm:$0xff] %v4982_v61  ;;  %v2729_v41 = vrot.slane %v2720_v3, 4  ;;  %v2706_v28 = vpack.c.bf16 %v4982_v61, %v4982_v61 }
0x136e   :  { %v2644_v50 = vpop.permute.xlu0 %2643  ;;  %v2731_v20 = vrot.slane %v2721_v21, 3  ;;  %v2707_v3 = vpack.c.bf16 %v4990_v45, %v4990_v45 }
0x136f   :  { %v2730_v40 = vsel %vm533_vm3, %v2729_v41, %v2728_v14  ;;  %v2722_v29 = vunpack.c.l.b16 %v2706_v28  ;;  %v4994_v9 = vmul.f32 %v4905_v54, %v2644_v50 }
0x1370   :  { %v2642_v55 = vpop.permute.xlu1 %2641  ;;  %v2723_v30 = vunpack.c.l.b16 %v2707_v3  ;;  %v2732_v8 = vsel %vm536_vm4, %v2731_v20, %v2730_v40 }
0x1371   :  { %v2733_v37 = vrot.slane %v2722_v29, 2  ;;  %v2709_v4 = vpack.c.bf16 %v4994_v9, %v4994_v9  ;;  %v5002_v48 = vmul.f32 %v4910_v18, %v2642_v55 }
0x1372   :  { %v2735_v54 = vrot.slane %v2723_v30, 1 }
0x1373   :  { %v2734_v28 = vsel %vm539_vm5, %v2733_v37, %v2732_v8  ;;  %v2725_v0 = vunpack.c.l.b16 %v2709_v4  ;;  %v2708_v41 = vpack.c.bf16 %v5002_v48, %v5002_v48 }
0x1374   :  { %v2736_v50 = vsel %vm542_vm6, %v2735_v54, %v2734_v28 }
0x1375   :  { %v2738_v14 = vrot.slane %v2725_v0, 7  ;;  %v2724_v21 = vunpack.c.l.b16 %v2708_v41 }
0x1377   :  { %v2737_v29 = vsel %vm545_vm7, %v2724_v21, %v2736_v50 }
0x1378   :  { %v2739_v3 = vsel %vm548_vm8, %v2738_v14, %v2737_v29 }
0x1379   :  { %v2740_v61 = vpack.c.b16 %v2739_v3, %v2739_v3 }
0x137b   :  { %2741 = vrot.lane.b32.xlu0 %v2740_v61, %s3842_s3 }
0x13ed   :  { %v2742_v18 = vpop.permute.xlu0 %2741 }
0x13ee   :  { %3307 = vmatmul.mubr.msk.bf16.vlgmr.msra.gmra.mrb[16].mxu1 %vm22_vm0, %v2742_v18  ;;  %vm3058_vm0 = vcmask 261127  }
0x14c1   :  { %v2780_v37 = vpop.f32.mrb[16].mxu1 }
0x14c2   :  { %v3308_v55 = vpop.f32.mrb[17].mxu1  ;;  %v2788_v4 = vrot.slane %v2780_v37, 2  ;;  %v2789_v30 = vrot.slane %v2780_v37, 3  ;;  %v2790_v8 = vrot.slane %v2780_v37, 4  ;;  %v2791_v28 = vrot.slane %v2780_v37, 5 }
0x14c3   :  { %v2783_v40 = vpop.f32.mrb[18].mxu1  ;;  %v2792_v41 = vrot.slane %v2780_v37, 6  ;;  %v2793_v61 = vrot.slane %v2780_v37, 7  ;;  %v2787_v29 = vrot.slane %v2780_v37, 1 }
0x14c4   :  { %v3309_v20 = vpop.f32.mrb[19].mxu1  ;;  %v2803_v0 = vadd.f32 %v2788_v4, %v3933_v24  ;;  %v2804_v54 = vadd.f32 %v2789_v30, %v3929_v16  ;;  %v2805_v14 = vadd.f32 %v2790_v8, %v3936_v26  ;;  %v2806_v21 = vadd.f32 %v2791_v28, %v3941_v34 }
0x14c5   :  { %v2807_v50 = vadd.f32 %v2792_v41, %v3945_v39  ;;  %v2808_v3 = vadd.f32 %v2793_v61, %v3943_v36  ;;  %v2809_v24 = vadd.f32 %v2780_v37, %v3949_v43  ;;  %v2802_v16 = vadd.f32 %v2787_v29, %v3931_v17 }
0x14c6   :  { %3771 = vtanh.f32 %v2803_v0  ;;  %v3197_v20 = vmul.f32 -1.442695, %v2803_v0  ;;  %v3199_v4 = vmul.f32 -1.442695, %v2805_v14 }
0x14c7   :  { %3773 = vtanh.f32 %v2804_v54  ;;  %v3203_v55 = vmul.f32 -1.442695, %v2809_v24  ;;  %v3196_v40 = vmul.f32 -1.442695, %v2802_v16 }
0x14c8   :  { %3775 = vtanh.f32 %v2805_v14 }
0x14c9   :  { %3777 = vtanh.f32 %v2806_v21 }
0x14ca   :  { %3779 = vtanh.f32 %v2807_v50 }
0x14cb   :  { %3781 = vtanh.f32 %v2808_v3 }
0x14cc   :  { %3783 = vtanh.f32 %v2809_v24 }
0x14cd   :  { %3785 = vtanh.f32 %v2802_v16 }
0x14d0   :  { %v3772_v18 = vpop.eup %3771 }
0x14d1   :  { %v3774_v26 = vpop.eup %3773  ;;  %2908 = vrot.lane.b32.xlu1 %v3772_v18, %s3841_s0 }
0x14d2   :  { %2910 = vrot.lane.b32.xlu0 %v3774_v26, %s3841_s0  ;;  %v3776_v34 = vpop.eup %3775 }
0x14d3   :  { %v3778_v39 = vpop.eup %3777 }
0x14d4   :  { %v3780_v36 = vpop.eup %3779 }
0x14d5   :  { %2912 = vrot.lane.b32.xlu1 %v3776_v34, %s3841_s0  ;;  %v3782_v43 = vpop.eup %3781 }
0x14d6   :  { %2914 = vrot.lane.b32.xlu0 %v3778_v39, %s3841_s0  ;;  %v3784_v17 = vpop.eup %3783 }
0x14d7   :  { %v3786_v37 = vpop.eup %3785 }
0x14d9   :  { %2916 = vrot.lane.b32.xlu1 %v3780_v36, %s3841_s0 }
0x14da   :  { %2918 = vrot.lane.b32.xlu0 %v3782_v43, %s3841_s0 }
0x14dd   :  { %2920 = vrot.lane.b32.xlu1 %v3784_v17, %s3841_s0 }
0x14de   :  { %2906 = vrot.lane.b32.xlu0 %v3786_v37, %s3841_s0 }
0x14e1   :  { %472 = vrot.lane.b32.xlu1 %v4055_v53, %s3842_s3  ;;  %v3198_v53 = vmul.f32 -1.442695, %v2804_v54 }
0x14e2   :  { %474 = vrot.lane.b32.xlu0 %v4065_v62, %s3842_s3  ;;  %v3200_v62 = vmul.f32 -1.442695, %v2806_v21 }
0x14e3   :  { %3787 = vpow2.f32 %v3198_v53 }
0x14e4   :  { %3789 = vpow2.f32 %v3200_v62 }
0x14e5   :  { %476 = vrot.lane.b32.xlu1 %v4052_v52, %s3842_s3  ;;  %v3202_v52 = vmul.f32 -1.442695, %v2808_v3 }
0x14e6   :  { %478 = vrot.lane.b32.xlu0 %v4058_v58, %s3842_s3 }
0x14e7   :  { %3791 = vpow2.f32 %v3202_v52 }
0x14e8   :  { %3793 = vpow2.f32 %v3203_v55 }
0x14e9   :  { %480 = vrot.lane.b32.xlu1 %v4072_v6, %s3842_s3  ;;  %3795 = vpow2.f32 %v3196_v40 }
0x14ea   :  { %482 = vrot.lane.b32.xlu0 %v4077_v11, %s3842_s3  ;;  %3797 = vpow2.f32 %v3197_v20 }
0x14ed   :  { %484 = vrot.lane.b32.xlu1 %v4083_v22, %s3842_s3  ;;  %v3788_v58 = vpop.eup %3787 }
0x14ee   :  { %486 = vrot.lane.b32.xlu0 %v4090_v33, %s3842_s3  ;;  %v2836_v6 = vadd.f32 1.0, %v3788_v58  ;;  %v3790_v11 = vpop.eup %3789  ;;  %v3201_v33 = vmul.f32 -1.442695, %v2807_v50 }
0x14ef   :  { %v2838_v22 = vadd.f32 1.0, %v3790_v11 }
0x14f0   :  { %3799 = vrcp.f32 %v2836_v6 }
0x14f1   :  { %v3792_v30 = vpop.eup %3791  ;;  %3801 = vpow2.f32 %v3199_v4 }
0x14f2   :  { %v3794_v8 = vpop.eup %3793  ;;  %3803 = vrcp.f32 %v2838_v22  ;;  %v2840_v28 = vadd.f32 1.0, %v3792_v30 }
0x14f3   :  { %v3796_v54 = vpop.eup %3795  ;;  %3805 = vpow2.f32 %v3201_v33  ;;  %v2841_v41 = vadd.f32 1.0, %v3794_v8 }
0x14f4   :  { %v3798_v61 = vpop.eup %3797  ;;  %3807 = vrcp.f32 %v2840_v28  ;;  %v2834_v0 = vadd.f32 1.0, %v3796_v54 }
0x14f5   :  { %v2835_v24 = vadd.f32 1.0, %v3798_v61  ;;  %3809 = vrcp.f32 %v2841_v41 }
0x14f6   :  { %3811 = vrcp.f32 %v2834_v0 }
0x14f7   :  { %3813 = vrcp.f32 %v2835_v24  ;;  %v2881_v24 = vrot.slane %v4948_v2, 7 }
0x14fa   :  { %v5044_v29 = vpop.eup %3799 }
0x14fb   :  { %v3802_v16 = vpop.eup %3801 }
0x14fc   :  { %v5048_v18 = vpop.eup %3803  ;;  %v2837_v39 = vadd.f32 1.0, %v3802_v16 }
0x14fd   :  { %v3806_v36 = vpop.eup %3805 }
0x14fe   :  { %v5052_v17 = vpop.eup %3807  ;;  %3815 = vrcp.f32 %v2837_v39  ;;  %v2839_v62 = vadd.f32 1.0, %v3806_v36 }
0x14ff   :  { %v5055_v52 = vpop.eup %3809 }
0x1500   :  { %v5058_v40 = vpop.eup %3811  ;;  %3817 = vrcp.f32 %v2839_v62 }
0x1501   :  { %v5063_v11 = vpop.eup %3813 }
0x1508   :  { %v5076_v33 = vpop.eup %3815 }
0x150a   :  { %v5090_v41 = vpop.eup %3817 }
0x1543   :  { %v2909_v21 = vpop.permute.xlu1 %2908 }
0x1544   :  { %v2911_v3 = vpop.permute.xlu0 %2910  ;;  %v2931_v22 = vmul.f32 %v5063_v11, %v2909_v21 }
0x1545   :  { %v2932_v14 = vmul.f32 %v5044_v29, %v2911_v3 }
0x1547   :  { %2950 = vrot.lane.b32.xlu0 %v2932_v14, %s3841_s0  ;;  %v2913_v50 = vpop.permute.xlu1 %2912  ;;  %v2880_v14 = vrot.slane %v4953_v19, 7 }
0x1548   :  { %v2915_v26 = vpop.permute.xlu0 %2914  ;;  %v2933_v28 = vmul.f32 %v5076_v33, %v2913_v50  ;;  %v2874_v50 = vrot.slane %v4917_v7, 7  ;;  %v2877_v7 = vrot.slane %v4935_v51, 7  ;;  %v2879_v51 = vrot.slane %v4946_v27, 7 }
0x1549   :  { %v2934_v34 = vmul.f32 %v5048_v18, %v2915_v26 }
0x154b   :  { %2954 = vrot.lane.b32.xlu0 %v2934_v34, %s3841_s0  ;;  %v2917_v43 = vpop.permute.xlu1 %2916  ;;  %v2875_v34 = vrot.slane %v4925_v38, 7 }
0x154c   :  { %v2919_v37 = vpop.permute.xlu0 %2918  ;;  %v2935_v61 = vmul.f32 %v5090_v41, %v2917_v43 }
0x154d   :  { %v2936_v53 = vmul.f32 %v5052_v17, %v2919_v37  ;;  %v2890_v37 = vmul.f32 %v5058_v40, %v2874_v50  ;;  %v2891_v2 = vmul.f32 %v5063_v11, %v2875_v34 }
0x154f   :  { %2958 = vrot.lane.b32.xlu0 %v2936_v53, %s3841_s0  ;;  %v2921_v55 = vpop.permute.xlu1 %2920 }
0x1550   :  { %v2937_v58 = vmul.f32 %v5055_v52, %v2921_v55  ;;  %v2907_v20 = vpop.permute.xlu0 %2906 }
0x1551   :  { %v2930_v6 = vmul.f32 %v5058_v40, %v2907_v20 }
0x1552   :  { %2960 = vrot.lane.b32.xlu1 %v2937_v58, %s3841_s0 }
0x1553   :  { %2946 = vrot.lane.b32.xlu0 %v2930_v6, %s3841_s0  ;;  %v473_v4 = vpop.permute.xlu1 %472  ;;  %v2893_v6 = vmul.f32 %v5076_v33, %v2877_v7 }
0x1554   :  { %497 = vst.msk [vmem:[%s5494_s4] sm:$0x1] %vm496_vm9, %v473_v4  ;;  %v475_v30 = vpop.permute.xlu0 %474 }
0x1555   :  { %498 = vst.msk [vmem:[%s5494_s4 + $0x8] sm:$0x1] %vm496_vm9, %v475_v30 }
0x1556   :  { %2948 = vrot.lane.b32.xlu1 %v2931_v22, %s3841_s0 }
0x1557   :  { %846 = vrot.lane.b32.xlu0 %v4206_v60, %s3842_s3  ;;  %v477_v8 = vpop.permute.xlu1 %476 }
0x1558   :  { %499 = vst.msk [vmem:[%s5494_s4 + $0x10] sm:$0x1] %vm496_vm9, %v477_v8  ;;  %v479_v54 = vpop.permute.xlu0 %478 }
0x1559   :  { %500 = vst.msk [vmem:[%s5494_s4 + $0x18] sm:$0x1] %vm496_vm9, %v479_v54  ;;  %v5558_v54 = vld [vmem:[#allocation16_spill] sm:$0xff] }
0x155a   :  { %2952 = vrot.lane.b32.xlu1 %v2933_v28, %s3841_s0 }
0x155b   :  { %850 = vrot.lane.b32.xlu0 %v4214_v5, %s3842_s3  ;;  %v481_v60 = vpop.permute.xlu1 %480 }
0x155c   :  { %501 = vst.msk [vmem:[%s5494_s4 + $0x20] sm:$0x1] %vm496_vm9, %v481_v60  ;;  %v483_v0 = vpop.permute.xlu0 %482  ;;  %v2895_v60 = vmul.f32 %v5090_v41, %v2879_v51 }
0x155d   :  { %502 = vst.msk [vmem:[%s5494_s4 + $0x28] sm:$0x1] %vm496_vm9, %v483_v0 }
0x155e   :  { %2956 = vrot.lane.b32.xlu1 %v2935_v61, %s3841_s0 }
0x155f   :  { %854 = vrot.lane.b32.xlu0 %v4226_v44, %s3842_s3  ;;  %v485_v5 = vpop.permute.xlu1 %484  ;;  %v5553_v44 = vld [vmem:[#allocation5_spill] sm:$0xff] }
0x1560   :  { %503 = vst.msk [vmem:[%s5494_s4 + $0x30] sm:$0x1] %vm496_vm9, %v485_v5  ;;  %v487_v21 = vpop.permute.xlu0 %486 }
0x1561   :  { %504 = vst.msk [vmem:[%s5494_s4 + $0x38] sm:$0x1] %vm496_vm9, %v487_v21 }
0x1562   :  { %844 = vrot.lane.b32.xlu1 %v4211_v63, %s3842_s3  ;;  %v5551_v63 = vld [vmem:[#allocation4_spill] sm:$0xff] }
0x1563   :  { %858 = vrot.lane.b32.xlu0 %v4238_v46, %s3842_s3  ;;  %v5555_v46 = vld [vmem:[#allocation9_spill] sm:$0xff] }
0x1566   :  { %848 = vrot.lane.b32.xlu1 %v4203_v59, %s3842_s3  ;;  %v5550_v59 = vld [vmem:[#allocation8_spill] sm:$0xff] }
0x1567   :  { %1211 = vrot.lane.b32.xlu0 %v4377_v56, %s3842_s3 }
0x156a   :  { %852 = vrot.lane.b32.xlu1 %v4223_v13, %s3842_s3  ;;  %v5552_v13 = vld [vmem:[#allocation7_spill] sm:$0xff] }
0x156b   :  { %1215 = vrot.lane.b32.xlu0 %v4367_v23, %s3842_s3  ;;  %v5557_v23 = vld [vmem:[#allocation11_spill] sm:$0xff] }
0x156e   :  { %856 = vrot.lane.b32.xlu1 %v4234_v35, %s3842_s3  ;;  %v5554_v35 = vld [vmem:[#allocation10_spill] sm:$0xff] }
0x156f   :  { %1219 = vrot.lane.b32.xlu0 %v4389_v12, %s3842_s3  ;;  %v2878_v12 = vrot.slane %v4939_v47, 7 }
0x1572   :  { %1209 = vrot.lane.b32.xlu1 %v4364_v1, %s3842_s3  ;;  %v5556_v1 = vld [vmem:[#allocation6_spill] sm:$0xff] }
0x1573   :  { %1223 = vrot.lane.b32.xlu0 %v4400_v42, %s3842_s3 }
0x1576   :  { %1213 = vrot.lane.b32.xlu1 %v4372_v15, %s3842_s3  ;;  %v2876_v15 = vrot.slane %v4928_v10, 7  ;;  %v2897_v10 = vmul.f32 %v5055_v52, %v2881_v24 }
0x1577   :  { %1576 = vrot.lane.b32.xlu0 %v4515_v31, %s3842_s3  ;;  %v2894_v31 = vmul.f32 %v5048_v18, %v2878_v12 }
0x1578   :  { %v2892_v56 = vmul.f32 %v5044_v29, %v2876_v15 }
0x157a   :  { %1217 = vrot.lane.b32.xlu1 %v4380_v57, %s3842_s3 }
0x157b   :  { %1580 = vrot.lane.b32.xlu0 %v5550_v59, %s3842_s3 }
0x157e   :  { %1221 = vrot.lane.b32.xlu1 %v5551_v63, %s3842_s3 }
0x157f   :  { %1584 = vrot.lane.b32.xlu0 %v5552_v13, %s3842_s3 }
0x1582   :  { %1574 = vrot.lane.b32.xlu1 %v5553_v44, %s3842_s3 }
0x1583   :  { %1588 = vrot.lane.b32.xlu0 %v5554_v35, %s3842_s3 }
0x1586   :  { %1578 = vrot.lane.b32.xlu1 %v5555_v46, %s3842_s3 }
0x1587   :  { %1941 = vrot.lane.b32.xlu0 %v4678_v49, %s3842_s3 }
0x158a   :  { %1582 = vrot.lane.b32.xlu1 %v5556_v1, %s3842_s3 }
0x158e   :  { %1586 = vrot.lane.b32.xlu1 %v5557_v23, %s3842_s3 }
0x1592   :  { %1939 = vrot.lane.b32.xlu1 %v4665_v25, %s3842_s3  ;;  %v2896_v25 = vmul.f32 %v5052_v17, %v2880_v14  ;;  %v5559_v14 = vld [vmem:[#allocation13_spill] sm:$0xff] }
0x15b9   :  { %v2951_v57 = vpop.permute.xlu0 %2950 }
0x15ba   :  { %v2972_v42 = vadd.f32 %v2951_v57, %v2892_v56 }
0x15bc   :  { %3819 = vtanh.f32 %v2972_v42  ;;  %v3095_v58 = vrot.slane %v2972_v42, 6 }
0x15bd   :  { %v2955_v49 = vpop.permute.xlu0 %2954 }
0x15be   :  { %v2974_v3 = vadd.f32 %v2955_v49, %v2894_v31 }
0x15c0   :  { %3821 = vtanh.f32 %v2974_v3  ;;  %v3099_v61 = vrot.slane %v2974_v3, 4 }
0x15c1   :  { %v2959_v16 = vpop.permute.xlu0 %2958 }
0x15c2   :  { %v2976_v26 = vadd.f32 %v2959_v16, %v2896_v25 }
0x15c4   :  { %v2961_v47 = vpop.permute.xlu1 %2960  ;;  %v3103_v35 = vrot.slane %v2976_v26, 2 }
0x15c5   :  { %v2977_v39 = vadd.f32 %v2961_v47, %v2897_v10  ;;  %v2947_v36 = vpop.permute.xlu0 %2946  ;;  %v5561_v47 = vld [vmem:[#allocation18_spill] sm:$0xff] }
0x15c6   :  { %v3820_v43 = vpop.eup %3819  ;;  %v5173_v19 = vadd.f32 %v2947_v36, %v2890_v37  ;;  %v5563_v36 = vld [vmem:[#allocation20_spill] sm:$0xff] }
0x15c7   :  { %3823 = vtanh.f32 %v2977_v39  ;;  %2998 = vrot.lane.b32.xlu0 %v3820_v43, %s3841_s0  ;;  %v3105_v23 = vrot.slane %v2977_v39, 1  ;;  %v5562_v39 = vld [vmem:[#allocation15_spill] sm:$0xff] }
0x15c8   :  { %3825 = vtanh.f32 %v2976_v26  ;;  %v2949_v53 = vpop.permute.xlu1 %2948  ;;  %v5560_v26 = vld [vmem:[#allocation12_spill] sm:$0xff] }
0x15c9   :  { %v2971_v62 = vadd.f32 %v2949_v53, %v2891_v2  ;;  %v847_v55 = vpop.permute.xlu0 %846  ;;  %v5564_v2 = vld [vmem:[#allocation14_spill] sm:$0xff]  ;;  %v5565_v53 = vld [vmem:[#allocation23_spill] sm:$0xff] }
0x15ca   :  { %v3822_v38 = vpop.eup %3821  ;;  %870 = vst.msk [vmem:[%s5494_s4 + $0x8] sm:$0x2] %vm868_vm10, %v847_v55  ;;  %v5566_v55 = vld [vmem:[#allocation17_spill] sm:$0xff] }
0x15cb   :  { %3827 = vtanh.f32 %v2971_v62  ;;  %v3094_v20 = vrot.slane %v2971_v62, 7  ;;  %3002 = vrot.lane.b32.xlu0 %v3822_v38, %s3841_s0  ;;  %v5567_v38 = vld [vmem:[#allocation24_spill] sm:$0xff] }
0x15cc   :  { %3829 = vtanh.f32 %v5173_v19  ;;  %v2953_v4 = vpop.permute.xlu1 %2952 }
0x15cd   :  { %v3096_v22 = vsel %vm530_vm2, %v3095_v58, %v3094_v20  ;;  %v2973_v30 = vadd.f32 %v2953_v4, %v2893_v6  ;;  %v851_v8 = vpop.permute.xlu0 %850  ;;  %v5568_v6 = vld [vmem:[#allocation19_spill] sm:$0xff]  ;;  %v5569_v4 = vld [vmem:[#allocation26_spill] sm:$0xff] }
0x15ce   :  { %872 = vst.msk [vmem:[%s5494_s4 + $0x18] sm:$0x2] %vm868_vm10, %v851_v8  ;;  %v5571_v8 = vld [vmem:[#allocation28_spill] sm:$0xff] }
0x15cf   :  { %3831 = vtanh.f32 %v2973_v30  ;;  %v3097_v28 = vrot.slane %v2973_v30, 5  ;;  %1945 = vrot.lane.b32.xlu0 %v5558_v54, %s3842_s3  ;;  %v5570_v30 = vld [vmem:[#allocation21_spill] sm:$0xff] }
0x15d0   :  { %v2957_v0 = vpop.permute.xlu1 %2956 }
0x15d1   :  { %v3824_v5 = vpop.eup %3823  ;;  %v3098_v27 = vsel %vm533_vm3, %v3097_v28, %v3096_v22  ;;  %v2975_v21 = vadd.f32 %v2957_v0, %v2895_v60  ;;  %v855_v59 = vpop.permute.xlu0 %854  ;;  %v5572_v60 = vld [vmem:[#allocation22_spill] sm:$0xff]  ;;  %v5573_v0 = vld [vmem:[#allocation25_spill] sm:$0xff] }
0x15d2   :  { %v3826_v63 = vpop.eup %3825  ;;  %v3100_v13 = vsel %vm536_vm4, %v3099_v61, %v3098_v27  ;;  %874 = vst.msk [vmem:[%s5494_s4 + $0x28] sm:$0x2] %vm868_vm10, %v855_v59  ;;  %3008 = vrot.lane.b32.xlu1 %v3824_v5, %s3841_s0 }
0x15d3   :  { %3833 = vtanh.f32 %v2975_v21  ;;  %v3101_v44 = vrot.slane %v2975_v21, 3  ;;  %3006 = vrot.lane.b32.xlu0 %v3826_v63, %s3841_s0  ;;  %v5575_v21 = vld [vmem:[#allocation29_spill] sm:$0xff] }
0x15d4   :  { %v845_v46 = vpop.permute.xlu1 %844 }
0x15d5   :  { %v3828_v1 = vpop.eup %3827  ;;  %v3102_v15 = vsel %vm539_vm5, %v3101_v44, %v3100_v13  ;;  %869 = vst.msk [vmem:[%s5494_s4] sm:$0x2] %vm868_vm10, %v845_v46  ;;  %v859_v56 = vpop.permute.xlu0 %858 }
0x15d6   :  { %v3830_v57 = vpop.eup %3829  ;;  %876 = vst.msk [vmem:[%s5494_s4 + $0x38] sm:$0x2] %vm868_vm10, %v859_v56  ;;  %2996 = vrot.lane.b32.xlu1 %v3828_v1, %s3841_s0  ;;  %v3104_v12 = vsel %vm542_vm6, %v3103_v35, %v3102_v15 }
0x15d7   :  { %2994 = vrot.lane.b32.xlu0 %v3830_v57, %s3841_s0  ;;  %v5213_v42 = vsel %vm545_vm7, %v3105_v23, %v3104_v12 }
0x15d8   :  { %v849_v31 = vpop.permute.xlu1 %848 }
0x15d9   :  { %v3832_v49 = vpop.eup %3831  ;;  %871 = vst.msk [vmem:[%s5494_s4 + $0x10] sm:$0x2] %vm868_vm10, %v849_v31  ;;  %v1212_v3 = vpop.permute.xlu0 %1211 }
0x15da   :  { %1235 = vst.msk [vmem:[%s5494_s4 + $0x8] sm:$0x4] %vm1233_vm11, %v1212_v3  ;;  %3000 = vrot.lane.b32.xlu1 %v3832_v49, %s3841_s0 }
0x15db   :  { %1949 = vrot.lane.b32.xlu0 %v5559_v14, %s3842_s3 }
0x15dc   :  { %v853_v24 = vpop.permute.xlu1 %852 }
0x15dd   :  { %v3834_v16 = vpop.eup %3833  ;;  %873 = vst.msk [vmem:[%s5494_s4 + $0x20] sm:$0x2] %vm868_vm10, %v853_v24  ;;  %v1216_v25 = vpop.permute.xlu0 %1215 }
0x15de   :  { %1237 = vst.msk [vmem:[%s5494_s4 + $0x18] sm:$0x4] %vm1233_vm11, %v1216_v25  ;;  %3004 = vrot.lane.b32.xlu1 %v3834_v16, %s3841_s0 }
0x15df   :  { %1953 = vrot.lane.b32.xlu0 %v4701_v32, %s3842_s3 }
0x15e0   :  { %v857_v10 = vpop.permute.xlu1 %856 }
0x15e1   :  { %875 = vst.msk [vmem:[%s5494_s4 + $0x30] sm:$0x2] %vm868_vm10, %v857_v10  ;;  %v1220_v50 = vpop.permute.xlu0 %1219 }
0x15e2   :  { %1239 = vst.msk [vmem:[%s5494_s4 + $0x28] sm:$0x4] %vm1233_vm11, %v1220_v50  ;;  %1943 = vrot.lane.b32.xlu1 %v5560_v26, %s3842_s3 }
0x15e3   :  { %2306 = vrot.lane.b32.xlu0 %v5561_v47, %s3842_s3 }
0x15e4   :  { %v1210_v34 = vpop.permute.xlu1 %1209 }
0x15e5   :  { %1234 = vst.msk [vmem:[%s5494_s4] sm:$0x4] %vm1233_vm11, %v1210_v34  ;;  %v1224_v32 = vpop.permute.xlu0 %1223 }
0x15e6   :  { %1241 = vst.msk [vmem:[%s5494_s4 + $0x38] sm:$0x4] %vm1233_vm11, %v1224_v32  ;;  %1947 = vrot.lane.b32.xlu1 %v5562_v39, %s3842_s3 }
0x15e7   :  { %2310 = vrot.lane.b32.xlu0 %v5563_v36, %s3842_s3 }
0x15e8   :  { %v1214_v43 = vpop.permute.xlu1 %1213 }
0x15e9   :  { %1236 = vst.msk [vmem:[%s5494_s4 + $0x10] sm:$0x4] %vm1233_vm11, %v1214_v43  ;;  %v1577_v37 = vpop.permute.xlu0 %1576 }
0x15ea   :  { %1600 = vst.msk [vmem:[%s5494_s4 + $0x8] sm:$0x8] %vm1598_vm12, %v1577_v37  ;;  %1951 = vrot.lane.b32.xlu1 %v5564_v2, %s3842_s3 }
0x15eb   :  { %2314 = vrot.lane.b32.xlu0 %v5565_v53, %s3842_s3 }
0x15ec   :  { %v1218_v7 = vpop.permute.xlu1 %1217 }
0x15ed   :  { %1238 = vst.msk [vmem:[%s5494_s4 + $0x20] sm:$0x4] %vm1233_vm11, %v1218_v7  ;;  %v1581_v62 = vpop.permute.xlu0 %1580 }
0x15ee   :  { %1602 = vst.msk [vmem:[%s5494_s4 + $0x18] sm:$0x8] %vm1598_vm12, %v1581_v62  ;;  %2304 = vrot.lane.b32.xlu1 %v5566_v55, %s3842_s3 }
0x15ef   :  { %2318 = vrot.lane.b32.xlu0 %v5567_v38, %s3842_s3 }
0x15f0   :  { %v1222_v58 = vpop.permute.xlu1 %1221 }
0x15f1   :  { %1240 = vst.msk [vmem:[%s5494_s4 + $0x30] sm:$0x4] %vm1233_vm11, %v1222_v58  ;;  %v1585_v20 = vpop.permute.xlu0 %1584 }
0x15f2   :  { %1604 = vst.msk [vmem:[%s5494_s4 + $0x28] sm:$0x8] %vm1598_vm12, %v1585_v20  ;;  %2308 = vrot.lane.b32.xlu1 %v5568_v6, %s3842_s3 }
0x15f3   :  { %2671 = vrot.lane.b32.xlu0 %v5569_v4, %s3842_s3 }
0x15f4   :  { %v1575_v51 = vpop.permute.xlu1 %1574 }
0x15f5   :  { %1599 = vst.msk [vmem:[%s5494_s4] sm:$0x8] %vm1598_vm12, %v1575_v51  ;;  %v1589_v22 = vpop.permute.xlu0 %1588 }
0x15f6   :  { %1606 = vst.msk [vmem:[%s5494_s4 + $0x38] sm:$0x8] %vm1598_vm12, %v1589_v22  ;;  %2312 = vrot.lane.b32.xlu1 %v5570_v30, %s3842_s3 }
0x15f7   :  { %2675 = vrot.lane.b32.xlu0 %v5571_v8, %s3842_s3 }
0x15f8   :  { %v1579_v28 = vpop.permute.xlu1 %1578 }
0x15f9   :  { %1601 = vst.msk [vmem:[%s5494_s4 + $0x10] sm:$0x8] %vm1598_vm12, %v1579_v28  ;;  %v1942_v54 = vpop.permute.xlu0 %1941 }
0x15fa   :  { %1965 = vst.msk [vmem:[%s5494_s4 + $0x8] sm:$0x10] %vm1963_vm13, %v1942_v54  ;;  %2316 = vrot.lane.b32.xlu1 %v5572_v60, %s3842_s3 }
0x15fb   :  { %2679 = vrot.lane.b32.xlu0 %v4990_v45, %s3842_s3  ;;  %v5574_v45 = vld [vmem:[#allocation27_spill] sm:$0xff] }
0x15fc   :  { %v1583_v61 = vpop.permute.xlu1 %1582 }
0x15fd   :  { %1603 = vst.msk [vmem:[%s5494_s4 + $0x20] sm:$0x8] %vm1598_vm12, %v1583_v61 }
0x15fe   :  { %2669 = vrot.lane.b32.xlu1 %v5573_v0, %s3842_s3 }
0x15ff   :  { %2683 = vrot.lane.b32.xlu0 %v4994_v9, %s3842_s3 }
0x1600   :  { %v1587_v5 = vpop.permute.xlu1 %1586 }
0x1601   :  { %1605 = vst.msk [vmem:[%s5494_s4 + $0x30] sm:$0x8] %vm1598_vm12, %v1587_v5 }
0x1602   :  { %2673 = vrot.lane.b32.xlu1 %v5574_v45, %s3842_s3 }
0x1604   :  { %v1940_v27 = vpop.permute.xlu1 %1939 }
0x1605   :  { %1964 = vst.msk [vmem:[%s5494_s4] sm:$0x10] %vm1963_vm13, %v1940_v27 }
0x1606   :  { %2677 = vrot.lane.b32.xlu1 %v5575_v21, %s3842_s3 }
0x160a   :  { %2681 = vrot.lane.b32.xlu1 %v5002_v48, %s3842_s3 }
0x1639   :  { %v2999_v9 = vpop.permute.xlu0 %2998 }
0x163a   :  { %v3020_v48 = vmul.f32 %v5044_v29, %v2999_v9 }
0x163c   :  { %v3068_v31 = vrot.slane %v3020_v48, 6 }
0x163d   :  { %v3003_v59 = vpop.permute.xlu0 %3002 }
0x163e   :  { %v3022_v49 = vmul.f32 %v5048_v18, %v3003_v59 }
0x1640   :  { %v3072_v24 = vrot.slane %v3022_v49, 4 }
0x1641   :  { %v1946_v63 = vpop.permute.xlu0 %1945 }
0x1642   :  { %1967 = vst.msk [vmem:[%s5494_s4 + $0x18] sm:$0x10] %vm1963_vm13, %v1946_v63 }
0x1644   :  { %v3009_v13 = vpop.permute.xlu1 %3008 }
0x1645   :  { %v3025_v44 = vmul.f32 %v5055_v52, %v3009_v13  ;;  %v3007_v35 = vpop.permute.xlu0 %3006 }
0x1646   :  { %v3024_v18 = vmul.f32 %v5052_v17, %v3007_v35 }
0x1647   :  { %3048 = vrot.lane.b32.xlu0 %v3025_v44, %s3842_s3  ;;  %v3078_v34 = vrot.slane %v3025_v44, 1 }
0x1648   :  { %v2997_v46 = vpop.permute.xlu1 %2996  ;;  %v3076_v50 = vrot.slane %v3024_v18, 2 }
0x1649   :  { %v3019_v1 = vmul.f32 %v5063_v11, %v2997_v46  ;;  %v2995_v23 = vpop.permute.xlu0 %2994 }
0x164a   :  { %v3018_v15 = vmul.f32 %v5058_v40, %v2995_v23 }
0x164b   :  { %3036 = vrot.lane.b32.xlu0 %v3019_v1, %s3842_s3  ;;  %v3067_v56 = vrot.slane %v3019_v1, 7 }
0x164c   :  { %3034 = vrot.lane.b32.xlu1 %v3018_v15, %s3842_s3  ;;  %v3001_v57 = vpop.permute.xlu1 %3000 }
0x164d   :  { %v3021_v12 = vmul.f32 %v5076_v33, %v3001_v57  ;;  %v1950_v52 = vpop.permute.xlu0 %1949  ;;  %v3069_v40 = vsel %vm530_vm2, %v3068_v31, %v3067_v56 }
0x164e   :  { %1969 = vst.msk [vmem:[%s5494_s4 + $0x28] sm:$0x10] %vm1963_vm13, %v1950_v52 }
0x164f   :  { %v3070_v29 = vrot.slane %v3021_v12, 5  ;;  %3040 = vrot.lane.b32.xlu0 %v3021_v12, %s3842_s3 }
0x1650   :  { %3038 = vrot.lane.b32.xlu1 %v3020_v48, %s3842_s3  ;;  %v3005_v11 = vpop.permute.xlu1 %3004 }
0x1651   :  { %v3071_v3 = vsel %vm533_vm3, %v3070_v29, %v3069_v40  ;;  %v3023_v33 = vmul.f32 %v5090_v41, %v3005_v11  ;;  %v1954_v14 = vpop.permute.xlu0 %1953 }
0x1652   :  { %1971 = vst.msk [vmem:[%s5494_s4 + $0x38] sm:$0x10] %vm1963_vm13, %v1954_v14  ;;  %v3073_v25 = vsel %vm536_vm4, %v3072_v24, %v3071_v3 }
0x1653   :  { %v3074_v16 = vrot.slane %v3023_v33, 3  ;;  %3044 = vrot.lane.b32.xlu0 %v3023_v33, %s3842_s3 }
0x1654   :  { %3042 = vrot.lane.b32.xlu1 %v3022_v49, %s3842_s3  ;;  %v1944_v10 = vpop.permute.xlu1 %1943 }
0x1655   :  { %v3075_v41 = vsel %vm539_vm5, %v3074_v16, %v3073_v25  ;;  %1966 = vst.msk [vmem:[%s5494_s4 + $0x10] sm:$0x10] %vm1963_vm13, %v1944_v10  ;;  %v2307_v17 = vpop.permute.xlu0 %2306 }
0x1656   :  { %2330 = vst.msk [vmem:[%s5494_s4 + $0x8] sm:$0x20] %vm2328_vm14, %v2307_v17  ;;  %v3077_v47 = vsel %vm542_vm6, %v3076_v50, %v3075_v41 }
0x1657   :  { %3107 = vrot.lane.b32.xlu0 %v5173_v19, %s3843_s6  ;;  %v3079_v39 = vsel %vm545_vm7, %v3078_v34, %v3077_v47 }
0x1658   :  { %3046 = vrot.lane.b32.xlu1 %v3024_v18, %s3842_s3  ;;  %v1948_v26 = vpop.permute.xlu1 %1947 }
0x1659   :  { %1968 = vst.msk [vmem:[%s5494_s4 + $0x20] sm:$0x10] %vm1963_vm13, %v1948_v26  ;;  %v2311_v32 = vpop.permute.xlu0 %2310 }
0x165a   :  { %2332 = vst.msk [vmem:[%s5494_s4 + $0x18] sm:$0x20] %vm2328_vm14, %v2311_v32 }
0x165c   :  { %3080 = vrot.lane.b32.xlu1 %v3079_v39, %s3842_s3  ;;  %v1952_v19 = vpop.permute.xlu1 %1951 }
0x165d   :  { %1970 = vst.msk [vmem:[%s5494_s4 + $0x30] sm:$0x10] %vm1963_vm13, %v1952_v19  ;;  %v2315_v36 = vpop.permute.xlu0 %2314 }
0x165e   :  { %2334 = vst.msk [vmem:[%s5494_s4 + $0x28] sm:$0x20] %vm2328_vm14, %v2315_v36 }
0x1660   :  { %3109 = vrot.lane.b32.xlu1 %v5213_v42, %s3843_s6  ;;  %v2305_v43 = vpop.permute.xlu1 %2304 }
0x1661   :  { %2329 = vst.msk [vmem:[%s5494_s4] sm:$0x20] %vm2328_vm14, %v2305_v43  ;;  %v2319_v37 = vpop.permute.xlu0 %2318 }
0x1662   :  { %2336 = vst.msk [vmem:[%s5494_s4 + $0x38] sm:$0x20] %vm2328_vm14, %v2319_v37 }
0x1664   :  { %v2309_v2 = vpop.permute.xlu1 %2308 }
0x1665   :  { %2331 = vst.msk [vmem:[%s5494_s4 + $0x10] sm:$0x20] %vm2328_vm14, %v2309_v2  ;;  %v2672_v42 = vpop.permute.xlu0 %2671 }
0x1666   :  { %2695 = vst.msk [vmem:[%s5494_s4 + $0x8] sm:$0x40] %vm2693_vm15, %v2672_v42 }
0x1668   :  { %v2313_v53 = vpop.permute.xlu1 %2312 }
0x1669   :  { %2333 = vst.msk [vmem:[%s5494_s4 + $0x20] sm:$0x20] %vm2328_vm14, %v2313_v53  ;;  %v2676_v7 = vpop.permute.xlu0 %2675 }
0x166a   :  { %2697 = vst.msk [vmem:[%s5494_s4 + $0x18] sm:$0x40] %vm2693_vm15, %v2676_v7 }
0x166c   :  { %v2317_v62 = vpop.permute.xlu1 %2316 }
0x166d   :  { %2335 = vst.msk [vmem:[%s5494_s4 + $0x30] sm:$0x20] %vm2328_vm14, %v2317_v62  ;;  %v2680_v55 = vpop.permute.xlu0 %2679 }
0x166e   :  { %2699 = vst.msk [vmem:[%s5494_s4 + $0x28] sm:$0x40] %vm2693_vm15, %v2680_v55 }
0x1670   :  { %v2670_v38 = vpop.permute.xlu1 %2669 }
0x1671   :  { %2694 = vst.msk [vmem:[%s5494_s4] sm:$0x40] %vm2693_vm15, %v2670_v38  ;;  %v2684_v58 = vpop.permute.xlu0 %2683 }
0x1672   :  { %2701 = vst.msk [vmem:[%s5494_s4 + $0x38] sm:$0x40] %vm2693_vm15, %v2684_v58 }
0x1674   :  { %v2674_v20 = vpop.permute.xlu1 %2673 }
0x1675   :  { %2696 = vst.msk [vmem:[%s5494_s4 + $0x10] sm:$0x40] %vm2693_vm15, %v2674_v20 }
0x1678   :  { %v2678_v6 = vpop.permute.xlu1 %2677 }
0x1679   :  { %2698 = vst.msk [vmem:[%s5494_s4 + $0x20] sm:$0x40] %vm2693_vm15, %v2678_v6 }
0x167c   :  { %v2682_v4 = vpop.permute.xlu1 %2681 }
0x167d   :  { %2700 = vst.msk [vmem:[%s5494_s4 + $0x30] sm:$0x40] %vm2693_vm15, %v2682_v4 }
0x16b9   :  { %v3049_v51 = vpop.permute.xlu0 %3048 }
0x16ba   :  { %3066 = vst.msk [vmem:[%s5494_s4 + $0x38] sm:$0x80] %vm3058_vm0, %v3049_v51 }
0x16bd   :  { %v3037_v22 = vpop.permute.xlu0 %3036 }
0x16be   :  { %v3035_v30 = vpop.permute.xlu1 %3034  ;;  %3060 = vst.msk [vmem:[%s5494_s4 + $0x8] sm:$0x80] %vm3058_vm0, %v3037_v22 }
0x16bf   :  { %3059 = vst.msk [vmem:[%s5494_s4] sm:$0x80] %vm3058_vm0, %v3035_v30  ;;  %3083 = vst.msk [vmem:[#allocation2 - $0x7] sm:$0x80] %vm3058_vm0, %v3035_v30 }
0x16c1   :  { %v3041_v8 = vpop.permute.xlu0 %3040 }
0x16c2   :  { %v3039_v28 = vpop.permute.xlu1 %3038  ;;  %3062 = vst.msk [vmem:[%s5494_s4 + $0x18] sm:$0x80] %vm3058_vm0, %v3041_v8 }
0x16c3   :  { %3061 = vst.msk [vmem:[%s5494_s4 + $0x10] sm:$0x80] %vm3058_vm0, %v3039_v28 }
0x16c5   :  { %v3045_v54 = vpop.permute.xlu0 %3044 }
0x16c6   :  { %v3043_v60 = vpop.permute.xlu1 %3042  ;;  %3064 = vst.msk [vmem:[%s5494_s4 + $0x28] sm:$0x80] %vm3058_vm0, %v3045_v54 }
0x16c7   :  { %3063 = vst.msk [vmem:[%s5494_s4 + $0x20] sm:$0x80] %vm3058_vm0, %v3043_v60 }
0x16c9   :  { %v3108_v61 = vpop.permute.xlu0 %3107 }
0x16ca   :  { %v3047_v0 = vpop.permute.xlu1 %3046  ;;  %3113 = vst.msk [vmem:[#allocation3 - $0x7] sm:$0x80] %vm3058_vm0, %v3108_v61 }
0x16cb   :  { %3065 = vst.msk [vmem:[%s5494_s4 + $0x30] sm:$0x80] %vm3058_vm0, %v3047_v0 }
0x16ce   :  { %v3081_v5 = vpop.permute.xlu1 %3080 }
0x16cf   :  { %3085 = vst.msk [vmem:[#allocation2 + $0x1] sm:$0x7f] %vm3084_vm1, %v3081_v5 }
0x16d2   :  { %v3110_v45 = vpop.permute.xlu1 %3109 }
0x16d3   :  { %3114 = vst.msk [vmem:[#allocation3 + $0x1] sm:$0x7f] %vm3084_vm1, %v3110_v45 }

</bundles_post_ra>
